<compile_context>
chip_gen: v5e
topology: v5e:2x2
jax: 0.10.0
libtpu: 0.0.40
codegen_flags: <defaults>
</compile_context>

<pallas_src>
import functools

import jax
import jax.numpy as jnp
from jax.experimental import pallas as pl
from jax.experimental.pallas import tpu as pltpu


# ------------------------------------------------------------------------------------
# Pallas kernel: processes WB windows per grid step, all heads batched.
# ------------------------------------------------------------------------------------
def _window_attn_kernel(x_ref, wqkv_ref, bqkv_ref, bias_ref, wproj_ref, bproj_ref,
                        o_ref, *, num_heads, head_dim, dim, wb, n_tok):
    WB, N, C, H, HD = wb, n_tok, dim, num_heads, head_dim

    # ---- qkv projection: one (WB*N, C) x (C, 3C) MXU matmul (qk scale pre-folded) ----
    x = x_ref[...].reshape(WB * N, C)                                   # bf16
    qkv = (jnp.dot(x, wqkv_ref[...], preferred_element_type=jnp.float32)
           + bqkv_ref[0]).astype(jnp.bfloat16)                          # single bf16 cast

    # ---- assemble q/k/v as a single (H*WB, N, HD) batch (data movement only) ----
    def heads(col0):
        return jnp.concatenate(
            [qkv[:, col0 + h * HD: col0 + (h + 1) * HD].reshape(WB, N, HD)
             for h in range(H)], axis=0)                                # (H*WB, N, HD)

    q = heads(0)
    k = heads(C)
    v = heads(2 * C)

    # ---- scores: ONE batched MXU einsum over all windows and heads ----
    s = jnp.einsum('bnd,bmd->bnm', q, k,
                   preferred_element_type=jnp.float32)                  # (H*WB, N, N) f32
    # relative position bias: bf16 ref added with implicit promotion, broadcast over WB
    s = s.reshape(H, WB, N, N) + bias_ref[...][:, None]

    # ---- numerically stable softmax (f32 on VPU, reciprocal on EUP) ----
    s = s - jnp.max(s, axis=-1, keepdims=True)
    p = jnp.exp(s)
    inv = pl.reciprocal(jnp.sum(p, axis=-1, keepdims=True), approx=True)
    p = (p * inv).astype(jnp.bfloat16).reshape(H * WB, N, N)

    # ---- PV: second batched MXU einsum ----
    o = jnp.einsum('bnm,bmd->bnd', p, v,
                   preferred_element_type=jnp.float32).astype(jnp.bfloat16)  # (H*WB, N, HD)

    # ---- merge heads back to (WB*N, C) lanes ----
    y = jnp.concatenate([o[h * WB:(h + 1) * WB].reshape(WB * N, HD)
                         for h in range(H)], axis=-1)                   # (WB*N, C) bf16

    # ---- output projection ----
    out = jnp.dot(y, wproj_ref[...],
                  preferred_element_type=jnp.float32) + bproj_ref[0]    # (WB*N, C) f32
    o_ref[...] = out.astype(o_ref.dtype).reshape(WB, N, C)


# ------------------------------------------------------------------------------------
# Window-batch selection (device-aware)
# ------------------------------------------------------------------------------------
def _tpu_generation():
    try:
        kind = jax.devices()[0].device_kind.lower()
    except Exception:
        return 6
    for g in (7, 6, 5):
        if str(g) in kind:
            return g
    return 6


def _vmem_bytes_per_window(N, C, H):
    """Rough per-window live-intermediate footprint inside one grid step (bytes)."""
    bf, f4 = 2, 4
    b = 2 * N * C * bf                 # x tile (double-buffered)
    b += N * 3 * C * (f4 + bf)         # qkv f32 accum + bf16 copy
    b += 3 * N * C * bf                # q / k / v head-major copies
    b += H * N * N * (2 * f4 + bf)     # scores f32, exp f32, probs bf16
    b += N * C * (f4 + bf)             # attention out f32 + y bf16
    b += N * C * f4                    # proj accumulation f32
    b += 2 * N * C * bf                # out tile (double-buffered)
    return b


def _pick_wb(B_, N, C, num_heads):
    """Largest window batch that divides B_, fits a per-generation VMEM budget,
    keeps enough grid steps for pipelining (and megacore on v7x), and prefers an
    MXU-friendly M-row multiple (128 on v5e, 256 on v6e/v7x)."""
    gen = _tpu_generation()
    min_steps = 4 if gen >= 7 else 2          # v7x: >=2 steps per TensorCore
    align = 128 if gen <= 5 else 256          # 4x128^2 MXU vs 2x256^2
    base_budget = (16 if gen >= 7 else (24 if gen == 6 else 10)) << 20

    # Constant operands stay VMEM-resident and are double-buffered by the pipeline.
    const_bytes = 2 * 2 * (C * 3 * C + C * C + num_heads * N * N) \
        + 2 * 4 * (3 * C + C)
    budget = max(base_budget - const_bytes, 1 << 20)
    cap = max(1, budget // _vmem_bytes_per_window(N, C, num_heads))

    divisors = [w for w in range(1, B_ + 1) if B_ % w == 0 and w <= cap]
    pipelined = [w for w in divisors if B_ // w >= min_steps]
    pool = pipelined if pipelined else divisors          # tiny B_: fall back gracefully
    aligned = [w for w in pool if (w * N) % align == 0]
    # Note: prime B_ degrades to WB=1 (many tiny steps) -- correct but slow.
    return max(aligned) if aligned else max(pool)


# ------------------------------------------------------------------------------------
# Wrapper
# ------------------------------------------------------------------------------------
def window_attention_pallas(x, wqkv, bqkv, rel_bias, wproj, bproj, *, num_heads, wb=None):
    """x: (B_, N, C) (cast to bf16); wqkv: (C, 3C) bf16 (qk scale pre-folded);
       bqkv: (1, 3C) f32; rel_bias: (H, N, N) bf16; wproj: (C, C) bf16; bproj: (1, C) f32.
       Returns (B_, N, C) bf16."""
    B_, N, C = x.shape
    head_dim = C // num_heads
    if wb is None:
        wb = _pick_wb(B_, N, C, num_heads)
    assert B_ % wb == 0, "window batch must divide B_"

    if x.dtype != jnp.bfloat16:
        x = x.astype(jnp.bfloat16)      # MXU runs bf16 anyway; halves the x DMA

    kernel = functools.partial(
        _window_attn_kernel,
        num_heads=num_heads, head_dim=head_dim, dim=C, wb=wb, n_tok=N)

    return pl.pallas_call(
        kernel,
        out_shape=jax.ShapeDtypeStruct((B_, N, C), jnp.bfloat16),
        grid_spec=pltpu.PrefetchScalarGridSpec(
            num_scalar_prefetch=0,
            grid=(B_ // wb,),
            in_specs=[
                pl.BlockSpec((wb, N, C), lambda b: (b, 0, 0)),          # x (WB windows)
                pl.BlockSpec((C, 3 * C), lambda b: (0, 0)),             # qkv weight (const)
                pl.BlockSpec((1, 3 * C), lambda b: (0, 0)),             # qkv bias (const)
                pl.BlockSpec((num_heads, N, N), lambda b: (0, 0, 0)),   # rel pos bias (const)
                pl.BlockSpec((C, C), lambda b: (0, 0)),                 # proj weight (const)
                pl.BlockSpec((1, C), lambda b: (0, 0)),                 # proj bias (const)
            ],
            out_specs=pl.BlockSpec((wb, N, C), lambda b: (b, 0, 0)),
        ),
        compiler_params=pltpu.CompilerParams(
            dimension_semantics=("parallel",)),
    )(x, wqkv, bqkv, rel_bias, wproj, bproj)


# ------------------------------------------------------------------------------------
# One-time parameter preparation for the kernel (scale folding + bf16 weights)
# ------------------------------------------------------------------------------------
def prepare_kernel_params(wqkv, bqkv, rel_bias, wproj, bproj, *, num_heads):
    C = wqkv.shape[0]
    head_dim = C // num_heads
    scale = head_dim ** (-0.5)
    col_scale = jnp.concatenate([jnp.full((C,), scale, jnp.float32),
                                 jnp.ones((2 * C,), jnp.float32)])
    wqkv_s = (wqkv * col_scale[None, :]).astype(jnp.bfloat16)
    bqkv_s = (bqkv * col_scale[None, :]).astype(jnp.float32)
    return (wqkv_s, bqkv_s, rel_bias.astype(jnp.bfloat16),
            wproj.astype(jnp.bfloat16), bproj.astype(jnp.float32))


# ------------------------------------------------------------------------------------
# Pure-JAX reference (mirrors the PyTorch forward, mask=None, dropout=0)
# ------------------------------------------------------------------------------------
def window_attention_ref(x, wqkv, bqkv, rel_bias, wproj, bproj, *, num_heads):
    B_, N, C = x.shape
    hd = C // num_heads
    scale = hd ** (-0.5)
    qkv = (x @ wqkv + bqkv).reshape(B_, N, 3, num_heads, hd).transpose(2, 0, 3, 1, 4)
    q, k, v = qkv[0] * scale, qkv[1], qkv[2]                        # (B_, H, N, hd)
    attn = q @ jnp.swapaxes(k, -2, -1) + rel_bias[None]             # (B_, H, N, N)
    attn = jax.nn.softmax(attn, axis=-1)
    y = (attn @ v).transpose(0, 2, 1, 3).reshape(B_, N, C)
    return y @ wproj + bproj


# ------------------------------------------------------------------------------------
# Parameter / buffer construction (deterministic, mirrors __init__ shapes)
# ------------------------------------------------------------------------------------
def make_params(key, dim, window_size, num_heads):
    Wh, Ww = window_size
    N = Wh * Ww
    k1, k2, k3, k4, k5 = jax.random.split(key, 5)

    # nn.Linear(dim, 3*dim): weight (3C, C) -> store transposed (C, 3C)
    wqkv = (jax.random.normal(k1, (3 * dim, dim), jnp.float32) * 0.02).T
    bqkv = (jax.random.normal(k2, (3 * dim,), jnp.float32) * 0.02).reshape(1, 3 * dim)
    # nn.Linear(dim, dim)
    wproj = (jax.random.normal(k3, (dim, dim), jnp.float32) * 0.02).T
    bproj = (jax.random.normal(k4, (dim,), jnp.float32) * 0.02).reshape(1, dim)

    # relative_position_bias_table: ((2Wh-1)*(2Ww-1), num_heads), trunc_normal std=0.02
    table = jax.random.normal(k5, ((2 * Wh - 1) * (2 * Ww - 1), num_heads),
                              jnp.float32) * 0.02

    # relative_position_index (same recipe as the PyTorch buffer)
    coords = jnp.stack(jnp.meshgrid(jnp.arange(Wh), jnp.arange(Ww), indexing="ij"))
    coords_flatten = coords.reshape(2, -1)                          # (2, N)
    rel = coords_flatten[:, :, None] - coords_flatten[:, None, :]   # (2, N, N)
    rel = rel.transpose(1, 2, 0)                                    # (N, N, 2)
    rel = rel.at[:, :, 0].add(Wh - 1)
    rel = rel.at[:, :, 1].add(Ww - 1)
    rel = rel.at[:, :, 0].multiply(2 * Ww - 1)
    rel_idx = rel.sum(-1)                                           # (N, N)

    # gather: (N, N, H) -> (H, N, N)
    rel_bias = table[rel_idx.reshape(-1)].reshape(N, N, num_heads).transpose(2, 0, 1)

    return wqkv, bqkv, rel_bias, wproj, bproj


if __name__ == "__main__":
    dim = 128                     # C (real Swin-like channel count -> lane-dense tiles)
    num_heads = 4                 # head_dim = 32, matching real Swin heads
    window_size = (8, 8)          # N = 64 tokens per window
    B_ = 8                        # num_windows * batch
    N = window_size[0] * window_size[1]

    key = jax.random.PRNGKey(0)
    kx, kp = jax.random.split(key)
    x = jax.random.normal(kx, (B_, N, dim), jnp.float32)

    wqkv, bqkv, rel_bias, wproj, bproj = make_params(kp, dim, window_size, num_heads)

    # one-time transform: fold qk scale into weights, cast matmul operands to bf16
    kwqkv, kbqkv, krel, kwproj, kbproj = prepare_kernel_params(
        wqkv, bqkv, rel_bias, wproj, bproj, num_heads=num_heads)

    out = window_attention_pallas(x.astype(jnp.bfloat16), kwqkv, kbqkv, krel,
                                  kwproj, kbproj, num_heads=num_heads)
    out = jax.block_until_ready(out)

    ref = window_attention_ref(x, wqkv, bqkv, rel_bias, wproj, bproj,
                               num_heads=num_heads)
    assert out.shape == (B_, N, dim)
    # bf16 operands/output + approx reciprocal -> looser tolerance than pure f32
    assert jnp.allclose(out.astype(jnp.float32), ref, atol=3e-2, rtol=3e-2), \
        "mismatch vs JAX reference"

    print("KERNEL_OK")
</pallas_src>

<mosaic_0001>
module attributes {stable_mosaic.version = 11 : i64} {
  func.func @_window_attn_kernel(%arg0: i32, %arg1: memref<4x64x128xbf16, #tpu.memory_space<vmem>>, %arg2: memref<128x384xbf16, #tpu.memory_space<vmem>>, %arg3: memref<1x384xf32, #tpu.memory_space<vmem>>, %arg4: memref<4x64x64xbf16, #tpu.memory_space<vmem>>, %arg5: memref<128x128xbf16, #tpu.memory_space<vmem>>, %arg6: memref<1x128xf32, #tpu.memory_space<vmem>>, %arg7: memref<4x64x128xbf16, #tpu.memory_space<vmem>>) attributes {dimension_semantics = [#tpu.dimension_semantics<parallel>], iteration_bounds = array<i64: 2>, scalar_prefetch = 0 : i64, scratch_operands = 0 : i64, tpu.core_type = #tpu.core_type<tc>, window_params = [{transform_indices = @transform_0, window_bounds = array<i64: 4, 64, 128>}, {pipeline_mode = #tpu.pipeline_mode<synchronous>, transform_indices = @transform_1, window_bounds = array<i64: 128, 384>}, {pipeline_mode = #tpu.pipeline_mode<synchronous>, transform_indices = @transform_2, window_bounds = array<i64: 1, 384>}, {pipeline_mode = #tpu.pipeline_mode<synchronous>, transform_indices = @transform_3, window_bounds = array<i64: 4, 64, 64>}, {pipeline_mode = #tpu.pipeline_mode<synchronous>, transform_indices = @transform_4, window_bounds = array<i64: 128, 128>}, {pipeline_mode = #tpu.pipeline_mode<synchronous>, transform_indices = @transform_5, window_bounds = array<i64: 1, 128>}, {transform_indices = @transform_6, window_bounds = array<i64: 4, 64, 128>}]} {
    %c0 = arith.constant 0 : index
    %c0_0 = arith.constant 0 : index
    %c0_1 = arith.constant 0 : index
    %0 = vector.load %arg1[%c0, %c0_0, %c0_1] : memref<4x64x128xbf16, #tpu.memory_space<vmem>>, vector<4x64x128xbf16>
    %1 = vector.shape_cast %0 : vector<4x64x128xbf16> to vector<256x128xbf16>
    %c0_2 = arith.constant 0 : index
    %c0_3 = arith.constant 0 : index
    %2 = vector.load %arg2[%c0_2, %c0_3] : memref<128x384xbf16, #tpu.memory_space<vmem>>, vector<128x384xbf16>
    %cst = arith.constant dense<0.000000e+00> : vector<256x384xf32>
    %3 = tpu.matmul %1, %2, %cst {dimension_numbers = #tpu.dot_dimension_numbers<[1], [0], [0], [1], [0, 0, 1, 1], [], []>} : vector<256x128xbf16>, vector<128x384xbf16>, vector<256x384xf32> -> vector<256x384xf32>
    %c0_4 = arith.constant 0 : index
    %c0_5 = arith.constant 0 : index
    %4 = vector.load %arg3[%c0_4, %c0_5] : memref<1x384xf32, #tpu.memory_space<vmem>>, vector<1x384xf32>
    %5 = vector.shape_cast %4 : vector<1x384xf32> to vector<384xf32>
    %6 = vector.shape_cast %5 : vector<384xf32> to vector<1x384xf32>
    %7 = vector.broadcast %6 : vector<1x384xf32> to vector<256x384xf32>
    %8 = arith.addf %3, %7 : vector<256x384xf32>
    %9 = arith.truncf %8 : vector<256x384xf32> to vector<256x384xbf16>
    %10 = vector.extract_strided_slice %9 {offsets = [0, 0], sizes = [256, 32], strides = [1, 1]} : vector<256x384xbf16> to vector<256x32xbf16>
    %11 = vector.shape_cast %10 : vector<256x32xbf16> to vector<4x64x32xbf16>
    %12 = vector.extract_strided_slice %9 {offsets = [0, 32], sizes = [256, 32], strides = [1, 1]} : vector<256x384xbf16> to vector<256x32xbf16>
    %13 = vector.shape_cast %12 : vector<256x32xbf16> to vector<4x64x32xbf16>
    %14 = vector.extract_strided_slice %9 {offsets = [0, 64], sizes = [256, 32], strides = [1, 1]} : vector<256x384xbf16> to vector<256x32xbf16>
    %15 = vector.shape_cast %14 : vector<256x32xbf16> to vector<4x64x32xbf16>
    %16 = vector.extract_strided_slice %9 {offsets = [0, 96], sizes = [256, 32], strides = [1, 1]} : vector<256x384xbf16> to vector<256x32xbf16>
    %17 = vector.shape_cast %16 : vector<256x32xbf16> to vector<4x64x32xbf16>
    %18 = tpu.concatenate %11, %13, %15, %17 in 0 : vector<4x64x32xbf16>, vector<4x64x32xbf16>, vector<4x64x32xbf16>, vector<4x64x32xbf16> -> vector<16x64x32xbf16>
    %19 = vector.extract_strided_slice %9 {offsets = [0, 128], sizes = [256, 32], strides = [1, 1]} : vector<256x384xbf16> to vector<256x32xbf16>
    %20 = vector.shape_cast %19 : vector<256x32xbf16> to vector<4x64x32xbf16>
    %21 = vector.extract_strided_slice %9 {offsets = [0, 160], sizes = [256, 32], strides = [1, 1]} : vector<256x384xbf16> to vector<256x32xbf16>
    %22 = vector.shape_cast %21 : vector<256x32xbf16> to vector<4x64x32xbf16>
    %23 = vector.extract_strided_slice %9 {offsets = [0, 192], sizes = [256, 32], strides = [1, 1]} : vector<256x384xbf16> to vector<256x32xbf16>
    %24 = vector.shape_cast %23 : vector<256x32xbf16> to vector<4x64x32xbf16>
    %25 = vector.extract_strided_slice %9 {offsets = [0, 224], sizes = [256, 32], strides = [1, 1]} : vector<256x384xbf16> to vector<256x32xbf16>
    %26 = vector.shape_cast %25 : vector<256x32xbf16> to vector<4x64x32xbf16>
    %27 = tpu.concatenate %20, %22, %24, %26 in 0 : vector<4x64x32xbf16>, vector<4x64x32xbf16>, vector<4x64x32xbf16>, vector<4x64x32xbf16> -> vector<16x64x32xbf16>
    %28 = vector.extract_strided_slice %9 {offsets = [0, 256], sizes = [256, 32], strides = [1, 1]} : vector<256x384xbf16> to vector<256x32xbf16>
    %29 = vector.shape_cast %28 : vector<256x32xbf16> to vector<4x64x32xbf16>
    %30 = vector.extract_strided_slice %9 {offsets = [0, 288], sizes = [256, 32], strides = [1, 1]} : vector<256x384xbf16> to vector<256x32xbf16>
    %31 = vector.shape_cast %30 : vector<256x32xbf16> to vector<4x64x32xbf16>
    %32 = vector.extract_strided_slice %9 {offsets = [0, 320], sizes = [256, 32], strides = [1, 1]} : vector<256x384xbf16> to vector<256x32xbf16>
    %33 = vector.shape_cast %32 : vector<256x32xbf16> to vector<4x64x32xbf16>
    %34 = vector.extract_strided_slice %9 {offsets = [0, 352], sizes = [256, 32], strides = [1, 1]} : vector<256x384xbf16> to vector<256x32xbf16>
    %35 = vector.shape_cast %34 : vector<256x32xbf16> to vector<4x64x32xbf16>
    %36 = tpu.concatenate %29, %31, %33, %35 in 0 : vector<4x64x32xbf16>, vector<4x64x32xbf16>, vector<4x64x32xbf16>, vector<4x64x32xbf16> -> vector<16x64x32xbf16>
    "tpu.trace_start"() <{level = 10 : i32, message = "bnd,bmd->bnm"}> : () -> ()
    %cst_6 = arith.constant dense<0.000000e+00> : vector<16x64x64xf32>
    %37 = tpu.matmul %18, %27, %cst_6 {dimension_numbers = #tpu.dot_dimension_numbers<[2], [2], [1], [1], [0, 0, 0, 1, 1, 1], [0], [0]>} : vector<16x64x32xbf16>, vector<16x64x32xbf16>, vector<16x64x64xf32> -> vector<16x64x64xf32>
    "tpu.trace_stop"() : () -> ()
    %38 = vector.shape_cast %37 : vector<16x64x64xf32> to vector<4x4x64x64xf32>
    %c0_7 = arith.constant 0 : index
    %c0_8 = arith.constant 0 : index
    %c0_9 = arith.constant 0 : index
    %39 = vector.load %arg4[%c0_7, %c0_8, %c0_9] : memref<4x64x64xbf16, #tpu.memory_space<vmem>>, vector<4x64x64xbf16>
    %40 = vector.shape_cast %39 : vector<4x64x64xbf16> to vector<4x1x64x64xbf16>
    %41 = arith.extf %40 : vector<4x1x64x64xbf16> to vector<4x1x64x64xf32>
    %42 = vector.broadcast %41 : vector<4x1x64x64xf32> to vector<4x4x64x64xf32>
    %43 = arith.addf %38, %42 : vector<4x4x64x64xf32>
    %cst_10 = arith.constant dense<0xFF800000> : vector<4x4x64xf32>
    %44 = vector.multi_reduction <maximumf>, %43, %cst_10 [3] : vector<4x4x64x64xf32> to vector<4x4x64xf32>
    %45 = vector.shape_cast %44 : vector<4x4x64xf32> to vector<4x4x64x1xf32>
    %46 = vector.broadcast %45 : vector<4x4x64x1xf32> to vector<4x4x64x64xf32>
    %47 = arith.subf %43, %46 : vector<4x4x64x64xf32>
    %48 = math.exp %47 : vector<4x4x64x64xf32>
    %cst_11 = arith.constant dense<0.000000e+00> : vector<4x4x64xf32>
    %49 = vector.multi_reduction <add>, %48, %cst_11 [3] : vector<4x4x64x64xf32> to vector<4x4x64xf32>
    %50 = vector.shape_cast %49 : vector<4x4x64xf32> to vector<4x4x64x1xf32>
    %51 = tpu.reciprocal %50 {approx = true} : vector<4x4x64x1xf32> -> vector<4x4x64x1xf32>
    %52 = vector.broadcast %51 : vector<4x4x64x1xf32> to vector<4x4x64x64xf32>
    %53 = arith.mulf %48, %52 : vector<4x4x64x64xf32>
    %54 = arith.truncf %53 : vector<4x4x64x64xf32> to vector<4x4x64x64xbf16>
    %55 = vector.shape_cast %54 : vector<4x4x64x64xbf16> to vector<16x64x64xbf16>
    "tpu.trace_start"() <{level = 10 : i32, message = "bnm,bmd->bnd"}> : () -> ()
    %cst_12 = arith.constant dense<0.000000e+00> : vector<16x64x32xf32>
    %56 = tpu.matmul %55, %36, %cst_12 {dimension_numbers = #tpu.dot_dimension_numbers<[2], [1], [1], [2], [0, 0, 0, 1, 1, 2], [0], [0]>} : vector<16x64x64xbf16>, vector<16x64x32xbf16>, vector<16x64x32xf32> -> vector<16x64x32xf32>
    "tpu.trace_stop"() : () -> ()
    %57 = arith.truncf %56 : vector<16x64x32xf32> to vector<16x64x32xbf16>
    %58 = vector.extract_strided_slice %57 {offsets = [0, 0, 0], sizes = [4, 64, 32], strides = [1, 1, 1]} : vector<16x64x32xbf16> to vector<4x64x32xbf16>
    %59 = vector.shape_cast %58 : vector<4x64x32xbf16> to vector<256x32xbf16>
    %60 = vector.extract_strided_slice %57 {offsets = [4, 0, 0], sizes = [4, 64, 32], strides = [1, 1, 1]} : vector<16x64x32xbf16> to vector<4x64x32xbf16>
    %61 = vector.shape_cast %60 : vector<4x64x32xbf16> to vector<256x32xbf16>
    %62 = vector.extract_strided_slice %57 {offsets = [8, 0, 0], sizes = [4, 64, 32], strides = [1, 1, 1]} : vector<16x64x32xbf16> to vector<4x64x32xbf16>
    %63 = vector.shape_cast %62 : vector<4x64x32xbf16> to vector<256x32xbf16>
    %64 = vector.extract_strided_slice %57 {offsets = [12, 0, 0], sizes = [4, 64, 32], strides = [1, 1, 1]} : vector<16x64x32xbf16> to vector<4x64x32xbf16>
    %65 = vector.shape_cast %64 : vector<4x64x32xbf16> to vector<256x32xbf16>
    %66 = tpu.concatenate %59, %61, %63, %65 in 1 : vector<256x32xbf16>, vector<256x32xbf16>, vector<256x32xbf16>, vector<256x32xbf16> -> vector<256x128xbf16>
    %c0_13 = arith.constant 0 : index
    %c0_14 = arith.constant 0 : index
    %67 = vector.load %arg5[%c0_13, %c0_14] : memref<128x128xbf16, #tpu.memory_space<vmem>>, vector<128x128xbf16>
    %cst_15 = arith.constant dense<0.000000e+00> : vector<256x128xf32>
    %68 = tpu.matmul %66, %67, %cst_15 {dimension_numbers = #tpu.dot_dimension_numbers<[1], [0], [0], [1], [0, 0, 1, 1], [], []>} : vector<256x128xbf16>, vector<128x128xbf16>, vector<256x128xf32> -> vector<256x128xf32>
    %c0_16 = arith.constant 0 : index
    %c0_17 = arith.constant 0 : index
    %69 = vector.load %arg6[%c0_16, %c0_17] : memref<1x128xf32, #tpu.memory_space<vmem>>, vector<1x128xf32>
    %70 = vector.shape_cast %69 : vector<1x128xf32> to vector<128xf32>
    %71 = vector.shape_cast %70 : vector<128xf32> to vector<1x128xf32>
    %72 = vector.broadcast %71 : vector<1x128xf32> to vector<256x128xf32>
    %73 = arith.addf %68, %72 : vector<256x128xf32>
    %74 = arith.truncf %73 : vector<256x128xf32> to vector<256x128xbf16>
    %75 = vector.shape_cast %74 : vector<256x128xbf16> to vector<4x64x128xbf16>
    %c0_18 = arith.constant 0 : index
    %c0_19 = arith.constant 0 : index
    %c0_20 = arith.constant 0 : index
    %76 = vector.load %arg7[%c0_18, %c0_19, %c0_20] : memref<4x64x128xbf16, #tpu.memory_space<vmem>>, vector<4x64x128xbf16>
    tpu.vector_store %arg7[%c0_18, %c0_19, %c0_20], %75 {strides = array<i32>} : memref<4x64x128xbf16, #tpu.memory_space<vmem>>, vector<4x64x128xbf16>,
    return
  }
  func.func @transform_0(%arg0: i32) -> (i32, i32, i32) {
    %c0_i32 = arith.constant 0 : i32
    %c0_i32_0 = arith.constant 0 : i32
    %c0_i32_1 = arith.constant 0 : i32
    return %arg0, %c0_i32, %c0_i32_0 : i32, i32, i32
  }
  func.func @transform_1(%arg0: i32) -> (i32, i32) {
    %c0_i32 = arith.constant 0 : i32
    %c0_i32_0 = arith.constant 0 : i32
    %c0_i32_1 = arith.constant 0 : i32
    return %c0_i32, %c0_i32_0 : i32, i32
  }
  func.func @transform_2(%arg0: i32) -> (i32, i32) {
    %c0_i32 = arith.constant 0 : i32
    %c0_i32_0 = arith.constant 0 : i32
    %c0_i32_1 = arith.constant 0 : i32
    return %c0_i32, %c0_i32_0 : i32, i32
  }
  func.func @transform_3(%arg0: i32) -> (i32, i32, i32) {
    %c0_i32 = arith.constant 0 : i32
    %c0_i32_0 = arith.constant 0 : i32
    %c0_i32_1 = arith.constant 0 : i32
    %c0_i32_2 = arith.constant 0 : i32
    return %c0_i32, %c0_i32_0, %c0_i32_1 : i32, i32, i32
  }
  func.func @transform_4(%arg0: i32) -> (i32, i32) {
    %c0_i32 = arith.constant 0 : i32
    %c0_i32_0 = arith.constant 0 : i32
    %c0_i32_1 = arith.constant 0 : i32
    return %c0_i32, %c0_i32_0 : i32, i32
  }
  func.func @transform_5(%arg0: i32) -> (i32, i32) {
    %c0_i32 = arith.constant 0 : i32
    %c0_i32_0 = arith.constant 0 : i32
    %c0_i32_1 = arith.constant 0 : i32
    return %c0_i32, %c0_i32_0 : i32, i32
  }
  func.func @transform_6(%arg0: i32) -> (i32, i32, i32) {
    %c0_i32 = arith.constant 0 : i32
    %c0_i32_0 = arith.constant 0 : i32
    %c0_i32_1 = arith.constant 0 : i32
    return %arg0, %c0_i32, %c0_i32_0 : i32, i32, i32
  }
}

</mosaic_0001>

<bundles_post_ra>
// kernel: tpu_custom_call.1
= control target key start
LH: loop header
LB: loop body
LE: loop exit
PB: predicated region body
PF: predicated region fallthrough
CT: control target
= control target key end

     0   :  { %11 = vsyncpa [#allocation3], 0  ;;  %s12555_s0 = inlined_call_operand.hbm [shape: bf16[8,64,128], index: 0, kind: input, shape index: {}]   ;;  %s12556_s1 = inlined_call_operand.hbm [shape: bf16[128,384], index: 1, kind: input, shape index: {}]   ;;  %s12557_s2 = inlined_call_operand.hbm [shape: f32[1,384], index: 2, kind: input, shape index: {}]   ;;  %s12558_s3 = inlined_call_operand.hbm [shape: bf16[4,64,64], index: 3, kind: input, shape index: {}]   ;;  %s12559_s4 = inlined_call_operand.hbm [shape: bf16[128,128], index: 4, kind: input, shape index: {}]   ;;  %s12560_s5 = inlined_call_operand.vmem [shape: f32[1,128], index: 5, kind: input, shape index: {}]   ;;  %s12561_s6 = inlined_call_operand.hbm [shape: bf16[8,64,128], index: 6, kind: output, shape index: {}]  }
   0x1   :  { %13 = vsyncpa [#allocation3 + $0x1], 0 }
   0x2   :  { %14 = vsyncpa [#allocation6], 0 }
   0x3   :  { %15 = vsyncpa [#allocation9], 0 }
   0x4   :  { %16 = vsyncpa [#allocation4], 0 }
   0x5   :  { %18 = vsyncpa [#allocation4 + $0x1], 0  ;;  %s8234_s21 = smov 0   ;;  %s8236_s22 = smov 0  }
   0x6   :  { %s8238_s23 = smov 0   ;;  %s8240_s24 = smov 0  }
   0x7 LB: > { %s8255_s25 = sadd.s32 4294967295, %s8185_s24   ;;  %s6759_s26 = sadd.s32 4294967294, %s8185_s24   ;;  %s8185_s24 = sphi %s8240_s24, %s13335_s24   ;;  %s8181_s23 = sphi %s8238_s23, %s13334_s23   ;;  %s8177_s22 = sphi %s8236_s22, %s13333_s22   ;;  %s8173_s21 = sphi %s8234_s21, %s13332_s21  }
   0x8   : > { %p44_p0 = scmp.ne.s32.totalorder %s8177_s22, %s8173_s21  ;;  %p45_p1 = scmp.eq.s32.totalorder %s8255_s25, 0 }
   0x9   : > { %p173_p2 = scmp.eq.s32.totalorder %s8255_s25, 1  ;;  %p179_p3 = scmp.eq.s32.totalorder %s6759_s26, 1 }
   0xa   : > { %p8264_p4 = por %p45_p1, %p44_p0  ;;  %p6760_p5 = scmp.ge.s32.totalorder %s8185_s24, 1 }
   0xb   : > { %p8269_p6 = por %p179_p3, %p44_p0  ;;  %p186_p7 = scmp.lt.s32.totalorder %s8185_s24, 3 }
   0xc   : > { %s197_s7 = sshll.u32 %s12556_s1, 4  ;;  %s8187_s9 = smov [#allocation5]   ;;  %s198_s7 = int_to_ptr.hbm [resolvable:$true] %s197_s7 }
   0xd   : > { %p8277_p8 = pnand %p6760_p5, %p186_p7  ;;  %s199_s10 = sshll.u32 %s8187_s9, 4  ;;  %s200_s10 = int_to_ptr.vmem [resolvable:$true] %s199_s10 }
   0xe   : > { %s223_s14 = sshll.u32 %s12558_s3, 4  ;;  %s8188_s15 = smov 192   ;;  %s224_s14 = int_to_ptr.hbm [resolvable:$true] %s223_s14 }
   0xf   : > { %p7373_p9 = pneg %p8277_p8  ;;  %s8189_s16 = smov 12  }
  0x10   : > { %s8190_s17 = smov [#allocation8]   ;;  %s12562_s19 = smov 64  }
  0x11   : > { %p8285_p10 = pnand %p7373_p9, %p45_p1  ;;  %s225_s18 = sshll.u32 %s8190_s17, 4  ;;  %s226_s18 = int_to_ptr.vmem [resolvable:$true] %s225_s18 }
  0x12   : > { %s12563_s20 = smov 4   ;;  %s212_s30 = sshll.u32 %s12557_s2, 4  ;;  %s213_s30 = int_to_ptr.hbm [resolvable:$true] %s212_s30 }
  0x13   : > { %7376 = dma.hbm_to_vmem [thread:$0]  (!%p8285_p10), %s198_s7, 3072, %s200_s10, [#allocation6], %s8188_s15, %s8188_s15, %s8189_s16  }
  0x14   : > { %7382 = dma.hbm_to_vmem [thread:$0]  (!%p8285_p10), %s224_s14, 2048, %s226_s18, [#allocation9], %s12562_s19, %s12562_s19, %s12563_s20  }
  0x15   : > { %s8193_s7 = smov [#allocation7]   ;;  %s237_s13 = sshll.u32 %s12559_s4, 4  ;;  %s238_s13 = int_to_ptr.hbm [resolvable:$true] %s237_s13 }
  0x16   : > { %s214_s9 = sshll.u32 %s8193_s7, 4  ;;  %s8194_s14 = smov [#allocation10]   ;;  %s215_s9 = int_to_ptr.vmem [resolvable:$true] %s214_s9 }
  0x17   : > { %7379 = dma.hbm_to_vmem [thread:$0]  (!%p8285_p10), %s213_s30, 48, %s215_s9, [#allocation6]  }
  0x18   : > { %s239_s15 = sshll.u32 %s8194_s14, 4  ;;  %s8314_s16 = sadd.s32 1, %s8185_s24   ;;  %s240_s15 = int_to_ptr.vmem [resolvable:$true] %s239_s15 }
  0x19   : > { %7385 = dma.hbm_to_vmem [thread:$0]  (!%p8285_p10), %s238_s13, 1024, %s240_s15, [#allocation9], %s12562_s19, %s12562_s19, %s12563_s20  }
  0x1a   : > { %s31_s17 = sadd.s32 1, %s8181_s23  ;;  %s28_s18 = ssub.s32 %s8185_s24, %s8314_s16 }
  0x1b   : > { %p38_p12 = scmp.ne.s32.totalorder %s8181_s23, %s8177_s22  ;;  %p29_p13 = scmp.eq.s32.totalorder %s28_s18, 0 }
  0x1c   : > { %p39_p0 = scmp.eq.s32.totalorder %s8185_s24, 0  ;;  %p7398_p5 = scmp.lt.s32.totalorder %s8185_s24, 2 }
  0x1d   : > { %p8324_p3 = por %p173_p2, %p38_p12  ;;  %s256_s11 = sand.u32 1, %s8181_s23  }
  0x1e   : > { %s8330_s29 = scalar_select %p29_p13, %s8181_s23, %s31_s17  }
  0x1f   : > { %p40_p7 = por %p39_p0, %p38_p12  ;;  %s6766_s30 = sshll.u32 %s256_s11, 7 }
  0x20   : > { %s7104_s7 = sshll.u32 %s8185_s24, 7  ;;  %s260_s13 = scalar_lea.vmem [#allocation2], %s6766_s30 }
  0x21   : > { %s266_s12 = scalar_lea.hbm %s12555_s0, %s7104_s7  ;;  %s269_s14 = sshll.u32 %s260_s13, 4  ;;  %s270_s14 = int_to_ptr.vmem [resolvable:$true] %s269_s14 }
  0x22   : > { %s267_s15 = sshll.u32 %s266_s12, 4  ;;  %p8337_p2 = pnand %p7398_p5, %p40_p7  ;;  %s268_s15 = int_to_ptr.hbm [resolvable:$true] %s267_s15 }
  0x23   : > { %s257_s17 = scalar_lea.sflag [#allocation3], %s256_s11  ;;  %s8081_s19 = sshra.s32 %s268_s15, 4  ;;  %s8082_s19 = int_to_ptr.hbm [resolvable:$true] %s8081_s19 }
  0x24   : > { %s8083_s20 = scalar_lea.hbm %s8082_s19, 128  ;;  %p8085_p10 = pneg %p8337_p2 }
  0x25   : > { %p8084_p9 = scmp.ne.s32.totalorder %s8082_s19, %s8083_s20  ;;  %s8088_s9 = scalar_lea.hbm %s12555_s0, 256 }
  0x26   : > { %p8089_p0 = scmp.lt.s32.totalorder %s8082_s19, %s12555_s0  ;;  %p8090_p5 = scmp.lt.s32.totalorder %s8088_s9, %s8083_s20 }
  0x27   : > { %p8086_p12 = pnand %p8085_p10, %p8084_p9 }
  0x28   : > { %p8091_p7 = por %p8090_p5, %p8089_p0 }
  0x29   : > { %p8087_p13 = pneg %p8086_p12 }
  0x2b   : > { %p8092_p11 = pnand %p8091_p7, %p8087_p13 }
  0x2d   : > { %8095 = shalt.err (!%p8092_p11)
}
  0x2e   : > { %s12731_s11 = smov 4   ;;  %s12732_s13 = smov 64  }
  0x2f   : > { %7389 = dma.hbm_to_vmem [thread:$0]  (!%p8337_p2), %s268_s15, 2048, %s270_s14, %s257_s17, %s12732_s13, %s12732_s13, %s12731_s11  }
  0x30   : > { %281 = sbr.rel (%p8277_p8) target bundleno = 2423 (0x977), region = 44 }
  0x35   : > { %s8357_s7 = sand.u32 1, %s8177_s22  }
  0x36   : > { %s6771_s19 = sshll.u32 %s8357_s7, 7  ;;  %s284_s20 = scalar_lea.sflag [#allocation3], %s8357_s7 }
  0x37   : > { %s8363_s30 = scalar_lea.vmem [#allocation2], %s6771_s19 }
  0x38   : > { %8156 = dma.done.wait (%p8264_p4), %s284_s20, 2048  }
  0x39   : > { %8158 = vsyncadd (%p8264_p4), %s284_s20, 4294965248 }
  0x3a   : > { %8160 = dma.done.wait (%p45_p1), [#allocation6], 3120  }
  0x3b   : > { %8162 = vsyncadd (%p45_p1), [#allocation6], 4294964176 }
  0x3c   : > { %8164 = dma.done.wait (%p45_p1), [#allocation9], 3072  }
  0x3d   : > { %8166 = vsyncadd (%p45_p1), [#allocation9], 4294964224  ;;  %v6927_v0 = vld [vmem:[#allocation5 + $0xa8] sm:$0xf]  ;;  %v7143_v1 = vld [vmem:[#allocation5 + $0xb0] sm:$0xf0] }
  0x3e   : > { %v6915_v2 = vld [vmem:[#allocation5 + $0x90] sm:$0xf]  ;;  %v6928_v3 = vor.u32 %v7143_v1, %v6927_v0  ;;  %v7140_v4 = vld [vmem:[#allocation5 + $0x98] sm:$0xf0]  ;;  %v6903_v6 = vld [vmem:[#allocation5 + $0x78] sm:$0xf] }
  0x3f   : > { %v6916_v5 = vor.u32 %v7140_v4, %v6915_v2  ;;  %v7137_v7 = vld [vmem:[#allocation5 + $0x80] sm:$0xf0]  ;;  %v6891_v9 = vld [vmem:[#allocation5 + $0x60] sm:$0xf]  ;;  %v7134_v10 = vld [vmem:[#allocation5 + $0x68] sm:$0xf0] }
  0x40   : > { %7329 = vmatpush.bf16.msra.mxu1 %v6928_v3  ;;  %7330 = vmatpush.bf16.msra.mxu2 %v6928_v3  ;;  %v6904_v8 = vor.u32 %v7137_v7, %v6903_v6  ;;  %v6892_v11 = vor.u32 %v7134_v10, %v6891_v9  ;;  %v6879_v12 = vld [vmem:[#allocation5 + $0x48] sm:$0xf]  ;;  %v7131_v13 = vld [vmem:[#allocation5 + $0x50] sm:$0xf0]  ;;  %v6867_v15 = vld [vmem:[#allocation5 + $0x30] sm:$0xf] }
  0x41   : > { %636 = vmatpush.bf16.msra.mxu0 %v6928_v3  ;;  %7331 = vmatpush.bf16.msra.mxu3 %v6928_v3  ;;  %v6880_v14 = vor.u32 %v7131_v13, %v6879_v12  ;;  %v7128_v16 = vld [vmem:[#allocation5 + $0x38] sm:$0xf0]  ;;  %v6855_v18 = vld [vmem:[#allocation5 + $0x18] sm:$0xf]  ;;  %v7125_v19 = vld [vmem:[#allocation5 + $0x20] sm:$0xf0] }
  0x42   : > { %v6868_v17 = vor.u32 %v7128_v16, %v6867_v15  ;;  %v6856_v20 = vor.u32 %v7125_v19, %v6855_v18  ;;  %v6843_v21 = vld [vmem:[#allocation5] sm:$0xf]  ;;  %v7122_v22 = vld [vmem:[#allocation5 + $0x8] sm:$0xf0]  ;;  %v6929_v27 = vld [vmem:[#allocation5 + $0xb4] sm:$0xf0] }
  0x43   : > { %v6844_v23 = vor.u32 %v7122_v22, %v6843_v21  ;;  %v8378_v24 = vld [vmem:[%s8363_s30 + $0x20] sm:$0xff]  ;;  %v7142_v26 = vld [vmem:[#allocation5 + $0xac] sm:$0xf]  ;;  %v6935_v29 = vld [vmem:[#allocation5 + $0xb0] sm:$0xf]  ;;  %s8195_s27 = smov 32  }
  0x44   : > { %7332 = vmatpush.bf16.msra.mxu1 %v6916_v5  ;;  %7333 = vmatpush.bf16.msra.mxu2 %v6916_v5  ;;  %v8381_v25 = vld [vmem:[%s8363_s30 + $0x40] sm:$0xff]  ;;  %v6932_v28 = vor.u32 %v7142_v26, %v6929_v27  ;;  %v7144_v30 = vld [vmem:[#allocation5 + $0xb8] sm:$0xf0]  ;;  %v7139_v32 = vld [vmem:[#allocation5 + $0x94] sm:$0xf]  ;;  %s8196_s8 = smov 64  }
  0x45   : > { %637 = vmatpush.bf16.msra.mxu0 %v6916_v5  ;;  %7334 = vmatpush.bf16.msra.mxu3 %v6916_v5  ;;  %v6936_v31 = vor.u32 %v7144_v30, %v6935_v29  ;;  %v6917_v33 = vld [vmem:[#allocation5 + $0x9c] sm:$0xf0]  ;;  %v6923_v34 = vld [vmem:[#allocation5 + $0x98] sm:$0xf]  ;;  %v7141_v36 = vld [vmem:[#allocation5 + $0xa0] sm:$0xf0] }
  0x46   : > { %v6920_v35 = vor.u32 %v7139_v32, %v6917_v33  ;;  %v6924_v37 = vor.u32 %v7141_v36, %v6923_v34  ;;  %v7136_v38 = vld [vmem:[#allocation5 + $0x7c] sm:$0xf]  ;;  %v6905_v39 = vld [vmem:[#allocation5 + $0x84] sm:$0xf0]  ;;  %v6911_v40 = vld [vmem:[#allocation5 + $0x80] sm:$0xf] }
  0x47   : > { %v7138_v41 = vld [vmem:[#allocation5 + $0x88] sm:$0xf0]  ;;  %v6908_v42 = vor.u32 %v7136_v38, %v6905_v39  ;;  %v7133_v44 = vld [vmem:[#allocation5 + $0x64] sm:$0xf]  ;;  %v6893_v45 = vld [vmem:[#allocation5 + $0x6c] sm:$0xf0] }
  0x48   : > { %7335 = vmatpush.bf16.msra.mxu1 %v6904_v8  ;;  %7336 = vmatpush.bf16.msra.mxu2 %v6904_v8  ;;  %v6912_v43 = vor.u32 %v7138_v41, %v6911_v40  ;;  %v6899_v46 = vld [vmem:[#allocation5 + $0x68] sm:$0xf]  ;;  %v7135_v47 = vld [vmem:[#allocation5 + $0x70] sm:$0xf0]  ;;  %v6896_v48 = vor.u32 %v7133_v44, %v6893_v45  ;;  %v7130_v52 = vld [vmem:[#allocation5 + $0x4c] sm:$0xf] }
  0x49   : > { %638 = vmatpush.bf16.msra.mxu0 %v6904_v8  ;;  %7337 = vmatpush.bf16.msra.mxu3 %v6904_v8  ;;  %v6900_v49 = vor.u32 %v7135_v47, %v6899_v46  ;;  %v8386_v50 = vld [vmem:[%s8363_s30 + $0x28] sm:$0xff]  ;;  %v6881_v53 = vld [vmem:[#allocation5 + $0x54] sm:$0xf0]  ;;  %v6887_v55 = vld [vmem:[#allocation5 + $0x50] sm:$0xf]  ;;  %s8197_s14 = smov 96  }
  0x4a   : > { %v8389_v51 = vld [vmem:[%s8363_s30 + $0x48] sm:$0xff]  ;;  %v6884_v54 = vor.u32 %v7130_v52, %v6881_v53  ;;  %v7132_v56 = vld [vmem:[#allocation5 + $0x58] sm:$0xf0]  ;;  %v7127_v58 = vld [vmem:[#allocation5 + $0x34] sm:$0xf]  ;;  %vm1567_vm0 = vcmask 261120  }
  0x4b   : > { %v6888_v57 = vor.u32 %v7132_v56, %v6887_v55  ;;  %v6869_v59 = vld [vmem:[#allocation5 + $0x3c] sm:$0xf0]  ;;  %v6875_v60 = vld [vmem:[#allocation5 + $0x38] sm:$0xf]  ;;  %v7129_v62 = vld [vmem:[#allocation5 + $0x40] sm:$0xf0] }
  0x4c   : > { %7338 = vmatpush.bf16.msra.mxu1 %v6892_v11  ;;  %7339 = vmatpush.bf16.msra.mxu2 %v6892_v11  ;;  %v6872_v61 = vor.u32 %v7127_v58, %v6869_v59  ;;  %v7105_v63 = vld [vmem:[%s8363_s30] sm:$0xff]  ;;  %v6876_v0 = vor.u32 %v7129_v62, %v6875_v60  ;;  %v7124_v1 = vld [vmem:[#allocation5 + $0x1c] sm:$0xf]  ;;  %v6857_v2 = vld [vmem:[#allocation5 + $0x24] sm:$0xf0]  ;;  %vm2968_vm1 = vcmask 523264  }
  0x4d   : > { %639 = vmatpush.bf16.msra.mxu0 %v6892_v11  ;;  %7340 = vmatpush.bf16.msra.mxu3 %v6892_v11  ;;  %v6863_v3 = vld [vmem:[#allocation5 + $0x20] sm:$0xf]  ;;  %v7126_v4 = vld [vmem:[#allocation5 + $0x28] sm:$0xf0]  ;;  %v6860_v5 = vor.u32 %v7124_v1, %v6857_v2  ;;  %v7121_v7 = vld [vmem:[#allocation5 + $0x4] sm:$0xf] }
  0x4e   : > { %v6864_v6 = vor.u32 %v7126_v4, %v6863_v3  ;;  %v6845_v8 = vld [vmem:[#allocation5 + $0xc] sm:$0xf0]  ;;  %v6851_v9 = vld [vmem:[#allocation5 + $0x8] sm:$0xf]  ;;  %v7123_v10 = vld [vmem:[#allocation5 + $0x10] sm:$0xf0] }
  0x4f   : > { %v6848_v11 = vor.u32 %v7121_v7, %v6845_v8  ;;  %v6852_v12 = vor.u32 %v7123_v10, %v6851_v9  ;;  %v7111_v13 = vld [vmem:[%s8363_s30 + $0x30] sm:$0xff]  ;;  %v7106_v15 = vld [vmem:[%s8363_s30 + $0x8] sm:$0xff]  ;;  %v7112_v16 = vld [vmem:[%s8363_s30 + $0x38] sm:$0xff]  ;;  %vm6361_vm2 = vcmask 785408   ;;  %s12397_s17 = scalar_lea.vmem [#allocation11], %s6771_s19  ;;  %s7154_s9 = sshll.u32 %s8255_s25, 7 }
  0x50   : > { %7341 = vmatpush.bf16.msra.mxu1 %v6880_v14  ;;  %7342 = vmatpush.bf16.msra.mxu2 %v6880_v14  ;;  %v7107_v18 = vld [vmem:[%s8363_s30 + $0x10] sm:$0xff]  ;;  %v7108_v19 = vld [vmem:[%s8363_s30 + $0x18] sm:$0xff]  ;;  %v8450_v46 = vld [vmem:[%s8363_s30 + $0x60] sm:$0xff]  ;;  %s6644_s11 = scalar_lea.hbm %s12561_s6, %s7154_s9  ;;  %s6645_s13 = sshll.u32 %s12397_s17, 4  ;;  %s6646_s13 = int_to_ptr.vmem [resolvable:$true] %s6645_s13 }
  0x51   : > { %640 = vmatpush.bf16.msra.mxu0 %v6880_v14  ;;  %7343 = vmatpush.bf16.msra.mxu3 %v6880_v14  ;;  %v8396_v14 = vld [vmem:[%s8363_s30 + $0x50] sm:$0xff]  ;;  %s6647_s19 = sshll.u32 %s6644_s11, 4  ;;  %s6632_s20 = scalar_lea.sflag [#allocation4], %s8357_s7  ;;  %s6648_s19 = int_to_ptr.hbm [resolvable:$true] %s6647_s19 }
  0x52   : > { %s8131_s15 = scalar_lea.hbm %s12561_s6, 256 }
  0x54   : > { %7344 = vmatpush.bf16.msra.mxu1 %v6868_v17  ;;  %7345 = vmatpush.bf16.msra.mxu2 %v6868_v17 }
  0x55   : > { %641 = vmatpush.bf16.msra.mxu0 %v6868_v17  ;;  %7346 = vmatpush.bf16.msra.mxu3 %v6868_v17  ;;  %v8402_v17 = vld [vmem:[%s8363_s30 + $0x58] sm:$0xff] }
  0x58   : > { %7347 = vmatpush.bf16.msra.mxu1 %v6856_v20  ;;  %7348 = vmatpush.bf16.msra.mxu2 %v6856_v20 }
  0x59   : > { %642 = vmatpush.bf16.msra.mxu0 %v6856_v20  ;;  %7349 = vmatpush.bf16.msra.mxu3 %v6856_v20 }
  0x5c   : > { %7350 = vmatpush.bf16.msra.mxu1 %v6844_v23  ;;  %7351 = vmatpush.bf16.msra.mxu2 %v6844_v23 }
  0x5d   : > { %643 = vmatpush.bf16.msra.mxu0 %v6844_v23  ;;  %7352 = vmatpush.bf16.msra.mxu3 %v6844_v23 }
  0x5f   : > { %664 = vmatmul.bf16.vlgmr.msra.gmra.mxu1 %v8378_v24  ;;  %684 = vmatmul.bf16.vlgmr.msra.gmra.mxu2 %v8381_v25 }
  0x60   : > { %725 = vmatpush.bf16.msrb.mxu1 %v6932_v28  ;;  %814 = vmatpush.bf16.msrb.mxu2 %v6936_v31 }
  0x61   : > { %644 = vmatmul.bf16.vlgmr.msra.gmra.mxu0 %v7105_v63  ;;  %704 = vmatmul.bf16.vlgmr.msra.gmra.mxu3 %v8450_v46 }
  0x64   : > { %726 = vmatpush.bf16.msrb.mxu1 %v6920_v35  ;;  %815 = vmatpush.bf16.msrb.mxu2 %v6924_v37  ;;  %v404_v37 = vld [vmem:[#allocation7] sm:$0x7] }
  0x65   : > { %v8441_v39 = vperm.slane %v404_v37, 0  ;;  %v8443_v40 = vperm.slane %v404_v37, 1 }
  0x68   : > { %727 = vmatpush.bf16.msrb.mxu1 %v6908_v42  ;;  %816 = vmatpush.bf16.msrb.mxu2 %v6912_v43 }
  0x6c   : > { %728 = vmatpush.bf16.msrb.mxu1 %v6896_v48  ;;  %817 = vmatpush.bf16.msrb.mxu2 %v6900_v49  ;;  %v8453_v48 = vperm.slane %v404_v37, 2 }
  0x6f   : > { %669 = vmatmul.bf16.gmra.mxu1 %v8386_v50  ;;  %689 = vmatmul.bf16.gmra.mxu2 %v8389_v51 }
  0x70   : > { %729 = vmatpush.bf16.msrb.mxu1 %v6884_v54  ;;  %818 = vmatpush.bf16.msrb.mxu2 %v6888_v57 }
  0x71   : > { %649 = vmatmul.bf16.gmra.mxu0 %v7106_v15 }
  0x74   : > { %730 = vmatpush.bf16.msrb.mxu1 %v6872_v61  ;;  %819 = vmatpush.bf16.msrb.mxu2 %v6876_v0 }
  0x78   : > { %731 = vmatpush.bf16.msrb.mxu1 %v6860_v5  ;;  %820 = vmatpush.bf16.msrb.mxu2 %v6864_v6  ;;  %v8476_v5 = vld [vmem:[%s8363_s30 + $0x68] sm:$0xff] }
  0x79   : > { %709 = vmatmul.bf16.gmra.mxu3 %v8476_v5 }
  0x7c   : > { %732 = vmatpush.bf16.msrb.mxu1 %v6848_v11  ;;  %821 = vmatpush.bf16.msrb.mxu2 %v6852_v12 }
  0x7f   : > { %674 = vmatmul.bf16.gmra.mxu1 %v7111_v13  ;;  %694 = vmatmul.bf16.gmra.mxu2 %v8396_v14 }
  0x81   : > { %654 = vmatmul.bf16.gmra.mxu0 %v7107_v18 }
  0x8f   : > { %679 = vmatmul.bf16.gmra.mxu1 %v7112_v16  ;;  %699 = vmatmul.bf16.gmra.mxu2 %v8402_v17 }
  0x91   : > { %659 = vmatmul.bf16.gmra.mxu0 %v7108_v19 }
  0x9f   : > { %733 = vmatmul.bf16.vlgmr.msrb.gmra.mxu1 %v7105_v63  ;;  %822 = vmatmul.bf16.vlgmr.msrb.gmra.mxu2 %v7105_v63 }
  0xaf   : > { %738 = vmatmul.bf16.gmra.mxu1 %v7106_v15  ;;  %827 = vmatmul.bf16.gmra.mxu2 %v7106_v15 }
  0xbf   : > { %743 = vmatmul.bf16.gmra.mxu1 %v7107_v18  ;;  %832 = vmatmul.bf16.gmra.mxu2 %v7107_v18 }
  0xcf   : > { %748 = vmatmul.bf16.gmra.mxu1 %v7108_v19  ;;  %837 = vmatmul.bf16.gmra.mxu2 %v7108_v19 }
  0xdc   : > { %v8407_v20 = vpop.f32.mrf.mxu1 }
  0xde   : > { %v645_v34 = vpop.f32.mrf.mxu0 }
  0xdf   : > { %753 = vmatmul.bf16.gmra.mxu1 %v8378_v24  ;;  %842 = vmatmul.bf16.gmra.mxu2 %v8378_v24  ;;  %v646_v42 = vadd.f32 %v645_v34, %v8441_v39 }
  0xe2   : > { %v8411_v21 = vpop.f32.mrf.mxu2 }
  0xe4   : > { %v8413_v22 = vpop.f32.mrf.mxu1 }
  0xe6   : > { %v647_v38 = vpop.f32.mrf.mxu0 }
  0xe7   : > { %v648_v53 = vadd.f32 %v647_v38, %v8441_v39 }
  0xea   : > { %v8415_v23 = vpop.f32.mrf.mxu2 }
  0xec   : > { %v8417_v26 = vpop.f32.mrf.mxu1 }
  0xee   : > { %v650_v45 = vpop.f32.mrf.mxu0 }
  0xef   : > { %758 = vmatmul.bf16.gmra.mxu1 %v8386_v50  ;;  %847 = vmatmul.bf16.gmra.mxu2 %v8386_v50  ;;  %v651_v6 = vadd.f32 %v650_v45, %v8441_v39 }
  0xf2   : > { %v8421_v27 = vpop.f32.mrf.mxu2 }
  0xf4   : > { %v8423_v28 = vpop.f32.mrf.mxu1 }
  0xf6   : > { %v652_v57 = vpop.f32.mrf.mxu0 }
  0xf7   : > { %v653_v15 = vadd.f32 %v652_v57, %v8441_v39 }
  0xfa   : > { %v8425_v29 = vpop.f32.mrf.mxu2 }
  0xfc   : > { %v8427_v30 = vpop.f32.mrf.mxu1 }
  0xfe   : > { %v655_v11 = vpop.f32.mrf.mxu0 }
  0xff   : > { %763 = vmatmul.bf16.gmra.mxu1 %v7111_v13  ;;  %852 = vmatmul.bf16.gmra.mxu2 %v7111_v13 }
 0x102   : > { %v8429_v24 = vpop.f32.mrf.mxu2 }
 0x104   : > { %v8431_v31 = vpop.f32.mrf.mxu1 }
 0x10a   : > { %v8433_v32 = vpop.f32.mrf.mxu2 }
 0x10c   : > { %v8435_v33 = vpop.f32.mrf.mxu1 }
 0x10f   : > { %768 = vmatmul.bf16.gmra.mxu1 %v7112_v16  ;;  %857 = vmatmul.bf16.gmra.mxu2 %v7112_v16 }
 0x112   : > { %v8437_v35 = vpop.f32.mrf.mxu2 }
 0x114   : > { %v8439_v36 = vpop.f32.mrf.mxu1 }
 0x11a   : > { %v8445_v41 = vpop.f32.mrf.mxu2 }
 0x11c   : > { %v734_v43 = vpop.f32.mrf.mxu1 }
 0x11d   : > { %v735_v44 = vadd.f32 %v734_v43, %v8443_v40 }
 0x11f   : > { %v903_v47 = vpack.c.bf16 %v735_v44, %v646_v42  ;;  %773 = vmatmul.bf16.gmra.mxu1 %v8381_v25  ;;  %862 = vmatmul.bf16.gmra.mxu2 %v8381_v25 }
 0x121   : > { %1127 = vrot.lane.b32.xlu1 %v903_v47, %s8195_s27  ;;  %1063 = vrot.lane.b32.xlu2 %v903_v47, %s8196_s8  ;;  %v1191_v56 = vrot.slane %v903_v47, 4  ;;  %v1543_v59 = vunpack.c.l.b16 %v903_v47 }
 0x122   : > { %999 = vrot.lane.b32.xlu0 %v903_v47, %s8197_s14  ;;  %v823_v49 = vpop.f32.mrf.mxu2  ;;  %v657_v47 = vpop.f32.mrf.mxu0 }
 0x123   : > { %v824_v50 = vadd.f32 %v823_v49, %v8453_v48  ;;  %v8467_v63 = vunpack.c.l.b16 %v1191_v56 }
 0x124   : > { %v736_v52 = vpop.f32.mrf.mxu1 }
 0x125   : > { %v904_v54 = vpack.c.bf16 %v824_v50, %v824_v50  ;;  %v737_v25 = vadd.f32 %v736_v52, %v8443_v40  ;;  %v8507_v52 = vld [vmem:[%s8363_s30 + $0x70] sm:$0xff] }
 0x126   : > { %714 = vmatmul.bf16.gmra.mxu3 %v8507_v52 }
 0x127   : > { %v905_v55 = vpack.c.bf16 %v737_v25, %v648_v53  ;;  %v4525_v8 = vunpack.c.l.b16 %v904_v54 }
 0x129   : > { %1479 = vrot.lane.b32.xlu1 %v904_v54, %s8195_s27  ;;  %1415 = vrot.lane.b32.xlu2 %v904_v54, %s8196_s8  ;;  %v1192_v58 = vrot.slane %v905_v55, 4  ;;  %v1544_v60 = vunpack.c.l.b16 %v905_v55 }
 0x12a   : > { %1351 = vrot.lane.b32.xlu0 %v904_v54, %s8197_s14  ;;  %v825_v61 = vpop.f32.mrf.mxu2  ;;  %v660_v57 = vpop.f32.mrf.mxu0 }
 0x12b   : > { %v826_v62 = vadd.f32 %v825_v61, %v8453_v48  ;;  %v8469_v0 = vunpack.c.l.b16 %v1192_v58  ;;  %v8471_v1 = vpack.c.b16 %v1544_v60, %v1543_v59  ;;  %v661_v61 = vadd.f32 %v660_v57, %v8441_v39 }
 0x12c   : > { %v739_v2 = vpop.f32.mrf.mxu1 }
 0x12d   : > { %v906_v3 = vpack.c.bf16 %v826_v62, %v826_v62  ;;  %v1563_v4 = vpack.c.b16 %v8469_v0, %v8467_v63  ;;  %v740_v7 = vadd.f32 %v739_v2, %v8443_v40 }
 0x12f   : > { %778 = vmatmul.bf16.gmra.mxu1 %v8389_v51  ;;  %867 = vmatmul.bf16.gmra.mxu2 %v8389_v51  ;;  %v4526_v9 = vunpack.c.l.b16 %v906_v3  ;;  %v8488_v13 = vpack.c.bf16 %v740_v7, %v651_v6  ;;  %v8534_v6 = vld [vmem:[%s8363_s30 + $0x78] sm:$0xff]  ;;  %s8125_s30 = sshra.s32 %s6648_s19, 4  ;;  %s8126_s30 = int_to_ptr.hbm [resolvable:$true] %s8125_s30 }
 0x130   : > { %s8127_s25 = scalar_lea.hbm %s8126_s30, 128  ;;  %p8132_p11 = scmp.lt.s32.totalorder %s8126_s30, %s12561_s6 }
 0x131   : > { %1353 = vrot.lane.b32.xlu1 %v906_v3, %s8197_s14  ;;  %1129 = vrot.lane.b32.xlu2 %v905_v55, %s8195_s27  ;;  %v8485_v10 = vpack.c.b16 %v4526_v9, %v4525_v8  ;;  %v1545_v34 = vunpack.c.l.b16 %v8488_v13  ;;  %v656_v8 = vadd.f32 %v655_v11, %v8441_v39  ;;  %p8128_p1 = scmp.ne.s32.totalorder %s8126_s30, %s8127_s25  ;;  %p8133_p2 = scmp.lt.s32.totalorder %s8131_s15, %s8127_s25 }
 0x132   : > { %1001 = vrot.lane.b32.xlu0 %v905_v55, %s8197_s14  ;;  %v828_v12 = vpop.f32.mrf.mxu2 }
 0x133   : > { %v829_v19 = vadd.f32 %v828_v12, %v8453_v48  ;;  %v658_v12 = vadd.f32 %v657_v47, %v8441_v39  ;;  %p8129_p4 = pnand %p8128_p1, %p8324_p3  ;;  %p8134_p9 = por %p8133_p2, %p8132_p11 }
 0x134   : > { %v741_v16 = vpop.f32.mrf.mxu1 }
 0x135   : > { %v742_v51 = vadd.f32 %v741_v16, %v8443_v40  ;;  %v908_v42 = vpack.c.bf16 %v829_v19, %v829_v19  ;;  %p8130_p8 = pneg %p8129_p4 }
 0x136   : > { %719 = vmatmul.bf16.gmra.mxu3 %v8534_v6 }
 0x137   : > { %v8492_v18 = vpack.c.bf16 %v742_v51, %v653_v15  ;;  %v4527_v50 = vunpack.c.l.b16 %v908_v42  ;;  %v662_v15 = vpop.f32.mrf.mxu0  ;;  %p8135_p10 = pnand %p8134_p9, %p8130_p8 }
 0x138   : > { %v663_v11 = vadd.f32 %v662_v15, %v8441_v39 }
 0x139   : > { %1003 = vrot.lane.b32.xlu1 %v8488_v13, %s8197_s14  ;;  %1481 = vrot.lane.b32.xlu2 %v906_v3, %s8195_s27  ;;  %v1546_v37 = vunpack.c.l.b16 %v8492_v18 }
 0x13a   : > { %1065 = vrot.lane.b32.xlu0 %v905_v55, %s8196_s8  ;;  %v830_v38 = vpop.f32.mrf.mxu2 }
 0x13b   : > { %v831_v43 = vadd.f32 %v830_v38, %v8453_v48  ;;  %v8502_v44 = vpack.c.b16 %v1546_v37, %v1545_v34 }
 0x13c   : > { %v744_v45 = vpop.f32.mrf.mxu1 }
 0x13d   : > { %v8504_v49 = vpack.c.bf16 %v831_v43, %v831_v43  ;;  %v745_v9 = vadd.f32 %v744_v45, %v8443_v40 }
 0x13f   : > { %783 = vmatmul.bf16.gmra.mxu1 %v8396_v14  ;;  %872 = vmatmul.bf16.gmra.mxu2 %v8396_v14  ;;  %v4528_v53 = vunpack.c.l.b16 %v8504_v49  ;;  %v8554_v34 = vpack.c.bf16 %v745_v9, %v656_v8 }
 0x141   : > { %1067 = vrot.lane.b32.xlu1 %v8488_v13, %s8196_s8  ;;  %1355 = vrot.lane.b32.xlu2 %v908_v42, %s8197_s14  ;;  %v8516_v54 = vpack.c.b16 %v4528_v53, %v4527_v50  ;;  %v1195_v50 = vrot.slane %v8554_v34, 4 }
 0x142   : > { %1417 = vrot.lane.b32.xlu0 %v906_v3, %s8196_s8  ;;  %v833_v25 = vpop.f32.mrf.mxu2 }
 0x143   : > { %v834_v56 = vadd.f32 %v833_v25, %v8453_v48 }
 0x144   : > { %v746_v55 = vpop.f32.mrf.mxu1 }
 0x145   : > { %v8523_v14 = vpack.c.bf16 %v834_v56, %v834_v56  ;;  %v747_v16 = vadd.f32 %v746_v55, %v8443_v40  ;;  %v666_v55 = vadd.f32 %v8407_v20, %v8441_v39 }
 0x147   : > { %v4529_v3 = vunpack.c.l.b16 %v8523_v14  ;;  %v8556_v37 = vpack.c.bf16 %v747_v16, %v658_v12  ;;  %v1193_v12 = vrot.slane %v8488_v13, 4 }
 0x149   : > { %1419 = vrot.lane.b32.xlu1 %v908_v42, %s8196_s8  ;;  %1069 = vrot.lane.b32.xlu2 %v8492_v18, %s8196_s8  ;;  %v1196_v53 = vrot.slane %v8556_v37, 4 }
 0x14a   : > { %1131 = vrot.lane.b32.xlu0 %v8488_v13, %s8195_s27  ;;  %v835_v58 = vpop.f32.mrf.mxu2  ;;  %v1557_v13 = vunpack.c.l.b16 %v1193_v12 }
 0x14b   : > { %v836_v59 = vadd.f32 %v835_v58, %v8453_v48 }
 0x14c   : > { %v749_v60 = vpop.f32.mrf.mxu1 }
 0x14d   : > { %v750_v62 = vadd.f32 %v749_v60, %v8443_v40  ;;  %v8530_v2 = vpack.c.bf16 %v836_v59, %v836_v59  ;;  %v1559_v59 = vunpack.c.l.b16 %v1195_v50  ;;  %v1560_v60 = vunpack.c.l.b16 %v1196_v53 }
 0x14f   : > { %788 = vmatmul.bf16.gmra.mxu1 %v8402_v17  ;;  %877 = vmatmul.bf16.gmra.mxu2 %v8402_v17  ;;  %v4530_v7 = vunpack.c.l.b16 %v8530_v2  ;;  %v8544_v51 = vpack.c.bf16 %v750_v62, %v661_v61  ;;  %v1565_v20 = vpack.c.b16 %v1560_v60, %v1559_v59 }
 0x151   : > { %1005 = vrot.lane.b32.xlu1 %v8492_v18, %s8197_s14  ;;  %1421 = vrot.lane.b32.xlu2 %v8504_v49, %s8196_s8  ;;  %v8550_v17 = vpack.c.b16 %v4530_v7, %v4529_v3  ;;  %v1197_v43 = vrot.slane %v8544_v51, 4  ;;  %v1549_v8 = vunpack.c.l.b16 %v8544_v51 }
 0x152   : > { %1483 = vrot.lane.b32.xlu0 %v908_v42, %s8195_s27  ;;  %v838_v61 = vpop.f32.mrf.mxu2 }
 0x153   : > { %v1561_v47 = vunpack.c.l.b16 %v1197_v43  ;;  %v839_v7 = vadd.f32 %v838_v61, %v8453_v48 }
 0x154   : > { %v751_v19 = vpop.f32.mrf.mxu1 }
 0x155   : > { %v752_v38 = vadd.f32 %v751_v19, %v8443_v40  ;;  %v8590_v16 = vpack.c.bf16 %v839_v7, %v839_v7 }
 0x157   : > { %v8560_v45 = vpack.c.bf16 %v752_v38, %v663_v11  ;;  %v1587_v38 = vsel %vm1567_vm0, %v1565_v20, 0  ;;  %v4531_v53 = vunpack.c.l.b16 %v8590_v16 }
 0x159   : > { %1133 = vrot.lane.b32.xlu1 %v8492_v18, %s8195_s27  ;;  %1007 = vrot.lane.b32.xlu2 %v8554_v34, %s8197_s14  ;;  %v1198_v42 = vrot.slane %v8560_v45, 4  ;;  %v1550_v9 = vunpack.c.l.b16 %v8560_v45 }
 0x15a   : > { %1357 = vrot.lane.b32.xlu0 %v8504_v49, %s8197_s14  ;;  %v840_v43 = vpop.f32.mrf.mxu2 }
 0x15b   : > { %v1562_v25 = vunpack.c.l.b16 %v1198_v42  ;;  %v8592_v11 = vpack.c.b16 %v1550_v9, %v1549_v8  ;;  %v841_v42 = vadd.f32 %v840_v43, %v8453_v48 }
 0x15c   : > { %v754_v56 = vpop.f32.mrf.mxu1 }
 0x15d   : > { %v755_v57 = vadd.f32 %v754_v56, %v8443_v40  ;;  %v1566_v58 = vpack.c.b16 %v1562_v25, %v1561_v47  ;;  %v8603_v25 = vpack.c.bf16 %v841_v42, %v841_v42 }
 0x15f   : > { %v8574_v62 = vpack.c.bf16 %v755_v57, %v666_v55  ;;  %v1590_v3 = vsel %vm1567_vm0, %v1566_v58, 0  ;;  %793 = vmatmul.bf16.gmra.mxu1 %v8450_v46  ;;  %882 = vmatmul.bf16.gmra.mxu2 %v8450_v46  ;;  %v1194_v46 = vrot.slane %v8492_v18, 4  ;;  %v4532_v57 = vunpack.c.l.b16 %v8603_v25 }
 0x160   : > { %1596 = vmatpush.bf16.xpose.msrb.mxu3 %v1590_v3 }
 0x161   : > { %1485 = vrot.lane.b32.xlu1 %v8504_v49, %s8195_s27  ;;  %1135 = vrot.lane.b32.xlu2 %v8554_v34, %s8195_s27  ;;  %v668_v49 = vadd.f32 %v8413_v22, %v8441_v39  ;;  %v1558_v50 = vunpack.c.l.b16 %v1194_v46  ;;  %v1199_v18 = vrot.slane %v8574_v62, 4  ;;  %v1621_v55 = vunpack.c.l.b16 %v8574_v62 }
 0x162   : > { %1071 = vrot.lane.b32.xlu0 %v8554_v34, %s8196_s8  ;;  %v8621_v7 = vpack.c.b16 %v4532_v57, %v4531_v53 }
 0x163   : > { %v1564_v58 = vpack.c.b16 %v1558_v50, %v1557_v13  ;;  %v8615_v59 = vunpack.c.l.b16 %v1199_v18  ;;  %v843_v50 = vpop.f32.mrf.mxu2 }
 0x164   : > { %v756_v15 = vpop.f32.mrf.mxu1  ;;  %v844_v53 = vadd.f32 %v843_v50, %v8453_v48 }
 0x165   : > { %v757_v19 = vadd.f32 %v756_v15, %v8443_v40  ;;  %v1584_v9 = vsel %vm1567_vm0, %v1564_v58, 0  ;;  %v673_v15 = vadd.f32 %v8423_v28, %v8441_v39 }
 0x167   : > { %v8599_v47 = vpack.c.bf16 %v757_v19, %v668_v49 }
 0x168   : > { %1597 = vmatpush.bf16.xpose.msrb.mxu3 %v1587_v38 }
 0x169   : > { %1359 = vrot.lane.b32.xlu1 %v8523_v14, %s8197_s14  ;;  %1487 = vrot.lane.b32.xlu2 %v8523_v14, %s8195_s27  ;;  %v1200_v22 = vrot.slane %v8599_v47, 4  ;;  %v1622_v56 = vunpack.c.l.b16 %v8599_v47 }
 0x16a   : > { %1423 = vrot.lane.b32.xlu0 %v8523_v14, %s8196_s8  ;;  %v671_v14 = vadd.f32 %v8417_v26, %v8441_v39  ;;  %v1581_v26 = vsel %vm1567_vm0, %v1563_v4, 0 }
 0x16b   : > { %v8617_v60 = vunpack.c.l.b16 %v1200_v22  ;;  %v8619_v61 = vpack.c.b16 %v1622_v56, %v1621_v55  ;;  %v845_v55 = vpop.f32.mrf.mxu2  ;;  %v8682_v56 = vpack.c.bf16 %v844_v53, %v844_v53 }
 0x16c   : > { %v759_v3 = vpop.f32.mrf.mxu1 }
 0x16d   : > { %v1641_v20 = vpack.c.b16 %v8617_v60, %v8615_v59  ;;  %v760_v8 = vadd.f32 %v759_v3, %v8443_v40  ;;  %v4602_v57 = vunpack.c.l.b16 %v8682_v56 }
 0x16f   : > { %798 = vmatmul.bf16.gmra.mxu1 %v8476_v5  ;;  %887 = vmatmul.bf16.gmra.mxu2 %v8476_v5  ;;  %v8637_v12 = vpack.c.bf16 %v760_v8, %v671_v14 }
 0x170   : > { %1598 = vmatpush.bf16.xpose.msrb.mxu3 %v1584_v9 }
 0x171   : > { %1073 = vrot.lane.b32.xlu1 %v8556_v37, %s8196_s8  ;;  %1009 = vrot.lane.b32.xlu2 %v8556_v37, %s8197_s14  ;;  %v1201_v19 = vrot.slane %v8637_v12, 4  ;;  %v1623_v38 = vunpack.c.l.b16 %v8637_v12 }
 0x172   : > { %1137 = vrot.lane.b32.xlu0 %v8556_v37, %s8195_s27 }
 0x173   : > { %v8660_v0 = vunpack.c.l.b16 %v1201_v19 }
 0x174   : > { %v761_v46 = vpop.f32.mrf.mxu1 }
 0x175   : > { %v762_v5 = vadd.f32 %v761_v46, %v8443_v40 }
 0x177   : > { %v8642_v49 = vpack.c.bf16 %v762_v5, %v673_v15  ;;  %v678_v5 = vadd.f32 %v8431_v31, %v8441_v39  ;;  %v1547_v31 = vunpack.c.l.b16 %v8554_v34 }
 0x178   : > { %1599 = vmatpush.bf16.xpose.msrb.mxu3 %v1581_v26  ;;  %v683_v26 = vadd.f32 %v8439_v36, %v8441_v39  ;;  %v1548_v36 = vunpack.c.l.b16 %v8556_v37 }
 0x179   : > { %1425 = vrot.lane.b32.xlu1 %v8530_v2, %s8196_s8  ;;  %1361 = vrot.lane.b32.xlu2 %v8530_v2, %s8197_s14  ;;  %v1202_v28 = vrot.slane %v8642_v49, 4  ;;  %v1624_v43 = vunpack.c.l.b16 %v8642_v49 }
 0x17a   : > { %1489 = vrot.lane.b32.xlu0 %v8530_v2, %s8195_s27 }
 0x17b   : > { %v8658_v63 = vpop.permute.xlu2 %1063  ;;  %v8662_v4 = vunpack.c.l.b16 %v1202_v28  ;;  %v8664_v42 = vpack.c.b16 %v1624_v43, %v1623_v38  ;;  %v676_v28 = vadd.f32 %v8427_v30, %v8441_v39 }
 0x17c   : > { %v764_v13 = vpop.f32.mrf.mxu1 }
 0x17d   : > { %v1642_v18 = vpack.c.b16 %v8662_v4, %v8660_v0  ;;  %v765_v19 = vadd.f32 %v764_v13, %v8443_v40  ;;  %v1658_v0 = vsel %vm1567_vm0, %v1641_v20, 0 }
 0x17f   : > { %6937 = vmatmul.msk.bf16.vlgmr.msrb.gmra.mxu3 %vm1567_vm0, %v8471_v1  ;;  %803 = vmatmul.bf16.gmra.mxu1 %v8507_v52  ;;  %v846_v1 = vadd.f32 %v845_v55, %v8453_v48  ;;  %v8733_v53 = vpack.c.bf16 %v765_v19, %v676_v28 }
 0x180   : > { %892 = vmatmul.bf16.gmra.mxu2 %v8507_v52 }
 0x181   : > { %1139 = vrot.lane.b32.xlu1 %v8544_v51, %s8195_s27  ;;  %1075 = vrot.lane.b32.xlu2 %v8544_v51, %s8196_s8  ;;  %v8684_v52 = vpack.c.bf16 %v846_v1, %v846_v1 }
 0x182   : > { %1011 = vrot.lane.b32.xlu0 %v8544_v51, %s8197_s14 }
 0x183   : > { %v8678_v2 = vpop.permute.xlu2 %1415  ;;  %v4603_v58 = vunpack.c.l.b16 %v8684_v52 }
 0x184   : > { %12733 = vst [vmem:[#allocation16_spill] sm:$0xff] %v8678_v2  ;;  %v766_v22 = vpop.f32.mrf.mxu1 }
 0x185   : > { %v8696_v8 = vpack.c.b16 %v4603_v58, %v4602_v57  ;;  %v767_v14 = vadd.f32 %v766_v22, %v8443_v40  ;;  %v686_v58 = vadd.f32 %v8411_v21, %v8441_v39 }
 0x187   : > { %12734 = vst [vmem:[#allocation17_spill] sm:$0xff] %v8696_v8  ;;  %v8728_v38 = vpack.c.bf16 %v767_v14, %v678_v5  ;;  %v848_v14 = vpop.f32.mrf.mxu2  ;;  %v691_v8 = vadd.f32 %v8421_v27, %v8441_v39 }
 0x189   : > { %1491 = vrot.lane.b32.xlu1 %v8590_v16, %s8195_s27  ;;  %1427 = vrot.lane.b32.xlu2 %v8590_v16, %s8196_s8  ;;  %v1204_v57 = vrot.slane %v8728_v38, 4 }
 0x18a   : > { %1363 = vrot.lane.b32.xlu0 %v8590_v16, %s8197_s14  ;;  %v681_v16 = vadd.f32 %v8435_v33, %v8441_v39 }
 0x18b   : > { %v8692_v51 = vpop.permute.xlu2 %1129 }
 0x18c   : > { %v769_v3 = vpop.f32.mrf.mxu1 }
 0x18d   : > { %v770_v9 = vadd.f32 %v769_v3, %v8443_v40 }
 0x18f   : > { %6938 = vmatmul.msk.bf16.gmra.mxu3 %vm1567_vm0, %v8502_v44  ;;  %808 = vmatmul.bf16.gmra.mxu1 %v8534_v6  ;;  %v8712_v46 = vpack.c.bf16 %v770_v9, %v681_v16  ;;  %v1553_v9 = vpack.c.b16 %v1548_v36, %v1547_v31 }
 0x190   : > { %897 = vmatmul.bf16.gmra.mxu2 %v8534_v6 }
 0x191   : > { %1013 = vrot.lane.b32.xlu1 %v8560_v45, %s8197_s14  ;;  %1141 = vrot.lane.b32.xlu2 %v8560_v45, %s8195_s27  ;;  %v1205_v50 = vrot.slane %v8712_v46, 4 }
 0x192   : > { %1077 = vrot.lane.b32.xlu0 %v8560_v45, %s8196_s8 }
 0x193   : > { %v8714_v44 = vpop.permute.xlu1 %1127  ;;  %v8716_v15 = vpop.permute.xlu2 %1481  ;;  %v1639_v55 = vunpack.c.l.b16 %v1205_v50  ;;  %v849_v50 = vadd.f32 %v848_v14, %v8453_v48 }
 0x194   : > { %12735 = vst [vmem:[#allocation18_spill] sm:$0xff] %v8716_v15  ;;  %v8718_v6 = vpop.permute.xlu0 %999  ;;  %v771_v33 = vpop.f32.mrf.mxu1 }
 0x195   : > { %v772_v45 = vadd.f32 %v771_v33, %v8443_v40 }
 0x197   : > { %v8730_v43 = vpack.c.bf16 %v772_v45, %v683_v26  ;;  %v1638_v26 = vunpack.c.l.b16 %v1204_v57  ;;  %v924_v57 = vpack.c.bf16 %v849_v50, %v849_v50 }
 0x199   : > { %1365 = vrot.lane.b32.xlu1 %v8603_v25, %s8197_s14  ;;  %1493 = vrot.lane.b32.xlu2 %v8603_v25, %s8195_s27  ;;  %v1206_v30 = vrot.slane %v8730_v43, 4 }
 0x19a   : > { %1429 = vrot.lane.b32.xlu0 %v8603_v25, %s8196_s8  ;;  %v1203_v25 = vrot.slane %v8733_v53, 4 }
 0x19b   : > { %v8744_v13 = vpop.permute.xlu1 %1479  ;;  %v8746_v22 = vpop.permute.xlu2 %1355  ;;  %v1640_v1 = vunpack.c.l.b16 %v1206_v30 }
 0x19c   : > { %12736 = vst [vmem:[#allocation19_spill] sm:$0xff] %v8744_v13  ;;  %v8751_v3 = vpop.permute.xlu0 %1351  ;;  %v774_v34 = vpop.f32.mrf.mxu1  ;;  %v1637_v21 = vunpack.c.l.b16 %v1203_v25  ;;  %v698_v13 = vadd.f32 %v8433_v32, %v8441_v39  ;;  %v1626_v32 = vunpack.c.l.b16 %v8728_v38 }
 0x19d   : > { %12737 = vst [vmem:[#allocation20_spill] sm:$0xff] %v8746_v22  ;;  %v775_v37 = vadd.f32 %v774_v34, %v8443_v40  ;;  %v1644_v16 = vpack.c.b16 %v1640_v1, %v1639_v55  ;;  %v850_v30 = vpop.f32.mrf.mxu2 }
 0x19e   : > { %12738 = vst [vmem:[#allocation21_spill] sm:$0xff] %v8751_v3  ;;  %v1643_v28 = vpack.c.b16 %v1638_v26, %v1637_v21  ;;  %v851_v55 = vadd.f32 %v850_v30, %v8453_v48 }
 0x19f   : > { %v8755_v33 = vpack.c.bf16 %v775_v37, %v686_v58  ;;  %6939 = vmatmul.msk.bf16.gmra.mxu3 %vm1567_vm0, %v1553_v9  ;;  %v1667_v5 = vsel %vm1567_vm0, %v1644_v16, 0  ;;  %v4604_v37 = vunpack.c.l.b16 %v924_v57 }
 0x1a0   : > { %1673 = vmatpush.bf16.xpose.msra.mxu3 %v1667_v5  ;;  %v1664_v1 = vsel %vm1567_vm0, %v1643_v28, 0  ;;  %v8776_v58 = vpack.c.bf16 %v851_v55, %v851_v55 }
 0x1a1   : > { %1079 = vrot.lane.b32.xlu1 %v8574_v62, %s8196_s8  ;;  %1015 = vrot.lane.b32.xlu2 %v8574_v62, %s8197_s14 }
 0x1a2   : > { %1143 = vrot.lane.b32.xlu0 %v8574_v62, %s8195_s27  ;;  %v4605_v25 = vunpack.c.l.b16 %v8776_v58 }
 0x1a3   : > { %v8765_v19 = vpop.permute.xlu1 %1353  ;;  %v8767_v45 = vpop.permute.xlu2 %1069 }
 0x1a4   : > { %12739 = vst [vmem:[#allocation22_spill] sm:$0xff] %v8765_v19  ;;  %v8770_v31 = vpop.permute.xlu0 %1001  ;;  %v8772_v36 = vpop.f32.mrf.mxu1  ;;  %v8793_v14 = vpack.c.b16 %v4605_v25, %v4604_v37 }
 0x1a5   : > { %v853_v59 = vpop.f32.mrf.mxu2  ;;  %v777_v27 = vadd.f32 %v8772_v36, %v8443_v40 }
 0x1a6   : > { %12741 = vst [vmem:[#allocation24_spill] sm:$0xff] %v8793_v14 }
 0x1a8   : > { %1674 = vmatpush.bf16.xpose.msra.mxu3 %v1664_v1 }
 0x1a9   : > { %1431 = vrot.lane.b32.xlu1 %v8682_v56, %s8196_s8  ;;  %1367 = vrot.lane.b32.xlu2 %v8682_v56, %s8197_s14 }
 0x1aa   : > { %1495 = vrot.lane.b32.xlu0 %v8682_v56, %s8195_s27  ;;  %v1661_v56 = vsel %vm1567_vm0, %v1642_v18, 0 }
 0x1ab   : > { %v8784_v62 = vpop.permute.xlu1 %1003  ;;  %v8786_v34 = vpop.permute.xlu2 %1421 }
 0x1ac   : > { %12740 = vst [vmem:[#allocation23_spill] sm:$0xff] %v8786_v34  ;;  %v8788_v9 = vpop.permute.xlu0 %1065  ;;  %v8790_v16 = vpop.f32.mrf.mxu1 }
 0x1ad   : > { %v855_v55 = vpop.f32.mrf.mxu2 }
 0x1af   : > { %6940 = vmatmul.msk.bf16.gmra.mxu3 %vm1567_vm0, %v8592_v11 }
 0x1b0   : > { %1675 = vmatpush.bf16.xpose.msra.mxu3 %v1661_v56 }
 0x1b1   : > { %1145 = vrot.lane.b32.xlu1 %v8599_v47, %s8195_s27  ;;  %1081 = vrot.lane.b32.xlu2 %v8599_v47, %s8196_s8 }
 0x1b2   : > { %1017 = vrot.lane.b32.xlu0 %v8599_v47, %s8197_s14 }
 0x1b3   : > { %v8807_v5 = vpop.permute.xlu1 %1067  ;;  %v8809_v26 = vpop.permute.xlu2 %1007 }
 0x1b4   : > { %v8811_v11 = vpop.permute.xlu0 %1417  ;;  %v781_v21 = vpop.f32.mrf.mxu1 }
 0x1b5   : > { %12742 = vst [vmem:[#allocation25_spill] sm:$0xff] %v8811_v11 }
 0x1b8   : > { %1676 = vmatpush.bf16.xpose.msra.mxu3 %v1658_v0 }
 0x1b9   : > { %1497 = vrot.lane.b32.xlu1 %v8684_v52, %s8195_s27  ;;  %1433 = vrot.lane.b32.xlu2 %v8684_v52, %s8196_s8 }
 0x1ba   : > { %1369 = vrot.lane.b32.xlu0 %v8684_v52, %s8197_s14  ;;  %v854_v52 = vadd.f32 %v853_v59, %v8453_v48 }
 0x1bb   : > { %v8823_v47 = vpop.permute.xlu1 %1419  ;;  %v8825_v4 = vpop.permute.xlu2 %1135 }
 0x1bc   : > { %12743 = vst [vmem:[#allocation26_spill] sm:$0xff] %v8823_v47  ;;  %v8827_v18 = vpop.permute.xlu0 %1131  ;;  %v784_v28 = vpop.f32.mrf.mxu1  ;;  %v8845_v1 = vpack.c.bf16 %v854_v52, %v854_v52 }
 0x1bd   : > { %v858_v47 = vpop.f32.mrf.mxu2 }
 0x1be   : > { %v4606_v56 = vunpack.c.l.b16 %v8845_v1 }
 0x1bf   : > { %6941 = vmatmul.msk.bf16.vlgmr.msra.gmra.mxu3 %vm1567_vm0, %v8619_v61  ;;  %v856_v61 = vadd.f32 %v855_v55, %v8453_v48 }
 0x1c1   : > { %1019 = vrot.lane.b32.xlu1 %v8637_v12, %s8197_s14  ;;  %1147 = vrot.lane.b32.xlu2 %v8637_v12, %s8195_s27  ;;  %v8847_v37 = vpack.c.bf16 %v856_v61, %v856_v61 }
 0x1c2   : > { %1083 = vrot.lane.b32.xlu0 %v8637_v12, %s8196_s8 }
 0x1c3   : > { %v8837_v60 = vpop.permute.xlu1 %1005  ;;  %v8839_v20 = vpop.permute.xlu2 %1487  ;;  %v4607_v0 = vunpack.c.l.b16 %v8847_v37 }
 0x1c4   : > { %12744 = vst [vmem:[#allocation27_spill] sm:$0xff] %v8839_v20  ;;  %v8842_v50 = vpop.permute.xlu0 %1483  ;;  %v786_v30 = vpop.f32.mrf.mxu1  ;;  %v785_v20 = vadd.f32 %v784_v28, %v8443_v40 }
 0x1c5   : > { %12745 = vst [vmem:[#allocation28_spill] sm:$0xff] %v8842_v50  ;;  %v8860_v55 = vpack.c.b16 %v4607_v0, %v4606_v56  ;;  %v787_v56 = vadd.f32 %v786_v30, %v8443_v40  ;;  %v703_v50 = vadd.f32 %v8445_v41, %v8441_v39  ;;  %v696_v30 = vadd.f32 %v8429_v24, %v8441_v39 }
 0x1c6   : > { %v1625_v24 = vunpack.c.l.b16 %v8733_v53 }
 0x1c7   : > { %12747 = vst [vmem:[#allocation30_spill] sm:$0xff] %v8860_v55  ;;  %v8895_v2 = vpack.c.bf16 %v785_v20, %v696_v30 }
 0x1c8   : > { %v1631_v11 = vpack.c.b16 %v1626_v32, %v1625_v24 }
 0x1c9   : > { %1371 = vrot.lane.b32.xlu1 %v924_v57, %s8197_s14  ;;  %1499 = vrot.lane.b32.xlu2 %v924_v57, %s8195_s27 }
 0x1ca   : > { %1435 = vrot.lane.b32.xlu0 %v924_v57, %s8196_s8  ;;  %v701_v57 = vadd.f32 %v8437_v35, %v8441_v39 }
 0x1cb   : > { %v8852_v12 = vpop.permute.xlu1 %1133  ;;  %v8854_v25 = vpop.permute.xlu2 %1009 }
 0x1cc   : > { %v8858_v59 = vpop.permute.xlu0 %1357  ;;  %v789_v52 = vpop.f32.mrf.mxu1 }
 0x1cd   : > { %12746 = vst [vmem:[#allocation29_spill] sm:$0xff] %v8858_v59  ;;  %v790_v61 = vadd.f32 %v789_v52, %v8443_v40 }
 0x1cf   : > { %6942 = vmatmul.msk.bf16.gmra.mxu3 %vm1567_vm0, %v8664_v42  ;;  %v8874_v0 = vpack.c.bf16 %v790_v61, %v701_v57  ;;  %v8890_v61 = vpack.c.bf16 %v787_v56, %v698_v13  ;;  %v782_v13 = vadd.f32 %v781_v21, %v8443_v40  ;;  %v1211_v21 = vrot.slane %v8895_v2, 4 }
 0x1d1   : > { %1085 = vrot.lane.b32.xlu1 %v8642_v49, %s8196_s8  ;;  %1021 = vrot.lane.b32.xlu2 %v8642_v49, %s8197_s14 }
 0x1d2   : > { %1149 = vrot.lane.b32.xlu0 %v8642_v49, %s8195_s27 }
 0x1d3   : > { %v8876_v52 = vpop.permute.xlu1 %1485  ;;  %v8878_v15 = vpop.permute.xlu2 %1361 }
 0x1d4   : > { %12748 = vst [vmem:[#allocation31_spill] sm:$0xff] %v8876_v52  ;;  %v8880_v42 = vpop.permute.xlu0 %1071  ;;  %v791_v35 = vpop.f32.mrf.mxu1  ;;  %v1213_v52 = vrot.slane %v8874_v0, 4 }
 0x1d5   : > { %12749 = vst [vmem:[#allocation32_spill] sm:$0xff] %v8878_v15  ;;  %v792_v49 = vadd.f32 %v791_v35, %v8443_v40  ;;  %v1212_v35 = vrot.slane %v8890_v61, 4 }
 0x1d7   : > { %v8892_v57 = vpack.c.bf16 %v792_v49, %v703_v50  ;;  %v1716_v50 = vunpack.c.l.b16 %v1213_v52  ;;  %v693_v49 = vadd.f32 %v8425_v29, %v8441_v39  ;;  %v1715_v29 = vunpack.c.l.b16 %v1212_v35 }
 0x1d9   : > { %12750 = vst [vmem:[#allocation33_spill] sm:$0xff] %v8892_v57  ;;  %1437 = vrot.lane.b32.xlu1 %v8776_v58, %s8196_s8  ;;  %1373 = vrot.lane.b32.xlu2 %v8776_v58, %s8197_s14  ;;  %v1214_v41 = vrot.slane %v8892_v57, 4  ;;  %v8921_v52 = vpack.c.bf16 %v782_v13, %v693_v49  ;;  %v688_v13 = vadd.f32 %v8415_v23, %v8441_v39  ;;  %v1628_v23 = vunpack.c.l.b16 %v8730_v43 }
 0x1da   : > { %1501 = vrot.lane.b32.xlu0 %v8776_v58, %s8195_s27  ;;  %v780_v58 = vadd.f32 %v8790_v16, %v8443_v40  ;;  %v1714_v16 = vunpack.c.l.b16 %v1211_v21 }
 0x1db   : > { %v8907_v28 = vpop.permute.xlu1 %1359  ;;  %v8909_v20 = vpop.permute.xlu2 %1075  ;;  %v1717_v56 = vunpack.c.l.b16 %v1214_v41  ;;  %v8949_v36 = vpack.c.bf16 %v777_v27, %v688_v13 }
 0x1dc   : > { %12751 = vst [vmem:[#allocation34_spill] sm:$0xff] %v8907_v28  ;;  %v8914_v30 = vpop.permute.xlu0 %1423  ;;  %v8926_v14 = vpack.c.bf16 %v780_v58, %v691_v8  ;;  %v1210_v8 = vrot.slane %v8921_v52, 4  ;;  %v8952_v58 = vpop.f32.mrf.mxu3  ;;  %v1226_v28 = vrot.slane %v8837_v60, 4 }
 0x1dd   : > { %12752 = vst [vmem:[#allocation35_spill] sm:$0xff] %v8909_v20  ;;  %v1721_v34 = vpack.c.b16 %v1717_v56, %v1716_v50  ;;  %v1208_v13 = vrot.slane %v8949_v36, 4 }
 0x1de   : > { %12753 = vst [vmem:[#allocation36_spill] sm:$0xff] %v8914_v30  ;;  %v859_v30 = vadd.f32 %v858_v47, %v8453_v48  ;;  %v1720_v47 = vpack.c.b16 %v1715_v29, %v1714_v16  ;;  %v1209_v50 = vrot.slane %v8926_v14, 4  ;;  %v1713_v49 = vunpack.c.l.b16 %v1210_v8 }
 0x1df   : > { %6943 = vmatmul.msk.bf16.gmra.mxu3 %vm1567_vm0, %v1631_v11  ;;  %v1744_v41 = vsel %vm1567_vm0, %v1721_v34, 0 }
 0x1e0   : > { %1750 = vmatpush.bf16.xpose.msrb.mxu3 %v1744_v41  ;;  %v8943_v24 = vpack.c.bf16 %v859_v30, %v859_v30  ;;  %v1741_v35 = vsel %vm1567_vm0, %v1720_v47, 0  ;;  %v1712_v41 = vunpack.c.l.b16 %v1209_v50  ;;  %v1627_v47 = vunpack.c.l.b16 %v8712_v46 }
 0x1e1   : > { %1151 = vrot.lane.b32.xlu1 %v8733_v53, %s8195_s27  ;;  %1087 = vrot.lane.b32.xlu2 %v8733_v53, %s8196_s8  ;;  %v1207_v50 = vrot.slane %v8755_v33, 4 }
 0x1e2   : > { %1023 = vrot.lane.b32.xlu0 %v8733_v53, %s8197_s14  ;;  %v860_v53 = vpop.f32.mrf.mxu2  ;;  %v4608_v21 = vunpack.c.l.b16 %v8943_v24  ;;  %v1719_v8 = vpack.c.b16 %v1713_v49, %v1712_v41 }
 0x1e3   : > { %v8936_v34 = vpop.permute.xlu1 %1073  ;;  %v8938_v11 = vpop.permute.xlu2 %1427  ;;  %v861_v56 = vadd.f32 %v860_v53, %v8453_v48  ;;  %v1710_v49 = vunpack.c.l.b16 %v1207_v50 }
 0x1e4   : > { %12754 = vst [vmem:[#allocation37_spill] sm:$0xff] %v8938_v11  ;;  %v8941_v32 = vpop.permute.xlu0 %1137  ;;  %v1711_v11 = vunpack.c.l.b16 %v1208_v13  ;;  %v8982_v41 = vpop.f32.mrf.mxu3  ;;  %v1699_v13 = vunpack.c.l.b16 %v8949_v36 }
 0x1e5   : > { %v8955_v30 = vpack.c.bf16 %v861_v56, %v861_v56 }
 0x1e7   : > { %v4609_v29 = vunpack.c.l.b16 %v8955_v30 }
 0x1e8   : > { %1751 = vmatpush.bf16.xpose.msrb.mxu3 %v1741_v35  ;;  %v1632_v35 = vpack.c.b16 %v1628_v23, %v1627_v47 }
 0x1e9   : > { %1503 = vrot.lane.b32.xlu1 %v8845_v1, %s8195_s27  ;;  %1439 = vrot.lane.b32.xlu2 %v8845_v1, %s8196_s8  ;;  %v8973_v56 = vpack.c.b16 %v4609_v29, %v4608_v21  ;;  %v1718_v29 = vpack.c.b16 %v1711_v11, %v1710_v49 }
 0x1ea   : > { %1375 = vrot.lane.b32.xlu0 %v8845_v1, %s8197_s14  ;;  %v1738_v1 = vsel %vm1567_vm0, %v1719_v8, 0 }
 0x1eb   : > { %v8965_v16 = vpop.permute.xlu1 %1425  ;;  %v8967_v27 = vpop.permute.xlu2 %1141  ;;  %12758 = vst [vmem:[#allocation41_spill] sm:$0xff] %v8973_v56  ;;  %v1735_v8 = vsel %vm1567_vm0, %v1718_v29, 0 }
 0x1ec   : > { %12755 = vst [vmem:[#allocation38_spill] sm:$0xff] %v8965_v16  ;;  %v8971_v53 = vpop.permute.xlu0 %1489  ;;  %v9005_v50 = vpop.f32.mrf.mxu3 }
 0x1ed   : > { %12756 = vst [vmem:[#allocation39_spill] sm:$0xff] %v8967_v27  ;;  %v863_v29 = vpop.f32.mrf.mxu2 }
 0x1ee   : > { %12757 = vst [vmem:[#allocation40_spill] sm:$0xff] %v8971_v53 }
 0x1ef   : > { %6944 = vmatmul.msk.bf16.gmra.mxu3 %vm1567_vm0, %v1632_v35 }
 0x1f0   : > { %1752 = vmatpush.bf16.xpose.msrb.mxu3 %v1738_v1 }
 0x1f1   : > { %1025 = vrot.lane.b32.xlu1 %v8728_v38, %s8197_s14  ;;  %1153 = vrot.lane.b32.xlu2 %v8728_v38, %s8195_s27 }
 0x1f2   : > { %1089 = vrot.lane.b32.xlu0 %v8728_v38, %s8196_s8  ;;  %v1698_v38 = vunpack.c.l.b16 %v8755_v33 }
 0x1f3   : > { %v8986_v21 = vpop.permute.xlu1 %1139  ;;  %v8988_v23 = vpop.permute.xlu2 %1493 }
 0x1f4   : > { %12759 = vst [vmem:[#allocation42_spill] sm:$0xff] %v8986_v21  ;;  %v8990_v47 = vpop.permute.xlu0 %1011  ;;  %v1706_v49 = vpack.c.b16 %v1699_v13, %v1698_v38  ;;  %v9026_v16 = vpop.f32.mrf.mxu3 }
 0x1f5   : > { %12760 = vst [vmem:[#allocation43_spill] sm:$0xff] %v8988_v23  ;;  %v865_v23 = vpop.f32.mrf.mxu2 }
 0x1f6   : > { %v866_v3 = vadd.f32 %v865_v23, %v8453_v48 }
 0x1f8   : > { %1753 = vmatpush.bf16.xpose.msrb.mxu3 %v1735_v8  ;;  %v9037_v22 = vpack.c.bf16 %v866_v3, %v866_v3 }
 0x1f9   : > { %1377 = vrot.lane.b32.xlu1 %v8847_v37, %s8197_s14  ;;  %1505 = vrot.lane.b32.xlu2 %v8847_v37, %s8195_s27 }
 0x1fa   : > { %1441 = vrot.lane.b32.xlu0 %v8847_v37, %s8196_s8  ;;  %v1229_v37 = vrot.slane %v8990_v47, 4 }
 0x1fb   : > { %v9001_v35 = vpop.permute.xlu1 %1491  ;;  %v9003_v11 = vpop.permute.xlu2 %1015 }
 0x1fc   : > { %12761 = vst [vmem:[#allocation44_spill] sm:$0xff] %v9001_v35  ;;  %v9007_v1 = vpop.permute.xlu0 %1363  ;;  %v1228_v35 = vrot.slane %v8854_v25, 4  ;;  %v1870_v55 = vunpack.c.l.b16 %v1229_v37 }
 0x1fd   : > { %12762 = vst [vmem:[#allocation45_spill] sm:$0xff] %v9003_v11 }
 0x1fe   : > { %12763 = vst [vmem:[#allocation46_spill] sm:$0xff] %v9007_v1  ;;  %v1869_v59 = vunpack.c.l.b16 %v1228_v35  ;;  %v4680_v35 = vunpack.c.l.b16 %v9037_v22 }
 0x1ff   : > { %6945 = vmatmul.msk.bf16.vlgmr.msrb.gmra.mxu3 %vm1567_vm0, %v1706_v49  ;;  %v864_v49 = vadd.f32 %v863_v29, %v8453_v48  ;;  %v1701_v29 = vunpack.c.l.b16 %v8921_v52 }
 0x201   : > { %1091 = vrot.lane.b32.xlu1 %v8712_v46, %s8196_s8  ;;  %1027 = vrot.lane.b32.xlu2 %v8712_v46, %s8197_s14 }
 0x202   : > { %1155 = vrot.lane.b32.xlu0 %v8712_v46, %s8195_s27  ;;  %v1227_v46 = vrot.slane %v8809_v26, 4 }
 0x203   : > { %v9017_v8 = vpop.permute.xlu1 %1013  ;;  %v9019_v53 = vpop.permute.xlu2 %1367 }
 0x204   : > { %12764 = vst [vmem:[#allocation47_spill] sm:$0xff] %v9019_v53  ;;  %v1230_v13 = vrot.slane %v9017_v8, 4  ;;  %v9022_v38 = vpop.permute.xlu0 %1077  ;;  %v9035_v53 = vpack.c.bf16 %v864_v49, %v864_v49 }
 0x205   : > { %12765 = vst [vmem:[#allocation48_spill] sm:$0xff] %v9022_v38 }
 0x206   : > { %v1871_v56 = vunpack.c.l.b16 %v1230_v13  ;;  %v1868_v13 = vunpack.c.l.b16 %v1227_v46  ;;  %v4679_v3 = vunpack.c.l.b16 %v9035_v53  ;;  %v1867_v46 = vunpack.c.l.b16 %v1226_v28 }
 0x207   : > { %v1223_v28 = vrot.slane %v8718_v6, 4 }
 0x208   : > { %v1875_v19 = vpack.c.b16 %v1871_v56, %v1870_v55  ;;  %v1700_v56 = vunpack.c.l.b16 %v8926_v14 }
 0x209   : > { %1443 = vrot.lane.b32.xlu1 %v8943_v24, %s8196_s8  ;;  %1379 = vrot.lane.b32.xlu2 %v8943_v24, %s8197_s14 }
 0x20a   : > { %1507 = vrot.lane.b32.xlu0 %v8943_v24, %s8195_s27  ;;  %v1898_v23 = vsel %vm1567_vm0, %v1875_v19, 0  ;;  %v1707_v49 = vpack.c.b16 %v1701_v29, %v1700_v56  ;;  %v1874_v24 = vpack.c.b16 %v1869_v59, %v1868_v13  ;;  %v9053_v19 = vpack.c.b16 %v4680_v35, %v4679_v3 }
 0x20b   : > { %v9042_v37 = vpop.permute.xlu1 %1365  ;;  %v9044_v55 = vpop.permute.xlu2 %1081  ;;  %1904 = vmatpush.bf16.xpose.msrb.mxu0 %v1898_v23  ;;  %v1224_v3 = vrot.slane %v8770_v31, 4 }
 0x20c   : > { %12766 = vst [vmem:[#allocation49_spill] sm:$0xff] %v9042_v37  ;;  %v9047_v15 = vpop.permute.xlu0 %1429  ;;  %v9056_v23 = vpop.f32.mrf.mxu3  ;;  %v1895_v59 = vsel %vm1567_vm0, %v1874_v24, 0 }
 0x20d   : > { %12767 = vst [vmem:[#allocation50_spill] sm:$0xff] %v9044_v55  ;;  %v1225_v55 = vrot.slane %v8784_v62, 4  ;;  %v9092_v37 = vpop.f32.mrf.mxu1 }
 0x20e   : > { %12768 = vst [vmem:[#allocation51_spill] sm:$0xff] %v9047_v15  ;;  %v1262_v15 = vrot.slane %v9022_v38, 4 }
 0x20f   : > { %6946 = vmatmul.msk.bf16.gmra.mxu3 %vm1567_vm0, %v1707_v49  ;;  %12769 = vst [vmem:[#allocation52_spill] sm:$0xff] %v9053_v19  ;;  %v1866_v13 = vunpack.c.l.b16 %v1225_v55  ;;  %v1261_v19 = vrot.slane %v8909_v20, 4  ;;  %v1865_v55 = vunpack.c.l.b16 %v1224_v3  ;;  %v868_v20 = vpop.f32.mrf.mxu2 }
 0x211   : > { %1157 = vrot.lane.b32.xlu1 %v8730_v43, %s8195_s27  ;;  %1093 = vrot.lane.b32.xlu2 %v8730_v43, %s8196_s8  ;;  %v1873_v35 = vpack.c.b16 %v1867_v46, %v1866_v13  ;;  %v2178_v3 = vunpack.c.l.b16 %v1261_v19 }
 0x212   : > { %1029 = vrot.lane.b32.xlu0 %v8730_v43, %s8197_s14  ;;  %v1703_v43 = vunpack.c.l.b16 %v8890_v61 }
 0x213   : > { %v9065_v29 = vpop.permute.xlu1 %1079  ;;  %v9067_v56 = vpop.permute.xlu2 %1433  ;;  %1905 = vmatpush.bf16.xpose.msrb.mxu0 %v1895_v59  ;;  %v1892_v46 = vsel %vm1567_vm0, %v1873_v35, 0  ;;  %v2179_v59 = vunpack.c.l.b16 %v1262_v15  ;;  %v1259_v35 = vrot.slane %v8880_v42, 4 }
 0x214   : > { %12770 = vst [vmem:[#allocation53_spill] sm:$0xff] %v9065_v29  ;;  %v9069_v49 = vpop.permute.xlu0 %1143  ;;  %v9080_v24 = vpop.f32.mrf.mxu3  ;;  %v1864_v29 = vunpack.c.l.b16 %v1223_v28 }
 0x215   : > { %12771 = vst [vmem:[#allocation54_spill] sm:$0xff] %v9067_v56  ;;  %v2183_v15 = vpack.c.b16 %v2179_v59, %v2178_v3  ;;  %v9113_v59 = vpop.f32.mrf.mxu1 }
 0x216   : > { %12772 = vst [vmem:[#allocation55_spill] sm:$0xff] %v9069_v49  ;;  %v1702_v49 = vunpack.c.l.b16 %v8895_v2  ;;  %v1872_v38 = vpack.c.b16 %v1865_v55, %v1864_v29  ;;  %v1853_v55 = vunpack.c.l.b16 %v8770_v31 }
 0x218   : > { %v1708_v11 = vpack.c.b16 %v1703_v43, %v1702_v49  ;;  %v1889_v19 = vsel %vm1567_vm0, %v1872_v38, 0  ;;  %v869_v43 = vadd.f32 %v868_v20, %v8453_v48  ;;  %v870_v38 = vpop.f32.mrf.mxu2 }
 0x219   : > { %1509 = vrot.lane.b32.xlu1 %v8955_v30, %s8195_s27  ;;  %1445 = vrot.lane.b32.xlu2 %v8955_v30, %s8196_s8 }
 0x21a   : > { %1381 = vrot.lane.b32.xlu0 %v8955_v30, %s8197_s14  ;;  %v1260_v30 = vrot.slane %v8936_v34, 4 }
 0x21b   : > { %v9085_v13 = vpop.permute.xlu1 %1431  ;;  %v9087_v56 = vpop.permute.xlu2 %1147  ;;  %1906 = vmatpush.bf16.xpose.msrb.mxu0 %v1892_v46 }
 0x21c   : > { %12773 = vst [vmem:[#allocation56_spill] sm:$0xff] %v9085_v13  ;;  %v9090_v1 = vpop.permute.xlu0 %1495  ;;  %v2177_v49 = vunpack.c.l.b16 %v1260_v30  ;;  %v9115_v3 = vpop.f32.mrf.mxu3  ;;  %v1852_v30 = vunpack.c.l.b16 %v8718_v6  ;;  %v1705_v6 = vunpack.c.l.b16 %v8892_v57 }
 0x21d   : > { %12774 = vst [vmem:[#allocation57_spill] sm:$0xff] %v9087_v56  ;;  %v1293_v56 = vrot.slane %v8986_v21, 4 }
 0x21e   : > { %12775 = vst [vmem:[#allocation58_spill] sm:$0xff] %v9090_v1  ;;  %v1257_v1 = vrot.slane %v8807_v5, 4  ;;  %v1860_v20 = vpack.c.b16 %v1853_v55, %v1852_v30 }
 0x21f   : > { %6947 = vmatmul.msk.bf16.gmra.mxu3 %vm1567_vm0, %v1708_v11  ;;  %v2206_v11 = vsel %vm1567_vm0, %v2183_v15, 0 }
 0x221   : > { %1031 = vrot.lane.b32.xlu1 %v8755_v33, %s8197_s14  ;;  %1159 = vrot.lane.b32.xlu2 %v8755_v33, %s8195_s27 }
 0x222   : > { %1095 = vrot.lane.b32.xlu0 %v8755_v33, %s8196_s8  ;;  %v2176_v33 = vunpack.c.l.b16 %v1259_v35  ;;  %v2174_v35 = vunpack.c.l.b16 %v1257_v1  ;;  %v9143_v1 = vpop.f32.mrf.mxu1 }
 0x223   : > { %v9104_v29 = vpop.permute.xlu1 %1145  ;;  %v9106_v28 = vpop.permute.xlu2 %1499  ;;  %1907 = vmatpush.bf16.xpose.msrb.mxu0 %v1889_v19  ;;  %v871_v19 = vadd.f32 %v870_v38, %v8453_v48 }
 0x224   : > { %12776 = vst [vmem:[#allocation59_spill] sm:$0xff] %v9104_v29  ;;  %v9111_v46 = vpop.permute.xlu0 %1017  ;;  %v2182_v15 = vpack.c.b16 %v2177_v49, %v2176_v33  ;;  %v1704_v33 = vunpack.c.l.b16 %v8874_v0  ;;  %v9148_v29 = vpop.f32.mrf.mxu3 }
 0x225   : > { %12777 = vst [vmem:[#allocation60_spill] sm:$0xff] %v9106_v28  ;;  %v9120_v28 = vpack.c.bf16 %v869_v43, %v869_v43  ;;  %v9122_v31 = vpack.c.bf16 %v871_v19, %v871_v19 }
 0x226   : > { %12778 = vst [vmem:[#allocation61_spill] sm:$0xff] %v9111_v46  ;;  %v2203_v55 = vsel %vm1567_vm0, %v2182_v15, 0  ;;  %v1709_v13 = vpack.c.b16 %v1705_v6, %v1704_v33  ;;  %v1255_v46 = vrot.slane %v8658_v63, 4  ;;  %v1855_v33 = vunpack.c.l.b16 %v8837_v60 }
 0x227   : > { %v4681_v38 = vunpack.c.l.b16 %v9120_v28  ;;  %v4682_v30 = vunpack.c.l.b16 %v9122_v31  ;;  %v1291_v60 = vrot.slane %v8825_v4, 4 }
 0x229   : > { %1383 = vrot.lane.b32.xlu1 %v9035_v53, %s8197_s14  ;;  %1511 = vrot.lane.b32.xlu2 %v9035_v53, %s8195_s27 }
 0x22a   : > { %1447 = vrot.lane.b32.xlu0 %v9035_v53, %s8196_s8  ;;  %6953 = vmatmul.msk.bf16.vlgmr.msrb.gmra.mxu0 %vm1567_vm0, %v1860_v20  ;;  %v9145_v20 = vpack.c.b16 %v4682_v30, %v4681_v38  ;;  %v2486_v38 = vunpack.c.l.b16 %v1293_v56 }
 0x22b   : > { %2212 = vmatpush.bf16.xpose.msra.mxu0 %v2206_v11  ;;  %v1258_v11 = vrot.slane %v8767_v45, 4  ;;  %v9133_v49 = vpop.permute.xlu1 %1497  ;;  %v9135_v43 = vpop.permute.xlu2 %1021 }
 0x22c   : > { %12779 = vst [vmem:[#allocation62_spill] sm:$0xff] %v9133_v49  ;;  %v9141_v19 = vpop.permute.xlu0 %1369  ;;  %v1256_v49 = vrot.slane %v8788_v9, 4 }
 0x22d   : > { %12780 = vst [vmem:[#allocation63_spill] sm:$0xff] %v9141_v19  ;;  %v2175_v53 = vunpack.c.l.b16 %v1258_v11  ;;  %v1294_v11 = vrot.slane %v8967_v27, 4  ;;  %v1854_v19 = vunpack.c.l.b16 %v8784_v62 }
 0x22e   : > { %12781 = vst [vmem:[#allocation64_spill] sm:$0xff] %v9145_v20  ;;  %v2173_v6 = vunpack.c.l.b16 %v1256_v49  ;;  %v2172_v20 = vunpack.c.l.b16 %v1255_v46  ;;  %v1292_v49 = vrot.slane %v8941_v32, 4 }
 0x22f   : > { %6948 = vmatmul.msk.bf16.gmra.mxu3 %vm1567_vm0, %v1709_v13  ;;  %v2181_v15 = vpack.c.b16 %v2175_v53, %v2174_v35  ;;  %v9168_v53 = vpop.f32.mrf.mxu1  ;;  %v2487_v27 = vunpack.c.l.b16 %v1294_v11  ;;  %v1861_v21 = vpack.c.b16 %v1855_v33, %v1854_v19  ;;  %v873_v11 = vpop.f32.mrf.mxu2 }
 0x231   : > { %1097 = vrot.lane.b32.xlu1 %v8949_v36, %s8196_s8  ;;  %1033 = vrot.lane.b32.xlu2 %v8949_v36, %s8197_s14  ;;  %v2200_v35 = vsel %vm1567_vm0, %v2181_v15, 0  ;;  %v2491_v57 = vpack.c.b16 %v2487_v27, %v2486_v38  ;;  %v2485_v27 = vunpack.c.l.b16 %v1292_v49  ;;  %v874_v38 = vadd.f32 %v873_v11, %v8453_v48 }
 0x232   : > { %1161 = vrot.lane.b32.xlu0 %v8949_v36, %s8195_s27  ;;  %v2180_v36 = vpack.c.b16 %v2173_v6, %v2172_v20  ;;  %v2484_v6 = vunpack.c.l.b16 %v1291_v60  ;;  %v1857_v49 = vunpack.c.l.b16 %v8854_v25  ;;  %v1288_v25 = vrot.slane %v8692_v51, 4 }
 0x233   : > { %2213 = vmatpush.bf16.xpose.msra.mxu0 %v2203_v55  ;;  %v9160_v55 = vpop.permute.xlu1 %1019  ;;  %v9162_v13 = vpop.permute.xlu2 %1373  ;;  %v2514_v20 = vsel %vm1567_vm0, %v2491_v57, 0 }
 0x234   : > { %12782 = vst [vmem:[#allocation65_spill] sm:$0xff] %v9162_v13  ;;  %v9166_v30 = vpop.permute.xlu0 %1083  ;;  %v2197_v46 = vsel %vm1567_vm0, %v2180_v36, 0  ;;  %v9209_v13 = vpack.c.bf16 %v874_v38, %v874_v38 }
 0x237   : > { %v9188_v15 = vpop.f32.mrf.mxu1 }
 0x239   : > { %1449 = vrot.lane.b32.xlu1 %v9037_v22, %s8196_s8  ;;  %1385 = vrot.lane.b32.xlu2 %v9037_v22, %s8197_s14 }
 0x23a   : > { %1513 = vrot.lane.b32.xlu0 %v9037_v22, %s8195_s27  ;;  %6954 = vmatmul.msk.bf16.gmra.mxu0 %vm1567_vm0, %v1861_v21  ;;  %v1290_v22 = vrot.slane %v8852_v12, 4  ;;  %v2490_v21 = vpack.c.b16 %v2485_v27, %v2484_v6  ;;  %v1856_v6 = vunpack.c.l.b16 %v8809_v26 }
 0x23b   : > { %2214 = vmatpush.bf16.xpose.msra.mxu0 %v2200_v35  ;;  %v9180_v62 = vpop.permute.xlu1 %1371  ;;  %v9182_v56 = vpop.permute.xlu2 %1087  ;;  %v1289_v35 = vrot.slane %v8827_v18, 4 }
 0x23c   : > { %12783 = vst [vmem:[#allocation66_spill] sm:$0xff] %v9180_v62  ;;  %v9185_v19 = vpop.permute.xlu0 %1435  ;;  %v2483_v36 = vunpack.c.l.b16 %v1290_v22  ;;  %v1862_v11 = vpack.c.b16 %v1857_v49, %v1856_v6 }
 0x23d   : > { %12784 = vst [vmem:[#allocation67_spill] sm:$0xff] %v9185_v19  ;;  %v2482_v19 = vunpack.c.l.b16 %v1289_v35 }
 0x23f   : > { %v806_v27 = vpop.f32.mrf.mxu1  ;;  %v2489_v22 = vpack.c.b16 %v2483_v36, %v2482_v19  ;;  %v4683_v19 = vunpack.c.l.b16 %v9209_v13 }
 0x241   : > { %1163 = vrot.lane.b32.xlu1 %v8926_v14, %s8195_s27  ;;  %1099 = vrot.lane.b32.xlu2 %v8926_v14, %s8196_s8  ;;  %v2508_v49 = vsel %vm1567_vm0, %v2489_v22, 0 }
 0x242   : > { %1035 = vrot.lane.b32.xlu0 %v8926_v14, %s8197_s14 }
 0x243   : > { %2215 = vmatpush.bf16.xpose.msra.mxu0 %v2197_v46  ;;  %v9198_v57 = vpop.permute.xlu1 %1085  ;;  %v9200_v33 = vpop.permute.xlu2 %1439  ;;  %v2511_v46 = vsel %vm1567_vm0, %v2490_v21, 0 }
 0x244   : > { %12785 = vst [vmem:[#allocation68_spill] sm:$0xff] %v9200_v33  ;;  %v9204_v60 = vpop.permute.xlu0 %1149  ;;  %v1287_v33 = vrot.slane %v8714_v44, 4 }
 0x246   : > { %v2480_v38 = vunpack.c.l.b16 %v1287_v33  ;;  %v723_v33 = vadd.f32 %v9148_v29, %v8441_v39 }
 0x249   : > { %1515 = vrot.lane.b32.xlu1 %v9120_v28, %s8195_s27  ;;  %1451 = vrot.lane.b32.xlu2 %v9120_v28, %s8196_s8 }
 0x24a   : > { %1387 = vrot.lane.b32.xlu0 %v9120_v28, %s8197_s14  ;;  %6955 = vmatmul.msk.bf16.gmra.mxu0 %vm1567_vm0, %v1862_v11  ;;  %v2481_v28 = vunpack.c.l.b16 %v1288_v25  ;;  %v1859_v25 = vunpack.c.l.b16 %v9017_v8 }
 0x24b   : > { %2520 = vmatpush.bf16.xpose.msrb.mxu0 %v2514_v20  ;;  %v875_v20 = vpop.f32.mrf.mxu2  ;;  %v9222_v26 = vpop.permute.xlu1 %1437 }
 0x24c   : > { %v876_v14 = vadd.f32 %v875_v20, %v8453_v48  ;;  %12786 = vst [vmem:[#allocation69_spill] sm:$0xff] %v9222_v26  ;;  %v9224_v21 = vpop.permute.xlu2 %1153  ;;  %v9228_v36 = vpop.permute.xlu0 %1501  ;;  %v2488_v6 = vpack.c.b16 %v2481_v28, %v2480_v38 }
 0x24d   : > { %12787 = vst [vmem:[#allocation70_spill] sm:$0xff] %v9228_v36 }
 0x24e   : > { %v9212_v62 = vpack.c.bf16 %v876_v14, %v876_v14  ;;  %v721_v14 = vadd.f32 %v9115_v3, %v8441_v39 }
 0x250   : > { %v4684_v35 = vunpack.c.l.b16 %v9212_v62 }
 0x251   : > { %1037 = vrot.lane.b32.xlu1 %v8921_v52, %s8197_s14  ;;  %1165 = vrot.lane.b32.xlu2 %v8921_v52, %s8195_s27 }
 0x252   : > { %v9231_v20 = vpack.c.b16 %v4684_v35, %v4683_v19  ;;  %1101 = vrot.lane.b32.xlu0 %v8921_v52, %s8196_s8  ;;  %v2505_v35 = vsel %vm1567_vm0, %v2488_v6, 0  ;;  %v1858_v52 = vunpack.c.l.b16 %v8990_v47  ;;  %v718_v6 = vadd.f32 %v9080_v24, %v8441_v39 }
 0x253   : > { %2521 = vmatpush.bf16.xpose.msrb.mxu0 %v2511_v46  ;;  %v809_v46 = vpop.f32.mrf.mxu1  ;;  %v9243_v11 = vpop.permute.xlu1 %1151 }
 0x254   : > { %12788 = vst [vmem:[#allocation71_spill] sm:$0xff] %v9231_v20  ;;  %v9245_v22 = vpop.permute.xlu2 %1505  ;;  %v9248_v19 = vpop.permute.xlu0 %1023  ;;  %v810_v38 = vadd.f32 %v809_v46, %v8443_v40  ;;  %v1863_v36 = vpack.c.b16 %v1859_v25, %v1858_v52  ;;  %v716_v46 = vadd.f32 %v9056_v23, %v8441_v39  ;;  %v711_v52 = vadd.f32 %v9005_v50, %v8441_v39 }
 0x255   : > { %12789 = vst [vmem:[#allocation72_spill] sm:$0xff] %v9245_v22  ;;  %v878_v23 = vpop.f32.mrf.mxu2 }
 0x256   : > { %v9254_v28 = vpack.c.bf16 %v810_v38, %v721_v14  ;;  %v805_v38 = vadd.f32 %v9188_v15, %v8443_v40 }
 0x258   : > { %v1221_v22 = vrot.slane %v9254_v28, 4 }
 0x259   : > { %1389 = vrot.lane.b32.xlu1 %v9122_v31, %s8197_s14  ;;  %1517 = vrot.lane.b32.xlu2 %v9122_v31, %s8195_s27 }
 0x25a   : > { %1453 = vrot.lane.b32.xlu0 %v9122_v31, %s8196_s8  ;;  %6956 = vmatmul.msk.bf16.gmra.mxu0 %vm1567_vm0, %v1863_v36  ;;  %v1793_v47 = vunpack.c.l.b16 %v1221_v22 }
 0x25b   : > { %2522 = vmatpush.bf16.xpose.msrb.mxu0 %v2508_v49  ;;  %v811_v49 = vpop.f32.mrf.mxu1  ;;  %v9271_v14 = vpop.permute.xlu1 %1503 }
 0x25c   : > { %v812_v3 = vadd.f32 %v811_v49, %v8443_v40  ;;  %12790 = vst [vmem:[#allocation73_spill] sm:$0xff] %v9271_v14  ;;  %v807_v49 = vadd.f32 %v806_v27, %v8443_v40 }
 0x25e   : > { %v9256_v29 = vpack.c.bf16 %v812_v3, %v723_v33  ;;  %v9273_v33 = vpop.permute.xlu2 %1027  ;;  %v9280_v3 = vpack.c.bf16 %v805_v38, %v716_v46  ;;  %v9282_v36 = vpack.c.bf16 %v807_v49, %v718_v6  ;;  %v800_v49 = vadd.f32 %v9143_v1, %v8443_v40 }
 0x260   : > { %v1222_v8 = vrot.slane %v9256_v29, 4  ;;  %v1219_v22 = vrot.slane %v9280_v3, 4  ;;  %v1220_v15 = vrot.slane %v9282_v36, 4  ;;  %v9311_v14 = vpack.c.bf16 %v800_v49, %v711_v52 }
 0x261   : > { %1103 = vrot.lane.b32.xlu1 %v8895_v2, %s8196_s8  ;;  %1039 = vrot.lane.b32.xlu2 %v8895_v2, %s8197_s14  ;;  %v708_v52 = vadd.f32 %v8982_v41, %v8441_v39 }
 0x262   : > { %v1794_v25 = vunpack.c.l.b16 %v1222_v8  ;;  %1167 = vrot.lane.b32.xlu0 %v8895_v2, %s8195_s27  ;;  %v1791_v27 = vunpack.c.l.b16 %v1219_v22  ;;  %v713_v8 = vadd.f32 %v9026_v16, %v8441_v39  ;;  %v1792_v6 = vunpack.c.l.b16 %v1220_v15  ;;  %v880_v2 = vpop.f32.mrf.mxu2 }
 0x263   : > { %2523 = vmatpush.bf16.xpose.msrb.mxu0 %v2505_v35  ;;  %v9275_v35 = vpop.permute.xlu0 %1375  ;;  %v9297_v46 = vpop.permute.xlu1 %1025  ;;  %v879_v16 = vadd.f32 %v878_v23, %v8453_v48  ;;  %v881_v22 = vadd.f32 %v880_v2, %v8453_v48 }
 0x264   : > { %v1798_v31 = vpack.c.b16 %v1794_v25, %v1793_v47  ;;  %v2161_v25 = vunpack.c.l.b16 %v8788_v9  ;;  %v1797_v50 = vpack.c.b16 %v1792_v6, %v1791_v27  ;;  %v706_v27 = vadd.f32 %v8952_v58, %v8441_v39 }
 0x265   : > { %v9315_v26 = vpack.c.bf16 %v879_v16, %v879_v16 }
 0x266   : > { %v1821_v24 = vsel %vm1567_vm0, %v1798_v31, 0  ;;  %v9299_v47 = vpop.permute.xlu2 %1379  ;;  %v802_v31 = vadd.f32 %v9168_v53, %v8443_v40  ;;  %v1818_v1 = vsel %vm1567_vm0, %v1797_v50, 0  ;;  %v1217_v53 = vrot.slane %v9311_v14, 4 }
 0x267   : > { %1827 = vmatpush.bf16.xpose.msra.mxu3 %v1821_v24  ;;  %v2160_v24 = vunpack.c.l.b16 %v8658_v63  ;;  %v9322_v63 = vpack.c.bf16 %v881_v22, %v881_v22 }
 0x268   : > { %v9313_v15 = vpack.c.bf16 %v802_v31, %v713_v8  ;;  %v1789_v49 = vunpack.c.l.b16 %v1217_v53  ;;  %v797_v31 = vadd.f32 %v9113_v59, %v8443_v40 }
 0x269   : > { %v2168_v9 = vpack.c.b16 %v2161_v25, %v2160_v24  ;;  %1455 = vrot.lane.b32.xlu1 %v9209_v13, %s8196_s8  ;;  %1391 = vrot.lane.b32.xlu2 %v9209_v13, %s8197_s14  ;;  %v4685_v25 = vunpack.c.l.b16 %v9315_v26 }
 0x26a   : > { %v1218_v23 = vrot.slane %v9313_v15, 4  ;;  %1519 = vrot.lane.b32.xlu0 %v9209_v13, %s8195_s27  ;;  %v795_v13 = vadd.f32 %v9092_v37, %v8443_v40  ;;  %v9349_v50 = vpack.c.bf16 %v797_v31, %v708_v52  ;;  %v9372_v52 = vpop.f32.mrf.mxu3 }
 0x26b   : > { %v9302_v38 = vpop.permute.xlu0 %1089  ;;  %6969 = vmatmul.msk.bf16.vlgmr.msra.gmra.mxu0 %vm1567_vm0, %v2168_v9  ;;  %v9334_v8 = vpop.permute.xlu1 %1377  ;;  %12795 = vst [vmem:[#allocation78_spill] sm:$0xff] %v9372_v52  ;;  %v12817_v52 = vld [vmem:[#allocation34_spill] sm:$0xff] }
 0x26c   : > { %4557 = vmatpush.bf16.msra.mxu0 %v8621_v7  ;;  %v1790_v2 = vunpack.c.l.b16 %v1218_v23  ;;  %v4686_v7 = vunpack.c.l.b16 %v9322_v63  ;;  %v9346_v41 = vpack.c.bf16 %v795_v13, %v706_v27  ;;  %v1216_v37 = vrot.slane %v9349_v50, 4 }
 0x26d   : > { %v2163_v27 = vunpack.c.l.b16 %v8767_v45  ;;  %v1237_v13 = vrot.slane %v9273_v33, 4 }
 0x26e   : > { %v9336_v6 = vpop.permute.xlu2 %1093  ;;  %v1796_v39 = vpack.c.b16 %v1790_v2, %v1789_v49  ;;  %v9351_v24 = vpack.c.b16 %v4686_v7, %v4685_v25  ;;  %v1215_v40 = vrot.slane %v9346_v41, 4  ;;  %v1788_v9 = vunpack.c.l.b16 %v1216_v37 }
 0x26f   : > { %1828 = vmatpush.bf16.xpose.msra.mxu3 %v1818_v1  ;;  %v2162_v1 = vunpack.c.l.b16 %v8807_v5  ;;  %v1775_v45 = vunpack.c.l.b16 %v9346_v41  ;;  %v2165_v7 = vunpack.c.l.b16 %v8936_v34  ;;  %v2164_v37 = vunpack.c.l.b16 %v8880_v42 }
 0x270   : > { %4558 = vmatpush.bf16.msra.mxu0 %v8550_v17  ;;  %12792 = vst [vmem:[#allocation75_spill] sm:$0xff] %v9351_v24  ;;  %v1815_v16 = vsel %vm1567_vm0, %v1796_v39, 0  ;;  %v1787_v22 = vunpack.c.l.b16 %v1215_v40  ;;  %v12816_v24 = vld [vmem:[#allocation46_spill] sm:$0xff] }
 0x271   : > { %1169 = vrot.lane.b32.xlu1 %v8890_v61, %s8195_s27  ;;  %1105 = vrot.lane.b32.xlu2 %v8890_v61, %s8196_s8 }
 0x272   : > { %1041 = vrot.lane.b32.xlu0 %v8890_v61, %s8197_s14  ;;  %v1795_v23 = vpack.c.b16 %v1788_v9, %v1787_v22  ;;  %v2169_v61 = vpack.c.b16 %v2163_v27, %v2162_v1  ;;  %v1947_v22 = vunpack.c.l.b16 %v1237_v13  ;;  %v1236_v9 = vrot.slane %v9297_v46, 4 }
 0x273   : > { %v9339_v58 = vpop.permute.xlu0 %1441  ;;  %v9363_v17 = vpop.permute.xlu1 %1091  ;;  %v2170_v1 = vpack.c.b16 %v2165_v7, %v2164_v37  ;;  %v1234_v7 = vrot.slane %v9135_v43, 4 }
 0x274   : > { %12791 = vst [vmem:[#allocation74_spill] sm:$0xff] %v9339_v58  ;;  %4559 = vmatpush.bf16.msra.mxu0 %v8516_v54  ;;  %v1812_v54 = vsel %vm1567_vm0, %v1795_v23, 0  ;;  %v1235_v23 = vrot.slane %v9248_v19, 4  ;;  %v1946_v42 = vunpack.c.l.b16 %v1236_v9  ;;  %v12809_v58 = vld [vmem:[#allocation45_spill] sm:$0xff] }
 0x276   : > { %v9365_v59 = vpop.permute.xlu2 %1445 }
 0x277   : > { %12793 = vst [vmem:[#allocation76_spill] sm:$0xff] %v9365_v59  ;;  %1829 = vmatpush.bf16.xpose.msra.mxu3 %v1815_v16  ;;  %v1231_v59 = vrot.slane %v12809_v58, 4 }
 0x278   : > { %4560 = vmatpush.bf16.msra.mxu0 %v8485_v10  ;;  %v1776_v10 = vunpack.c.l.b16 %v9349_v50 }
 0x279   : > { %1521 = vrot.lane.b32.xlu1 %v9212_v62, %s8195_s27  ;;  %1457 = vrot.lane.b32.xlu2 %v9212_v62, %s8196_s8 }
 0x27a   : > { %1393 = vrot.lane.b32.xlu0 %v9212_v62, %s8197_s14  ;;  %v1783_v2 = vpack.c.b16 %v1776_v10, %v1775_v45  ;;  %v9394_v62 = vpop.f32.mrf.mxu3  ;;  %v1945_v10 = vunpack.c.l.b16 %v1235_v23 }
 0x27b   : > { %v9368_v53 = vpop.permute.xlu0 %1155  ;;  %6970 = vmatmul.msk.bf16.gmra.mxu0 %vm1567_vm0, %v2169_v61  ;;  %v9384_v5 = vpop.permute.xlu1 %1443  ;;  %12799 = vst [vmem:[#allocation82_spill] sm:$0xff] %v9394_v62 }
 0x27c   : > { %12794 = vst [vmem:[#allocation77_spill] sm:$0xff] %v9368_v53  ;;  %v1951_v13 = vpack.c.b16 %v1946_v42, %v1945_v10  ;;  %v1944_v42 = vunpack.c.l.b16 %v1234_v7 }
 0x27d   : > { %12796 = vst [vmem:[#allocation79_spill] sm:$0xff] %v9384_v5  ;;  %v1941_v5 = vunpack.c.l.b16 %v1231_v59  ;;  %v1267_v59 = vrot.slane %v9182_v56, 4 }
 0x27e   : > { %v9386_v25 = vpop.permute.xlu2 %1159  ;;  %v1972_v9 = vsel %vm1567_vm0, %v1951_v13, 0  ;;  %v1270_v13 = vrot.slane %v9336_v6, 4 }
 0x27f   : > { %12797 = vst [vmem:[#allocation80_spill] sm:$0xff] %v9386_v25  ;;  %1830 = vmatpush.bf16.xpose.msra.mxu3 %v1812_v54 }
 0x281   : > { %1043 = vrot.lane.b32.xlu1 %v8874_v0, %s8197_s14  ;;  %1171 = vrot.lane.b32.xlu2 %v8874_v0, %s8195_s27 }
 0x282   : > { %1107 = vrot.lane.b32.xlu0 %v8874_v0, %s8196_s8 }
 0x283   : > { %v9388_v49 = vpop.permute.xlu0 %1507  ;;  %v9400_v31 = vpop.permute.xlu1 %1157 }
 0x284   : > { %12798 = vst [vmem:[#allocation81_spill] sm:$0xff] %v9388_v49 }
 0x285   : > { %12800 = vst [vmem:[#allocation83_spill] sm:$0xff] %v9400_v31 }
 0x286   : > { %6949 = vmatmul.msk.bf16.vlgmr.msra.gmra.mxu3 %vm1567_vm0, %v1783_v2  ;;  %v9402_v39 = vpop.permute.xlu2 %1511  ;;  %v1233_v2 = vrot.slane %v9160_v55, 4 }
 0x287   : > { %12801 = vst [vmem:[#allocation84_spill] sm:$0xff] %v9402_v39  ;;  %v12808_v39 = vld [vmem:[#allocation61_spill] sm:$0xff] }
 0x288   : > { %v1232_v49 = vrot.slane %v12808_v39, 4 }
 0x289   : > { %1395 = vrot.lane.b32.xlu1 %v9315_v26, %s8197_s14  ;;  %1523 = vrot.lane.b32.xlu2 %v9315_v26, %s8195_s27 }
 0x28a   : > { %1459 = vrot.lane.b32.xlu0 %v9315_v26, %s8196_s8  ;;  %v12803_v26 = vld [vmem:[#allocation33_spill] sm:$0xff]  ;;  %v1942_v7 = vunpack.c.l.b16 %v1232_v49 }
 0x28b   : > { %v9405_v16 = vpop.permute.xlu0 %1029  ;;  %6971 = vmatmul.msk.bf16.gmra.mxu0 %vm1567_vm0, %v2170_v1  ;;  %v9418_v27 = vpop.permute.xlu1 %1509 }
 0x28c   : > { %v1238_v40 = vrot.slane %v9405_v16, 4  ;;  %12802 = vst [vmem:[#allocation85_spill] sm:$0xff] %v9418_v27  ;;  %v1949_v49 = vpack.c.b16 %v1942_v7, %v1941_v5  ;;  %v2468_v7 = vunpack.c.l.b16 %v8714_v44  ;;  %v4839_v44 = vunpack.c.l.b16 %v12816_v24  ;;  %v12818_v24 = vld [vmem:[#allocation32_spill] sm:$0xff] }
 0x28e   : > { %v1948_v0 = vunpack.c.l.b16 %v1238_v40  ;;  %v9420_v61 = vpop.permute.xlu2 %1033  ;;  %v1943_v40 = vunpack.c.l.b16 %v1233_v2  ;;  %v1269_v2 = vrot.slane %v9363_v17, 4 }
 0x290   : > { %v1952_v34 = vpack.c.b16 %v1948_v0, %v1947_v22  ;;  %v12805_v0 = vld [vmem:[#allocation48_spill] sm:$0xff] }
 0x291   : > { %1109 = vrot.lane.b32.xlu1 %v12803_v26, %s8196_s8  ;;  %1045 = vrot.lane.b32.xlu2 %v12803_v26, %s8197_s14  ;;  %v2167_v1 = vunpack.c.l.b16 %v12805_v0 }
 0x292   : > { %v1975_v54 = vsel %vm1567_vm0, %v1952_v34, 0  ;;  %1173 = vrot.lane.b32.xlu0 %v12803_v26, %s8195_s27  ;;  %v9441_v34 = vpop.f32.mrf.mxu3  ;;  %v1950_v26 = vpack.c.b16 %v1944_v42, %v1943_v40  ;;  %v1778_v42 = vunpack.c.l.b16 %v9313_v15 }
 0x293   : > { %1981 = vmatpush.bf16.xpose.msra.mxu1 %v1975_v54  ;;  %v9423_v45 = vpop.permute.xlu0 %1381  ;;  %v9433_v37 = vpop.permute.xlu1 %1031  ;;  %12806 = vst [vmem:[#allocation48_spill] sm:$0xff] %v9441_v34  ;;  %v12807_v54 = vld [vmem:[#allocation35_spill] sm:$0xff]  ;;  %v1932_v34 = vunpack.c.l.b16 %v9135_v43 }
 0x294   : > { %v2166_v10 = vunpack.c.l.b16 %v12807_v54  ;;  %v1969_v0 = vsel %vm1567_vm0, %v1950_v26, 0  ;;  %v2255_v54 = vunpack.c.l.b16 %v1269_v2 }
 0x296   : > { %v9435_v22 = vpop.permute.xlu2 %1385  ;;  %v2171_v27 = vpack.c.b16 %v2167_v1, %v2166_v10  ;;  %v1777_v1 = vunpack.c.l.b16 %v9311_v14 }
 0x297   : > { %12804 = vst [vmem:[#allocation33_spill] sm:$0xff] %v9435_v22 }
 0x298   : > { %v1784_v22 = vpack.c.b16 %v1778_v42, %v1777_v1 }
 0x299   : > { %1461 = vrot.lane.b32.xlu1 %v9322_v63, %s8196_s8  ;;  %1397 = vrot.lane.b32.xlu2 %v9322_v63, %s8197_s14 }
 0x29a   : > { %1525 = vrot.lane.b32.xlu0 %v9322_v63, %s8195_s27  ;;  %v2256_v63 = vunpack.c.l.b16 %v1270_v13  ;;  %v9464_v20 = vpop.f32.mrf.mxu3  ;;  %6950 = vmatmul.msk.bf16.gmra.mxu3 %vm1567_vm0, %v1784_v22  ;;  %v1966_v13 = vsel %vm1567_vm0, %v1949_v49, 0  ;;  %v1929_v49 = vunpack.c.l.b16 %v12809_v58 }
 0x29b   : > { %1982 = vmatpush.bf16.xpose.msra.mxu1 %v1972_v9  ;;  %v9439_v23 = vpop.permute.xlu0 %1095  ;;  %6972 = vmatmul.msk.bf16.gmra.mxu0 %vm1567_vm0, %v2171_v27  ;;  %v9455_v40 = vpop.permute.xlu1 %1383  ;;  %12812 = vst [vmem:[#allocation45_spill] sm:$0xff] %v9464_v20  ;;  %v1268_v27 = vrot.slane %v9302_v38, 4 }
 0x29c   : > { %12810 = vst [vmem:[#allocation35_spill] sm:$0xff] %v9455_v40  ;;  %v883_v40 = vpop.f32.mrf.mxu2  ;;  %v2260_v26 = vpack.c.b16 %v2256_v63, %v2255_v54  ;;  %v1930_v63 = vunpack.c.l.b16 %v12808_v39  ;;  %v4838_v39 = vunpack.c.l.b16 %v12818_v24  ;;  %v12825_v24 = vld [vmem:[#allocation22_spill] sm:$0xff] }
 0x29d   : > { %v884_v2 = vadd.f32 %v883_v40, %v8453_v48  ;;  %v12814_v40 = vld [vmem:[#allocation49_spill] sm:$0xff] }
 0x29e   : > { %v9457_v9 = vpop.permute.xlu2 %1099  ;;  %v2283_v42 = vsel %vm1567_vm0, %v2260_v26, 0  ;;  %v4840_v54 = vunpack.c.l.b16 %v12814_v40  ;;  %v4837_v26 = vunpack.c.l.b16 %v12817_v52  ;;  %v1937_v40 = vpack.c.b16 %v1930_v63, %v1929_v49  ;;  %v12823_v49 = vld [vmem:[#allocation20_spill] sm:$0xff] }
 0x2a0   : > { %v4844_v62 = vpack.c.b16 %v4840_v54, %v4839_v44  ;;  %v4843_v54 = vpack.c.b16 %v4838_v39, %v4837_v26  ;;  %v4835_v44 = vunpack.c.l.b16 %v12823_v49  ;;  %v1780_v49 = vunpack.c.l.b16 %v9282_v36 }
 0x2a1   : > { %1175 = vrot.lane.b32.xlu1 %v9346_v41, %s8195_s27  ;;  %1111 = vrot.lane.b32.xlu2 %v9346_v41, %s8196_s8 }
 0x2a2   : > { %1047 = vrot.lane.b32.xlu0 %v9346_v41, %s8197_s14  ;;  %v2469_v41 = vunpack.c.l.b16 %v8692_v51  ;;  %v1265_v51 = vrot.slane %v9166_v30, 4  ;;  %v9512_v63 = vpop.f32.mrf.mxu3 }
 0x2a3   : > { %1983 = vmatpush.bf16.xpose.msra.mxu1 %v1969_v0  ;;  %v9462_v10 = vpop.permute.xlu0 %1447  ;;  %v9476_v5 = vpop.permute.xlu1 %1097  ;;  %v2254_v0 = vunpack.c.l.b16 %v1268_v27  ;;  %12822 = vst [vmem:[#allocation32_spill] sm:$0xff] %v9512_v63 }
 0x2a4   : > { %12811 = vst [vmem:[#allocation61_spill] sm:$0xff] %v9462_v10  ;;  %v9487_v10 = vpack.c.bf16 %v884_v2, %v884_v2  ;;  %v2476_v27 = vpack.c.b16 %v2469_v41, %v2468_v7  ;;  %v885_v58 = vpop.f32.mrf.mxu2  ;;  %v2251_v41 = vunpack.c.l.b16 %v1265_v51  ;;  %v12827_v51 = vld [vmem:[#allocation50_spill] sm:$0xff] }
 0x2a5   : > { %v1264_v39 = vrot.slane %v12827_v51, 4 }
 0x2a6   : > { %v9478_v22 = vpop.permute.xlu2 %1451  ;;  %12815 = vst [vmem:[#allocation49_spill] sm:$0xff] %v9487_v10 }
 0x2a7   : > { %12813 = vst [vmem:[#allocation86_spill] sm:$0xff] %v9478_v22  ;;  %v2253_v22 = vunpack.c.l.b16 %v1267_v59 }
 0x2a9   : > { %v2259_v20 = vpack.c.b16 %v2254_v0, %v2253_v22  ;;  %1527 = vrot.lane.b32.xlu1 %v9487_v10, %s8195_s27  ;;  %1463 = vrot.lane.b32.xlu2 %v9487_v10, %s8196_s8  ;;  %v12821_v0 = vld [vmem:[#allocation29_spill] sm:$0xff] }
 0x2aa   : > { %1399 = vrot.lane.b32.xlu0 %v9487_v10, %s8197_s14  ;;  %v9540_v63 = vpop.f32.mrf.mxu3 }
 0x2ab   : > { %1984 = vmatpush.bf16.xpose.msra.mxu1 %v1966_v13  ;;  %v9482_v1 = vpop.permute.xlu0 %1161  ;;  %v1266_v13 = vrot.slane %v9198_v57, 4  ;;  %6985 = vmatmul.msk.bf16.vlgmr.msrb.gmra.mxu0 %vm1567_vm0, %v2476_v27  ;;  %v9504_v52 = vpop.permute.xlu1 %1449  ;;  %v2280_v7 = vsel %vm1567_vm0, %v2259_v20, 0  ;;  %v12826_v20 = vld [vmem:[#allocation21_spill] sm:$0xff] }
 0x2ac   : > { %4865 = vmatpush.bf16.msrb.mxu0 %v4844_v62  ;;  %12819 = vst [vmem:[#allocation46_spill] sm:$0xff] %v9504_v52  ;;  %v12824_v62 = vld [vmem:[#allocation53_spill] sm:$0xff]  ;;  %v4834_v52 = vunpack.c.l.b16 %v12825_v24  ;;  %v4833_v26 = vunpack.c.l.b16 %v12826_v20 }
 0x2ad   : > { %v2252_v59 = vunpack.c.l.b16 %v1266_v13  ;;  %v1263_v27 = vrot.slane %v12824_v62, 4 }
 0x2ae   : > { %v9506_v2 = vpop.permute.xlu2 %1165  ;;  %v4841_v10 = vpack.c.b16 %v4834_v52, %v4833_v26 }
 0x2af   : > { %v2249_v24 = vunpack.c.l.b16 %v1263_v27 }
 0x2b0   : > { %4866 = vmatpush.bf16.msrb.mxu0 %v4843_v54  ;;  %v886_v54 = vadd.f32 %v885_v58, %v8453_v48  ;;  %v2250_v58 = vunpack.c.l.b16 %v1264_v39 }
 0x2b1   : > { %1049 = vrot.lane.b32.xlu1 %v9349_v50, %s8197_s14  ;;  %1177 = vrot.lane.b32.xlu2 %v9349_v50, %s8195_s27 }
 0x2b2   : > { %6957 = vmatmul.msk.bf16.vlgmr.msra.gmra.mxu1 %vm1567_vm0, %v1937_v40  ;;  %v2258_v40 = vpack.c.b16 %v2252_v59, %v2251_v41  ;;  %1113 = vrot.lane.b32.xlu0 %v9349_v50, %s8196_s8  ;;  %v1301_v59 = vrot.slane %v9368_v53, 4  ;;  %v1779_v41 = vunpack.c.l.b16 %v9280_v3  ;;  %v2257_v52 = vpack.c.b16 %v2250_v58, %v2249_v24 }
 0x2b3   : > { %2289 = vmatpush.bf16.xpose.msrb.mxu1 %v2283_v42  ;;  %v9508_v22 = vpop.permute.xlu0 %1513  ;;  %v4836_v42 = vunpack.c.l.b16 %v12821_v0  ;;  %v9527_v0 = vpop.permute.xlu1 %1163 }
 0x2b4   : > { %12820 = vst [vmem:[#allocation34_spill] sm:$0xff] %v9508_v22  ;;  %v1302_v22 = vrot.slane %v9400_v31, 4  ;;  %v2277_v50 = vsel %vm1567_vm0, %v2258_v40, 0  ;;  %v1785_v31 = vpack.c.b16 %v1780_v49, %v1779_v41  ;;  %v2563_v25 = vunpack.c.l.b16 %v1301_v59  ;;  %v12833_v41 = vld [vmem:[#allocation57_spill] sm:$0xff] }
 0x2b5   : > { %v4842_v13 = vpack.c.b16 %v4836_v42, %v4835_v44  ;;  %v2471_v44 = vunpack.c.l.b16 %v8852_v12  ;;  %v9543_v12 = vpack.c.bf16 %v886_v54, %v886_v54  ;;  %v2274_v26 = vsel %vm1567_vm0, %v2257_v52, 0 }
 0x2b6   : > { %v9529_v42 = vpop.permute.xlu2 %1517  ;;  %v2564_v53 = vunpack.c.l.b16 %v1302_v22  ;;  %6951 = vmatmul.msk.bf16.gmra.mxu3 %vm1567_vm0, %v1785_v31  ;;  %v1300_v31 = vrot.slane %v9224_v21, 4  ;;  %v1297_v49 = vrot.slane %v12833_v41, 4  ;;  %v1934_v52 = vunpack.c.l.b16 %v9297_v46 }
 0x2b7   : > { %4867 = vmatpush.bf16.msrb.mxu0 %v4842_v13  ;;  %12828 = vst [vmem:[#allocation29_spill] sm:$0xff] %v9529_v42  ;;  %v1931_v13 = vunpack.c.l.b16 %v9160_v55  ;;  %v2470_v42 = vunpack.c.l.b16 %v8827_v18  ;;  %v1299_v55 = vrot.slane %v9243_v11, 4 }
 0x2b8   : > { %12829 = vst [vmem:[#allocation20_spill] sm:$0xff] %v9543_v12  ;;  %v2568_v43 = vpack.c.b16 %v2564_v53, %v2563_v25  ;;  %v2562_v59 = vunpack.c.l.b16 %v1300_v31  ;;  %v12835_v31 = vld [vmem:[#allocation59_spill] sm:$0xff] }
 0x2b9   : > { %v2477_v27 = vpack.c.b16 %v2471_v44, %v2470_v42  ;;  %v1938_v40 = vpack.c.b16 %v1932_v34, %v1931_v13  ;;  %1401 = vrot.lane.b32.xlu1 %v9543_v12, %s8197_s14  ;;  %1051 = vrot.lane.b32.xlu2 %v9311_v14, %s8197_s14  ;;  %v1298_v42 = vrot.slane %v9204_v60, 4 }
 0x2ba   : > { %1465 = vrot.lane.b32.xlu0 %v9543_v12, %s8196_s8  ;;  %v2591_v25 = vsel %vm1567_vm0, %v2568_v43, 0 }
 0x2bb   : > { %2290 = vmatpush.bf16.xpose.msrb.mxu1 %v2280_v7  ;;  %v888_v7 = vpop.f32.mrf.mxu2  ;;  %v9535_v20 = vpop.permute.xlu0 %1035  ;;  %4868 = vmatpush.bf16.msrb.mxu0 %v4841_v10 }
 0x2bc   : > { %v889_v18 = vadd.f32 %v888_v7, %v8453_v48  ;;  %6986 = vmatmul.msk.bf16.gmra.mxu0 %vm1567_vm0, %v2477_v27  ;;  %v9557_v34 = vpop.permute.xlu1 %1515  ;;  %v2561_v7 = vunpack.c.l.b16 %v1299_v55  ;;  %v2560_v27 = vunpack.c.l.b16 %v1298_v42  ;;  %v2472_v55 = vunpack.c.l.b16 %v8825_v4  ;;  %v12836_v4 = vld [vmem:[#allocation55_spill] sm:$0xff] }
 0x2bd   : > { %12830 = vst [vmem:[#allocation53_spill] sm:$0xff] %v9557_v34  ;;  %v1295_v46 = vrot.slane %v12836_v4, 4 }
 0x2be   : > { %v9559_v10 = vpop.permute.xlu2 %1039  ;;  %v9564_v53 = vpack.c.bf16 %v889_v18, %v889_v18  ;;  %v2567_v54 = vpack.c.b16 %v2562_v59, %v2561_v7  ;;  %v1933_v18 = vunpack.c.l.b16 %v9248_v19 }
 0x2c0   : > { %12832 = vst [vmem:[#allocation21_spill] sm:$0xff] %v9564_v53  ;;  %v1939_v7 = vpack.c.b16 %v1934_v52, %v1933_v18  ;;  %v2557_v52 = vunpack.c.l.b16 %v1295_v46  ;;  %v1781_v18 = vunpack.c.l.b16 %v9254_v28 }
 0x2c1   : > { %1115 = vrot.lane.b32.xlu1 %v9311_v14, %s8196_s8  ;;  %1403 = vrot.lane.b32.xlu2 %v9564_v53, %s8197_s14 }
 0x2c2   : > { %6958 = vmatmul.msk.bf16.gmra.mxu1 %vm1567_vm0, %v1938_v40  ;;  %1179 = vrot.lane.b32.xlu0 %v9311_v14, %s8195_s27  ;;  %v2588_v40 = vsel %vm1567_vm0, %v2567_v54, 0  ;;  %v2559_v14 = vunpack.c.l.b16 %v1297_v49  ;;  %v9603_v49 = vpop.f32.mrf.mxu3 }
 0x2c3   : > { %2291 = vmatpush.bf16.xpose.msrb.mxu1 %v2277_v50  ;;  %v9561_v22 = vpop.permute.xlu0 %1387  ;;  %v890_v39 = vpop.f32.mrf.mxu2  ;;  %v2473_v50 = vunpack.c.l.b16 %v8941_v32 }
 0x2c4   : > { %12831 = vst [vmem:[#allocation22_spill] sm:$0xff] %v9561_v22  ;;  %v9575_v44 = vpop.permute.xlu1 %1037  ;;  %v2566_v32 = vpack.c.b16 %v2560_v27, %v2559_v14  ;;  %v891_v59 = vadd.f32 %v890_v39, %v8453_v48 }
 0x2c5   : > { %v2478_v43 = vpack.c.b16 %v2473_v50, %v2472_v55 }
 0x2c6   : > { %v9577_v24 = vpop.permute.xlu2 %1391  ;;  %v2585_v50 = vsel %vm1567_vm0, %v2566_v32, 0 }
 0x2c7   : > { %12834 = vst [vmem:[#allocation50_spill] sm:$0xff] %v9577_v24 }
 0x2c9   : > { %1467 = vrot.lane.b32.xlu1 %v9564_v53, %s8196_s8  ;;  %1117 = vrot.lane.b32.xlu2 %v9313_v15, %s8196_s8 }
 0x2ca   : > { %1053 = vrot.lane.b32.xlu0 %v9313_v15, %s8197_s14  ;;  %v9626_v34 = vpop.f32.mrf.mxu3 }
 0x2cb   : > { %2292 = vmatpush.bf16.xpose.msrb.mxu1 %v2274_v26  ;;  %v9580_v13 = vpop.permute.xlu0 %1101  ;;  %v893_v58 = vpop.f32.mrf.mxu2  ;;  %v1296_v26 = vrot.slane %v12835_v31, 4 }
 0x2cc   : > { %6987 = vmatmul.msk.bf16.gmra.mxu0 %vm1567_vm0, %v2478_v43  ;;  %v9596_v19 = vpop.permute.xlu1 %1389  ;;  %v1782_v43 = vunpack.c.l.b16 %v9256_v29 }
 0x2cd   : > { %12837 = vst [vmem:[#allocation57_spill] sm:$0xff] %v9596_v19  ;;  %v2558_v54 = vunpack.c.l.b16 %v1296_v26  ;;  %v12841_v26 = vld [vmem:[#allocation42_spill] sm:$0xff] }
 0x2cf   : > { %v2565_v55 = vpack.c.b16 %v2558_v54, %v2557_v52  ;;  %v12842_v54 = vld [vmem:[#allocation39_spill] sm:$0xff] }
 0x2d1   : > { %1181 = vrot.lane.b32.xlu1 %v9313_v15, %s8195_s27  ;;  %v1936_v15 = vunpack.c.l.b16 %v9405_v16  ;;  %v2582_v46 = vsel %vm1567_vm0, %v2565_v55, 0  ;;  %v894_v16 = vadd.f32 %v893_v58, %v8453_v48 }
 0x2d2   : > { %6959 = vmatmul.msk.bf16.gmra.mxu1 %vm1567_vm0, %v1939_v7  ;;  %v2474_v7 = vunpack.c.l.b16 %v12841_v26 }
 0x2d3   : > { %2597 = vmatpush.bf16.xpose.msra.mxu1 %v2591_v25  ;;  %v9598_v25 = vpop.permute.xlu2 %1105  ;;  %v9601_v42 = vpop.permute.xlu0 %1453 }
 0x2d4   : > { %12838 = vst [vmem:[#allocation59_spill] sm:$0xff] %v9601_v42  ;;  %v895_v27 = vpop.f32.mrf.mxu2  ;;  %v9614_v39 = vpop.permute.xlu1 %1103  ;;  %v1935_v42 = vunpack.c.l.b16 %v9273_v33  ;;  %v1276_v24 = vrot.slane %v9598_v25, 4 }
 0x2d6   : > { %v1940_v22 = vpack.c.b16 %v1936_v15, %v1935_v42 }
 0x2d9   : > { %1055 = vrot.lane.b32.xlu1 %v9280_v3, %s8197_s14 }
 0x2db   : > { %2598 = vmatpush.bf16.xpose.msra.mxu1 %v2588_v40  ;;  %v9606_v40 = vpack.c.bf16 %v891_v59, %v891_v59  ;;  %v9616_v14 = vpop.permute.xlu2 %1457  ;;  %v9621_v32 = vpop.permute.xlu0 %1167  ;;  %v1786_v59 = vpack.c.b16 %v1782_v43, %v1781_v18  ;;  %v9645_v18 = vpack.c.bf16 %v894_v16, %v894_v16 }
 0x2dc   : > { %12840 = vst [vmem:[#allocation87_spill] sm:$0xff] %v9616_v14  ;;  %v898_v52 = vpop.f32.mrf.mxu2  ;;  %v9639_v33 = vpop.permute.xlu1 %1455 }
 0x2dd   : > { %12839 = vst [vmem:[#allocation55_spill] sm:$0xff] %v9606_v40  ;;  %1469 = vrot.lane.b32.xlu2 %v9606_v40, %s8196_s8  ;;  %1405 = vrot.lane.b32.xlu0 %v9606_v40, %s8197_s14  ;;  %v899_v43 = vadd.f32 %v898_v52, %v8453_v48  ;;  %v2238_v52 = vunpack.c.l.b16 %v12827_v51 }
 0x2de   : > { %6952 = vmatmul.msk.bf16.gmra.mxu3 %vm1567_vm0, %v1786_v59  ;;  %12843 = vst [vmem:[#allocation42_spill] sm:$0xff] %v9639_v33  ;;  %v2237_v59 = vunpack.c.l.b16 %v12824_v62  ;;  %v12851_v62 = vld [vmem:[#allocation41_spill] sm:$0xff] }
 0x2df   : > { %12846 = vst [vmem:[#allocation89_spill] sm:$0xff] %v9645_v18 }
 0x2e1   : > { %1407 = vrot.lane.b32.xlu1 %v9645_v18, %s8197_s14 }
 0x2e2   : > { %6960 = vmatmul.msk.bf16.gmra.mxu1 %vm1567_vm0, %v1940_v22 }
 0x2e3   : > { %2599 = vmatpush.bf16.xpose.msra.mxu1 %v2585_v50  ;;  %v2475_v50 = vunpack.c.l.b16 %v12842_v54  ;;  %v9641_v55 = vpop.permute.xlu2 %1171  ;;  %v9643_v42 = vpop.permute.xlu0 %1519 }
 0x2e4   : > { %12844 = vst [vmem:[#allocation39_spill] sm:$0xff] %v9641_v55  ;;  %v900_v26 = vpop.f32.mrf.mxu2 }
 0x2e5   : > { %v2479_v14 = vpack.c.b16 %v2475_v50, %v2474_v7  ;;  %1183 = vrot.lane.b32.xlu2 %v9280_v3, %s8195_s27  ;;  %1119 = vrot.lane.b32.xlu0 %v9280_v3, %s8196_s8  ;;  %12845 = vst [vmem:[#allocation88_spill] sm:$0xff] %v9643_v42  ;;  %v901_v58 = vadd.f32 %v900_v26, %v8453_v48  ;;  %v2239_v42 = vunpack.c.l.b16 %v9166_v30 }
 0x2e6   : > { %v9653_v3 = vpack.c.bf16 %v899_v43, %v899_v43  ;;  %v896_v7 = vadd.f32 %v895_v27, %v8453_v48  ;;  %v2245_v26 = vpack.c.b16 %v2238_v52, %v2237_v59  ;;  %v2240_v52 = vunpack.c.l.b16 %v9198_v57 }
 0x2e7   : > { %6988 = vmatmul.msk.bf16.gmra.mxu0 %vm1567_vm0, %v2479_v14  ;;  %v9655_v22 = vpack.c.bf16 %v901_v58, %v901_v58  ;;  %v9659_v14 = vpop.permute.xlu1 %1169  ;;  %v12852_v58 = vld [vmem:[#allocation30_spill] sm:$0xff] }
 0x2e8   : > { %v4762_v15 = vunpack.c.l.b16 %v9653_v3  ;;  %v9670_v16 = vpack.c.bf16 %v896_v7, %v896_v7 }
 0x2e9   : > { %v4763_v50 = vunpack.c.l.b16 %v9655_v22  ;;  %1121 = vrot.lane.b32.xlu1 %v9282_v36, %s8196_s8 }
 0x2ea   : > { %12848 = vst [vmem:[#allocation91_spill] sm:$0xff] %v9670_v16 }
 0x2eb   : > { %2600 = vmatpush.bf16.xpose.msra.mxu1 %v2582_v46  ;;  %v9663_v46 = vpop.permute.xlu0 %1041  ;;  %v9666_v54 = vpop.permute.xlu2 %1523  ;;  %v9672_v43 = vpack.c.b16 %v4763_v50, %v4762_v15  ;;  %v12853_v15 = vld [vmem:[#allocation24_spill] sm:$0xff] }
 0x2ec   : > { %12847 = vst [vmem:[#allocation90_spill] sm:$0xff] %v9666_v54  ;;  %v12854_v54 = vld [vmem:[#allocation17_spill] sm:$0xff] }
 0x2ed   : > { %1057 = vrot.lane.b32.xlu2 %v9282_v36, %s8197_s14  ;;  %1471 = vrot.lane.b32.xlu0 %v9645_v18, %s8196_s8  ;;  %12849 = vst [vmem:[#allocation92_spill] sm:$0xff] %v9672_v43  ;;  %v2246_v43 = vpack.c.b16 %v2240_v52, %v2239_v42  ;;  %v1242_v42 = vrot.slane %v9575_v44, 4 }
 0x2ef   : > { %v9681_v48 = vpop.permute.xlu1 %1521 }
 0x2f0   : > { %12850 = vst [vmem:[#allocation93_spill] sm:$0xff] %v9681_v48  ;;  %v1243_v48 = vrot.slane %v9559_v10, 4 }
 0x2f1   : > { %1473 = vrot.lane.b32.xlu1 %v9670_v16, %s8196_s8 }
 0x2f2   : > { %6973 = vmatmul.msk.bf16.vlgmr.msrb.gmra.mxu1 %vm1567_vm0, %v2245_v26  ;;  %v1244_v26 = vrot.slane %v9663_v46, 4 }
 0x2f3   : > { %4634 = vmatpush.bf16.msrb.mxu1 %v12851_v62  ;;  %v9684_v51 = vpop.permute.xlu0 %1393  ;;  %v9686_v27 = vpop.permute.xlu2 %1045 }
 0x2f5   : > { %1409 = vrot.lane.b32.xlu2 %v9670_v16, %s8197_s14  ;;  %1185 = vrot.lane.b32.xlu0 %v9282_v36, %s8195_s27  ;;  %v1246_v36 = vrot.slane %v9686_v27, 4 }
 0x2f7   : > { %4635 = vmatpush.bf16.msrb.mxu1 %v12852_v58  ;;  %v9696_v7 = vpop.permute.xlu1 %1043  ;;  %v2025_v62 = vunpack.c.l.b16 %v1246_v36 }
 0x2f8   : > { %v1245_v59 = vrot.slane %v9696_v7, 4 }
 0x2f9   : > { %1187 = vrot.lane.b32.xlu1 %v9254_v28, %s8195_s27 }
 0x2fa   : > { %v2024_v58 = vunpack.c.l.b16 %v1245_v59  ;;  %v1241_v59 = vrot.slane %v9535_v20, 4 }
 0x2fb   : > { %4636 = vmatpush.bf16.msrb.mxu1 %v12853_v15  ;;  %v9700_v50 = vpop.permute.xlu0 %1107  ;;  %v2023_v15 = vunpack.c.l.b16 %v1244_v26 }
 0x2fc   : > { %v2029_v33 = vpack.c.b16 %v2025_v62, %v2024_v58  ;;  %v2020_v52 = vunpack.c.l.b16 %v1241_v59  ;;  %v2242_v62 = vunpack.c.l.b16 %v9302_v38  ;;  %v1239_v58 = vrot.slane %v9433_v37, 4 }
 0x2fd   : > { %1123 = vrot.lane.b32.xlu2 %v9254_v28, %s8196_s8  ;;  %1059 = vrot.lane.b32.xlu0 %v9254_v28, %s8197_s14 }
 0x2fe   : > { %v2052_v57 = vsel %vm1567_vm0, %v2029_v33, 0  ;;  %v2021_v33 = vunpack.c.l.b16 %v1242_v42  ;;  %v9736_v42 = vpop.f32.mrf.mxu3  ;;  %v2018_v38 = vunpack.c.l.b16 %v1239_v58  ;;  %v1275_v58 = vrot.slane %v9614_v39, 4 }
 0x2ff   : > { %4637 = vmatpush.bf16.msrb.mxu1 %v12854_v54  ;;  %v9715_v30 = vpop.permute.xlu1 %1395  ;;  %2058 = vmatpush.bf16.xpose.msra.mxu2 %v2052_v57  ;;  %v2022_v54 = vunpack.c.l.b16 %v1243_v48  ;;  %v2241_v57 = vunpack.c.l.b16 %v9182_v56 }
 0x301   : > { %v2028_v28 = vpack.c.b16 %v2023_v15, %v2022_v54  ;;  %1061 = vrot.lane.b32.xlu1 %v9256_v29, %s8197_s14  ;;  %v2027_v15 = vpack.c.b16 %v2021_v33, %v2020_v52 }
 0x302   : > { %6974 = vmatmul.msk.bf16.gmra.mxu1 %vm1567_vm0, %v2246_v43 }
 0x303   : > { %v9717_v36 = vpop.permute.xlu0 %1459  ;;  %v2049_v43 = vsel %vm1567_vm0, %v2028_v28, 0  ;;  %v2247_v28 = vpack.c.b16 %v2242_v62, %v2241_v57  ;;  %v2046_v56 = vsel %vm1567_vm0, %v2027_v15, 0  ;;  %v9752_v62 = vpop.permute.xlu2 %1397 }
 0x304   : > { %12855 = vst [vmem:[#allocation41_spill] sm:$0xff] %v9717_v36  ;;  %v1277_v36 = vrot.slane %v9700_v50, 4 }
 0x305   : > { %1475 = vrot.lane.b32.xlu2 %v9653_v3, %s8196_s8  ;;  %1411 = vrot.lane.b32.xlu0 %v9653_v3, %s8197_s14 }
 0x306   : > { %v2332_v57 = vunpack.c.l.b16 %v1277_v36  ;;  %v9760_v15 = vpop.f32.mrf.mxu3  ;;  %v2330_v36 = vunpack.c.l.b16 %v1275_v58 }
 0x307   : > { %v9728_v48 = vpop.permute.xlu1 %1109  ;;  %2059 = vmatpush.bf16.xpose.msra.mxu2 %v2049_v43 }
 0x308   : > { %v1278_v54 = vrot.slane %v9728_v48, 4 }
 0x309   : > { %1413 = vrot.lane.b32.xlu1 %v9655_v22, %s8197_s14 }
 0x30a   : > { %v2333_v59 = vunpack.c.l.b16 %v1278_v54 }
 0x30b   : > { %v9730_v26 = vpop.permute.xlu0 %1173  ;;  %v9775_v58 = vpop.permute.xlu2 %1111 }
 0x30d   : > { %1189 = vrot.lane.b32.xlu2 %v9256_v29, %s8195_s27  ;;  %1125 = vrot.lane.b32.xlu0 %v9256_v29, %s8196_s8  ;;  %v1240_v29 = vrot.slane %v9420_v61, 4 }
 0x30f   : > { %v9748_v33 = vpop.permute.xlu1 %1461  ;;  %2060 = vmatpush.bf16.xpose.msra.mxu2 %v2046_v56  ;;  %v2019_v43 = vunpack.c.l.b16 %v1240_v29 }
 0x310   : > { %12856 = vst [vmem:[#allocation30_spill] sm:$0xff] %v9748_v33 }
 0x311   : > { %v2026_v19 = vpack.c.b16 %v2019_v43, %v2018_v38  ;;  %1533 = vrot.lane.b32.xlu1 %v9606_v40, %s8195_s27  ;;  %v2006_v38 = vunpack.c.l.b16 %v9433_v37  ;;  %v2331_v43 = vunpack.c.l.b16 %v1276_v24  ;;  %v9789_v37 = vpop.f32.mrf.mxu3 }
 0x312   : > { %6975 = vmatmul.msk.bf16.gmra.mxu1 %vm1567_vm0, %v2247_v28 }
 0x313   : > { %v9750_v52 = vpop.permute.xlu0 %1525  ;;  %v2043_v54 = vsel %vm1567_vm0, %v2026_v19, 0  ;;  %v1274_v19 = vrot.slane %v9580_v13, 4  ;;  %v2336_v33 = vpack.c.b16 %v2331_v43, %v2330_v36  ;;  %v1310_v36 = vrot.slane %v9730_v26, 4 }
 0x314   : > { %12857 = vst [vmem:[#allocation24_spill] sm:$0xff] %v9750_v52  ;;  %v2244_v52 = vunpack.c.l.b16 %v9336_v6 }
 0x315   : > { %1529 = vrot.lane.b32.xlu2 %v9543_v12, %s8195_s27  ;;  %1477 = vrot.lane.b32.xlu0 %v9655_v22, %s8196_s8  ;;  %v2337_v12 = vpack.c.b16 %v2333_v59, %v2332_v57  ;;  %v2243_v59 = vunpack.c.l.b16 %v9363_v17  ;;  %v2007_v57 = vunpack.c.l.b16 %v9420_v61  ;;  %v2329_v6 = vunpack.c.l.b16 %v1274_v19 }
 0x316   : > { %v2357_v61 = vsel %vm1567_vm0, %v2336_v33, 0  ;;  %v2641_v19 = vunpack.c.l.b16 %v1310_v36  ;;  %v1308_v36 = vrot.slane %v9659_v14, 4 }
 0x317   : > { %v9765_v29 = vpop.permute.xlu1 %1175  ;;  %2061 = vmatpush.bf16.xpose.msra.mxu2 %v2043_v54  ;;  %v2360_v28 = vsel %vm1567_vm0, %v2337_v12, 0  ;;  %v2014_v54 = vpack.c.b16 %v2007_v57, %v2006_v38  ;;  %v2248_v40 = vpack.c.b16 %v2244_v52, %v2243_v59  ;;  %v1273_v12 = vrot.slane %v9457_v9, 4  ;;  %v9796_v38 = vpop.permute.xlu2 %1463 }
 0x318   : > { %12860 = vst [vmem:[#allocation95_spill] sm:$0xff] %v9796_v38  ;;  %v2009_v57 = vunpack.c.l.b16 %v9575_v44  ;;  %v2545_v38 = vunpack.c.l.b16 %v12836_v4  ;;  %v4914_v4 = vunpack.c.l.b16 %v9275_v35 }
 0x319   : > { %1539 = vrot.lane.b32.xlu1 %v9653_v3, %s8195_s27  ;;  %v2328_v3 = vunpack.c.l.b16 %v1273_v12  ;;  %v2546_v12 = vunpack.c.l.b16 %v12835_v31  ;;  %v4915_v31 = vunpack.c.l.b16 %v9334_v8 }
 0x31b   : > { %v9769_v56 = vpop.permute.xlu0 %1047  ;;  %v2335_v52 = vpack.c.b16 %v2329_v6, %v2328_v3  ;;  %v4917_v3 = vunpack.c.l.b16 %v9423_v45 }
 0x31d   : > { %1535 = vrot.lane.b32.xlu2 %v9645_v18, %s8195_s27  ;;  %1531 = vrot.lane.b32.xlu0 %v9564_v53, %s8195_s27  ;;  %v2354_v33 = vsel %vm1567_vm0, %v2335_v52, 0  ;;  %v4916_v52 = vunpack.c.l.b16 %v9299_v47  ;;  %v2553_v53 = vpack.c.b16 %v2546_v12, %v2545_v38  ;;  %v12864_v12 = vld [vmem:[#allocation65_spill] sm:$0xff]  ;;  %v12878_v18 = vld [vmem:[#allocation32_spill] sm:$0xff] }
 0x31e   : > { %6961 = vmatmul.msk.bf16.vlgmr.msra.gmra.mxu2 %vm1567_vm0, %v2014_v54 }
 0x31f   : > { %2366 = vmatpush.bf16.xpose.msrb.mxu2 %v2360_v28  ;;  %v9786_v17 = vpop.permute.xlu1 %1527  ;;  %v1271_v28 = vrot.slane %v9439_v23, 4  ;;  %v9816_v45 = vpop.permute.xlu2 %1177 }
 0x320   : > { %12858 = vst [vmem:[#allocation17_spill] sm:$0xff] %v9786_v17  ;;  %v2008_v17 = vunpack.c.l.b16 %v9535_v20 }
 0x321   : > { %v2326_v6 = vunpack.c.l.b16 %v1271_v28  ;;  %v4921_v28 = vpack.c.b16 %v4917_v3, %v4916_v52  ;;  %v12865_v3 = vld [vmem:[#allocation63_spill] sm:$0xff] }
 0x322   : > { %6976 = vmatmul.msk.bf16.gmra.mxu1 %vm1567_vm0, %v2248_v40  ;;  %v1309_v40 = vrot.slane %v9641_v55, 4  ;;  %v2015_v44 = vpack.c.b16 %v2009_v57, %v2008_v17  ;;  %v2639_v17 = vunpack.c.l.b16 %v1308_v36  ;;  %v4920_v57 = vpack.c.b16 %v4915_v31, %v4914_v4 }
 0x323   : > { %v9791_v24 = vpop.permute.xlu0 %1399 }
 0x324   : > { %12859 = vst [vmem:[#allocation94_spill] sm:$0xff] %v9791_v24 }
 0x325   : > { %1541 = vrot.lane.b32.xlu2 %v9655_v22, %s8195_s27  ;;  %1537 = vrot.lane.b32.xlu0 %v9670_v16, %s8195_s27  ;;  %v1272_v22 = vrot.slane %v9476_v5, 4  ;;  %v1307_v16 = vrot.slane %v9621_v32, 4 }
 0x327   : > { %2367 = vmatpush.bf16.xpose.msrb.mxu2 %v2357_v61  ;;  %v2327_v59 = vunpack.c.l.b16 %v1272_v22  ;;  %v9799_v43 = vpop.permute.xlu1 %1049  ;;  %v9806_v61 = vpop.f32.mrf.mxu3  ;;  %v2640_v22 = vunpack.c.l.b16 %v1309_v40  ;;  %v12863_v40 = vld [vmem:[#allocation66_spill] sm:$0xff] }
 0x329   : > { %v2334_v24 = vpack.c.b16 %v2327_v59, %v2326_v6  ;;  %v4912_v59 = vunpack.c.l.b16 %v12863_v40  ;;  %v7299_v40 = vld [vmem:[#allocation8 + $0x8] sm:$0xff]  }
 0x32b   : > { %v9803_v54 = vpop.permute.xlu0 %1113  ;;  %v2351_v47 = vsel %vm1567_vm0, %v2334_v24, 0  ;;  %v1305_v24 = vrot.slane %v9527_v0, 4 }
 0x32e   : > { %6962 = vmatmul.msk.bf16.gmra.mxu2 %vm1567_vm0, %v2015_v44  ;;  %v1306_v44 = vrot.slane %v9506_v2, 4 }
 0x32f   : > { %2368 = vmatpush.bf16.xpose.msrb.mxu2 %v2354_v33  ;;  %v2645_v33 = vpack.c.b16 %v2641_v19, %v2640_v22  ;;  %v9819_v20 = vpop.permute.xlu1 %1401  ;;  %v2638_v19 = vunpack.c.l.b16 %v1307_v16  ;;  %v9828_v6 = vpop.f32.mrf.mxu3  ;;  %v4911_v22 = vunpack.c.l.b16 %v12865_v3  ;;  %v2011_v16 = vunpack.c.l.b16 %v9663_v46 }
 0x330   : > { %12861 = vst [vmem:[#allocation96_spill] sm:$0xff] %v9819_v20  ;;  %v1304_v46 = vrot.slane %v9482_v1, 4  ;;  %v9846_v3 = vunpack.c.l.bf16 %v7299_v40 }
 0x331   : > { %v2668_v8 = vsel %vm1567_vm0, %v2645_v33, 0  ;;  %v2644_v35 = vpack.c.b16 %v2639_v17, %v2638_v19  ;;  %v12866_v33 = vld [vmem:[#allocation47_spill] sm:$0xff]  ;;  %v9841_v17 = vpop.permute.xlu2 %1051  ;;  %v2010_v19 = vunpack.c.l.b16 %v9559_v10 }
 0x332   : > { %6989 = vmatmul.msk.bf16.vlgmr.msra.gmra.mxu1 %vm1567_vm0, %v2553_v53  ;;  %v4913_v53 = vunpack.c.l.b16 %v12864_v12  ;;  %v2547_v12 = vunpack.c.l.b16 %v12833_v41  ;;  %12867 = vst [vmem:[#allocation66_spill] sm:$0xff] %v9846_v3 }
 0x333   : > { %4942 = vmatpush.bf16.msra.mxu1 %v4921_v28  ;;  %v9824_v38 = vpop.permute.xlu0 %1465  ;;  %v4910_v28 = vunpack.c.l.b16 %v12866_v33  ;;  %v2665_v31 = vsel %vm1567_vm0, %v2644_v35, 0 }
 0x334   : > { %12862 = vst [vmem:[#allocation97_spill] sm:$0xff] %v9824_v38  ;;  %v4919_v52 = vpack.c.b16 %v4913_v53, %v4912_v59  ;;  %v7156_v53 = vld [vmem:[#allocation8] sm:$0xff]  }
 0x335   : > { %v4918_v59 = vpack.c.b16 %v4911_v22, %v4910_v28  ;;  %v9854_v10 = vunpack.c.l.bf16 %v7156_v53 }
 0x337   : > { %2369 = vmatpush.bf16.xpose.msrb.mxu2 %v2351_v47  ;;  %4943 = vmatpush.bf16.msra.mxu1 %v4920_v57  ;;  %v9833_v36 = vpop.permute.xlu1 %1115  ;;  %v2636_v47 = vunpack.c.l.b16 %v1305_v24  ;;  %v2637_v57 = vunpack.c.l.b16 %v1306_v44  ;;  %v2016_v24 = vpack.c.b16 %v2011_v16, %v2010_v19  ;;  %v9850_v33 = vpop.f32.mrf.mxu3  ;;  %v2635_v44 = vunpack.c.l.b16 %v1304_v46  ;;  %v7300_v46 = vld [vmem:[#allocation8 + $0x10] sm:$0xff]  }
 0x339   : > { %v2643_v35 = vpack.c.b16 %v2637_v57, %v2636_v47  ;;  %v12871_v47 = vld [vmem:[#allocation48_spill] sm:$0xff] }
 0x33a   : > { %v9862_v16 = vadd.f32 %v9846_v3, %v12871_v47  ;;  %v9880_v47 = vunpack.c.h.bf16 %v7300_v46 }
 0x33b   : > { %4944 = vmatpush.bf16.msra.mxu1 %v4919_v52  ;;  %v9838_v4 = vpop.permute.xlu0 %1179  ;;  %v2662_v28 = vsel %vm1567_vm0, %v2643_v35, 0 }
 0x33c   : > { %v9901_v20 = vadd.f32 %v9880_v47, %v9540_v63 }
 0x33e   : > { %6963 = vmatmul.msk.bf16.gmra.mxu2 %vm1567_vm0, %v2016_v24  ;;  %v9874_v24 = vpop.permute.xlu2 %1403  ;;  %12877 = vst [vmem:[#allocation48_spill] sm:$0xff] %v9901_v20 }
 0x33f   : > { %2674 = vmatpush.bf16.xpose.msra.mxu2 %v2668_v8  ;;  %v2548_v8 = vunpack.c.l.b16 %v9204_v60  ;;  %4945 = vmatpush.bf16.msra.mxu1 %v4918_v59  ;;  %v9848_v60 = vunpack.c.h.bf16 %v7156_v53  ;;  %v9857_v41 = vpop.permute.xlu1 %1467  ;;  %12874 = vst [vmem:[#allocation47_spill] sm:$0xff] %v9874_v24  ;;  %v7301_v24 = vld [vmem:[#allocation8 + $0x18] sm:$0xff]  }
 0x340   : > { %12870 = vst [vmem:[#allocation63_spill] sm:$0xff] %v9857_v41  ;;  %v12875_v41 = vld [vmem:[#allocation45_spill] sm:$0xff] }
 0x341   : > { %v2554_v52 = vpack.c.b16 %v2548_v8, %v2547_v12  ;;  %12868 = vst [vmem:[#allocation65_spill] sm:$0xff] %v9848_v60  ;;  %v12872_v8 = vld [vmem:[#allocation82_spill] sm:$0xff] }
 0x342   : > { %v9866_v59 = vadd.f32 %v9848_v60, %v12872_v8  ;;  %v12873_v12 = vld [vmem:[#allocation78_spill] sm:$0xff]  ;;  %v9884_v8 = vunpack.c.l.bf16 %v7300_v46  ;;  %v2549_v46 = vunpack.c.l.b16 %v9243_v11 }
 0x343   : > { %6990 = vmatmul.msk.bf16.gmra.mxu1 %vm1567_vm0, %v2554_v52  ;;  %v9868_v19 = vpop.permute.xlu0 %1053  ;;  %v9872_v53 = vadd.f32 %v9854_v10, %v12873_v12  ;;  %v9876_v52 = vunpack.c.h.bf16 %v7299_v40  ;;  %v2012_v40 = vunpack.c.l.b16 %v9696_v7 }
 0x344   : > { %v9906_v7 = vadd.f32 %v9884_v8, %v12878_v18  ;;  %v2984_v18 = vsel %vm2968_vm1, %v9901_v20, -inf  ;;  %v2314_v20 = vunpack.c.l.b16 %v9439_v23  ;;  %v12892_v23 = vld [vmem:[#allocation75_spill] sm:$0xff] }
 0x345   : > { %v2969_v38 = vsel %vm2968_vm1, %v9872_v53, -inf }
 0x347   : > { %2675 = vmatpush.bf16.xpose.msra.mxu2 %v2665_v31  ;;  %v12869_v31 = vld [vmem:[#allocation80_spill] sm:$0xff]  ;;  %v9886_v12 = vpop.permute.xlu1 %1181 }
 0x348   : > { %v1303_v22 = vrot.slane %v12869_v31, 4 }
 0x34a   : > { %v2634_v57 = vunpack.c.l.b16 %v1303_v22  ;;  %v2972_v22 = vsel %vm2968_vm1, %v9866_v59, -inf }
 0x34b   : > { %2973 = vmax.xlane.f32.xlu1 %v2972_v22  ;;  %v2013_v22 = vunpack.c.l.b16 %v9686_v27  ;;  %v9920_v27 = vunpack.c.h.bf16 %v7301_v24 }
 0x34c   : > { %v2642_v35 = vpack.c.b16 %v2635_v44, %v2634_v57  ;;  %v9890_v44 = vpop.f32.mrf.mxu3 }
 0x34d   : > { %12881 = vst [vmem:[#allocation45_spill] sm:$0xff] %v9920_v27 }
 0x34e   : > { %v2659_v57 = vsel %vm1567_vm0, %v2642_v35, 0  ;;  %v2017_v35 = vpack.c.b16 %v2013_v22, %v2012_v40  ;;  %v2981_v40 = vsel %vm2968_vm1, %v9906_v7, -inf  ;;  %v9933_v22 = vadd.f32 %v9854_v10, %v9736_v42 }
 0x34f   : > { %2676 = vmatpush.bf16.xpose.msra.mxu2 %v2662_v28  ;;  %v2975_v28 = vsel %vm2968_vm1, %v9862_v16, -inf  ;;  %2970 = vmax.xlane.f32.xlu0 %v2969_v38  ;;  %v2550_v38 = vunpack.c.l.b16 %v9224_v21  ;;  %v9909_v55 = vpop.permute.xlu0 %1405  ;;  %v9923_v21 = vpop.permute.xlu1 %1055 }
 0x350   : > { %2976 = vmax.xlane.f32.xlu2 %v2975_v28  ;;  %v9896_v28 = vadd.f32 %v9876_v52, %v12875_v41  ;;  %12879 = vst [vmem:[#allocation82_spill] sm:$0xff] %v9909_v55  ;;  %v9911_v41 = vunpack.c.l.bf16 %v7301_v24  ;;  %6964 = vmatmul.msk.bf16.gmra.mxu2 %vm1567_vm0, %v2017_v35  ;;  %v9937_v24 = vadd.f32 %v9920_v27, %v9626_v34  ;;  %v1909_v35 = vpop.f32.mrf.mxu0  ;;  %v2315_v34 = vunpack.c.l.b16 %v9476_v5 }
 0x351   : > { %v2555_v11 = vpack.c.b16 %v2550_v38, %v2549_v46  ;;  %12883 = vst [vmem:[#allocation98_spill] sm:$0xff] %v9933_v22  ;;  %v9954_v55 = vadd.f32 %v9848_v60, %v9760_v15 }
 0x352   : > { %12876 = vst [vmem:[#allocation80_spill] sm:$0xff] %v9896_v28  ;;  %v2978_v63 = vsel %vm2968_vm1, %v9896_v28, -inf  ;;  %v9929_v46 = vadd.f32 %v9911_v41, %v9603_v49  ;;  %v2993_v49 = vsel %vm2968_vm1, %v9933_v22, -inf  ;;  %v2990_v42 = vsel %vm2968_vm1, %v9937_v24, -inf }
 0x353   : > { %12880 = vst [vmem:[#allocation78_spill] sm:$0xff] %v9911_v41  ;;  %6991 = vmatmul.msk.bf16.gmra.mxu1 %vm1567_vm0, %v2555_v11  ;;  %2985 = vmax.xlane.f32.xlu1 %v2984_v18  ;;  %v2996_v15 = vsel %vm2968_vm1, %v9954_v55, -inf }
 0x354   : > { %12882 = vst [vmem:[#allocation32_spill] sm:$0xff] %v9929_v46  ;;  %v1695_v38 = vpop.f32.mrf.mxu3  ;;  %v2987_v11 = vsel %vm2968_vm1, %v9929_v46, -inf  ;;  %v12888_v46 = vld [vmem:[#allocation83_spill] sm:$0xff] }
 0x355   : > { %12884 = vst [vmem:[#allocation99_spill] sm:$0xff] %v9937_v24 }
 0x356   : > { %12887 = vst [vmem:[#allocation102_spill] sm:$0xff] %v9954_v55  ;;  %v2318_v55 = vunpack.c.l.b16 %v9614_v39 }
 0x357   : > { %2677 = vmatpush.bf16.xpose.msra.mxu2 %v2659_v57  ;;  %v9913_v57 = vpop.permute.xlu2 %1117  ;;  %2982 = vmax.xlane.f32.xlu0 %v2981_v40  ;;  %v9947_v40 = vpop.permute.xlu1 %1407 }
 0x358   : > { %2979 = vmax.xlane.f32.xlu2 %v2978_v63  ;;  %v9941_v63 = vpop.permute.xlu0 %1119  ;;  %12886 = vst [vmem:[#allocation101_spill] sm:$0xff] %v9947_v40  ;;  %v9964_v40 = vadd.f32 %v9876_v52, %v9806_v61  ;;  %v1911_v28 = vpop.f32.mrf.mxu0 }
 0x35a   : > { %12890 = vst [vmem:[#allocation103_spill] sm:$0xff] %v9964_v40 }
 0x35b   : > { %2994 = vmax.xlane.f32.xlu1 %v2993_v49  ;;  %v12891_v49 = vld [vmem:[#allocation77_spill] sm:$0xff] }
 0x35c   : > { %v2551_v22 = vunpack.c.l.b16 %v12891_v49  ;;  %v1755_v5 = vpop.f32.mrf.mxu3  ;;  %v12897_v49 = vld [vmem:[#allocation71_spill] sm:$0xff] }
 0x35f   : > { %v9945_v18 = vpop.permute.xlu2 %1469  ;;  %2991 = vmax.xlane.f32.xlu0 %v2990_v42  ;;  %v2322_v42 = vpack.c.b16 %v2315_v34, %v2314_v20  ;;  %v3002_v20 = vsel %vm2968_vm1, %v9964_v40, -inf }
 0x360   : > { %2988 = vmax.xlane.f32.xlu2 %v2987_v11  ;;  %12885 = vst [vmem:[#allocation100_spill] sm:$0xff] %v9945_v18  ;;  %v2552_v11 = vunpack.c.l.b16 %v12888_v46  ;;  %v9960_v18 = vadd.f32 %v9846_v3, %v9789_v37  ;;  %v9972_v37 = vpop.permute.xlu1 %1121  ;;  %v9978_v46 = vpop.permute.xlu0 %1471 }
 0x361   : > { %6977 = vmatmul.msk.bf16.vlgmr.msrb.gmra.mxu2 %vm1567_vm0, %v2322_v42  ;;  %12893 = vst [vmem:[#allocation77_spill] sm:$0xff] %v9978_v46  ;;  %v7302_v42 = vld [vmem:[#allocation8 + $0x20] sm:$0xff]   ;;  %v1914_v46 = vpop.f32.mrf.mxu0 }
 0x362   : > { %12889 = vst [vmem:[#allocation83_spill] sm:$0xff] %v9960_v18  ;;  %v2556_v24 = vpack.c.b16 %v2552_v11, %v2551_v22  ;;  %4711 = vmatpush.bf16.msrb.mxu2 %v12892_v23  ;;  %v2999_v61 = vsel %vm2968_vm1, %v9960_v18, -inf  ;;  %v9982_v22 = vadd.f32 %v9884_v8, %v9828_v6  ;;  %v9992_v11 = vadd.f32 %v9911_v41, %v9890_v44 }
 0x363   : > { %3003 = vmax.xlane.f32.xlu1 %v3002_v20  ;;  %v9997_v6 = vunpack.c.l.bf16 %v7302_v42 }
 0x364   : > { %6992 = vmatmul.msk.bf16.gmra.mxu1 %vm1567_vm0, %v2556_v24  ;;  %12894 = vst [vmem:[#allocation75_spill] sm:$0xff] %v9982_v22  ;;  %v9988_v24 = vadd.f32 %v9880_v47, %v9850_v33  ;;  %v1757_v23 = vpop.f32.mrf.mxu3  ;;  %v3011_v44 = vsel %vm2968_vm1, %v9992_v11, -inf }
 0x365   : > { %12896 = vst [vmem:[#allocation105_spill] sm:$0xff] %v9992_v11  ;;  %v12904_v11 = vld [vmem:[#allocation52_spill] sm:$0xff] }
 0x366   : > { %12895 = vst [vmem:[#allocation104_spill] sm:$0xff] %v9988_v24  ;;  %4712 = vmatpush.bf16.msrb.mxu2 %v12897_v49  ;;  %v3008_v33 = vsel %vm2968_vm1, %v9988_v24, -inf  ;;  %v2317_v49 = vunpack.c.l.b16 %v9580_v13  ;;  %v7303_v13 = vld [vmem:[#allocation8 + $0x28] sm:$0xff]  }
 0x367   : > { %3000 = vmax.xlane.f32.xlu0 %v2999_v61  ;;  %v9984_v34 = vpop.permute.xlu2 %1183  ;;  %12898 = vst [vmem:[#allocation71_spill] sm:$0xff] %v9997_v6  ;;  %v12899_v61 = vld [vmem:[#allocation64_spill] sm:$0xff] }
 0x368   : > { %2997 = vmax.xlane.f32.xlu2 %v2996_v15  ;;  %v3005_v15 = vsel %vm2968_vm1, %v9982_v22, -inf  ;;  %v10000_v20 = vpop.permute.xlu1 %1473  ;;  %v10008_v22 = vadd.f32 %v9920_v27, %v1695_v38  ;;  %v10011_v18 = vpop.permute.xlu0 %1185 }
 0x369   : > { %12900 = vst [vmem:[#allocation64_spill] sm:$0xff] %v10000_v20  ;;  %v10017_v20 = vadd.f32 %v9997_v6, %v1909_v35 }
 0x36a   : > { %4713 = vmatpush.bf16.msrb.mxu2 %v12899_v61  ;;  %12901 = vst [vmem:[#allocation106_spill] sm:$0xff] %v10008_v22  ;;  %v10014_v61 = vadd.f32 %v9854_v10, %v1755_v5  ;;  %v3014_v38 = vsel %vm2968_vm1, %v10008_v22, -inf }
 0x36b   : > { %3012 = vmax.xlane.f32.xlu1 %v3011_v44  ;;  %12903 = vst [vmem:[#allocation108_spill] sm:$0xff] %v10017_v20  ;;  %v10022_v44 = vunpack.c.h.bf16 %v7302_v42  ;;  %v3065_v35 = vsel %vm2968_vm1, %v10017_v20, -inf  ;;  %v1251_v20 = vrot.slane %v9923_v21, 4 }
 0x36c   : > { %12902 = vst [vmem:[#allocation107_spill] sm:$0xff] %v10014_v61  ;;  %v1760_v40 = vpop.f32.mrf.mxu3 }
 0x36d   : > { %12905 = vst [vmem:[#allocation52_spill] sm:$0xff] %v10022_v44  ;;  %v10036_v42 = vadd.f32 %v10022_v44, %v1911_v28 }
 0x36e   : > { %4714 = vmatpush.bf16.msrb.mxu2 %v12904_v11  ;;  %v3017_v11 = vsel %vm2968_vm1, %v10014_v61, -inf }
 0x36f   : > { %3009 = vmax.xlane.f32.xlu0 %v3008_v33  ;;  %v10019_v24 = vpop.permute.xlu2 %1057  ;;  %12907 = vst [vmem:[#allocation110_spill] sm:$0xff] %v10036_v42  ;;  %v3068_v61 = vsel %vm2968_vm1, %v10036_v42, -inf  ;;  %v10062_v42 = vadd.f32 %v9846_v3, %v1760_v40  ;;  %v2099_v3 = vunpack.c.l.b16 %v1251_v20  ;;  %v1250_v20 = vrot.slane %v9868_v19, 4 }
 0x370   : > { %3006 = vmax.xlane.f32.xlu2 %v3005_v15  ;;  %v2316_v15 = vunpack.c.l.b16 %v9457_v9  ;;  %v10027_v9 = vunpack.c.l.bf16 %v7303_v13  ;;  %v10029_v5 = vpop.permute.xlu1 %1187 }
 0x371   : > { %12912 = vst [vmem:[#allocation115_spill] sm:$0xff] %v10062_v42  ;;  %v3023_v40 = vsel %vm2968_vm1, %v10062_v42, -inf }
 0x372   : > { %v2323_v33 = vpack.c.b16 %v2317_v49, %v2316_v15  ;;  %12906 = vst [vmem:[#allocation109_spill] sm:$0xff] %v10027_v9  ;;  %v1916_v49 = vpop.f32.mrf.mxu0  ;;  %v10039_v15 = vadd.f32 %v9848_v60, %v1757_v23  ;;  %v2319_v60 = vunpack.c.l.b16 %v9598_v25 }
 0x373   : > { %3066 = vmax.xlane.f32.xlu1 %v3065_v35 }
 0x374   : > { %6978 = vmatmul.msk.bf16.gmra.mxu2 %vm1567_vm0, %v2323_v33  ;;  %12908 = vst [vmem:[#allocation111_spill] sm:$0xff] %v10039_v15  ;;  %v10042_v33 = vadd.f32 %v10027_v9, %v1914_v46  ;;  %v3020_v46 = vsel %vm2968_vm1, %v10039_v15, -inf  ;;  %v2324_v27 = vpack.c.b16 %v2319_v60, %v2318_v55 }
 0x376   : > { %12909 = vst [vmem:[#allocation112_spill] sm:$0xff] %v10042_v33  ;;  %v3071_v23 = vsel %vm2968_vm1, %v10042_v33, -inf }
 0x377   : > { %3018 = vmax.xlane.f32.xlu0 %v3017_v11  ;;  %v10046_v22 = vpop.permute.xlu2 %1409  ;;  %v10051_v11 = vunpack.c.h.bf16 %v7303_v13  ;;  %v7304_v13 = vld [vmem:[#allocation8 + $0x30] sm:$0xff]  }
 0x378   : > { %3015 = vmax.xlane.f32.xlu2 %v3014_v38  ;;  %v10044_v38 = vpop.permute.xlu0 %1059  ;;  %12910 = vst [vmem:[#allocation113_spill] sm:$0xff] %v10046_v22  ;;  %v10053_v28 = vpop.permute.xlu1 %1061  ;;  %v10072_v41 = vunpack.c.l.bf16 %v7304_v13 }
 0x379   : > { %v1253_v35 = vrot.slane %v10044_v38, 4  ;;  %12911 = vst [vmem:[#allocation114_spill] sm:$0xff] %v10051_v11  ;;  %v1254_v22 = vrot.slane %v10053_v28, 4  ;;  %v10069_v15 = vadd.f32 %v10051_v11, %v1916_v49 }
 0x37a   : > { %v1919_v39 = vpop.f32.mrf.mxu0  ;;  %12914 = vst [vmem:[#allocation117_spill] sm:$0xff] %v10072_v41 }
 0x37b   : > { %3021 = vmax.xlane.f32.xlu1 %v3020_v46  ;;  %v2101_v33 = vunpack.c.l.b16 %v1253_v35  ;;  %v2102_v9 = vunpack.c.l.b16 %v1254_v22  ;;  %12913 = vst [vmem:[#allocation116_spill] sm:$0xff] %v10069_v15  ;;  %v3074_v55 = vsel %vm2968_vm1, %v10069_v15, -inf  ;;  %v10091_v35 = vunpack.c.h.bf16 %v7304_v13 }
 0x37c   : > { %v2320_v13 = vunpack.c.l.b16 %v9700_v50  ;;  %v1248_v15 = vrot.slane %v9799_v43, 4 }
 0x37d   : > { %v2106_v46 = vpack.c.b16 %v2102_v9, %v2101_v33  ;;  %v10085_v9 = vadd.f32 %v10072_v41, %v1919_v39  ;;  %12918 = vst [vmem:[#allocation121_spill] sm:$0xff] %v10091_v35  ;;  %v2321_v39 = vunpack.c.l.b16 %v9728_v48 }
 0x37f   : > { %3072 = vmax.xlane.f32.xlu0 %v3071_v23  ;;  %v1252_v23 = vrot.slane %v10019_v24, 4  ;;  %v2129_v25 = vsel %vm1567_vm0, %v2106_v46, 0  ;;  %v10080_v22 = vpop.permute.xlu2 %1123  ;;  %12917 = vst [vmem:[#allocation120_spill] sm:$0xff] %v10085_v9  ;;  %v3077_v46 = vsel %vm2968_vm1, %v10085_v9, -inf }
 0x380   : > { %3069 = vmax.xlane.f32.xlu2 %v3068_v61  ;;  %v10064_v61 = vpop.f32.mrf.mxu3  ;;  %v10076_v6 = vpop.permute.xlu0 %1411  ;;  %12916 = vst [vmem:[#allocation119_spill] sm:$0xff] %v10080_v22  ;;  %2135 = vmatpush.bf16.xpose.msrb.mxu3 %v2129_v25  ;;  %v2098_v25 = vunpack.c.l.b16 %v1250_v20  ;;  %v1285_v48 = vrot.slane %v10080_v22, 4 }
 0x381   : > { %12915 = vst [vmem:[#allocation118_spill] sm:$0xff] %v10076_v6  ;;  %v2100_v60 = vunpack.c.l.b16 %v1252_v23  ;;  %v1284_v6 = vrot.slane %v9972_v37, 4 }
 0x383   : > { %3075 = vmax.xlane.f32.xlu1 %v3074_v55  ;;  %v2105_v49 = vpack.c.b16 %v2100_v60, %v2099_v3 }
 0x384   : > { %6979 = vmatmul.msk.bf16.gmra.mxu2 %vm1567_vm0, %v2324_v27  ;;  %v1249_v27 = vrot.slane %v9841_v17, 4 }
 0x385   : > { %v2126_v23 = vsel %vm1567_vm0, %v2105_v49, 0  ;;  %v1247_v49 = vrot.slane %v9769_v56, 4 }
 0x386   : > { %v2097_v55 = vunpack.c.l.b16 %v1249_v27 }
 0x387   : > { %v10102_v60 = vpop.permute.xlu2 %1475 }
 0x388   : > { %3024 = vmax.xlane.f32.xlu2 %v3023_v40  ;;  %v10088_v33 = vpop.f32.mrf.mxu3  ;;  %v1921_v40 = vpop.f32.mrf.mxu0  ;;  %2136 = vmatpush.bf16.xpose.msrb.mxu3 %v2126_v23  ;;  %12920 = vst [vmem:[#allocation123_spill] sm:$0xff] %v10102_v60  ;;  %v2104_v9 = vpack.c.b16 %v2098_v25, %v2097_v55  ;;  %v2095_v25 = vunpack.c.l.b16 %v1247_v49 }
 0x389   : > { %v10097_v42 = vpop.permute.xlu0 %1125  ;;  %v10100_v3 = vadd.f32 %v10091_v35, %v1921_v40  ;;  %v2096_v40 = vunpack.c.l.b16 %v1248_v15  ;;  %v1283_v15 = vrot.slane %v9941_v63, 4 }
 0x38a   : > { %v1286_v20 = vrot.slane %v10097_v42, 4  ;;  %v2123_v50 = vsel %vm1567_vm0, %v2104_v9, 0 }
 0x38b   : > { %12919 = vst [vmem:[#allocation122_spill] sm:$0xff] %v10100_v3  ;;  %v3080_v27 = vsel %vm2968_vm1, %v10100_v3, -inf }
 0x38c   : > { %v2410_v60 = vunpack.c.l.b16 %v1286_v20  ;;  %v2408_v20 = vunpack.c.l.b16 %v1284_v6 }
 0x38f   : > { %v10117_v22 = vpop.permute.xlu2 %1189 }
 0x390   : > { %3078 = vmax.xlane.f32.xlu2 %v3077_v46  ;;  %v2325_v46 = vpack.c.b16 %v2321_v39, %v2320_v13  ;;  %v1767_v23 = vpop.f32.mrf.mxu3  ;;  %2137 = vmatpush.bf16.xpose.msrb.mxu3 %v2123_v50  ;;  %v2409_v39 = vunpack.c.l.b16 %v1285_v48  ;;  %v2103_v13 = vpack.c.b16 %v2096_v40, %v2095_v25  ;;  %v2623_v48 = vunpack.c.l.b16 %v9482_v1 }
 0x391   : > { %v10114_v55 = vadd.f32 %v9880_v47, %v1767_v23  ;;  %v4993_v23 = vunpack.c.l.b16 %v9715_v30  ;;  %v2622_v40 = vunpack.c.l.b16 %v12869_v31  ;;  %v2083_v50 = vunpack.c.l.b16 %v9769_v56  ;;  %v10135_v30 = vpop.permute.xlu1 %1413  ;;  %v12923_v56 = vld [vmem:[#allocation50_spill] sm:$0xff] }
 0x392   : > { %v2414_v3 = vpack.c.b16 %v2410_v60, %v2409_v39  ;;  %v2120_v9 = vsel %vm1567_vm0, %v2103_v13, 0  ;;  %v2407_v60 = vunpack.c.l.b16 %v1283_v15  ;;  %v4994_v25 = vunpack.c.l.b16 %v9752_v62  ;;  %v10140_v15 = vpop.permute.xlu0 %1477 }
 0x393   : > { %12921 = vst [vmem:[#allocation124_spill] sm:$0xff] %v10114_v55  ;;  %v1281_v39 = vrot.slane %v9833_v36, 4  ;;  %v2630_v13 = vpack.c.b16 %v2623_v48, %v2622_v40  ;;  %v4991_v62 = vunpack.c.l.b16 %v12923_v56  ;;  %v1280_v40 = vrot.slane %v9803_v54, 4  ;;  %v12928_v56 = vld [vmem:[#allocation33_spill] sm:$0xff] }
 0x394   : > { %6980 = vmatmul.msk.bf16.gmra.mxu2 %vm1567_vm0, %v2325_v46  ;;  %v3032_v46 = vsel %vm2968_vm1, %v10114_v55, -inf  ;;  %v2437_v49 = vsel %vm1567_vm0, %v2414_v3, 0  ;;  %v2413_v6 = vpack.c.b16 %v2408_v20, %v2407_v60  ;;  %v4992_v3 = vunpack.c.l.b16 %v9684_v51  ;;  %12924 = vst [vmem:[#allocation50_spill] sm:$0xff] %v10140_v15  ;;  %v12925_v51 = vld [vmem:[#allocation57_spill] sm:$0xff]  ;;  %v12954_v55 = vld [vmem:[#allocation20_spill] sm:$0xff] }
 0x395   : > { %v4998_v1 = vpack.c.b16 %v4994_v25, %v4993_v23  ;;  %v2405_v31 = vunpack.c.l.b16 %v1281_v39  ;;  %v12926_v23 = vld [vmem:[#allocation22_spill] sm:$0xff]  ;;  %v1317_v25 = vrot.slane %v10029_v5, 4  ;;  %v12950_v15 = vld [vmem:[#allocation45_spill] sm:$0xff] }
 0x396   : > { %v2434_v20 = vsel %vm1567_vm0, %v2413_v6, 0  ;;  %v4997_v48 = vpack.c.b16 %v4992_v3, %v4991_v62  ;;  %v4989_v60 = vunpack.c.l.b16 %v12926_v23  ;;  %v1318_v6 = vrot.slane %v10117_v22, 4 }
 0x397   : > { %v2624_v62 = vunpack.c.l.b16 %v9527_v0  ;;  %v1316_v0 = vrot.slane %v10011_v18, 4 }
 0x398   : > { %3081 = vmax.xlane.f32.xlu2 %v3080_v27  ;;  %2138 = vmatpush.bf16.xpose.msrb.mxu3 %v2120_v9  ;;  %v2084_v27 = vunpack.c.l.b16 %v9799_v43  ;;  %v1282_v43 = vrot.slane %v9913_v57, 4  ;;  %v10133_v9 = vpop.permute.xlu2 %1529 }
 0x399   : > { %12922 = vst [vmem:[#allocation125_spill] sm:$0xff] %v10133_v9 }
 0x3a0   : > { %3033 = vmax.xlane.f32.xlu2 %v3032_v46  ;;  %2443 = vmatpush.bf16.xpose.msra.mxu3 %v2437_v49  ;;  %v2091_v46 = vpack.c.b16 %v2084_v27, %v2083_v50  ;;  %v4990_v49 = vunpack.c.l.b16 %v12925_v51  ;;  %v2406_v27 = vunpack.c.l.b16 %v1282_v43  ;;  %v2404_v51 = vunpack.c.l.b16 %v1280_v40  ;;  %v10151_v3 = vpop.permute.xlu2 %1535 }
 0x3a1   : > { %12929 = vst [vmem:[#allocation57_spill] sm:$0xff] %v10151_v3  ;;  %v2085_v40 = vunpack.c.l.b16 %v9841_v17  ;;  %v12946_v3 = vld [vmem:[#allocation55_spill] sm:$0xff] }
 0x3a2   : > { %6965 = vmatmul.msk.bf16.vlgmr.msrb.gmra.mxu3 %vm1567_vm0, %v2091_v46  ;;  %v2412_v50 = vpack.c.b16 %v2406_v27, %v2405_v31  ;;  %v4996_v46 = vpack.c.b16 %v4990_v49, %v4989_v60  ;;  %v2086_v31 = vunpack.c.l.b16 %v9868_v19  ;;  %v10156_v27 = vpop.permute.xlu1 %1533  ;;  %v10158_v60 = vpop.permute.xlu0 %1531 }
 0x3a3   : > { %12930 = vst [vmem:[#allocation22_spill] sm:$0xff] %v10156_v27 }
 0x3a4   : > { %6993 = vmatmul.msk.bf16.vlgmr.msra.gmra.mxu2 %vm1567_vm0, %v2630_v13  ;;  %v12927_v13 = vld [vmem:[#allocation35_spill] sm:$0xff]  ;;  %v2431_v43 = vsel %vm1567_vm0, %v2412_v50, 0  ;;  %v2092_v9 = vpack.c.b16 %v2086_v31, %v2085_v40  ;;  %v2087_v40 = vunpack.c.l.b16 %v9923_v21 }
 0x3a5   : > { %5019 = vmatpush.bf16.msra.mxu2 %v4998_v1  ;;  %v4987_v39 = vunpack.c.l.b16 %v12927_v13  ;;  %v1279_v1 = vrot.slane %v9775_v58, 4  ;;  %12931 = vst [vmem:[#allocation35_spill] sm:$0xff] %v10158_v60  ;;  %v2625_v13 = vunpack.c.l.b16 %v9506_v2 }
 0x3a7   : > { %v2403_v23 = vunpack.c.l.b16 %v1279_v1  ;;  %v2631_v50 = vpack.c.b16 %v2625_v13, %v2624_v62  ;;  %v1314_v62 = vrot.slane %v9886_v12, 4 }
 0x3a8   : > { %2444 = vmatpush.bf16.xpose.msra.mxu3 %v2434_v20  ;;  %v4988_v20 = vunpack.c.l.b16 %v12928_v56  ;;  %v2718_v56 = vunpack.c.l.b16 %v1318_v6  ;;  %v10170_v1 = vpop.permute.xlu2 %1541 }
 0x3a9   : > { %5020 = vmatpush.bf16.msra.mxu2 %v4997_v48  ;;  %v2717_v48 = vunpack.c.l.b16 %v1317_v25  ;;  %v10163_v25 = vpop.f32.mrf.mxu1  ;;  %12932 = vst [vmem:[#allocation33_spill] sm:$0xff] %v10170_v1  ;;  %v2714_v13 = vunpack.c.l.b16 %v1314_v62 }
 0x3aa   : > { %v4995_v49 = vpack.c.b16 %v4988_v20, %v4987_v39  ;;  %v2716_v39 = vunpack.c.l.b16 %v1316_v0  ;;  %v10172_v20 = vpop.permute.xlu1 %1539 }
 0x3ab   : > { %v2722_v19 = vpack.c.b16 %v2718_v56, %v2717_v48  ;;  %12933 = vst [vmem:[#allocation126_spill] sm:$0xff] %v10172_v20  ;;  %v2627_v48 = vunpack.c.l.b16 %v9659_v14  ;;  %v1311_v14 = vrot.slane %v9765_v29, 4 }
 0x3ad   : > { %5021 = vmatpush.bf16.msra.mxu2 %v4996_v46  ;;  %v2411_v46 = vpack.c.b16 %v2404_v51, %v2403_v23  ;;  %v2745_v17 = vsel %vm1567_vm0, %v2722_v19, 0  ;;  %v10174_v51 = vpop.permute.xlu0 %1537  ;;  %v10179_v23 = vpop.f32.mrf.mxu3  ;;  %v2088_v19 = vunpack.c.l.b16 %v10019_v24 }
 0x3ae   : > { %12934 = vst [vmem:[#allocation127_spill] sm:$0xff] %v10174_v51  ;;  %v4759_v51 = vunpack.c.l.b16 %v12946_v3  ;;  %v4757_v3 = vunpack.c.l.b16 %v12954_v55 }
 0x3af   : > { %v2428_v2 = vsel %vm1567_vm0, %v2411_v46, 0  ;;  %v2626_v46 = vunpack.c.l.b16 %v9621_v32  ;;  %v2093_v62 = vpack.c.b16 %v2088_v19, %v2087_v40 }
 0x3b0   : > { %2445 = vmatpush.bf16.xpose.msra.mxu3 %v2431_v43  ;;  %v1315_v43 = vrot.slane %v9984_v34, 4 }
 0x3b1   : > { %5022 = vmatpush.bf16.msra.mxu2 %v4995_v49  ;;  %v1988_v49 = vpop.f32.mrf.mxu1 }
 0x3b2   : > { %6966 = vmatmul.msk.bf16.gmra.mxu3 %vm1567_vm0, %v2092_v9  ;;  %v2715_v6 = vunpack.c.l.b16 %v1315_v43  ;;  %v1313_v9 = vrot.slane %v9838_v4, 4 }
 0x3b4   : > { %6994 = vmatmul.msk.bf16.gmra.mxu2 %vm1567_vm0, %v2631_v50  ;;  %v2721_v31 = vpack.c.b16 %v2716_v39, %v2715_v6  ;;  %v2713_v0 = vunpack.c.l.b16 %v1313_v9  ;;  %v2632_v39 = vpack.c.b16 %v2627_v48, %v2626_v46 }
 0x3b5   : > { %v10195_v48 = vpop.f32.mrf.mxu3 }
 0x3b6   : > { %v2742_v56 = vsel %vm1567_vm0, %v2721_v31, 0  ;;  %v2720_v60 = vpack.c.b16 %v2714_v13, %v2713_v0  ;;  %v1924_v0 = vpop.f32.mrf.mxu0 }
 0x3b8   : > { %2446 = vmatpush.bf16.xpose.msra.mxu3 %v2428_v2  ;;  %v2739_v24 = vsel %vm1567_vm0, %v2720_v60, 0 }
 0x3be   : > { %v2974_v2 = vpop.xlane.xlu1 %2973 }
 0x3bf   : > { %v3354_v6 = vsub.f32 %v9866_v59, %v2974_v2  ;;  %v10193_v59 = vpop.f32.mrf.mxu1 }
 0x3c0   : > { %2751 = vmatpush.bf16.xpose.msrb.mxu3 %v2745_v17 }
 0x3c1   : > { %v3483_v32 = vmul.f32 1.442695, %v3354_v6  ;;  %v10216_v6 = vadd.f32 %v9884_v8, %v10088_v33 }
 0x3c2   : > { %v2971_v17 = vpop.xlane.xlu0 %2970  ;;  %6967 = vmatmul.msk.bf16.gmra.mxu3 %vm1567_vm0, %v2093_v62  ;;  %v12936_v62 = vld [vmem:[#allocation39_spill] sm:$0xff] }
 0x3c3   : > { %v2977_v50 = vpop.xlane.xlu2 %2976  ;;  %v3353_v31 = vsub.f32 %v9872_v53, %v2971_v17  ;;  %12935 = vst [vmem:[#allocation128_spill] sm:$0xff] %v10216_v6 }
 0x3c4   : > { %v3355_v43 = vsub.f32 %v9862_v16, %v2977_v50  ;;  %6995 = vmatmul.msk.bf16.gmra.mxu2 %vm1567_vm0, %v2632_v39  ;;  %v2711_v16 = vunpack.c.l.b16 %v1311_v14  ;;  %v2629_v39 = vunpack.c.l.b16 %v9730_v26  ;;  %v2090_v14 = vunpack.c.l.b16 %v10053_v28 }
 0x3c5   : > { %v3481_v9 = vmul.f32 1.442695, %v3353_v31  ;;  %v10220_v31 = vadd.f32 %v10022_v44, %v1988_v49  ;;  %v10225_v26 = vadd.f32 %v9876_v52, %v10064_v61 }
 0x3c6   : > { %v3485_v21 = vmul.f32 1.442695, %v3355_v43  ;;  %v10197_v13 = vpop.xlane.xlu1 %2985 }
 0x3c7   : > { %v10227_v28 = vpop.f32.mrf.mxu1  ;;  %v3092_v61 = vsel %vm2968_vm1, %v10220_v31, -inf }
 0x3c8   : > { %2752 = vmatpush.bf16.xpose.msrb.mxu3 %v2742_v56  ;;  %v1312_v56 = vrot.slane %v9816_v45, 4  ;;  %7449 = vpow2.f32 %v3485_v21  ;;  %v2628_v21 = vunpack.c.l.b16 %v12936_v62 }
 0x3c9   : > { %7451 = vpow2.f32 %v3483_v32  ;;  %v2089_v32 = vunpack.c.l.b16 %v10044_v38 }
 0x3ca   : > { %7453 = vpow2.f32 %v3481_v9  ;;  %v2712_v53 = vunpack.c.l.b16 %v1312_v56  ;;  %v1832_v56 = vpop.f32.mrf.mxu3  ;;  %v2983_v9 = vpop.xlane.xlu0 %2982 }
 0x3cb   : > { %v2094_v33 = vpack.c.b16 %v2090_v14, %v2089_v32  ;;  %v1926_v14 = vpop.f32.mrf.mxu0 }
 0x3cc   : > { %v2719_v46 = vpack.c.b16 %v2712_v53, %v2711_v16  ;;  %v2980_v16 = vpop.xlane.xlu2 %2979  ;;  %v2633_v53 = vpack.c.b16 %v2629_v39, %v2628_v21  ;;  %v10249_v21 = vadd.f32 %v9854_v10, %v1832_v56  ;;  %v2391_v56 = vunpack.c.l.b16 %v9775_v58 }
 0x3ce   : > { %v10199_v40 = vpop.eup %7449  ;;  %v2736_v17 = vsel %vm1567_vm0, %v2719_v46, 0  ;;  %v10229_v46 = vpop.xlane.xlu1 %2994  ;;  %12940 = vst [vmem:[#allocation129_spill] sm:$0xff] %v10249_v21 }
 0x3cf   : > { %v10201_v50 = vpop.eup %7451  ;;  %v3743_v19 = vsel %vm2968_vm1, %v10199_v40, 0.0 }
 0x3d0   : > { %2753 = vmatpush.bf16.xpose.msrb.mxu3 %v2739_v24  ;;  %v10205_v43 = vpop.eup %7453  ;;  %3744 = vadd.xlane.f32.xlu2 %v3743_v19  ;;  %v3740_v60 = vsel %vm2968_vm1, %v10201_v50, 0.0  ;;  %v7305_v24 = vld [vmem:[#allocation8 + $0x38] sm:$0xff]   ;;  %v3357_v19 = vsub.f32 %v9906_v7, %v2983_v9  ;;  %v3026_v7 = vsel %vm2968_vm1, %v10225_v26, -inf }
 0x3d1   : > { %v3737_v2 = vsel %vm2968_vm1, %v10205_v43, 0.0  ;;  %3741 = vadd.xlane.f32.xlu1 %v3740_v60  ;;  %v10232_v49 = vunpack.c.h.bf16 %v7305_v24  ;;  %v12938_v60 = vld [vmem:[#allocation80_spill] sm:$0xff]  ;;  %v10241_v39 = vunpack.c.l.bf16 %v7305_v24 }
 0x3d2   : > { %3738 = vadd.xlane.f32.xlu0 %v3737_v2  ;;  %v3356_v38 = vsub.f32 %v12938_v60, %v2980_v16  ;;  %6968 = vmatmul.msk.bf16.gmra.mxu3 %vm1567_vm0, %v2094_v33  ;;  %v3029_v2 = vsel %vm2968_vm1, %v10216_v6, -inf  ;;  %v10254_v16 = vpop.f32.mrf.mxu1  ;;  %v10256_v24 = vpop.f32.mrf.mxu3  ;;  %v3041_v33 = vsel %vm2968_vm1, %v10249_v21, -inf  ;;  %v10303_v21 = vadd.f32 %v12950_v15, %v10195_v48 }
 0x3d3   : > { %12937 = vst [vmem:[#allocation39_spill] sm:$0xff] %v10232_v49  ;;  %v10246_v62 = vadd.f32 %v10232_v49, %v1926_v14  ;;  %v10252_v9 = vadd.f32 %v10241_v39, %v1924_v0  ;;  %v2392_v0 = vunpack.c.l.b16 %v9803_v54 }
 0x3d4   : > { %6996 = vmatmul.msk.bf16.gmra.mxu2 %vm1567_vm0, %v2633_v53  ;;  %12939 = vst [vmem:[#allocation80_spill] sm:$0xff] %v10241_v39  ;;  %v3487_v32 = vmul.f32 1.442695, %v3356_v38  ;;  %v12941_v38 = vld [vmem:[#allocation71_spill] sm:$0xff]  ;;  %v10280_v27 = vpop.xlane.xlu2 %2988 }
 0x3d5   : > { %v3083_v10 = vsel %vm2968_vm1, %v10252_v9, -inf  ;;  %v2399_v14 = vpack.c.b16 %v2392_v0, %v2391_v56 }
 0x3d6   : > { %v10258_v53 = vpop.xlane.xlu1 %3003 }
 0x3d8   : > { %2754 = vmatpush.bf16.xpose.msrb.mxu3 %v2736_v17  ;;  %3093 = vmax.xlane.f32.xlu2 %v3092_v61  ;;  %v3489_v17 = vmul.f32 1.442695, %v3357_v19  ;;  %v3086_v19 = vsel %vm2968_vm1, %v10246_v62, -inf  ;;  %v10272_v61 = vadd.f32 %v12941_v38, %v10163_v25 }
 0x3d9   : > { %3030 = vmax.xlane.f32.xlu1 %v3029_v2 }
 0x3da   : > { %3027 = vmax.xlane.f32.xlu0 %v3026_v7  ;;  %7455 = vpow2.f32 %v3489_v17  ;;  %v10276_v7 = vpop.f32.mrf.mxu3  ;;  %v12942_v17 = vld [vmem:[#allocation89_spill] sm:$0xff]  ;;  %v1998_v54 = vpop.f32.mrf.mxu1  ;;  %v3089_v0 = vsel %vm2968_vm1, %v10272_v61, -inf }
 0x3db   : > { %7457 = vpow2.f32 %v3487_v32  ;;  %v4760_v32 = vunpack.c.l.b16 %v12942_v17  ;;  %v10295_v1 = vadd.f32 %v10091_v35, %v1998_v54  ;;  %v12955_v54 = vld [vmem:[#allocation48_spill] sm:$0xff] }
 0x3dc   : > { %v3358_v35 = vsub.f32 %v12955_v54, %v10197_v13 }
 0x3dd   : > { %12947 = vst [vmem:[#allocation89_spill] sm:$0xff] %v10295_v1  ;;  %v3104_v6 = vsel %vm2968_vm1, %v10295_v1, -inf }
 0x3de   : > { %v10290_v56 = vpop.xlane.xlu1 %3012 }
 0x3e0   : > { %3042 = vmax.xlane.f32.xlu2 %v3041_v33  ;;  %v10268_v60 = vpop.eup %7455  ;;  %v12943_v33 = vld [vmem:[#allocation91_spill] sm:$0xff] }
 0x3e1   : > { %3087 = vmax.xlane.f32.xlu1 %v3086_v19  ;;  %v10274_v2 = vpop.eup %7457  ;;  %v4761_v19 = vunpack.c.l.b16 %v12943_v33  ;;  %v3749_v58 = vsel %vm2968_vm1, %v10268_v60, 0.0  ;;  %v12945_v33 = vld [vmem:[#allocation21_spill] sm:$0xff] }
 0x3e2   : > { %3084 = vmax.xlane.f32.xlu0 %v3083_v10  ;;  %6981 = vmatmul.msk.bf16.vlgmr.msra.gmra.mxu3 %vm1567_vm0, %v2399_v14  ;;  %v12944_v10 = vld [vmem:[#allocation92_spill] sm:$0xff]  ;;  %v3746_v25 = vsel %vm2968_vm1, %v10274_v2, 0.0  ;;  %v4758_v14 = vunpack.c.l.b16 %v12945_v33 }
 0x3e3   : > { %4788 = vmatpush.bf16.msra.mxu3 %v12944_v10  ;;  %v4766_v17 = vpack.c.b16 %v4761_v19, %v4760_v32  ;;  %v2992_v10 = vpop.xlane.xlu0 %2991  ;;  %12951 = vst [vmem:[#allocation92_spill] sm:$0xff] %v10303_v21  ;;  %v12953_v19 = vld [vmem:[#allocation49_spill] sm:$0xff] }
 0x3e4   : > { %v4765_v32 = vpack.c.b16 %v4759_v51, %v4758_v14  ;;  %v4756_v33 = vunpack.c.l.b16 %v12953_v19  ;;  %v2393_v51 = vunpack.c.l.b16 %v9833_v36  ;;  %v10317_v14 = vpop.xlane.xlu2 %2997  ;;  %v12957_v19 = vld [vmem:[#allocation109_spill] sm:$0xff]  ;;  %v10329_v36 = vadd.f32 %v10051_v11, %v10227_v28 }
 0x3e5   : > { %v10325_v54 = vadd.f32 %v12957_v19, %v10193_v59 }
 0x3e6   : > { %v4764_v13 = vpack.c.b16 %v4757_v3, %v4756_v33  ;;  %v3098_v28 = vsel %vm2968_vm1, %v10329_v36, -inf }
 0x3e7   : > { %4789 = vmatpush.bf16.msra.mxu3 %v4766_v17  ;;  %v3038_v17 = vsel %vm2968_vm1, %v10303_v21, -inf  ;;  %v3095_v59 = vsel %vm2968_vm1, %v10325_v54, -inf }
 0x3e8   : > { %3750 = vadd.xlane.f32.xlu2 %v3749_v58  ;;  %v12948_v58 = vld [vmem:[#allocation78_spill] sm:$0xff] }
 0x3e9   : > { %3090 = vmax.xlane.f32.xlu1 %v3089_v0  ;;  %v10299_v20 = vadd.f32 %v12948_v58, %v10179_v23  ;;  %v1839_v23 = vpop.f32.mrf.mxu3 }
 0x3ea   : > { %3747 = vadd.xlane.f32.xlu0 %v3746_v25  ;;  %v12952_v25 = vld [vmem:[#allocation99_spill] sm:$0xff] }
 0x3eb   : > { %12949 = vst [vmem:[#allocation91_spill] sm:$0xff] %v10299_v20  ;;  %v3360_v0 = vsub.f32 %v12952_v25, %v2992_v10  ;;  %4790 = vmatpush.bf16.msra.mxu3 %v4765_v32  ;;  %v3035_v48 = vsel %vm2968_vm1, %v10299_v20, -inf  ;;  %v2394_v10 = vunpack.c.l.b16 %v9913_v57  ;;  %v10321_v25 = vadd.f32 %v9876_v52, %v1839_v23  ;;  %v3067_v32 = vpop.xlane.xlu1 %3066  ;;  %v12970_v20 = vld [vmem:[#allocation112_spill] sm:$0xff] }
 0x3ec   : > { %v10343_v3 = vpop.xlane.xlu2 %3006 }
 0x3ed   : > { %v3495_v55 = vmul.f32 1.442695, %v3360_v0  ;;  %12956 = vst [vmem:[#allocation21_spill] sm:$0xff] %v10321_v25  ;;  %v12958_v0 = vld [vmem:[#allocation108_spill] sm:$0xff]  ;;  %v3050_v52 = vsel %vm2968_vm1, %v10321_v25, -inf }
 0x3ee   : > { %v3385_v57 = vsub.f32 %v12958_v0, %v3067_v32 }
 0x3ef   : > { %4791 = vmatpush.bf16.msra.mxu3 %v4764_v13  ;;  %7459 = vpow2.f32 %v3495_v55  ;;  %v12959_v13 = vld [vmem:[#allocation32_spill] sm:$0xff] }
 0x3f0   : > { %3105 = vmax.xlane.f32.xlu2 %v3104_v6  ;;  %v3491_v6 = vmul.f32 1.442695, %v3358_v35  ;;  %v3545_v33 = vmul.f32 1.442695, %v3385_v57 }
 0x3f1   : > { %3039 = vmax.xlane.f32.xlu1 %v3038_v17  ;;  %v10331_v17 = vpop.xlane.xlu0 %3000  ;;  %v10337_v35 = vpop.f32.mrf.mxu3 }
 0x3f2   : > { %3036 = vmax.xlane.f32.xlu0 %v3035_v48  ;;  %v2400_v48 = vpack.c.b16 %v2394_v10, %v2393_v51  ;;  %7461 = vpow2.f32 %v3491_v6  ;;  %v10349_v51 = vadd.f32 %v10072_v41, %v10254_v16  ;;  %v3359_v10 = vsub.f32 %v12959_v13, %v10280_v27  ;;  %v12960_v6 = vld [vmem:[#allocation98_spill] sm:$0xff]  ;;  %v12961_v13 = vld [vmem:[#allocation65_spill] sm:$0xff] }
 0x3f3   : > { %7463 = vpow2.f32 %v3545_v33  ;;  %v3361_v32 = vsub.f32 %v12960_v6, %v10229_v46  ;;  %v2395_v46 = vunpack.c.l.b16 %v9941_v63  ;;  %v10371_v6 = vadd.f32 %v12961_v13, %v10256_v24  ;;  %v12965_v63 = vld [vmem:[#allocation102_spill] sm:$0xff] }
 0x3f4   : > { %6982 = vmatmul.msk.bf16.gmra.mxu3 %vm1567_vm0, %v2400_v48  ;;  %v3101_v16 = vsel %vm2968_vm1, %v10349_v51, -inf  ;;  %v10377_v21 = vpop.xlane.xlu2 %3015 }
 0x3f5   : > { %v10345_v23 = vpop.eup %7459  ;;  %12962 = vst [vmem:[#allocation55_spill] sm:$0xff] %v10371_v6 }
 0x3f6   : > { %v3758_v0 = vsel %vm2968_vm1, %v10345_v23, 0.0 }
 0x3f8   : > { %3051 = vmax.xlane.f32.xlu2 %v3050_v52  ;;  %v10351_v55 = vpop.eup %7461  ;;  %v2396_v52 = vunpack.c.l.b16 %v9972_v37  ;;  %v10379_v37 = vpop.f32.mrf.mxu0 }
 0x3f9   : > { %3099 = vmax.xlane.f32.xlu1 %v3098_v28  ;;  %v10357_v48 = vpop.xlane.xlu0 %3009  ;;  %v3752_v57 = vsel %vm2968_vm1, %v10351_v55, 0.0  ;;  %v1844_v27 = vpop.f32.mrf.mxu3  ;;  %v3497_v28 = vmul.f32 1.442695, %v3361_v32 }
 0x3fa   : > { %3096 = vmax.xlane.f32.xlu0 %v3095_v59  ;;  %v3493_v59 = vmul.f32 1.442695, %v3359_v10  ;;  %v10367_v33 = vpop.eup %7463  ;;  %v2401_v41 = vpack.c.b16 %v2396_v52, %v2395_v46  ;;  %v3362_v10 = vsub.f32 %v12965_v63, %v10317_v14  ;;  %v7306_v46 = vld [vmem:[#allocation8 + $0x40] sm:$0xff]  }
 0x3fb   : > { %v3833_v24 = vsel %vm2968_vm1, %v10367_v33, 0.0  ;;  %v10401_v13 = vunpack.c.h.bf16 %v7306_v46 }
 0x3fc   : > { %7465 = vpow2.f32 %v3493_v59  ;;  %v3499_v52 = vmul.f32 1.442695, %v3362_v10 }
 0x3fd   : > { %7467 = vpow2.f32 %v3497_v28  ;;  %v10399_v28 = vpop.f32.mrf.mxu2  ;;  %12967 = vst [vmem:[#allocation99_spill] sm:$0xff] %v10401_v13 }
 0x3fe   : > { %7469 = vpow2.f32 %v3499_v52  ;;  %v12968_v52 = vld [vmem:[#allocation119_spill] sm:$0xff] }
 0x400   : > { %3759 = vadd.xlane.f32.xlu2 %v3758_v0  ;;  %v12963_v0 = vld [vmem:[#allocation66_spill] sm:$0xff] }
 0x401   : > { %3102 = vmax.xlane.f32.xlu1 %v3101_v16  ;;  %v10375_v25 = vadd.f32 %v12963_v0, %v10276_v7  ;;  %v3044_v7 = vsel %vm2968_vm1, %v10371_v6, -inf  ;;  %v1847_v16 = vpop.f32.mrf.mxu3  ;;  %v3070_v0 = vpop.xlane.xlu2 %3069 }
 0x402   : > { %3753 = vadd.xlane.f32.xlu0 %v3752_v57  ;;  %v10390_v57 = vpop.xlane.xlu0 %3018  ;;  %v10393_v14 = vadd.f32 %v12948_v58, %v1847_v16 }
 0x403   : > { %12964 = vst [vmem:[#allocation78_spill] sm:$0xff] %v10375_v25  ;;  %v3047_v32 = vsel %vm2968_vm1, %v10375_v25, -inf  ;;  %v2397_v25 = vunpack.c.l.b16 %v12968_v52  ;;  %v12974_v52 = vld [vmem:[#allocation110_spill] sm:$0xff] }
 0x404   : > { %6983 = vmatmul.msk.bf16.gmra.mxu3 %vm1567_vm0, %v2401_v41  ;;  %12966 = vst [vmem:[#allocation45_spill] sm:$0xff] %v10393_v14  ;;  %v10395_v41 = vpop.eup %7465  ;;  %v3059_v63 = vsel %vm2968_vm1, %v10393_v14, -inf }
 0x405   : > { %v10397_v59 = vpop.eup %7467  ;;  %v3755_v10 = vsel %vm2968_vm1, %v10395_v41, 0.0 }
 0x406   : > { %v3761_v58 = vsel %vm2968_vm1, %v10397_v59, 0.0 }
 0x408   : > { %3834 = vadd.xlane.f32.xlu2 %v3833_v24  ;;  %v2219_v24 = vpop.f32.mrf.mxu0 }
 0x409   : > { %3048 = vmax.xlane.f32.xlu1 %v3047_v32  ;;  %v2398_v32 = vunpack.c.l.b16 %v10097_v42  ;;  %v10411_v16 = vadd.f32 %v10401_v13, %v2219_v24 }
 0x40a   : > { %3045 = vmax.xlane.f32.xlu0 %v3044_v7  ;;  %v2001_v7 = vpop.f32.mrf.mxu1  ;;  %v3073_v6 = vpop.xlane.xlu0 %3072 }
 0x40b   : > { %v10415_v14 = vadd.f32 %v10241_v39, %v2001_v7  ;;  %v2402_v1 = vpack.c.b16 %v2398_v32, %v2397_v25  ;;  %v3387_v11 = vsub.f32 %v12970_v20, %v3073_v6  ;;  %v3164_v42 = vsel %vm2968_vm1, %v10411_v16, -inf  ;;  %v10427_v7 = vpop.xlane.xlu2 %3024 }
 0x40c   : > { %v10436_v6 = vadd.f32 %v9884_v8, %v10337_v35  ;;  %v10439_v32 = vadd.f32 %v9880_v47, %v1844_v27  ;;  %v2699_v8 = vunpack.c.l.b16 %v9765_v29  ;;  %v5071_v47 = vunpack.c.l.b16 %v10135_v30  ;;  %v12977_v29 = vld [vmem:[#allocation118_spill] sm:$0xff] }
 0x40d   : > { %12969 = vst [vmem:[#allocation49_spill] sm:$0xff] %v10415_v14  ;;  %v3107_v24 = vsel %vm2968_vm1, %v10415_v14, -inf  ;;  %v3549_v20 = vmul.f32 1.442695, %v3387_v11  ;;  %v2700_v27 = vunpack.c.l.b16 %v9816_v45  ;;  %v12979_v45 = vld [vmem:[#allocation120_spill] sm:$0xff]  ;;  %v12981_v14 = vld [vmem:[#allocation103_spill] sm:$0xff] }
 0x40e   : > { %12972 = vst [vmem:[#allocation48_spill] sm:$0xff] %v10436_v6  ;;  %v3053_v11 = vsel %vm2968_vm1, %v10436_v6, -inf  ;;  %v5070_v6 = vunpack.c.l.b16 %v12977_v29  ;;  %v3364_v19 = vsub.f32 %v12981_v14, %v10258_v53 }
 0x40f   : > { %12973 = vst [vmem:[#allocation108_spill] sm:$0xff] %v10439_v32  ;;  %7471 = vpow2.f32 %v3549_v20 }
 0x410   : > { %3060 = vmax.xlane.f32.xlu2 %v3059_v63  ;;  %v10417_v63 = vpop.eup %7469  ;;  %v10429_v25 = vpop.f32.mrf.mxu0  ;;  %v5075_v39 = vpack.c.b16 %v5071_v47, %v5070_v6 }
 0x411   : > { %3756 = vadd.xlane.f32.xlu1 %v3755_v10  ;;  %v3764_v10 = vsel %vm2968_vm1, %v10417_v63, 0.0  ;;  %v10478_v47 = vpop.xlane.xlu1 %3021 }
 0x412   : > { %3762 = vadd.xlane.f32.xlu0 %v3761_v58  ;;  %v2065_v58 = vpop.f32.mrf.mxu2  ;;  %v2003_v35 = vpop.f32.mrf.mxu1 }
 0x413   : > { %v3079_v20 = vpop.xlane.xlu2 %3078 }
 0x414   : > { %6984 = vmatmul.msk.bf16.gmra.mxu3 %vm1567_vm0, %v2402_v1  ;;  %v10432_v1 = vadd.f32 %v10022_v44, %v2065_v58  ;;  %v3056_v58 = vsel %vm2968_vm1, %v10439_v32, -inf  ;;  %v10460_v32 = vadd.f32 %v10232_v49, %v2003_v35  ;;  %v12978_v44 = vld [vmem:[#allocation101_spill] sm:$0xff] }
 0x415   : > { %v5068_v30 = vunpack.c.l.b16 %v12978_v44  ;;  %v12982_v35 = vld [vmem:[#allocation113_spill] sm:$0xff] }
 0x416   : > { %12971 = vst [vmem:[#allocation20_spill] sm:$0xff] %v10432_v1  ;;  %v5069_v29 = vunpack.c.l.b16 %v12982_v35  ;;  %v3110_v44 = vsel %vm2968_vm1, %v10460_v32, -inf }
 0x417   : > { %12976 = vst [vmem:[#allocation98_spill] sm:$0xff] %v10460_v32 }
 0x418   : > { %3165 = vmax.xlane.f32.xlu2 %v3164_v42  ;;  %v3386_v42 = vsub.f32 %v12974_v52, %v3070_v0  ;;  %v5074_v14 = vpack.c.b16 %v5069_v29, %v5068_v30 }
 0x419   : > { %3765 = vadd.xlane.f32.xlu1 %v3764_v10  ;;  %v10444_v10 = vunpack.c.l.bf16 %v7306_v46  ;;  %v10453_v46 = vpop.eup %7471 }
 0x41a   : > { %3108 = vmax.xlane.f32.xlu0 %v3107_v24  ;;  %v3116_v24 = vsel %vm2968_vm1, %v10432_v1, -inf  ;;  %v3547_v0 = vmul.f32 1.442695, %v3386_v42  ;;  %v3389_v42 = vsub.f32 %v12979_v45, %v3079_v20  ;;  %v3503_v20 = vmul.f32 1.442695, %v3364_v19 }
 0x41b   : > { %12975 = vst [vmem:[#allocation32_spill] sm:$0xff] %v10444_v10  ;;  %v10457_v52 = vadd.f32 %v10444_v10, %v10379_v37  ;;  %v3839_v37 = vsel %vm2968_vm1, %v10453_v46, 0.0  ;;  %v10486_v45 = vadd.f32 %v12941_v38, %v10399_v28  ;;  %v10498_v28 = vpop.xlane.xlu2 %3081  ;;  %v7308_v38 = vld [vmem:[#allocation8 + $0x50] sm:$0xff]  }
 0x41c   : > { %7473 = vpow2.f32 %v3547_v0 }
 0x41d   : > { %v3161_v6 = vsel %vm2968_vm1, %v10457_v52, -inf  ;;  %12985 = vst [vmem:[#allocation66_spill] sm:$0xff] %v10486_v45 }
 0x420   : > { %3117 = vmax.xlane.f32.xlu2 %v3116_v24  ;;  %v2224_v24 = vpop.f32.mrf.mxu0 }
 0x421   : > { %3057 = vmax.xlane.f32.xlu1 %v3056_v58  ;;  %v7307_v58 = vld [vmem:[#allocation8 + $0x48] sm:$0xff]  }
 0x422   : > { %3054 = vmax.xlane.f32.xlu0 %v3053_v11  ;;  %v2707_v11 = vpack.c.b16 %v2700_v27, %v2699_v8  ;;  %v10465_v1 = vunpack.c.h.bf16 %v7307_v58  ;;  %v12983_v8 = vld [vmem:[#allocation82_spill] sm:$0xff]  ;;  %v3553_v27 = vmul.f32 1.442695, %v3389_v42  ;;  %v12987_v42 = vld [vmem:[#allocation83_spill] sm:$0xff] }
 0x423   : > { %v5067_v53 = vunpack.c.l.b16 %v12983_v8 }
 0x424   : > { %12980 = vst [vmem:[#allocation65_spill] sm:$0xff] %v10465_v1  ;;  %6997 = vmatmul.msk.bf16.vlgmr.msrb.gmra.mxu3 %vm1567_vm0, %v2707_v11  ;;  %v10481_v0 = vadd.f32 %v10465_v1, %v2224_v24  ;;  %7475 = vpow2.f32 %v3553_v27  ;;  %v3363_v24 = vsub.f32 %v12987_v42, %v10331_v17  ;;  %v2702_v27 = vunpack.c.l.b16 %v9886_v12  ;;  %v3076_v42 = vpop.xlane.xlu1 %3075  ;;  %v12991_v12 = vld [vmem:[#allocation104_spill] sm:$0xff] }
 0x425   : > { %5096 = vmatpush.bf16.msrb.mxu3 %v5075_v39  ;;  %v12984_v39 = vld [vmem:[#allocation47_spill] sm:$0xff]  ;;  %7477 = vpow2.f32 %v3503_v20  ;;  %v2701_v20 = vunpack.c.l.b16 %v9838_v4  ;;  %v3366_v49 = vsub.f32 %v12991_v12, %v10357_v48 }
 0x426   : > { %v5066_v11 = vunpack.c.l.b16 %v12984_v39  ;;  %v3170_v19 = vsel %vm2968_vm1, %v10481_v0, -inf  ;;  %v1849_v39 = vpop.f32.mrf.mxu3 }
 0x428   : > { %3840 = vadd.xlane.f32.xlu2 %v3839_v37  ;;  %v10488_v37 = vpop.eup %7473  ;;  %v10490_v35 = vpop.f32.mrf.mxu0  ;;  %v5073_v29 = vpack.c.b16 %v5067_v53, %v5066_v11  ;;  %v3113_v53 = vsel %vm2968_vm1, %v10486_v45, -inf  ;;  %v3501_v11 = vmul.f32 1.442695, %v3363_v24  ;;  %v10521_v24 = vunpack.c.l.bf16 %v7307_v58  ;;  %v13000_v45 = vld [vmem:[#allocation51_spill] sm:$0xff] }
 0x429   : > { %3162 = vmax.xlane.f32.xlu1 %v3161_v6  ;;  %5097 = vmatpush.bf16.msrb.mxu3 %v5074_v14  ;;  %v12988_v6 = vld [vmem:[#allocation94_spill] sm:$0xff]  ;;  %v3836_v14 = vsel %vm2968_vm1, %v10488_v37, 0.0 }
 0x42a   : > { %3111 = vmax.xlane.f32.xlu0 %v3110_v44  ;;  %v12986_v44 = vld [vmem:[#allocation96_spill] sm:$0xff]  ;;  %v5064_v8 = vunpack.c.l.b16 %v12988_v6  ;;  %v2708_v6 = vpack.c.b16 %v2702_v27, %v2701_v20  ;;  %7479 = vpow2.f32 %v3501_v11  ;;  %12994 = vst [vmem:[#allocation110_spill] sm:$0xff] %v10521_v24  ;;  %v3507_v27 = vmul.f32 1.442695, %v3366_v49 }
 0x42b   : > { %v5065_v30 = vunpack.c.l.b16 %v12986_v44  ;;  %v10506_v44 = vpop.eup %7475  ;;  %v10534_v58 = vadd.f32 %v10521_v24, %v10429_v25  ;;  %v2704_v25 = vunpack.c.l.b16 %v10011_v18  ;;  %v12997_v18 = vld [vmem:[#allocation106_spill] sm:$0xff] }
 0x42c   : > { %12989 = vst [vmem:[#allocation102_spill] sm:$0xff] %v10506_v44  ;;  %7481 = vpow2.f32 %v3507_v27 }
 0x42d   : > { %5098 = vmatpush.bf16.msrb.mxu3 %v5073_v29  ;;  %v5072_v17 = vpack.c.b16 %v5065_v30, %v5064_v8  ;;  %v10509_v29 = vadd.f32 %v12950_v15, %v1849_v39  ;;  %v12993_v30 = vld [vmem:[#allocation116_spill] sm:$0xff]  ;;  %v3845_v15 = vsel %vm2968_vm1, %v10506_v44, 0.0  ;;  %v10527_v39 = vpop.xlane.xlu2 %3033  ;;  %v3167_v12 = vsel %vm2968_vm1, %v10534_v58, -inf }
 0x42e   : > { %v3388_v4 = vsub.f32 %v12993_v30, %v3076_v42  ;;  %v12995_v42 = vld [vmem:[#allocation75_spill] sm:$0xff] }
 0x42f   : > { %12990 = vst [vmem:[#allocation119_spill] sm:$0xff] %v10509_v29  ;;  %v3062_v48 = vsel %vm2968_vm1, %v10509_v29, -inf }
 0x430   : > { %3171 = vmax.xlane.f32.xlu2 %v3170_v19  ;;  %v10511_v19 = vpop.eup %7477  ;;  %v2229_v8 = vpop.f32.mrf.mxu0  ;;  %v3551_v20 = vmul.f32 1.442695, %v3388_v4 }
 0x431   : > { %3114 = vmax.xlane.f32.xlu1 %v3113_v53  ;;  %5099 = vmatpush.bf16.msrb.mxu3 %v5072_v17  ;;  %v3770_v53 = vsel %vm2968_vm1, %v10511_v19, 0.0  ;;  %v10536_v11 = vpop.eup %7479 }
 0x432   : > { %3837 = vadd.xlane.f32.xlu0 %v3836_v14  ;;  %v10515_v14 = vunpack.c.h.bf16 %v7308_v38  ;;  %7483 = vpow2.f32 %v3551_v20  ;;  %v3767_v30 = vsel %vm2968_vm1, %v10536_v11, 0.0 }
 0x434   : > { %12992 = vst [vmem:[#allocation112_spill] sm:$0xff] %v10515_v14  ;;  %6998 = vmatmul.msk.bf16.gmra.mxu3 %vm1567_vm0, %v2708_v6  ;;  %v10530_v17 = vadd.f32 %v10515_v14, %v2229_v8  ;;  %v3365_v6 = vsub.f32 %v12995_v42, %v10343_v3  ;;  %v10554_v42 = vunpack.c.l.bf16 %v7308_v38  ;;  %v2706_v14 = vunpack.c.l.b16 %v10117_v22 }
 0x436   : > { %v3176_v49 = vsel %vm2968_vm1, %v10530_v17, -inf  ;;  %v3505_v3 = vmul.f32 1.442695, %v3365_v6  ;;  %12996 = vst [vmem:[#allocation118_spill] sm:$0xff] %v10554_v42 }
 0x438   : > { %3846 = vadd.xlane.f32.xlu2 %v3845_v15  ;;  %v2703_v15 = vunpack.c.l.b16 %v9984_v34  ;;  %v12998_v34 = vld [vmem:[#allocation122_spill] sm:$0xff]  ;;  %v10602_v22 = vpop.f32.mrf.mxu0 }
 0x439   : > { %3771 = vadd.xlane.f32.xlu1 %v3770_v53  ;;  %v10550_v53 = vpop.eup %7481  ;;  %v3390_v6 = vsub.f32 %v12998_v34, %v10498_v28 }
 0x43a   : > { %3063 = vmax.xlane.f32.xlu0 %v3062_v48  ;;  %v10552_v27 = vpop.eup %7483  ;;  %v2709_v20 = vpack.c.b16 %v2704_v25, %v2703_v15  ;;  %v10567_v15 = vadd.f32 %v10554_v42, %v10490_v35 }
 0x43b   : > { %v3555_v28 = vmul.f32 1.442695, %v3390_v6 }
 0x43c   : > { %v3173_v6 = vsel %vm2968_vm1, %v10567_v15, -inf }
 0x440   : > { %3177 = vmax.xlane.f32.xlu2 %v3176_v49  ;;  %v3368_v49 = vsub.f32 %v12997_v18, %v10377_v21 }
 0x441   : > { %3168 = vmax.xlane.f32.xlu1 %v3167_v12  ;;  %v3776_v12 = vsel %vm2968_vm1, %v10550_v53, 0.0 }
 0x442   : > { %3768 = vadd.xlane.f32.xlu0 %v3767_v30  ;;  %v3842_v30 = vsel %vm2968_vm1, %v10552_v27, 0.0  ;;  %v3511_v21 = vmul.f32 1.442695, %v3368_v49  ;;  %v5148_v49 = vunpack.c.l.b16 %v13000_v45 }
 0x443   : > { %v10547_v4 = vpop.xlane.xlu2 %3744 }
 0x444   : > { %v3742_v8 = vpop.xlane.xlu1 %3741  ;;  %6999 = vmatmul.msk.bf16.gmra.mxu3 %vm1567_vm0, %v2709_v20 }
 0x445   : > { %v3739_v48 = vpop.xlane.xlu0 %3738  ;;  %7485 = vrcp.f32 %v3742_v8 }
 0x446   : > { %7487 = vrcp.f32 %v3739_v48 }
 0x447   : > { %7489 = vpow2.f32 %v3505_v3 }
 0x448   : > { %7491 = vpow2.f32 %v3511_v21 }
 0x449   : > { %3777 = vadd.xlane.f32.xlu1 %v3776_v12  ;;  %7493 = vpow2.f32 %v3555_v28 }
 0x44a   : > { %3843 = vadd.xlane.f32.xlu0 %v3842_v30  ;;  %v12999_v30 = vld [vmem:[#allocation107_spill] sm:$0xff] }
 0x44b   : > { %v7486_v25 = vpop.eup %7485  ;;  %v10570_v8 = vpop.xlane.xlu2 %3093  ;;  %v3369_v29 = vsub.f32 %v12999_v30, %v10390_v57  ;;  %v2705_v57 = vunpack.c.l.b16 %v10029_v5 }
 0x44c   : > { %v7488_v38 = vpop.eup %7487  ;;  %v4250_v3 = vmul.f32 %v7486_v25, %v10201_v50  ;;  %v10575_v18 = vpop.xlane.xlu1 %3030 }
 0x44d   : > { %v4249_v48 = vmul.f32 %v7488_v38, %v10205_v43  ;;  %v10573_v20 = vpop.xlane.xlu0 %3027  ;;  %v10577_v34 = vpop.eup %7489  ;;  %v13001_v43 = vld [vmem:[#allocation105_spill] sm:$0xff]  ;;  %v3513_v45 = vmul.f32 1.442695, %v3369_v29 }
 0x44e   : > { %v4378_v12 = vpack.c.bf16 %v4250_v3, %v4250_v3  ;;  %v3367_v25 = vsub.f32 %v13001_v43, %v10290_v56  ;;  %v3773_v32 = vsel %vm2968_vm1, %v10577_v34, 0.0  ;;  %v13002_v3 = vld [vmem:[#allocation37_spill] sm:$0xff]  ;;  %v10595_v43 = vpop.eup %7491 }
 0x44f   : > { %v4377_v35 = vpack.c.bf16 %v4249_v48, %v4249_v48  ;;  %v5147_v42 = vunpack.c.l.b16 %v13002_v3  ;;  %v13003_v48 = vld [vmem:[#allocation38_spill] sm:$0xff]  ;;  %v13004_v3 = vld [vmem:[#allocation36_spill] sm:$0xff]  ;;  %v10599_v29 = vpop.eup %7493  ;;  %7495 = vpow2.f32 %v3513_v45 }
 0x450   : > { %v4514_v50 = vunpack.c.l.b16 %v4378_v12  ;;  %v5146_v12 = vunpack.c.l.b16 %v13003_v48  ;;  %v3509_v56 = vmul.f32 1.442695, %v3367_v25  ;;  %v5145_v5 = vunpack.c.l.b16 %v13004_v3  ;;  %v13006_v25 = vld [vmem:[#allocation111_spill] sm:$0xff] }
 0x451   : > { %v4513_v38 = vunpack.c.l.b16 %v4377_v35  ;;  %3174 = vmax.xlane.f32.xlu1 %v3173_v6  ;;  %v5152_v30 = vpack.c.b16 %v5148_v49, %v5147_v42  ;;  %v2710_v6 = vpack.c.b16 %v2706_v14, %v2705_v57  ;;  %v13005_v42 = vld [vmem:[#allocation26_spill] sm:$0xff]  ;;  %7497 = vrcp.f32 %v10547_v4  ;;  %v13007_v57 = vld [vmem:[#allocation23_spill] sm:$0xff] }
 0x452   : > { %3774 = vadd.xlane.f32.xlu0 %v3773_v32  ;;  %v5143_v49 = vunpack.c.l.b16 %v13005_v42  ;;  %7499 = vpow2.f32 %v3509_v56  ;;  %v5144_v48 = vunpack.c.l.b16 %v13007_v57  ;;  %v3848_v45 = vsel %vm2968_vm1, %v10599_v29, 0.0 }
 0x453   : > { %v4521_v21 = vpack.c.b16 %v4514_v50, %v4513_v38  ;;  %v10592_v44 = vpop.xlane.xlu2 %3042  ;;  %v5151_v50 = vpack.c.b16 %v5146_v12, %v5145_v5  ;;  %v3370_v38 = vsub.f32 %v13006_v25, %v10478_v47  ;;  %v13008_v47 = vld [vmem:[#allocation25_spill] sm:$0xff] }
 0x454   : > { %v3088_v35 = vpop.xlane.xlu1 %3087  ;;  %7000 = vmatmul.msk.bf16.gmra.mxu3 %vm1567_vm0, %v2710_v6  ;;  %v5142_v4 = vunpack.c.l.b16 %v13008_v47  ;;  %v5150_v12 = vpack.c.b16 %v5144_v48, %v5143_v49  ;;  %v13009_v6 = vld [vmem:[#allocation16_spill] sm:$0xff] }
 0x455   : > { %7001 = vmatmul.msk.bf16.vlgmr.msra.gmra.mxu0 %vm2968_vm1, %v4521_v21  ;;  %v3085_v28 = vpop.xlane.xlu0 %3084  ;;  %v3392_v14 = vsub.f32 %v10246_v62, %v3088_v35  ;;  %v10615_v56 = vpop.eup %7495 }
 0x456   : > { %5173 = vmatpush.bf16.msra.mxu0 %v5152_v30  ;;  %v3391_v32 = vsub.f32 %v10252_v9, %v3085_v28  ;;  %v3782_v9 = vsel %vm2968_vm1, %v10595_v43, 0.0  ;;  %v3515_v30 = vmul.f32 1.442695, %v3370_v38  ;;  %v3785_v49 = vsel %vm2968_vm1, %v10615_v56, 0.0  ;;  %v2234_v38 = vpop.f32.mrf.mxu0 }
 0x457   : > { %v3559_v62 = vmul.f32 1.442695, %v3392_v14  ;;  %v7498_v5 = vpop.eup %7497 }
 0x458   : > { %v3557_v21 = vmul.f32 1.442695, %v3391_v32  ;;  %v5141_v32 = vunpack.c.l.b16 %v13009_v6  ;;  %v10618_v42 = vpop.eup %7499  ;;  %v4251_v14 = vmul.f32 %v7498_v5, %v10199_v40 }
 0x459   : > { %3783 = vadd.xlane.f32.xlu1 %v3782_v9 }
 0x45a   : > { %7501 = vpow2.f32 %v3557_v21  ;;  %5174 = vmatpush.bf16.msra.mxu0 %v5151_v50  ;;  %3849 = vadd.xlane.f32.xlu0 %v3848_v45  ;;  %v7309_v50 = vld [vmem:[#allocation8 + $0x58] sm:$0xff]   ;;  %v5149_v21 = vpack.c.b16 %v5142_v4, %v5141_v32  ;;  %v3779_v45 = vsel %vm2968_vm1, %v10618_v42, 0.0  ;;  %v4379_v40 = vpack.c.bf16 %v4251_v14, %v4251_v14 }
 0x45b   : > { %v3751_v28 = vpop.xlane.xlu2 %3750  ;;  %v10622_v9 = vunpack.c.h.bf16 %v7309_v50 }
 0x45c   : > { %v3091_v3 = vpop.xlane.xlu1 %3090 }
 0x45d   : > { %v3748_v35 = vpop.xlane.xlu0 %3747  ;;  %13010 = vst [vmem:[#allocation101_spill] sm:$0xff] %v10622_v9  ;;  %v3393_v57 = vsub.f32 %v10272_v61, %v3091_v3  ;;  %v10633_v4 = vadd.f32 %v10622_v9, %v2234_v38 }
 0x45e   : > { %5175 = vmatpush.bf16.msra.mxu0 %v5150_v12  ;;  %7503 = vrcp.f32 %v3748_v35 }
 0x45f   : > { %7505 = vpow2.f32 %v3515_v30  ;;  %v3561_v61 = vmul.f32 1.442695, %v3393_v57  ;;  %v3182_v32 = vsel %vm2968_vm1, %v10633_v4, -inf }
 0x460   : > { %v10620_v25 = vpop.eup %7501  ;;  %7507 = vpow2.f32 %v3559_v62 }
 0x461   : > { %v3851_v48 = vsel %vm2968_vm1, %v10620_v25, 0.0  ;;  %3786 = vadd.xlane.f32.xlu1 %v3785_v49  ;;  %7509 = vpow2.f32 %v3561_v61  ;;  %v4515_v49 = vunpack.c.l.b16 %v4379_v40 }
 0x462   : > { %5176 = vmatpush.bf16.msra.mxu0 %v5149_v21  ;;  %3852 = vadd.xlane.f32.xlu2 %v3851_v48  ;;  %v3394_v21 = vsub.f32 %v10220_v31, %v10570_v8  ;;  %7511 = vrcp.f32 %v3751_v28 }
 0x463   : > { %3780 = vadd.xlane.f32.xlu0 %v3779_v45  ;;  %v10635_v12 = vpop.xlane.xlu2 %3105 }
 0x464   : > { %v7504_v47 = vpop.eup %7503  ;;  %v10640_v35 = vpop.xlane.xlu1 %3039 }
 0x465   : > { %v4252_v30 = vmul.f32 %v7504_v47, %v10274_v2  ;;  %v10638_v62 = vpop.xlane.xlu0 %3036  ;;  %v10642_v3 = vpop.eup %7505  ;;  %v10650_v2 = vunpack.c.l.bf16 %v7309_v50  ;;  %v3563_v47 = vmul.f32 1.442695, %v3394_v21 }
 0x466   : > { %v10644_v5 = vpop.eup %7507  ;;  %v3788_v14 = vsel %vm2968_vm1, %v10642_v3, 0.0 }
 0x467   : > { %v4380_v6 = vpack.c.bf16 %v4252_v30, %v4252_v30  ;;  %13011 = vst [vmem:[#allocation120_spill] sm:$0xff] %v10650_v2  ;;  %v3854_v57 = vsel %vm2968_vm1, %v10644_v5, 0.0  ;;  %v10663_v50 = vadd.f32 %v10650_v2, %v10602_v22  ;;  %v10665_v40 = vpop.eup %7509  ;;  %v13013_v30 = vld [vmem:[#allocation115_spill] sm:$0xff]  ;;  %7513 = vpow2.f32 %v3563_v47 }
 0x468   : > { %v3371_v61 = vsub.f32 %v13013_v30, %v10427_v7 }
 0x469   : > { %v4516_v38 = vunpack.c.l.b16 %v4380_v6  ;;  %3183 = vmax.xlane.f32.xlu1 %v3182_v32  ;;  %v3857_v6 = vsel %vm2968_vm1, %v10665_v40, 0.0  ;;  %v3179_v32 = vsel %vm2968_vm1, %v10663_v50, -inf }
 0x46a   : > { %3789 = vadd.xlane.f32.xlu2 %v3788_v14  ;;  %v7512_v14 = vpop.eup %7511 }
 0x46b   : > { %3855 = vadd.xlane.f32.xlu0 %v3854_v57  ;;  %v4522_v48 = vpack.c.b16 %v4516_v38, %v4515_v49  ;;  %v10656_v45 = vpop.xlane.xlu2 %3051  ;;  %v3517_v49 = vmul.f32 1.442695, %v3371_v61  ;;  %v10677_v57 = vpop.f32.mrf.mxu1  ;;  %v4253_v7 = vmul.f32 %v7512_v14, %v10268_v60 }
 0x46c   : > { %13012 = vst [vmem:[#allocation103_spill] sm:$0xff] %v10656_v45  ;;  %v10659_v8 = vpop.xlane.xlu1 %3099 }
 0x46d   : > { %7002 = vmatmul.msk.bf16.gmra.mxu0 %vm2968_vm1, %v4522_v48  ;;  %v3097_v31 = vpop.xlane.xlu0 %3096  ;;  %v10675_v28 = vpop.eup %7513  ;;  %v4381_v61 = vpack.c.bf16 %v4253_v7, %v4253_v7 }
 0x46e   : > { %13014 = vst [vmem:[#allocation113_spill] sm:$0xff] %v10675_v28  ;;  %v3860_v48 = vsel %vm2968_vm1, %v10675_v28, 0.0 }
 0x46f   : > { %v4517_v60 = vunpack.c.l.b16 %v4381_v61 }
 0x472   : > { %3858 = vadd.xlane.f32.xlu2 %v3857_v6 }
 0x473   : > { %3180 = vmax.xlane.f32.xlu0 %v3179_v32  ;;  %v3760_v21 = vpop.xlane.xlu2 %3759  ;;  %v2296_v9 = vpop.f32.mrf.mxu1 }
 0x474   : > { %v10673_v22 = vpop.xlane.xlu1 %3102 }
 0x475   : > { %v3754_v38 = vpop.xlane.xlu0 %3753 }
 0x476   : > { %7515 = vrcp.f32 %v3754_v38 }
 0x477   : > { %7517 = vpow2.f32 %v3517_v49  ;;  %v3395_v49 = vsub.f32 %v10325_v54, %v3097_v31 }
 0x478   : > { %7519 = vrcp.f32 %v3760_v21 }
 0x47b   : > { %3861 = vadd.xlane.f32.xlu0 %v3860_v48  ;;  %v10682_v30 = vpop.xlane.xlu2 %3834 }
 0x47c   : > { %v7516_v47 = vpop.eup %7515  ;;  %v10687_v38 = vpop.xlane.xlu1 %3048 }
 0x47d   : > { %v4254_v6 = vmul.f32 %v7516_v47, %v10351_v55  ;;  %v10685_v32 = vpop.xlane.xlu0 %3045  ;;  %13015 = vst [vmem:[#allocation82_spill] sm:$0xff] %v10687_v38  ;;  %v10689_v45 = vpop.eup %7517  ;;  %v3565_v55 = vmul.f32 1.442695, %v3395_v49 }
 0x47e   : > { %13016 = vst [vmem:[#allocation47_spill] sm:$0xff] %v10689_v45  ;;  %v3791_v48 = vsel %vm2968_vm1, %v10689_v45, 0.0  ;;  %v7520_v54 = vpop.eup %7519 }
 0x47f   : > { %v4382_v2 = vpack.c.bf16 %v4254_v6, %v4254_v6  ;;  %v10698_v6 = vadd.f32 %v10401_v13, %v2296_v9  ;;  %v10757_v13 = vpop.f32.mrf.mxu1 }
 0x481   : > { %v4518_v14 = vunpack.c.l.b16 %v4382_v2  ;;  %v4256_v2 = vmul.f32 %v7520_v54, %v10345_v23  ;;  %v3188_v31 = vsel %vm2968_vm1, %v10698_v6, -inf }
 0x483   : > { %3792 = vadd.xlane.f32.xlu0 %v3791_v48  ;;  %v4523_v7 = vpack.c.b16 %v4518_v14, %v4517_v60  ;;  %v10694_v28 = vpop.xlane.xlu2 %3060  ;;  %v4384_v9 = vpack.c.bf16 %v4256_v2, %v4256_v2 }
 0x484   : > { %13017 = vst [vmem:[#allocation96_spill] sm:$0xff] %v10694_v28  ;;  %v3757_v38 = vpop.xlane.xlu1 %3756 }
 0x485   : > { %7003 = vmatmul.msk.bf16.gmra.mxu0 %vm2968_vm1, %v4523_v7  ;;  %v3763_v47 = vpop.xlane.xlu0 %3762  ;;  %7521 = vrcp.f32 %v3757_v38 }
 0x486   : > { %7523 = vrcp.f32 %v3763_v47 }
 0x487   : > { %7525 = vpow2.f32 %v3565_v55 }
 0x48b   : > { %3189 = vmax.xlane.f32.xlu0 %v3188_v31  ;;  %v3166_v21 = vpop.xlane.xlu2 %3165  ;;  %v7522_v61 = vpop.eup %7521 }
 0x48c   : > { %v3418_v49 = vsub.f32 %v10411_v16, %v3166_v21  ;;  %v3766_v14 = vpop.xlane.xlu1 %3765  ;;  %v7524_v48 = vpop.eup %7523  ;;  %v4255_v7 = vmul.f32 %v7522_v61, %v10395_v41  ;;  %v4520_v16 = vunpack.c.l.b16 %v4384_v9  ;;  %v13022_v9 = vld [vmem:[#allocation79_spill] sm:$0xff] }
 0x48d   : > { %v10704_v60 = vpop.xlane.xlu0 %3108  ;;  %7527 = vrcp.f32 %v3766_v14  ;;  %v10707_v38 = vpop.eup %7525  ;;  %v4257_v47 = vmul.f32 %v7524_v48, %v10397_v59 }
 0x48e   : > { %13018 = vst [vmem:[#allocation83_spill] sm:$0xff] %v10707_v38  ;;  %v3611_v55 = vmul.f32 1.442695, %v3418_v49  ;;  %v4383_v23 = vpack.c.bf16 %v4255_v7, %v4255_v7  ;;  %v3863_v54 = vsel %vm2968_vm1, %v10707_v38, 0.0  ;;  %v10722_v14 = vpop.f32.mrf.mxu0  ;;  %v5224_v7 = vunpack.c.l.b16 %v13022_v9 }
 0x48f   : > { %v4385_v45 = vpack.c.bf16 %v4257_v47, %v4257_v47 }
 0x490   : > { %7529 = vpow2.f32 %v3611_v55  ;;  %v4519_v31 = vunpack.c.l.b16 %v4383_v23 }
 0x491   : > { %v4590_v23 = vunpack.c.l.b16 %v4385_v45  ;;  %7531 = vrcp.f32 %v10682_v30 }
 0x492   : > { %v4524_v2 = vpack.c.b16 %v4520_v16, %v4519_v31  ;;  %v13024_v31 = vld [vmem:[#allocation74_spill] sm:$0xff] }
 0x493   : > { %3864 = vadd.xlane.f32.xlu0 %v3863_v54  ;;  %v7528_v21 = vpop.eup %7527  ;;  %v10712_v28 = vpop.xlane.xlu2 %3117  ;;  %v5223_v16 = vunpack.c.l.b16 %v13024_v31 }
 0x494   : > { %v4258_v41 = vmul.f32 %v7528_v21, %v10417_v63  ;;  %v10717_v49 = vpop.xlane.xlu1 %3057  ;;  %v13023_v63 = vld [vmem:[#allocation76_spill] sm:$0xff] }
 0x495   : > { %v10715_v61 = vpop.xlane.xlu0 %3054  ;;  %13020 = vst [vmem:[#allocation104_spill] sm:$0xff] %v10717_v49  ;;  %7004 = vmatmul.msk.bf16.gmra.mxu0 %vm2968_vm1, %v4524_v2  ;;  %v5225_v54 = vunpack.c.l.b16 %v13023_v63  ;;  %v10731_v2 = vadd.f32 %v10444_v10, %v10677_v57  ;;  %v13026_v63 = vld [vmem:[#allocation69_spill] sm:$0xff]  ;;  %v3372_v57 = vsub.f32 %v10225_v26, %v10573_v20 }
 0x496   : > { %13019 = vst [vmem:[#allocation94_spill] sm:$0xff] %v10715_v61  ;;  %v10720_v59 = vpop.eup %7529  ;;  %v4386_v48 = vpack.c.bf16 %v4258_v41, %v4258_v41  ;;  %v13025_v41 = vld [vmem:[#allocation68_spill] sm:$0xff] }
 0x497   : > { %13021 = vst [vmem:[#allocation116_spill] sm:$0xff] %v10720_v59  ;;  %v3932_v55 = vsel %vm2968_vm1, %v10720_v59, 0.0  ;;  %v5229_v49 = vpack.c.b16 %v5225_v54, %v5224_v7  ;;  %v5222_v9 = vunpack.c.l.b16 %v13025_v41  ;;  %v3185_v31 = vsel %vm2968_vm1, %v10731_v2, -inf  ;;  %v13027_v41 = vld [vmem:[#allocation67_spill] sm:$0xff]  ;;  %v7532_v10 = vpop.eup %7531  ;;  %v13029_v59 = vld [vmem:[#allocation54_spill] sm:$0xff] }
 0x498   : > { %v4591_v47 = vunpack.c.l.b16 %v4386_v48  ;;  %3933 = vadd.xlane.f32.xlu2 %v3932_v55  ;;  %v7310_v48 = vld [vmem:[#allocation8 + $0x60] sm:$0xff]  }
 0x499   : > { %v5228_v7 = vpack.c.b16 %v5223_v16, %v5222_v9 }
 0x49a   : > { %v4598_v21 = vpack.c.b16 %v4591_v47, %v4590_v23  ;;  %v5221_v23 = vunpack.c.l.b16 %v13026_v63  ;;  %v10741_v47 = vunpack.c.h.bf16 %v7310_v48  ;;  %v3519_v63 = vmul.f32 1.442695, %v3372_v57 }
 0x49b   : > { %v10733_v61 = vpop.xlane.xlu2 %3840 }
 0x49c   : > { %7005 = vmatmul.msk.bf16.vlgmr.msrb.gmra.mxu1 %vm2968_vm1, %v4598_v21  ;;  %v3163_v45 = vpop.xlane.xlu1 %3162  ;;  %v2527_v21 = vpop.f32.mrf.mxu0 }
 0x49d   : > { %v10737_v38 = vpop.xlane.xlu0 %3111  ;;  %5250 = vmatpush.bf16.msrb.mxu1 %v5229_v49  ;;  %v3417_v55 = vsub.f32 %v10457_v52, %v3163_v45  ;;  %v5220_v49 = vunpack.c.l.b16 %v13027_v41  ;;  %v13028_v52 = vld [vmem:[#allocation56_spill] sm:$0xff]  ;;  %v10751_v9 = vadd.f32 %v10741_v47, %v2527_v21  ;;  %v4281_v41 = vmul.f32 %v7532_v10, %v10367_v33 }
 0x49e   : > { %v5218_v45 = vunpack.c.l.b16 %v13028_v52  ;;  %v13032_v10 = vld [vmem:[#allocation44_spill] sm:$0xff] }
 0x49f   : > { %v3609_v54 = vmul.f32 1.442695, %v3417_v55  ;;  %v5227_v16 = vpack.c.b16 %v5221_v23, %v5220_v49  ;;  %v3260_v57 = vsel %vm2968_vm1, %v10751_v9, -inf }
 0x4a0   : > { %3186 = vmax.xlane.f32.xlu2 %v3185_v31  ;;  %v5219_v31 = vunpack.c.l.b16 %v13029_v59 }
 0x4a1   : > { %5251 = vmatpush.bf16.msrb.mxu1 %v5228_v7  ;;  %7533 = vpow2.f32 %v3609_v54  ;;  %v13030_v7 = vld [vmem:[#allocation128_spill] sm:$0xff] }
 0x4a2   : > { %v3373_v23 = vsub.f32 %v13030_v7, %v10575_v18  ;;  %v5226_v21 = vpack.c.b16 %v5219_v31, %v5218_v45  ;;  %v4409_v18 = vpack.c.bf16 %v4281_v41, %v4281_v41  ;;  %v2301_v31 = vpop.f32.mrf.mxu1  ;;  %v3396_v7 = vsub.f32 %v10329_v36, %v10659_v8 }
 0x4a3   : > { %v3172_v26 = vpop.xlane.xlu2 %3171  ;;  %v10781_v41 = vunpack.c.l.bf16 %v7310_v48 }
 0x4a4   : > { %v3420_v20 = vsub.f32 %v10481_v0, %v3172_v26  ;;  %v10754_v55 = vpop.xlane.xlu1 %3114  ;;  %v3521_v49 = vmul.f32 1.442695, %v3373_v23 }
 0x4a5   : > { %v3838_v30 = vpop.xlane.xlu0 %3837  ;;  %5252 = vmatpush.bf16.msrb.mxu1 %v5227_v16 }
 0x4a6   : > { %7535 = vrcp.f32 %v3838_v30  ;;  %v3615_v54 = vmul.f32 1.442695, %v3420_v20  ;;  %v5455_v30 = vunpack.c.l.b16 %v13032_v10 }
 0x4a7   : > { %7537 = vpow2.f32 %v3519_v63  ;;  %v10763_v0 = vpop.eup %7533 }
 0x4a8   : > { %7539 = vpow2.f32 %v3615_v54  ;;  %3261 = vmax.xlane.f32.xlu2 %v3260_v57  ;;  %v3929_v59 = vsel %vm2968_vm1, %v10763_v0, 0.0 }
 0x4a9   : > { %5253 = vmatpush.bf16.msrb.mxu1 %v5226_v21  ;;  %3930 = vadd.xlane.f32.xlu1 %v3929_v59  ;;  %7541 = vpow2.f32 %v3521_v49  ;;  %v13033_v21 = vld [vmem:[#allocation43_spill] sm:$0xff] }
 0x4aa   : > { %v5456_v57 = vunpack.c.l.b16 %v13033_v21 }
 0x4ab   : > { %v10783_v59 = vpop.xlane.xlu2 %3846 }
 0x4ac   : > { %v7536_v52 = vpop.eup %7535  ;;  %v3772_v16 = vpop.xlane.xlu1 %3771  ;;  %v5460_v8 = vpack.c.b16 %v5456_v57, %v5455_v30 }
 0x4ad   : > { %v4282_v45 = vmul.f32 %v7536_v52, %v10488_v37  ;;  %v10769_v63 = vpop.xlane.xlu0 %3063  ;;  %v10771_v26 = vpop.eup %7537  ;;  %7543 = vrcp.f32 %v3772_v16  ;;  %v4821_v37 = vunpack.c.l.b16 %v4409_v18  ;;  %v3567_v16 = vmul.f32 1.442695, %v3396_v7  ;;  %v13035_v18 = vld [vmem:[#allocation27_spill] sm:$0xff] }
 0x4ae   : > { %13031 = vst [vmem:[#allocation75_spill] sm:$0xff] %v10769_v63  ;;  %v10773_v20 = vpop.eup %7539  ;;  %v3794_v49 = vsel %vm2968_vm1, %v10771_v26, 0.0  ;;  %v10794_v63 = vadd.f32 %v10781_v41, %v10722_v14  ;;  %v13036_v7 = vld [vmem:[#allocation31_spill] sm:$0xff] }
 0x4af   : > { %v4410_v33 = vpack.c.bf16 %v4282_v45, %v4282_v45  ;;  %v3938_v23 = vsel %vm2968_vm1, %v10773_v20, 0.0  ;;  %v13034_v45 = vld [vmem:[#allocation40_spill] sm:$0xff]  ;;  %v10788_v10 = vpop.eup %7541 }
 0x4b0   : > { %3939 = vadd.xlane.f32.xlu0 %v3938_v23  ;;  %v5454_v36 = vunpack.c.l.b16 %v13034_v45  ;;  %v3797_v45 = vsel %vm2968_vm1, %v10788_v10, 0.0 }
 0x4b1   : > { %v4822_v54 = vunpack.c.l.b16 %v4410_v33  ;;  %3795 = vadd.xlane.f32.xlu1 %v3794_v49  ;;  %v5453_v33 = vunpack.c.l.b16 %v13035_v18  ;;  %v2068_v49 = vpop.f32.mrf.mxu2  ;;  %v13037_v18 = vld [vmem:[#allocation28_spill] sm:$0xff] }
 0x4b3   : > { %v4829_v52 = vpack.c.b16 %v4822_v54, %v4821_v37  ;;  %v7544_v21 = vpop.eup %7543  ;;  %v3397_v37 = vsub.f32 %v10349_v51, %v10673_v22  ;;  %v5452_v54 = vunpack.c.l.b16 %v13036_v7  ;;  %v5459_v57 = vpack.c.b16 %v5454_v36, %v5453_v33  ;;  %v10805_v22 = vpop.f32.mrf.mxu1 }
 0x4b4   : > { %v3169_v23 = vpop.xlane.xlu1 %3168  ;;  %v4260_v14 = vmul.f32 %v7544_v21, %v10511_v19  ;;  %v5451_v51 = vunpack.c.l.b16 %v13037_v18  ;;  %v3257_v36 = vsel %vm2968_vm1, %v10794_v63, -inf  ;;  %v3178_v19 = vpop.xlane.xlu2 %3177 }
 0x4b5   : > { %7017 = vmatmul.msk.bf16.vlgmr.msrb.gmra.mxu0 %vm2968_vm1, %v4829_v52  ;;  %v3769_v48 = vpop.xlane.xlu0 %3768  ;;  %v3419_v30 = vsub.f32 %v10534_v58, %v3169_v23  ;;  %v3569_v58 = vmul.f32 1.442695, %v3397_v37  ;;  %v3422_v18 = vsub.f32 %v10530_v17, %v3178_v19 }
 0x4b6   : > { %5481 = vmatpush.bf16.msrb.mxu0 %v5460_v8  ;;  %7545 = vrcp.f32 %v3769_v48  ;;  %v5458_v23 = vpack.c.b16 %v5452_v54, %v5451_v51  ;;  %v4388_v48 = vpack.c.bf16 %v4260_v14, %v4260_v14  ;;  %v13040_v14 = vld [vmem:[#allocation124_spill] sm:$0xff] }
 0x4b7   : > { %7547 = vpow2.f32 %v3567_v16  ;;  %v3613_v52 = vmul.f32 1.442695, %v3419_v30  ;;  %v13038_v16 = vld [vmem:[#allocation19_spill] sm:$0xff]  ;;  %v3374_v51 = vsub.f32 %v13040_v14, %v10527_v39  ;;  %v3619_v19 = vmul.f32 1.442695, %v3422_v18 }
 0x4b8   : > { %7549 = vrcp.f32 %v10733_v61  ;;  %3798 = vadd.xlane.f32.xlu0 %v3797_v45  ;;  %v5449_v33 = vunpack.c.l.b16 %v13038_v16  ;;  %v10811_v61 = vadd.f32 %v10465_v1, %v2301_v31  ;;  %v4593_v16 = vunpack.c.l.b16 %v4388_v48  ;;  %v13042_v48 = vld [vmem:[#allocation114_spill] sm:$0xff]  ;;  %v13043_v18 = vld [vmem:[#allocation91_spill] sm:$0xff] }
 0x4b9   : > { %7551 = vpow2.f32 %v3613_v52  ;;  %3258 = vmax.xlane.f32.xlu1 %v3257_v36 }
 0x4ba   : > { %5482 = vmatpush.bf16.msrb.mxu0 %v5459_v57  ;;  %v13039_v57 = vld [vmem:[#allocation18_spill] sm:$0xff]  ;;  %7553 = vpow2.f32 %v3569_v58 }
 0x4bb   : > { %v5450_v52 = vunpack.c.l.b16 %v13039_v57 }
 0x4bc   : > { %v7546_v8 = vpop.eup %7545  ;;  %v3778_v30 = vpop.xlane.xlu1 %3777 }
 0x4bd   : > { %v4259_v21 = vmul.f32 %v7546_v8, %v10536_v11  ;;  %v3844_v7 = vpop.xlane.xlu0 %3843  ;;  %v10814_v37 = vpop.eup %7547  ;;  %v5457_v31 = vpack.c.b16 %v5450_v52, %v5449_v33  ;;  %v3194_v11 = vsel %vm2968_vm1, %v10811_v61, -inf  ;;  %v13041_v52 = vld [vmem:[#allocation109_spill] sm:$0xff] }
 0x4be   : > { %5483 = vmatpush.bf16.msrb.mxu0 %v5458_v23  ;;  %v7550_v45 = vpop.eup %7549  ;;  %7555 = vrcp.f32 %v3844_v7  ;;  %v2070_v23 = vpop.f32.mrf.mxu2  ;;  %v3866_v33 = vsel %vm2968_vm1, %v10814_v37, 0.0  ;;  %v3523_v7 = vmul.f32 1.442695, %v3374_v51 }
 0x4bf   : > { %v4387_v36 = vpack.c.bf16 %v4259_v21, %v4259_v21  ;;  %v10818_v54 = vpop.eup %7551  ;;  %7557 = vrcp.f32 %v3778_v30  ;;  %v4283_v17 = vmul.f32 %v7550_v45, %v10453_v46  ;;  %v10831_v30 = vpop.f32.mrf.mxu1  ;;  %v10837_v14 = vadd.f32 %v13042_v48, %v2070_v23 }
 0x4c0   : > { %3195 = vmax.xlane.f32.xlu0 %v3194_v11  ;;  %v3935_v58 = vsel %vm2968_vm1, %v10818_v54, 0.0  ;;  %v10829_v21 = vpop.eup %7553  ;;  %v3375_v11 = vsub.f32 %v13043_v18, %v10638_v62  ;;  %v2530_v51 = vpop.f32.mrf.mxu0 }
 0x4c1   : > { %v4592_v8 = vunpack.c.l.b16 %v4387_v36  ;;  %3936 = vadd.xlane.f32.xlu2 %v3935_v58  ;;  %3867 = vadd.xlane.f32.xlu1 %v3866_v33  ;;  %v10834_v36 = vadd.f32 %v13041_v52, %v2068_v49  ;;  %v4411_v58 = vpack.c.bf16 %v4283_v17, %v4283_v17  ;;  %v3122_v33 = vsel %vm2968_vm1, %v10837_v14, -inf }
 0x4c2   : > { %5484 = vmatpush.bf16.msrb.mxu0 %v5457_v31  ;;  %v3525_v62 = vmul.f32 1.442695, %v3375_v11 }
 0x4c3   : > { %v4599_v39 = vpack.c.b16 %v4593_v16, %v4592_v8  ;;  %v3869_v16 = vsel %vm2968_vm1, %v10829_v21, 0.0  ;;  %v4823_v17 = vunpack.c.l.b16 %v4411_v58  ;;  %v13044_v58 = vld [vmem:[#allocation89_spill] sm:$0xff] }
 0x4c4   : > { %v7556_v57 = vpop.eup %7555  ;;  %v3175_v46 = vpop.xlane.xlu1 %3174 }
 0x4c5   : > { %7006 = vmatmul.msk.bf16.gmra.mxu1 %vm2968_vm1, %v4599_v39  ;;  %v3775_v45 = vpop.xlane.xlu0 %3774  ;;  %v7558_v31 = vpop.eup %7557  ;;  %v4284_v8 = vmul.f32 %v7556_v57, %v10552_v27  ;;  %v3119_v27 = vsel %vm2968_vm1, %v10834_v36, -inf }
 0x4c6   : > { %7559 = vrcp.f32 %v3775_v45  ;;  %v4262_v23 = vmul.f32 %v7558_v31, %v10550_v53  ;;  %v7311_v45 = vld [vmem:[#allocation8 + $0x68] sm:$0xff]   ;;  %v10855_v53 = vadd.f32 %v10521_v24, %v10757_v13 }
 0x4c7   : > { %7561 = vpow2.f32 %v3619_v19  ;;  %v4412_v49 = vpack.c.bf16 %v4284_v8, %v4284_v8  ;;  %v10860_v8 = vpop.f32.mrf.mxu1 }
 0x4c8   : > { %7563 = vpow2.f32 %v3523_v7  ;;  %3870 = vadd.xlane.f32.xlu0 %v3869_v16 }
 0x4c9   : > { %7565 = vrcp.f32 %v10783_v59  ;;  %3123 = vmax.xlane.f32.xlu2 %v3122_v33  ;;  %v4824_v19 = vunpack.c.l.b16 %v4412_v49  ;;  %3120 = vmax.xlane.f32.xlu1 %v3119_v27  ;;  %v4390_v59 = vpack.c.bf16 %v4262_v23, %v4262_v23  ;;  %v3398_v49 = vsub.f32 %v13044_v58, %v10635_v12  ;;  %v13047_v58 = vld [vmem:[#allocation102_spill] sm:$0xff] }
 0x4ca   : > { %7567 = vpow2.f32 %v3525_v62  ;;  %v3421_v27 = vsub.f32 %v10567_v15, %v3175_v46  ;;  %v10866_v23 = vunpack.c.l.bf16 %v7311_v45  ;;  %v3191_v12 = vsel %vm2968_vm1, %v10855_v53, -inf }
 0x4cb   : > { %v4830_v7 = vpack.c.b16 %v4824_v19, %v4823_v17  ;;  %v10870_v17 = vunpack.c.h.bf16 %v7311_v45  ;;  %v4595_v19 = vunpack.c.l.b16 %v4390_v59 }
 0x4cc   : > { %v7560_v39 = vpop.eup %7559  ;;  %v3784_v18 = vpop.xlane.xlu1 %3783  ;;  %13045 = vst [vmem:[#allocation106_spill] sm:$0xff] %v10866_v23  ;;  %v3617_v46 = vmul.f32 1.442695, %v3421_v27 }
 0x4cd   : > { %v10851_v57 = vpop.eup %7561  ;;  %v4261_v31 = vmul.f32 %v7560_v39, %v10577_v34  ;;  %7018 = vmatmul.msk.bf16.gmra.mxu0 %vm2968_vm1, %v4830_v7  ;;  %v3850_v16 = vpop.xlane.xlu0 %3849  ;;  %13046 = vst [vmem:[#allocation122_spill] sm:$0xff] %v10870_v17  ;;  %v3571_v7 = vmul.f32 1.442695, %v3398_v49 }
 0x4ce   : > { %v10858_v11 = vpop.eup %7563  ;;  %7569 = vrcp.f32 %v3850_v16  ;;  %v3944_v34 = vsel %vm2968_vm1, %v10851_v57, 0.0  ;;  %v2532_v39 = vpop.f32.mrf.mxu0 }
 0x4cf   : > { %v7566_v33 = vpop.eup %7565  ;;  %v4389_v13 = vpack.c.bf16 %v4261_v31, %v4261_v31  ;;  %7571 = vrcp.f32 %v3784_v18  ;;  %v3800_v15 = vsel %vm2968_vm1, %v10858_v11, 0.0  ;;  %v10883_v59 = vadd.f32 %v10870_v17, %v2532_v39  ;;  %v13049_v18 = vld [vmem:[#allocation49_spill] sm:$0xff] }
 0x4d0   : > { %3945 = vadd.xlane.f32.xlu0 %v3944_v34  ;;  %v4285_v24 = vmul.f32 %v7566_v33, %v13047_v58  ;;  %v10877_v45 = vpop.eup %7567  ;;  %v10880_v34 = vadd.f32 %v10866_v23, %v2530_v51  ;;  %7573 = vpow2.f32 %v3571_v7  ;;  %v3399_v33 = vsub.f32 %v13049_v18, %v10704_v60  ;;  %v10889_v58 = vpop.f32.mrf.mxu1  ;;  %v13050_v18 = vld [vmem:[#allocation112_spill] sm:$0xff] }
 0x4d1   : > { %v4594_v62 = vunpack.c.l.b16 %v4389_v13  ;;  %3192 = vmax.xlane.f32.xlu2 %v3191_v12  ;;  %3801 = vadd.xlane.f32.xlu1 %v3800_v15  ;;  %13048 = vst [vmem:[#allocation107_spill] sm:$0xff] %v10877_v45  ;;  %7575 = vpow2.f32 %v3617_v46  ;;  %v2073_v51 = vpop.f32.mrf.mxu2  ;;  %v3803_v39 = vsel %vm2968_vm1, %v10877_v45, 0.0 }
 0x4d2   : > { %v4413_v13 = vpack.c.bf16 %v4285_v24, %v4285_v24  ;;  %v3263_v60 = vsel %vm2968_vm1, %v10880_v34, -inf  ;;  %v3266_v24 = vsel %vm2968_vm1, %v10883_v59, -inf }
 0x4d3   : > { %v4600_v31 = vpack.c.b16 %v4595_v19, %v4594_v62 }
 0x4d4   : > { %v7570_v16 = vpop.eup %7569  ;;  %v3787_v49 = vpop.xlane.xlu1 %3786  ;;  %v4825_v7 = vunpack.c.l.b16 %v4413_v13 }
 0x4d5   : > { %7007 = vmatmul.msk.bf16.gmra.mxu1 %vm2968_vm1, %v4600_v31  ;;  %v4286_v27 = vmul.f32 %v7570_v16, %v10599_v29  ;;  %v3853_v12 = vpop.xlane.xlu2 %3852  ;;  %v7572_v19 = vpop.eup %7571  ;;  %v3573_v29 = vmul.f32 1.442695, %v3399_v33 }
 0x4d6   : > { %v3781_v62 = vpop.xlane.xlu0 %3780  ;;  %v4264_v31 = vmul.f32 %v7572_v19, %v10595_v43  ;;  %v10898_v16 = vpop.eup %7573 }
 0x4d7   : > { %v4414_v15 = vpack.c.bf16 %v4286_v27, %v4286_v27  ;;  %7577 = vrcp.f32 %v3781_v62  ;;  %v10904_v62 = vpop.eup %7575 }
 0x4d8   : > { %7579 = vrcp.f32 %v3787_v49  ;;  %3804 = vadd.xlane.f32.xlu0 %v3803_v39  ;;  %v10902_v49 = vadd.f32 %v13050_v18, %v10831_v30  ;;  %v13052_v30 = vld [vmem:[#allocation92_spill] sm:$0xff] }
 0x4d9   : > { %7581 = vrcp.f32 %v3853_v12  ;;  %3267 = vmax.xlane.f32.xlu2 %v3266_v24  ;;  %v4826_v46 = vunpack.c.l.b16 %v4414_v15  ;;  %3264 = vmax.xlane.f32.xlu1 %v3263_v60  ;;  %v4392_v15 = vpack.c.bf16 %v4264_v31, %v4264_v31  ;;  %v3376_v24 = vsub.f32 %v13052_v30, %v10640_v35  ;;  %v2075_v31 = vpop.f32.mrf.mxu2 }
 0x4da   : > { %13051 = vst [vmem:[#allocation51_spill] sm:$0xff] %v10902_v49  ;;  %7583 = vpow2.f32 %v3573_v29 }
 0x4db   : > { %v4831_v27 = vpack.c.b16 %v4826_v46, %v4825_v7  ;;  %v3200_v7 = vsel %vm2968_vm1, %v10902_v49, -inf  ;;  %v3941_v46 = vsel %vm2968_vm1, %v10904_v62, 0.0 }
 0x4dc   : > { %v3184_v39 = vpop.xlane.xlu1 %3183 }
 0x4dd   : > { %v7578_v23 = vpop.eup %7577  ;;  %v3790_v33 = vpop.xlane.xlu2 %3789  ;;  %7019 = vmatmul.msk.bf16.gmra.mxu0 %vm2968_vm1, %v4831_v27  ;;  %v3424_v19 = vsub.f32 %v10633_v4, %v3184_v39  ;;  %v3872_v4 = vsel %vm2968_vm1, %v10898_v16, 0.0 }
 0x4de   : > { %v3856_v13 = vpop.xlane.xlu0 %3855  ;;  %v7580_v12 = vpop.eup %7579  ;;  %v4263_v43 = vmul.f32 %v7578_v23, %v10618_v42  ;;  %7585 = vrcp.f32 %v3790_v33  ;;  %v4597_v33 = vunpack.c.l.b16 %v4392_v15 }
 0x4df   : > { %v7582_v60 = vpop.eup %7581  ;;  %7587 = vrcp.f32 %v3856_v13  ;;  %v10915_v27 = vpop.f32.mrf.mxu1  ;;  %v4265_v42 = vmul.f32 %v7580_v12, %v10615_v56  ;;  %v3623_v23 = vmul.f32 1.442695, %v3424_v19  ;;  %v13055_v56 = vld [vmem:[#allocation117_spill] sm:$0xff] }
 0x4e0   : > { %v4391_v29 = vpack.c.bf16 %v4263_v43, %v4263_v43  ;;  %3201 = vmax.xlane.f32.xlu0 %v3200_v7  ;;  %v4287_v35 = vmul.f32 %v7582_v60, %v10620_v25  ;;  %v10921_v13 = vpop.eup %7583  ;;  %v3527_v43 = vmul.f32 1.442695, %v3376_v24  ;;  %v13054_v7 = vld [vmem:[#allocation121_spill] sm:$0xff]  ;;  %v10927_v12 = vadd.f32 %v13055_v56, %v2073_v51 }
 0x4e1   : > { %3942 = vadd.xlane.f32.xlu2 %v3941_v46  ;;  %3873 = vadd.xlane.f32.xlu1 %v3872_v4  ;;  %13053 = vst [vmem:[#allocation105_spill] sm:$0xff] %v10921_v13  ;;  %v10924_v18 = vadd.f32 %v13054_v7, %v2075_v31  ;;  %v13056_v46 = vld [vmem:[#allocation129_spill] sm:$0xff]  ;;  %v4393_v25 = vpack.c.bf16 %v4265_v42, %v4265_v42  ;;  %7589 = vpow2.f32 %v3623_v23  ;;  %v2535_v31 = vpop.f32.mrf.mxu0  ;;  %v3875_v51 = vsel %vm2968_vm1, %v10921_v13, 0.0 }
 0x4e2   : > { %v4596_v39 = vunpack.c.l.b16 %v4391_v29  ;;  %v3377_v45 = vsub.f32 %v13056_v46, %v10592_v44  ;;  %v4415_v29 = vpack.c.bf16 %v4287_v35, %v4287_v35  ;;  %7591 = vpow2.f32 %v3527_v43 }
 0x4e3   : > { %v4667_v35 = vunpack.c.l.b16 %v4393_v25 }
 0x4e4   : > { %v7586_v30 = vpop.eup %7585  ;;  %v4601_v49 = vpack.c.b16 %v4597_v33, %v4596_v39  ;;  %v13057_v39 = vld [vmem:[#allocation30_spill] sm:$0xff]  ;;  %v3529_v42 = vmul.f32 1.442695, %v3377_v45  ;;  %v4827_v43 = vunpack.c.l.b16 %v4415_v29 }
 0x4e5   : > { %v7588_v17 = vpop.eup %7587  ;;  %v4266_v19 = vmul.f32 %v7586_v30, %v10642_v3  ;;  %v3859_v60 = vpop.xlane.xlu2 %3858  ;;  %v5302_v33 = vunpack.c.l.b16 %v13057_v39  ;;  %v3128_v3 = vsel %vm2968_vm1, %v10924_v18, -inf  ;;  %v13061_v45 = vld [vmem:[#allocation118_spill] sm:$0xff] }
 0x4e6   : > { %v3181_v15 = vpop.xlane.xlu0 %3180  ;;  %v4288_v24 = vmul.f32 %v7588_v17, %v10644_v5  ;;  %7008 = vmatmul.msk.bf16.gmra.mxu1 %vm2968_vm1, %v4601_v49  ;;  %7593 = vrcp.f32 %v3859_v60  ;;  %v3125_v5 = vsel %vm2968_vm1, %v10927_v12, -inf  ;;  %v13058_v17 = vld [vmem:[#allocation41_spill] sm:$0xff]  ;;  %v10949_v25 = vadd.f32 %v13061_v45, %v10805_v22  ;;  %v13064_v22 = vld [vmem:[#allocation59_spill] sm:$0xff] }
 0x4e7   : > { %v4394_v4 = vpack.c.bf16 %v4266_v19, %v4266_v19  ;;  %v5301_v49 = vunpack.c.l.b16 %v13058_v17  ;;  %v10942_v46 = vpop.f32.mrf.mxu1  ;;  %v10944_v60 = vpop.eup %7589  ;;  %7595 = vpow2.f32 %v3529_v42  ;;  %v13072_v45 = vld [vmem:[#allocation61_spill] sm:$0xff] }
 0x4e8   : > { %v4416_v44 = vpack.c.bf16 %v4288_v24, %v4288_v24  ;;  %3876 = vadd.xlane.f32.xlu0 %v3875_v51  ;;  %13059 = vst [vmem:[#allocation37_spill] sm:$0xff] %v10944_v60  ;;  %v13060_v24 = vld [vmem:[#allocation42_spill] sm:$0xff]  ;;  %v10951_v56 = vpop.eup %7591  ;;  %v3950_v42 = vsel %vm2968_vm1, %v10944_v60, 0.0  ;;  %v13088_v60 = vld [vmem:[#allocation80_spill] sm:$0xff] }
 0x4e9   : > { %v4668_v23 = vunpack.c.l.b16 %v4394_v4  ;;  %3129 = vmax.xlane.f32.xlu2 %v3128_v3  ;;  %3126 = vmax.xlane.f32.xlu1 %v3125_v5  ;;  %v5299_v51 = vunpack.c.l.b16 %v13060_v24  ;;  %v5306_v39 = vpack.c.b16 %v5302_v33, %v5301_v49  ;;  %v13062_v3 = vld [vmem:[#allocation87_spill] sm:$0xff]  ;;  %v5298_v33 = vunpack.c.l.b16 %v13064_v22  ;;  %v13070_v22 = vld [vmem:[#allocation46_spill] sm:$0xff] }
 0x4ea   : > { %v4828_v30 = vunpack.c.l.b16 %v4416_v44  ;;  %v5300_v5 = vunpack.c.l.b16 %v13062_v3  ;;  %v3423_v49 = vsub.f32 %v10663_v50, %v3181_v15  ;;  %v3806_v50 = vsel %vm2968_vm1, %v10951_v56, 0.0  ;;  %v13068_v15 = vld [vmem:[#allocation86_spill] sm:$0xff] }
 0x4eb   : > { %v4675_v19 = vpack.c.b16 %v4668_v23, %v4667_v35  ;;  %v7312_v35 = vld [vmem:[#allocation8 + $0x70] sm:$0xff]   ;;  %v13063_v23 = vld [vmem:[#allocation20_spill] sm:$0xff] }
 0x4ec   : > { %v4832_v4 = vpack.c.b16 %v4828_v30, %v4827_v43  ;;  %v7594_v44 = vpop.eup %7593  ;;  %v3402_v17 = vsub.f32 %v13063_v23, %v10712_v28  ;;  %v5305_v43 = vpack.c.b16 %v5300_v5, %v5299_v51  ;;  %v10962_v30 = vunpack.c.h.bf16 %v7312_v35 }
 0x4ed   : > { %7009 = vmatmul.msk.bf16.vlgmr.msrb.gmra.mxu2 %vm2968_vm1, %v4675_v19  ;;  %v13066_v19 = vld [vmem:[#allocation98_spill] sm:$0xff]  ;;  %v3197_v28 = vsel %vm2968_vm1, %v10949_v25, -inf  ;;  %v5297_v51 = vunpack.c.l.b16 %v13068_v15  ;;  %v10974_v5 = vpop.eup %7595 }
 0x4ee   : > { %v3862_v29 = vpop.xlane.xlu0 %3861  ;;  %7020 = vmatmul.msk.bf16.gmra.mxu0 %vm2968_vm1, %v4832_v4  ;;  %5327 = vmatpush.bf16.msrb.mxu2 %v5306_v39  ;;  %13065 = vst [vmem:[#allocation38_spill] sm:$0xff] %v10962_v30  ;;  %v3400_v24 = vsub.f32 %v13066_v19, %v10737_v38  ;;  %v10968_v4 = vunpack.c.l.bf16 %v7312_v35  ;;  %v2537_v39 = vpop.f32.mrf.mxu0  ;;  %v3579_v3 = vmul.f32 1.442695, %v3402_v17  ;;  %v3621_v38 = vmul.f32 1.442695, %v3423_v49  ;;  %v13071_v17 = vld [vmem:[#allocation113_spill] sm:$0xff] }
 0x4ef   : > { %7597 = vrcp.f32 %v3862_v29  ;;  %v4289_v29 = vmul.f32 %v7594_v44, %v10665_v40  ;;  %13069 = vst [vmem:[#allocation26_spill] sm:$0xff] %v10974_v5  ;;  %v5304_v35 = vpack.c.b16 %v5298_v33, %v5297_v51  ;;  %v10978_v19 = vadd.f32 %v10962_v30, %v2537_v39  ;;  %v13073_v39 = vld [vmem:[#allocation85_spill] sm:$0xff] }
 0x4f0   : > { %3951 = vadd.xlane.f32.xlu0 %v3950_v42  ;;  %13067 = vst [vmem:[#allocation36_spill] sm:$0xff] %v10968_v4  ;;  %v5296_v42 = vunpack.c.l.b16 %v13070_v22  ;;  %v3575_v40 = vmul.f32 1.442695, %v3400_v24  ;;  %v10981_v44 = vadd.f32 %v10968_v4, %v2535_v31  ;;  %v5295_v49 = vunpack.c.l.b16 %v13072_v45  ;;  %v2078_v22 = vpop.f32.mrf.mxu2 }
 0x4f1   : > { %3198 = vmax.xlane.f32.xlu2 %v3197_v28  ;;  %3807 = vadd.xlane.f32.xlu1 %v3806_v50  ;;  %v10983_v28 = vpop.f32.mrf.mxu1  ;;  %v4417_v15 = vpack.c.bf16 %v4289_v29, %v4289_v29  ;;  %7599 = vpow2.f32 %v3579_v3  ;;  %v3809_v24 = vsel %vm2968_vm1, %v10974_v5, 0.0  ;;  %v5533_v31 = vunpack.c.l.b16 %v13073_v39  ;;  %v13074_v3 = vld [vmem:[#allocation81_spill] sm:$0xff] }
 0x4f2   : > { %5328 = vmatpush.bf16.msrb.mxu2 %v5305_v43  ;;  %7601 = vpow2.f32 %v3621_v38  ;;  %v5303_v51 = vpack.c.b16 %v5296_v42, %v5295_v49  ;;  %v3272_v29 = vsel %vm2968_vm1, %v10978_v19, -inf  ;;  %v3269_v45 = vsel %vm2968_vm1, %v10981_v44, -inf  ;;  %v13076_v39 = vld [vmem:[#allocation73_spill] sm:$0xff]  ;;  %v11000_v49 = vld [vmem:[#allocation8 + $0x78] sm:$0xff]  }
 0x4f3   : > { %7603 = vpow2.f32 %v3575_v40  ;;  %v5532_v38 = vunpack.c.l.b16 %v13074_v3  ;;  %v5530_v42 = vunpack.c.l.b16 %v13076_v39  ;;  %v11034_v13 = vadd.f32 %v13088_v60, %v2078_v22 }
 0x4f5   : > { %v7598_v23 = vpop.eup %7597  ;;  %v5537_v40 = vpack.c.b16 %v5533_v31, %v5532_v38  ;;  %v13081_v31 = vld [vmem:[#allocation66_spill] sm:$0xff]  ;;  %v3131_v22 = vsel %vm2968_vm1, %v11034_v13, -inf }
 0x4f6   : > { %v4290_v43 = vmul.f32 %v7598_v23, %v13071_v17  ;;  %v10986_v50 = vpop.xlane.xlu0 %3792  ;;  %5329 = vmatpush.bf16.msrb.mxu2 %v5304_v35  ;;  %v4898_v23 = vunpack.c.l.b16 %v4417_v15  ;;  %v13082_v38 = vld [vmem:[#allocation70_spill] sm:$0xff]  ;;  %v2540_v4 = vpop.f32.mrf.mxu0 }
 0x4f8   : > { %v4418_v33 = vpack.c.bf16 %v4290_v43, %v4290_v43  ;;  %3810 = vadd.xlane.f32.xlu0 %v3809_v24  ;;  %v10997_v43 = vpop.eup %7599 }
 0x4f9   : > { %3273 = vmax.xlane.f32.xlu2 %v3272_v29  ;;  %3270 = vmax.xlane.f32.xlu1 %v3269_v45  ;;  %13075 = vst [vmem:[#allocation111_spill] sm:$0xff] %v10997_v43  ;;  %v11002_v24 = vpop.eup %7601  ;;  %v13079_v29 = vld [vmem:[#allocation72_spill] sm:$0xff]  ;;  %v3401_v45 = vsub.f32 %v13081_v31, %v10754_v55  ;;  %v3884_v3 = vsel %vm2968_vm1, %v10997_v43, 0.0 }
 0x4fa   : > { %v4899_v17 = vunpack.c.l.b16 %v4418_v33  ;;  %5330 = vmatpush.bf16.msrb.mxu2 %v5303_v51  ;;  %13077 = vst [vmem:[#allocation23_spill] sm:$0xff] %v11002_v24  ;;  %v11005_v33 = vpop.eup %7603  ;;  %v5531_v30 = vunpack.c.l.b16 %v13079_v29  ;;  %v13083_v29 = vld [vmem:[#allocation55_spill] sm:$0xff]  ;;  %v13084_v55 = vld [vmem:[#allocation60_spill] sm:$0xff] }
 0x4fb   : > { %13078 = vst [vmem:[#allocation25_spill] sm:$0xff] %v11005_v33  ;;  %v3878_v5 = vsel %vm2968_vm1, %v11005_v33, 0.0  ;;  %v5528_v31 = vunpack.c.l.b16 %v13084_v55 }
 0x4fc   : > { %v4906_v35 = vpack.c.b16 %v4899_v17, %v4898_v23  ;;  %v11010_v23 = vunpack.c.l.bf16 %v11000_v49  ;;  %v11012_v17 = vpop.f32.mrf.mxu1  ;;  %v5536_v39 = vpack.c.b16 %v5531_v30, %v5530_v42  ;;  %v3577_v42 = vmul.f32 1.442695, %v3401_v45 }
 0x4fe   : > { %7021 = vmatmul.msk.bf16.vlgmr.msra.gmra.mxu1 %vm2968_vm1, %v4906_v35  ;;  %v3190_v15 = vpop.xlane.xlu0 %3189  ;;  %13080 = vst [vmem:[#allocation16_spill] sm:$0xff] %v11010_v23  ;;  %v5529_v35 = vunpack.c.l.b16 %v13082_v38  ;;  %v11027_v30 = vadd.f32 %v11010_v23, %v2540_v4  ;;  %v13086_v38 = vld [vmem:[#allocation62_spill] sm:$0xff] }
 0x4ff   : > { %5558 = vmatpush.bf16.msra.mxu1 %v5537_v40  ;;  %v3426_v51 = vsub.f32 %v10698_v6, %v3190_v15  ;;  %v3378_v40 = vsub.f32 %v13083_v29, %v10685_v32  ;;  %v3947_v6 = vsel %vm2968_vm1, %v11002_v24, 0.0  ;;  %v2080_v15 = vpop.f32.mrf.mxu2  ;;  %v5527_v32 = vunpack.c.l.b16 %v13086_v38  ;;  %v13087_v29 = vld [vmem:[#allocation39_spill] sm:$0xff] }
 0x500   : > { %3885 = vadd.xlane.f32.xlu0 %v3884_v3  ;;  %13085 = vst [vmem:[#allocation115_spill] sm:$0xff] %v11027_v30  ;;  %v5535_v3 = vpack.c.b16 %v5529_v35, %v5528_v31  ;;  %v11031_v43 = vadd.f32 %v13087_v29, %v2080_v15  ;;  %v3275_v4 = vsel %vm2968_vm1, %v11027_v30, -inf  ;;  %v2140_v15 = vpop.f32.mrf.mxu3  ;;  %v13092_v38 = vld [vmem:[#allocation71_spill] sm:$0xff] }
 0x501   : > { %3948 = vadd.xlane.f32.xlu2 %v3947_v6  ;;  %v3627_v7 = vmul.f32 1.442695, %v3426_v51  ;;  %3879 = vadd.xlane.f32.xlu1 %v3878_v5  ;;  %v3531_v24 = vmul.f32 1.442695, %v3378_v40  ;;  %v13089_v6 = vld [vmem:[#allocation58_spill] sm:$0xff] }
 0x502   : > { %v5526_v33 = vunpack.c.l.b16 %v13089_v6  ;;  %v3134_v51 = vsel %vm2968_vm1, %v11031_v43, -inf  ;;  %v13094_v6 = vld [vmem:[#allocation101_spill] sm:$0xff] }
 0x503   : > { %5559 = vmatpush.bf16.msra.mxu1 %v5536_v39  ;;  %7605 = vpow2.f32 %v3627_v7 }
 0x504   : > { %7607 = vpow2.f32 %v3577_v42  ;;  %v5534_v5 = vpack.c.b16 %v5527_v32, %v5526_v33  ;;  %v11041_v45 = vpop.f32.mrf.mxu1  ;;  %v11062_v32 = vadd.f32 %v13092_v38, %v2140_v15  ;;  %v13097_v38 = vld [vmem:[#allocation99_spill] sm:$0xff] }
 0x505   : > { %7609 = vpow2.f32 %v3531_v24 }
 0x506   : > { %13093 = vst [vmem:[#allocation74_spill] sm:$0xff] %v11062_v32 }
 0x507   : > { %5560 = vmatpush.bf16.msra.mxu1 %v5535_v3  ;;  %v11051_v24 = vpop.f32.mrf.mxu2 }
 0x508   : > { %3276 = vmax.xlane.f32.xlu0 %v3275_v4  ;;  %v11066_v4 = vadd.f32 %v13094_v6, %v10889_v58  ;;  %v11078_v58 = vunpack.c.h.bf16 %v11000_v49 }
 0x509   : > { %3135 = vmax.xlane.f32.xlu2 %v3134_v51  ;;  %3132 = vmax.xlane.f32.xlu1 %v3131_v22  ;;  %v11045_v35 = vpop.eup %7605  ;;  %v13095_v51 = vld [vmem:[#allocation120_spill] sm:$0xff] }
 0x50a   : > { %13090 = vst [vmem:[#allocation79_spill] sm:$0xff] %v11045_v35  ;;  %v11047_v39 = vpop.eup %7607  ;;  %v3956_v33 = vsel %vm2968_vm1, %v11045_v35, 0.0  ;;  %v11071_v22 = vadd.f32 %v13095_v51, %v10860_v8  ;;  %v3206_v15 = vsel %vm2968_vm1, %v11066_v4, -inf  ;;  %v2542_v8 = vpop.f32.mrf.mxu0  ;;  %v13103_v51 = vld [vmem:[#allocation21_spill] sm:$0xff]  ;;  %v13105_v35 = vld [vmem:[#allocation32_spill] sm:$0xff] }
 0x50b   : > { %5561 = vmatpush.bf16.msra.mxu1 %v5534_v5  ;;  %v3934_v7 = vpop.xlane.xlu2 %3933  ;;  %v11049_v40 = vpop.eup %7609  ;;  %v3881_v55 = vsel %vm2968_vm1, %v11047_v39, 0.0  ;;  %13096 = vst [vmem:[#allocation68_spill] sm:$0xff] %v11078_v58  ;;  %v11087_v23 = vadd.f32 %v11078_v58, %v2542_v8  ;;  %v11113_v30 = vadd.f32 %v13105_v35, %v11051_v24 }
 0x50c   : > { %v3812_v31 = vsel %vm2968_vm1, %v11049_v40, 0.0  ;;  %v11059_v42 = vpop.f32.mrf.mxu1  ;;  %7611 = vrcp.f32 %v3934_v7 }
 0x50d   : > { %13091 = vst [vmem:[#allocation76_spill] sm:$0xff] %v11059_v42  ;;  %v3278_v8 = vsel %vm2968_vm1, %v11087_v23, -inf }
 0x510   : > { %3957 = vadd.xlane.f32.xlu0 %v3956_v33 }
 0x511   : > { %3882 = vadd.xlane.f32.xlu2 %v3881_v55  ;;  %3813 = vadd.xlane.f32.xlu1 %v3812_v31  ;;  %v3137_v55 = vsel %vm2968_vm1, %v11062_v32, -inf  ;;  %v2373_v31 = vpop.f32.mrf.mxu2 }
 0x512   : > { %v11083_v7 = vadd.f32 %v13097_v38, %v2373_v31 }
 0x513   : > { %v3187_v3 = vpop.xlane.xlu2 %3186 }
 0x514   : > { %v3425_v5 = vsub.f32 %v10731_v2, %v3187_v3  ;;  %v3203_v2 = vsel %vm2968_vm1, %v11071_v22, -inf  ;;  %13098 = vst [vmem:[#allocation69_spill] sm:$0xff] %v11083_v7  ;;  %v3865_v3 = vpop.xlane.xlu0 %3864  ;;  %v11089_v6 = vpop.f32.mrf.mxu1  ;;  %v3212_v31 = vsel %vm2968_vm1, %v11083_v7, -inf  ;;  %v13102_v7 = vld [vmem:[#allocation103_spill] sm:$0xff] }
 0x515   : > { %13099 = vst [vmem:[#allocation67_spill] sm:$0xff] %v11089_v6 }
 0x516   : > { %v3625_v33 = vmul.f32 1.442695, %v3425_v5 }
 0x518   : > { %7613 = vpow2.f32 %v3625_v33  ;;  %3138 = vmax.xlane.f32.xlu0 %v3137_v55  ;;  %v7612_v55 = vpop.eup %7611 }
 0x519   : > { %3207 = vmax.xlane.f32.xlu2 %v3206_v15  ;;  %3204 = vmax.xlane.f32.xlu1 %v3203_v2 }
 0x51b   : > { %v3262_v5 = vpop.xlane.xlu2 %3261 }
 0x51c   : > { %v3450_v33 = vsub.f32 %v10751_v9, %v3262_v5  ;;  %v3931_v49 = vpop.xlane.xlu1 %3930  ;;  %v13101_v9 = vld [vmem:[#allocation116_spill] sm:$0xff] }
 0x51d   : > { %7615 = vrcp.f32 %v3931_v49  ;;  %v4314_v2 = vmul.f32 %v7612_v55, %v13101_v9  ;;  %v13104_v9 = vld [vmem:[#allocation47_spill] sm:$0xff] }
 0x51e   : > { %v11091_v29 = vpop.eup %7613  ;;  %v3675_v32 = vmul.f32 1.442695, %v3450_v33  ;;  %7617 = vrcp.f32 %v10986_v50 }
 0x51f   : > { %13100 = vst [vmem:[#allocation56_spill] sm:$0xff] %v11091_v29  ;;  %v3953_v15 = vsel %vm2968_vm1, %v11091_v29, 0.0  ;;  %v4442_v38 = vpack.c.bf16 %v4314_v2, %v4314_v2 }
 0x520   : > { %7619 = vpow2.f32 %v3675_v32  ;;  %3213 = vmax.xlane.f32.xlu0 %v3212_v31  ;;  %v3380_v32 = vsub.f32 %v13103_v51, %v13102_v7  ;;  %v11106_v31 = vpop.f32.mrf.mxu1 }
 0x521   : > { %3954 = vadd.xlane.f32.xlu2 %v3953_v15  ;;  %3279 = vmax.xlane.f32.xlu1 %v3278_v8  ;;  %v5130_v60 = vunpack.c.l.b16 %v4442_v38 }
 0x522   : > { %v3535_v2 = vmul.f32 1.442695, %v3380_v32 }
 0x523   : > { %v3940_v5 = vpop.xlane.xlu0 %3939  ;;  %v7616_v33 = vpop.eup %7615 }
 0x524   : > { %v7618_v49 = vpop.eup %7617  ;;  %v4313_v50 = vmul.f32 %v7616_v33, %v10763_v0  ;;  %v3796_v6 = vpop.xlane.xlu1 %3795 }
 0x525   : > { %7621 = vrcp.f32 %v3796_v6  ;;  %v4267_v8 = vmul.f32 %v7618_v49, %v13104_v9 }
 0x526   : > { %v11102_v58 = vpop.eup %7619  ;;  %v4441_v55 = vpack.c.bf16 %v4313_v50, %v4313_v50  ;;  %7623 = vpow2.f32 %v3535_v2 }
 0x527   : > { %v4028_v15 = vsel %vm2968_vm1, %v11102_v58, 0.0  ;;  %v4395_v6 = vpack.c.bf16 %v4267_v8, %v4267_v8  ;;  %7625 = vrcp.f32 %v3940_v5  ;;  %v13108_v8 = vld [vmem:[#allocation78_spill] sm:$0xff] }
 0x528   : > { %v5129_v42 = vunpack.c.l.b16 %v4441_v55  ;;  %v11118_v38 = vpop.f32.mrf.mxu1  ;;  %7627 = vrcp.f32 %v3865_v3 }
 0x529   : > { %4029 = vadd.xlane.f32.xlu2 %v4028_v15  ;;  %13106 = vst [vmem:[#allocation54_spill] sm:$0xff] %v11118_v38  ;;  %v4669_v24 = vunpack.c.l.b16 %v4395_v6 }
 0x52a   : > { %v5137_v0 = vpack.c.b16 %v5130_v60, %v5129_v42  ;;  %v3209_v42 = vsel %vm2968_vm1, %v11113_v30, -inf }
 0x52b   : > { %v3799_v33 = vpop.xlane.xlu0 %3798  ;;  %v7622_v29 = vpop.eup %7621 }
 0x52c   : > { %v4268_v51 = vmul.f32 %v7622_v29, %v10771_v26  ;;  %v3259_v7 = vpop.xlane.xlu1 %3258  ;;  %7033 = vmatmul.msk.bf16.vlgmr.msra.gmra.mxu0 %vm2968_vm1, %v5137_v0  ;;  %v11122_v55 = vpop.eup %7623 }
 0x52d   : > { %v3449_v49 = vsub.f32 %v10794_v63, %v3259_v7  ;;  %v7626_v9 = vpop.eup %7625  ;;  %v13107_v63 = vld [vmem:[#allocation82_spill] sm:$0xff]  ;;  %v3818_v7 = vsel %vm2968_vm1, %v11122_v55, 0.0 }
 0x52e   : > { %v4396_v50 = vpack.c.bf16 %v4268_v51, %v4268_v51  ;;  %v3379_v2 = vsub.f32 %v13108_v8, %v13107_v63  ;;  %v7628_v3 = vpop.eup %7627  ;;  %v4316_v51 = vmul.f32 %v7626_v9, %v10773_v20 }
 0x52f   : > { %v3673_v60 = vmul.f32 1.442695, %v3449_v49 }
 0x530   : > { %v4670_v32 = vunpack.c.l.b16 %v4396_v50  ;;  %v3533_v49 = vmul.f32 1.442695, %v3379_v2  ;;  %v13109_v50 = vld [vmem:[#allocation83_spill] sm:$0xff]  ;;  %v4444_v9 = vpack.c.bf16 %v4316_v51, %v4316_v51  ;;  %v13111_v2 = vld [vmem:[#allocation52_spill] sm:$0xff] }
 0x531   : > { %3210 = vmax.xlane.f32.xlu2 %v3209_v42  ;;  %7629 = vpow2.f32 %v3673_v60  ;;  %v4291_v60 = vmul.f32 %v7628_v3, %v13109_v50  ;;  %v11134_v42 = vpop.f32.mrf.mxu1 }
 0x532   : > { %v4676_v29 = vpack.c.b16 %v4670_v32, %v4669_v24  ;;  %13110 = vst [vmem:[#allocation128_spill] sm:$0xff] %v11134_v42  ;;  %v2142_v32 = vpop.f32.mrf.mxu3 }
 0x533   : > { %v3196_v26 = vpop.xlane.xlu0 %3195  ;;  %v4419_v3 = vpack.c.bf16 %v4291_v60, %v4291_v60 }
 0x534   : > { %v3937_v15 = vpop.xlane.xlu2 %3936  ;;  %v3868_v5 = vpop.xlane.xlu1 %3867  ;;  %7010 = vmatmul.msk.bf16.gmra.mxu2 %vm2968_vm1, %v4676_v29  ;;  %v3428_v0 = vsub.f32 %v10811_v61, %v3196_v26  ;;  %v11140_v61 = vadd.f32 %v10781_v41, %v10915_v27 }
 0x535   : > { %7631 = vrcp.f32 %v3937_v15 }
 0x536   : > { %7633 = vrcp.f32 %v3868_v5  ;;  %v3631_v20 = vmul.f32 1.442695, %v3428_v0  ;;  %v11144_v5 = vadd.f32 %v13111_v2, %v2142_v32  ;;  %v3281_v51 = vsel %vm2968_vm1, %v11140_v61, -inf }
 0x537   : > { %v11128_v6 = vpop.eup %7629  ;;  %7635 = vpow2.f32 %v3533_v49  ;;  %v5132_v32 = vunpack.c.l.b16 %v4444_v9 }
 0x538   : > { %v4025_v24 = vsel %vm2968_vm1, %v11128_v6, 0.0  ;;  %7637 = vrcp.f32 %v3799_v33  ;;  %v4900_v33 = vunpack.c.l.b16 %v4419_v3 }
 0x539   : > { %3819 = vadd.xlane.f32.xlu2 %v3818_v7  ;;  %4026 = vadd.xlane.f32.xlu1 %v4025_v24  ;;  %7639 = vpow2.f32 %v3631_v20 }
 0x53b   : > { %v7632_v29 = vpop.eup %7631  ;;  %v3871_v26 = vpop.xlane.xlu0 %3870 }
 0x53c   : > { %v7634_v15 = vpop.eup %7633  ;;  %v4315_v63 = vmul.f32 %v7632_v29, %v10818_v54  ;;  %v3124_v8 = vpop.xlane.xlu2 %3123 }
 0x53d   : > { %v4292_v7 = vmul.f32 %v7634_v15, %v10814_v37  ;;  %v3121_v50 = vpop.xlane.xlu1 %3120  ;;  %v3404_v54 = vsub.f32 %v10837_v14, %v3124_v8  ;;  %v3140_v37 = vsel %vm2968_vm1, %v11144_v5, -inf  ;;  %v11155_v60 = vpop.eup %7635 }
 0x53e   : > { %v4443_v24 = vpack.c.bf16 %v4315_v63, %v4315_v63  ;;  %v3403_v27 = vsub.f32 %v10834_v36, %v3121_v50  ;;  %v7638_v63 = vpop.eup %7637  ;;  %v11160_v8 = vpop.f32.mrf.mxu2 }
 0x53f   : > { %v4420_v0 = vpack.c.bf16 %v4292_v7, %v4292_v7  ;;  %v3583_v7 = vmul.f32 1.442695, %v3404_v54  ;;  %v11158_v9 = vpop.eup %7639  ;;  %v3815_v54 = vsel %vm2968_vm1, %v11155_v60, 0.0 }
 0x540   : > { %v3581_v38 = vmul.f32 1.442695, %v3403_v27  ;;  %v5131_v29 = vunpack.c.l.b16 %v4443_v24  ;;  %v3962_v24 = vsel %vm2968_vm1, %v11158_v9, 0.0  ;;  %v2145_v27 = vpop.f32.mrf.mxu3 }
 0x541   : > { %3282 = vmax.xlane.f32.xlu2 %v3281_v51  ;;  %v4901_v49 = vunpack.c.l.b16 %v4420_v0  ;;  %3141 = vmax.xlane.f32.xlu1 %v3140_v37  ;;  %v4269_v0 = vmul.f32 %v7638_v63, %v10788_v10  ;;  %v11178_v37 = vadd.f32 %v13041_v52, %v2145_v27  ;;  %v11182_v10 = vadd.f32 %v10741_v47, %v10942_v46 }
 0x542   : > { %v11151_v2 = vpop.f32.mrf.mxu1  ;;  %7641 = vpow2.f32 %v3581_v38  ;;  %v5138_v36 = vpack.c.b16 %v5132_v32, %v5131_v29 }
 0x543   : > { %13112 = vst [vmem:[#allocation44_spill] sm:$0xff] %v11151_v2  ;;  %v3946_v20 = vpop.xlane.xlu0 %3945  ;;  %v4907_v15 = vpack.c.b16 %v4901_v49, %v4900_v33  ;;  %v3143_v46 = vsel %vm2968_vm1, %v11178_v37, -inf  ;;  %v3284_v27 = vsel %vm2968_vm1, %v11182_v10, -inf }
 0x544   : > { %v3193_v14 = vpop.xlane.xlu2 %3192  ;;  %7034 = vmatmul.msk.bf16.gmra.mxu0 %vm2968_vm1, %v5138_v36  ;;  %v4397_v36 = vpack.c.bf16 %v4269_v0, %v4269_v0 }
 0x545   : > { %v3802_v50 = vpop.xlane.xlu1 %3801  ;;  %7022 = vmatmul.msk.bf16.gmra.mxu1 %vm2968_vm1, %v4907_v15  ;;  %v3427_v3 = vsub.f32 %v10855_v53, %v3193_v14 }
 0x546   : > { %7643 = vrcp.f32 %v3802_v50  ;;  %v2378_v50 = vpop.f32.mrf.mxu2 }
 0x547   : > { %7645 = vpow2.f32 %v3583_v7  ;;  %v3629_v33 = vmul.f32 1.442695, %v3427_v3 }
 0x548   : > { %v11163_v38 = vpop.eup %7641  ;;  %7647 = vrcp.f32 %v3871_v26  ;;  %v4671_v26 = vunpack.c.l.b16 %v4397_v36 }
 0x549   : > { %3963 = vadd.xlane.f32.xlu2 %v3962_v24  ;;  %v3887_v51 = vsel %vm2968_vm1, %v11163_v38, 0.0  ;;  %3816 = vadd.xlane.f32.xlu1 %v3815_v54  ;;  %7649 = vrcp.f32 %v3946_v20 }
 0x54a   : > { %v11173_v29 = vpop.f32.mrf.mxu1  ;;  %3888 = vadd.xlane.f32.xlu0 %v3887_v51  ;;  %7651 = vpow2.f32 %v3629_v33 }
 0x54b   : > { %13113 = vst [vmem:[#allocation43_spill] sm:$0xff] %v11173_v29  ;;  %v11175_v32 = vpop.xlane.xlu0 %3804 }
 0x54c   : > { %v7644_v53 = vpop.eup %7643  ;;  %v3268_v49 = vpop.xlane.xlu2 %3267 }
 0x54d   : > { %v4270_v15 = vmul.f32 %v7644_v53, %v10858_v11  ;;  %v3265_v63 = vpop.xlane.xlu1 %3264  ;;  %v11185_v7 = vpop.eup %7645  ;;  %v3452_v3 = vsub.f32 %v10883_v59, %v3268_v49  ;;  %v11198_v59 = vadd.f32 %v10465_v1, %v2378_v50 }
 0x54e   : > { %v3451_v14 = vsub.f32 %v10880_v34, %v3265_v63  ;;  %v3890_v11 = vsel %vm2968_vm1, %v11185_v7, 0.0  ;;  %v7648_v51 = vpop.eup %7647  ;;  %v13115_v63 = vld [vmem:[#allocation94_spill] sm:$0xff] }
 0x54f   : > { %v4398_v24 = vpack.c.bf16 %v4270_v15, %v4270_v15  ;;  %v3679_v54 = vmul.f32 1.442695, %v3452_v3  ;;  %v7650_v49 = vpop.eup %7649  ;;  %v3218_v3 = vsel %vm2968_vm1, %v11198_v59, -inf }
 0x550   : > { %v3677_v52 = vmul.f32 1.442695, %v3451_v14  ;;  %v11203_v36 = vpop.eup %7651  ;;  %v13116_v14 = vld [vmem:[#allocation48_spill] sm:$0xff]  ;;  %v4318_v50 = vmul.f32 %v7650_v49, %v10851_v57 }
 0x551   : > { %3144 = vmax.xlane.f32.xlu2 %v3143_v46  ;;  %v4672_v0 = vunpack.c.l.b16 %v4398_v24  ;;  %3891 = vadd.xlane.f32.xlu1 %v3890_v11  ;;  %v3381_v24 = vsub.f32 %v13116_v14, %v13115_v63  ;;  %v2147_v46 = vpop.f32.mrf.mxu3  ;;  %v4293_v11 = vmul.f32 %v7648_v51, %v10829_v21 }
 0x552   : > { %7653 = vpow2.f32 %v3677_v52  ;;  %3285 = vmax.xlane.f32.xlu0 %v3284_v27  ;;  %v11200_v53 = vpop.f32.mrf.mxu1  ;;  %v11212_v27 = vpop.f32.mrf.mxu2  ;;  %v11220_v57 = vadd.f32 %v13042_v48, %v2147_v46  ;;  %v13119_v46 = vld [vmem:[#allocation108_spill] sm:$0xff] }
 0x553   : > { %v11195_v34 = vpop.xlane.xlu0 %3201  ;;  %v4677_v20 = vpack.c.b16 %v4672_v0, %v4671_v26  ;;  %13114 = vst [vmem:[#allocation40_spill] sm:$0xff] %v11200_v53  ;;  %v3959_v0 = vsel %vm2968_vm1, %v11203_v36, 0.0  ;;  %v4421_v63 = vpack.c.bf16 %v4293_v11, %v4293_v11 }
 0x554   : > { %v3943_v33 = vpop.xlane.xlu2 %3942 }
 0x555   : > { %v3874_v15 = vpop.xlane.xlu1 %3873  ;;  %7655 = vrcp.f32 %v3943_v33  ;;  %7011 = vmatmul.msk.bf16.gmra.mxu2 %vm2968_vm1, %v4677_v20 }
 0x556   : > { %7657 = vrcp.f32 %v3874_v15  ;;  %v4446_v15 = vpack.c.bf16 %v4318_v50, %v4318_v50 }
 0x557   : > { %7659 = vpow2.f32 %v3679_v54  ;;  %v3537_v54 = vmul.f32 1.442695, %v3381_v24  ;;  %v13118_v24 = vld [vmem:[#allocation104_spill] sm:$0xff] }
 0x558   : > { %v11207_v52 = vpop.eup %7653  ;;  %v5134_v11 = vunpack.c.l.b16 %v4446_v15 }
 0x559   : > { %v4031_v26 = vsel %vm2968_vm1, %v11207_v52, 0.0  ;;  %3219 = vmax.xlane.f32.xlu2 %v3218_v3  ;;  %3960 = vadd.xlane.f32.xlu1 %v3959_v0  ;;  %7661 = vpow2.f32 %v3537_v54  ;;  %v3382_v0 = vsub.f32 %v13119_v46, %v13118_v24 }
 0x55a   : > { %4032 = vadd.xlane.f32.xlu0 %v4031_v26  ;;  %v11228_v26 = vpop.f32.mrf.mxu1  ;;  %7663 = vrcp.f32 %v11175_v32  ;;  %v11239_v54 = vpop.f32.mrf.mxu2  ;;  %v13120_v32 = vld [vmem:[#allocation110_spill] sm:$0xff] }
 0x55b   : > { %v7656_v20 = vpop.eup %7655  ;;  %v11222_v33 = vpop.xlane.xlu0 %3876  ;;  %13117 = vst [vmem:[#allocation27_spill] sm:$0xff] %v11228_v26 }
 0x55c   : > { %v7658_v49 = vpop.eup %7657  ;;  %v4317_v21 = vmul.f32 %v7656_v20, %v10904_v62  ;;  %v3130_v51 = vpop.xlane.xlu2 %3129  ;;  %v3146_v62 = vsel %vm2968_vm1, %v11220_v57, -inf }
 0x55d   : > { %v4294_v14 = vmul.f32 %v7658_v49, %v10898_v16  ;;  %v3127_v53 = vpop.xlane.xlu1 %3126  ;;  %v11226_v2 = vpop.eup %7659  ;;  %v3406_v20 = vsub.f32 %v10924_v18, %v3130_v51 }
 0x55e   : > { %v4445_v3 = vpack.c.bf16 %v4317_v21, %v4317_v21  ;;  %v3405_v48 = vsub.f32 %v10927_v12, %v3127_v53  ;;  %v4034_v49 = vsel %vm2968_vm1, %v11226_v2, 0.0  ;;  %v4902_v21 = vunpack.c.l.b16 %v4421_v63 }
 0x55f   : > { %v4422_v29 = vpack.c.bf16 %v4294_v14, %v4294_v14  ;;  %v3539_v14 = vmul.f32 1.442695, %v3382_v0  ;;  %v11246_v18 = vpop.eup %7661  ;;  %v3587_v51 = vmul.f32 1.442695, %v3406_v20 }
 0x560   : > { %v3585_v50 = vmul.f32 1.442695, %v3405_v48  ;;  %v5133_v16 = vunpack.c.l.b16 %v4445_v3  ;;  %v11243_v48 = vadd.f32 %v13120_v32, %v11160_v8  ;;  %v7664_v63 = vpop.eup %7663  ;;  %v3821_v20 = vsel %vm2968_vm1, %v11246_v18, 0.0 }
 0x561   : > { %v4903_v12 = vunpack.c.l.b16 %v4422_v29  ;;  %4035 = vadd.xlane.f32.xlu1 %v4034_v49  ;;  %v13124_v49 = vld [vmem:[#allocation122_spill] sm:$0xff] }
 0x562   : > { %7665 = vpow2.f32 %v3585_v50  ;;  %3147 = vmax.xlane.f32.xlu0 %v3146_v62  ;;  %v5139_v53 = vpack.c.b16 %v5134_v11, %v5133_v16  ;;  %v3215_v8 = vsel %vm2968_vm1, %v11243_v48, -inf  ;;  %v13123_v62 = vld [vmem:[#allocation107_spill] sm:$0xff] }
 0x563   : > { %v4908_v24 = vpack.c.b16 %v4903_v12, %v4902_v21  ;;  %v3952_v15 = vpop.xlane.xlu0 %3951  ;;  %v11251_v0 = vpop.f32.mrf.mxu1  ;;  %v4271_v50 = vmul.f32 %v7664_v63, %v13123_v62  ;;  %v11263_v21 = vadd.f32 %v13124_v49, %v11012_v17  ;;  %v13143_v49 = vld [vmem:[#allocation119_spill] sm:$0xff] }
 0x564   : > { %v3199_v3 = vpop.xlane.xlu2 %3198  ;;  %7035 = vmatmul.msk.bf16.gmra.mxu0 %vm2968_vm1, %v5139_v53  ;;  %13122 = vst [vmem:[#allocation28_spill] sm:$0xff] %v11251_v0  ;;  %v13125_v53 = vld [vmem:[#allocation51_spill] sm:$0xff]  ;;  %v11272_v62 = vpop.f32.mrf.mxu3 }
 0x565   : > { %v3808_v29 = vpop.xlane.xlu1 %3807  ;;  %7023 = vmatmul.msk.bf16.gmra.mxu1 %vm2968_vm1, %v4908_v24  ;;  %v3429_v16 = vsub.f32 %v10949_v25, %v3199_v3  ;;  %v11269_v25 = vpop.f32.mrf.mxu2  ;;  %v4399_v3 = vpack.c.bf16 %v4271_v50, %v4271_v50 }
 0x566   : > { %7667 = vrcp.f32 %v3808_v29 }
 0x567   : > { %7669 = vpow2.f32 %v3539_v14  ;;  %v3430_v14 = vsub.f32 %v13125_v53, %v11195_v34  ;;  %v3633_v63 = vmul.f32 1.442695, %v3429_v16  ;;  %v3290_v53 = vsel %vm2968_vm1, %v11263_v21, -inf }
 0x568   : > { %v11249_v46 = vpop.eup %7665  ;;  %7671 = vpow2.f32 %v3587_v51 }
 0x569   : > { %13121 = vst [vmem:[#allocation31_spill] sm:$0xff] %v11249_v46  ;;  %v3893_v11 = vsel %vm2968_vm1, %v11249_v46, 0.0  ;;  %3216 = vmax.xlane.f32.xlu1 %v3215_v8  ;;  %7673 = vrcp.f32 %v11222_v33  ;;  %v3635_v0 = vmul.f32 1.442695, %v3430_v14 }
 0x56a   : > { %3894 = vadd.xlane.f32.xlu2 %v3893_v11  ;;  %3822 = vadd.xlane.f32.xlu0 %v3821_v20  ;;  %7675 = vrcp.f32 %v3952_v15 }
 0x56b   : > { %v11274_v11 = vpop.xlane.xlu0 %3810  ;;  %7677 = vpow2.f32 %v3633_v63 }
 0x56c   : > { %v7668_v12 = vpop.eup %7667  ;;  %v3274_v24 = vpop.xlane.xlu2 %3273 }
 0x56d   : > { %v11267_v51 = vpop.eup %7669  ;;  %v4272_v29 = vmul.f32 %v7668_v12, %v10951_v56  ;;  %v3271_v8 = vpop.xlane.xlu1 %3270  ;;  %v3454_v16 = vsub.f32 %v10978_v19, %v3274_v24  ;;  %v4673_v12 = vunpack.c.l.b16 %v4399_v3 }
 0x56e   : > { %13126 = vst [vmem:[#allocation19_spill] sm:$0xff] %v11267_v51  ;;  %v3453_v17 = vsub.f32 %v10981_v44, %v3271_v8  ;;  %v11277_v20 = vpop.eup %7671  ;;  %v3824_v56 = vsel %vm2968_vm1, %v11267_v51, 0.0  ;;  %v11285_v44 = vpop.f32.mrf.mxu1  ;;  %v13129_v8 = vld [vmem:[#allocation106_spill] sm:$0xff] }
 0x56f   : > { %13127 = vst [vmem:[#allocation18_spill] sm:$0xff] %v11277_v20  ;;  %v4400_v34 = vpack.c.bf16 %v4272_v29, %v4272_v29  ;;  %v3896_v33 = vsel %vm2968_vm1, %v11277_v20, 0.0  ;;  %v7674_v29 = vpop.eup %7673  ;;  %v3683_v19 = vmul.f32 1.442695, %v3454_v16 }
 0x570   : > { %v3681_v50 = vmul.f32 1.442695, %v3453_v17  ;;  %13128 = vst [vmem:[#allocation124_spill] sm:$0xff] %v11285_v44  ;;  %v11291_v17 = vadd.f32 %v13129_v8, %v10983_v28  ;;  %v7676_v3 = vpop.eup %7675 }
 0x571   : > { %v4674_v26 = vunpack.c.l.b16 %v4400_v34  ;;  %3825 = vadd.xlane.f32.xlu1 %v3824_v56  ;;  %v11294_v63 = vpop.eup %7677  ;;  %v11296_v34 = vpop.f32.mrf.mxu2 }
 0x572   : > { %7679 = vpow2.f32 %v3681_v50  ;;  %3291 = vmax.xlane.f32.xlu2 %v3290_v53  ;;  %3897 = vadd.xlane.f32.xlu0 %v3896_v33  ;;  %13130 = vst [vmem:[#allocation109_spill] sm:$0xff] %v11291_v17  ;;  %v13132_v53 = vld [vmem:[#allocation96_spill] sm:$0xff]  ;;  %v13133_v50 = vld [vmem:[#allocation45_spill] sm:$0xff]  ;;  %v3287_v16 = vsel %vm2968_vm1, %v11291_v17, -inf }
 0x573   : > { %v4678_v14 = vpack.c.b16 %v4674_v26, %v4673_v12  ;;  %7681 = vpow2.f32 %v3635_v0  ;;  %13131 = vst [vmem:[#allocation114_spill] sm:$0xff] %v11294_v63  ;;  %v3383_v26 = vsub.f32 %v13133_v50, %v13132_v53  ;;  %v2152_v12 = vpop.f32.mrf.mxu3  ;;  %v3886_v28 = vpop.xlane.xlu0 %3885  ;;  %v13135_v33 = vld [vmem:[#allocation105_spill] sm:$0xff] }
 0x574   : > { %v3949_v15 = vpop.xlane.xlu2 %3948  ;;  %v4295_v0 = vmul.f32 %v7674_v29, %v13135_v33  ;;  %v13138_v50 = vld [vmem:[#allocation121_spill] sm:$0xff] }
 0x575   : > { %v3880_v24 = vpop.xlane.xlu1 %3879  ;;  %7012 = vmatmul.msk.bf16.gmra.mxu2 %vm2968_vm1, %v4678_v14  ;;  %v11313_v1 = vadd.f32 %v13138_v50, %v2152_v12  ;;  %v3541_v29 = vmul.f32 1.442695, %v3383_v26 }
 0x576   : > { %7683 = vrcp.f32 %v3880_v24  ;;  %v13136_v24 = vld [vmem:[#allocation37_spill] sm:$0xff]  ;;  %v4423_v17 = vpack.c.bf16 %v4295_v0, %v4295_v0 }
 0x577   : > { %7685 = vrcp.f32 %v3949_v15  ;;  %v4320_v44 = vmul.f32 %v7676_v3, %v13136_v24  ;;  %v3965_v15 = vsel %vm2968_vm1, %v11294_v63, 0.0  ;;  %13139 = vst [vmem:[#allocation102_spill] sm:$0xff] %v11313_v1  ;;  %v13142_v63 = vld [vmem:[#allocation75_spill] sm:$0xff]  ;;  %v3152_v26 = vsel %vm2968_vm1, %v11313_v1, -inf }
 0x578   : > { %v11300_v56 = vpop.eup %7679  ;;  %7687 = vpow2.f32 %v3683_v19  ;;  %v3384_v46 = vsub.f32 %v13143_v49, %v13142_v63  ;;  %v4904_v50 = vunpack.c.l.b16 %v4423_v17 }
 0x579   : > { %13134 = vst [vmem:[#allocation91_spill] sm:$0xff] %v11300_v56  ;;  %v4037_v14 = vsel %vm2968_vm1, %v11300_v56, 0.0  ;;  %3288 = vmax.xlane.f32.xlu1 %v3287_v16  ;;  %v11310_v53 = vpop.eup %7681  ;;  %v13140_v56 = vld [vmem:[#allocation25_spill] sm:$0xff]  ;;  %v4448_v24 = vpack.c.bf16 %v4320_v44, %v4320_v44  ;;  %v13141_v16 = vld [vmem:[#allocation23_spill] sm:$0xff]  ;;  %7689 = vpow2.f32 %v3541_v29 }
 0x57a   : > { %4038 = vadd.xlane.f32.xlu2 %v4037_v14  ;;  %13137 = vst [vmem:[#allocation89_spill] sm:$0xff] %v11310_v53  ;;  %3966 = vadd.xlane.f32.xlu0 %v3965_v15  ;;  %7691 = vrcp.f32 %v11274_v11  ;;  %v3968_v44 = vsel %vm2968_vm1, %v11310_v53, 0.0 }
 0x57b   : > { %v4947_v42 = vpop.f32.mrf.mxu1  ;;  %7693 = vrcp.f32 %v3886_v28  ;;  %v5136_v63 = vunpack.c.l.b16 %v4448_v24 }
 0x57c   : > { %v7684_v19 = vpop.eup %7683  ;;  %v3136_v33 = vpop.xlane.xlu2 %3135 }
 0x57d   : > { %v7686_v8 = vpop.eup %7685  ;;  %v4296_v20 = vmul.f32 %v7684_v19, %v13140_v56  ;;  %v3133_v3 = vpop.xlane.xlu1 %3132  ;;  %v3408_v0 = vsub.f32 %v11031_v43, %v3136_v33 }
 0x57e   : > { %v4319_v14 = vmul.f32 %v7686_v8, %v13141_v16  ;;  %v11317_v51 = vpop.eup %7687  ;;  %v11327_v56 = vpop.f32.mrf.mxu2  ;;  %v5777_v8 = vpack.c.bf16 %v4947_v42, %v4947_v42  ;;  %v13144_v42 = vld [vmem:[#allocation117_spill] sm:$0xff] }
 0x57f   : > { %v4424_v12 = vpack.c.bf16 %v4296_v20, %v4296_v20  ;;  %v11329_v19 = vpop.xlane.xlu0 %3276  ;;  %v4040_v20 = vsel %vm2968_vm1, %v11317_v51, 0.0  ;;  %v3591_v16 = vmul.f32 1.442695, %v3408_v0  ;;  %v11333_v28 = vpop.eup %7689  ;;  %v11337_v17 = vadd.f32 %v13144_v42, %v11272_v62 }
 0x580   : > { %v4447_v15 = vpack.c.bf16 %v4319_v14, %v4319_v14  ;;  %v7692_v24 = vpop.eup %7691 }
 0x581   : > { %v4905_v29 = vunpack.c.l.b16 %v4424_v12  ;;  %3969 = vadd.xlane.f32.xlu1 %v3968_v44  ;;  %v3543_v12 = vmul.f32 1.442695, %v3384_v46  ;;  %v11339_v44 = vunpack.c.l.b16 %v5777_v8  ;;  %v3407_v46 = vsub.f32 %v11034_v13, %v3133_v3  ;;  %v13148_v8 = vld [vmem:[#allocation26_spill] sm:$0xff]  ;;  %v13150_v3 = vld [vmem:[#allocation112_spill] sm:$0xff] }
 0x582   : > { %3153 = vmax.xlane.f32.xlu2 %v3152_v26  ;;  %v5135_v11 = vunpack.c.l.b16 %v4447_v15  ;;  %4041 = vadd.xlane.f32.xlu0 %v4040_v20  ;;  %v13147_v15 = vld [vmem:[#allocation118_spill] sm:$0xff]  ;;  %v13149_v20 = vld [vmem:[#allocation111_spill] sm:$0xff] }
 0x583   : > { %v4949_v49 = vpop.f32.mrf.mxu1  ;;  %v4909_v33 = vpack.c.b16 %v4905_v29, %v4904_v50  ;;  %13145 = vst [vmem:[#allocation49_spill] sm:$0xff] %v11339_v44  ;;  %v11346_v0 = vadd.f32 %v13147_v15, %v11212_v27  ;;  %v7694_v50 = vpop.eup %7693  ;;  %v4273_v29 = vmul.f32 %v7692_v24, %v13148_v8  ;;  %v3827_v27 = vsel %vm2968_vm1, %v11333_v28, 0.0  ;;  %v13152_v8 = vld [vmem:[#allocation24_spill] sm:$0xff]  ;;  %v13154_v44 = vld [vmem:[#allocation50_spill] sm:$0xff] }
 0x584   : > { %v5778_v43 = vpack.c.bf16 %v4949_v49, %v4949_v49  ;;  %v3883_v14 = vpop.xlane.xlu2 %3882  ;;  %v5140_v53 = vpack.c.b16 %v5136_v63, %v5135_v11  ;;  %v3149_v49 = vsel %vm2968_vm1, %v11337_v17, -inf  ;;  %v4298_v11 = vmul.f32 %v7694_v50, %v13149_v20 }
 0x585   : > { %v3814_v26 = vpop.xlane.xlu1 %3813  ;;  %7024 = vmatmul.msk.bf16.gmra.mxu1 %vm2968_vm1, %v4909_v33  ;;  %v3589_v33 = vmul.f32 1.442695, %v3407_v46 }
 0x586   : > { %v11341_v1 = vunpack.c.l.b16 %v5778_v43  ;;  %7695 = vrcp.f32 %v3814_v26  ;;  %7036 = vmatmul.msk.bf16.gmra.mxu0 %vm2968_vm1, %v5140_v53  ;;  %v3221_v53 = vsel %vm2968_vm1, %v11346_v0, -inf  ;;  %v11360_v63 = vpop.f32.mrf.mxu2  ;;  %v11364_v43 = vadd.f32 %v13150_v3, %v11239_v54  ;;  %v13153_v54 = vld [vmem:[#allocation123_spill] sm:$0xff] }
 0x587   : > { %7697 = vrcp.f32 %v3883_v14  ;;  %v5378_v46 = vunpack.c.l.b16 %v13153_v54 }
 0x588   : > { %13146 = vst [vmem:[#allocation92_spill] sm:$0xff] %v11341_v1  ;;  %7699 = vpow2.f32 %v3591_v16  ;;  %v3958_v16 = vpop.xlane.xlu0 %3957  ;;  %v5379_v1 = vunpack.c.l.b16 %v13154_v44  ;;  %v3224_v3 = vsel %vm2968_vm1, %v11364_v43, -inf }
 0x589   : > { %7701 = vpow2.f32 %v3543_v12  ;;  %3150 = vmax.xlane.f32.xlu1 %v3149_v49  ;;  %v4401_v12 = vpack.c.bf16 %v4273_v29, %v4273_v29  ;;  %v5610_v49 = vunpack.c.l.b16 %v13152_v8 }
 0x58a   : > { %3828 = vadd.xlane.f32.xlu2 %v3827_v27  ;;  %3222 = vmax.xlane.f32.xlu0 %v3221_v53  ;;  %v4426_v27 = vpack.c.bf16 %v4298_v11, %v4298_v11  ;;  %7703 = vrcp.f32 %v3958_v16 }
 0x58b   : > { %7705 = vpow2.f32 %v3589_v33  ;;  %v4744_v8 = vunpack.c.l.b16 %v4401_v12  ;;  %v13155_v33 = vld [vmem:[#allocation90_spill] sm:$0xff] }
 0x58c   : > { %v7696_v13 = vpop.eup %7695  ;;  %v3208_v14 = vpop.xlane.xlu2 %3207  ;;  %v5609_v16 = vunpack.c.l.b16 %v13155_v33 }
 0x58d   : > { %v7698_v42 = vpop.eup %7697  ;;  %v4274_v26 = vmul.f32 %v7696_v13, %v11049_v40  ;;  %v3205_v24 = vpop.xlane.xlu1 %3204 }
 0x58e   : > { %v11367_v50 = vpop.eup %7699  ;;  %v4297_v20 = vmul.f32 %v7698_v42, %v11047_v39  ;;  %v3431_v53 = vsub.f32 %v11071_v22, %v3205_v24  ;;  %v3432_v39 = vsub.f32 %v11066_v4, %v3208_v14  ;;  %v4976_v42 = vunpack.c.l.b16 %v4426_v27 }
 0x58f   : > { %13151 = vst [vmem:[#allocation129_spill] sm:$0xff] %v11367_v50  ;;  %v11372_v62 = vpop.eup %7701  ;;  %v4402_v29 = vpack.c.bf16 %v4274_v26, %v4274_v26  ;;  %v3902_v22 = vsel %vm2968_vm1, %v11367_v50, 0.0  ;;  %v5614_v27 = vpack.c.b16 %v5610_v49, %v5609_v16  ;;  %v13161_v49 = vld [vmem:[#allocation53_spill] sm:$0xff] }
 0x590   : > { %v4425_v40 = vpack.c.bf16 %v4297_v20, %v4297_v20  ;;  %v3637_v13 = vmul.f32 1.442695, %v3431_v53  ;;  %v3830_v44 = vsel %vm2968_vm1, %v11372_v62, 0.0  ;;  %v13156_v20 = vld [vmem:[#allocation64_spill] sm:$0xff]  ;;  %v5383_v53 = vpack.c.b16 %v5379_v1, %v5378_v46  ;;  %v7704_v14 = vpop.eup %7703  ;;  %v11394_v1 = vpop.f32.mrf.mxu2 }
 0x591   : > { %v4745_v11 = vunpack.c.l.b16 %v4402_v29  ;;  %3225 = vmax.xlane.f32.xlu1 %v3224_v3  ;;  %v5377_v12 = vunpack.c.l.b16 %v13156_v20  ;;  %v13157_v29 = vld [vmem:[#allocation93_spill] sm:$0xff]  ;;  %v11387_v3 = vpop.eup %7705 }
 0x592   : > { %v4975_v24 = vunpack.c.l.b16 %v4425_v40  ;;  %7707 = vpow2.f32 %v3637_v13  ;;  %3903 = vadd.xlane.f32.xlu2 %v3902_v22  ;;  %3831 = vadd.xlane.f32.xlu0 %v3830_v44  ;;  %v5608_v15 = vunpack.c.l.b16 %v13157_v29  ;;  %v3639_v40 = vmul.f32 1.442695, %v3432_v39  ;;  %13158 = vst [vmem:[#allocation30_spill] sm:$0xff] %v11387_v3  ;;  %v13159_v22 = vld [vmem:[#allocation77_spill] sm:$0xff]  ;;  %v13163_v44 = vld [vmem:[#allocation63_spill] sm:$0xff] }
 0x593   : > { %v4752_v26 = vpack.c.b16 %v4745_v11, %v4744_v8  ;;  %v5376_v33 = vunpack.c.l.b16 %v13159_v22  ;;  %v13160_v8 = vld [vmem:[#allocation36_spill] sm:$0xff]  ;;  %v5605_v39 = vunpack.c.l.b16 %v13161_v49  ;;  %v5374_v16 = vunpack.c.l.b16 %v13163_v44  ;;  %v13166_v29 = vld [vmem:[#allocation79_spill] sm:$0xff] }
 0x594   : > { %v4983_v54 = vpack.c.b16 %v4976_v42, %v4975_v24  ;;  %v3955_v4 = vpop.xlane.xlu2 %3954  ;;  %v11392_v11 = vadd.f32 %v13160_v8, %v11041_v45  ;;  %v13162_v42 = vld [vmem:[#allocation88_spill] sm:$0xff]  ;;  %v13165_v45 = vld [vmem:[#allocation115_spill] sm:$0xff]  ;;  %v4322_v22 = vmul.f32 %v7704_v14, %v13166_v29 }
 0x595   : > { %v3280_v13 = vpop.xlane.xlu1 %3279  ;;  %7709 = vrcp.f32 %v3955_v4  ;;  %7013 = vmatmul.msk.bf16.vlgmr.msra.gmra.mxu3 %vm2968_vm1, %v4752_v26  ;;  %v5607_v24 = vunpack.c.l.b16 %v13162_v42  ;;  %v5382_v20 = vpack.c.b16 %v5377_v12, %v5376_v33  ;;  %v3455_v4 = vsub.f32 %v13165_v45, %v11329_v19  ;;  %v13169_v33 = vld [vmem:[#allocation97_spill] sm:$0xff] }
 0x596   : > { %v3456_v46 = vsub.f32 %v11087_v23, %v3280_v13  ;;  %7025 = vmatmul.msk.bf16.vlgmr.msra.gmra.mxu2 %vm2968_vm1, %v4983_v54  ;;  %5404 = vmatpush.bf16.msra.mxu3 %v5383_v53  ;;  %7711 = vpow2.f32 %v3639_v40  ;;  %v3899_v53 = vsel %vm2968_vm1, %v11387_v3, 0.0  ;;  %v13167_v13 = vld [vmem:[#allocation100_spill] sm:$0xff]  ;;  %v3293_v12 = vsel %vm2968_vm1, %v11392_v11, -inf  ;;  %v13174_v3 = vld [vmem:[#allocation95_spill] sm:$0xff] }
 0x597   : > { %5635 = vmatpush.bf16.msra.mxu2 %v5614_v27  ;;  %v5613_v23 = vpack.c.b16 %v5608_v15, %v5607_v24  ;;  %v5375_v49 = vunpack.c.l.b16 %v13167_v13  ;;  %v13168_v27 = vld [vmem:[#allocation29_spill] sm:$0xff]  ;;  %v5373_v15 = vunpack.c.l.b16 %v13169_v33  ;;  %v4450_v42 = vpack.c.bf16 %v4322_v22, %v4322_v22  ;;  %v13170_v24 = vld [vmem:[#allocation56_spill] sm:$0xff] }
 0x598   : > { %v11401_v26 = vpop.eup %7707  ;;  %v3687_v8 = vmul.f32 1.442695, %v3456_v46  ;;  %v5606_v14 = vunpack.c.l.b16 %v13168_v27  ;;  %v3685_v46 = vmul.f32 1.442695, %v3455_v4  ;;  %v13172_v13 = vld [vmem:[#allocation76_spill] sm:$0xff]  ;;  %v5372_v27 = vunpack.c.l.b16 %v13174_v3 }
 0x599   : > { %13164 = vst [vmem:[#allocation41_spill] sm:$0xff] %v11401_v26  ;;  %v3971_v54 = vsel %vm2968_vm1, %v11401_v26, 0.0  ;;  %3900 = vadd.xlane.f32.xlu1 %v3899_v53  ;;  %v5381_v40 = vpack.c.b16 %v5375_v49, %v5374_v16  ;;  %v13173_v26 = vld [vmem:[#allocation38_spill] sm:$0xff]  ;;  %v13175_v16 = vld [vmem:[#allocation84_spill] sm:$0xff]  ;;  %v11427_v49 = vpop.f32.mrf.mxu2 }
 0x59a   : > { %7713 = vpow2.f32 %v3687_v8  ;;  %5405 = vmatpush.bf16.msra.mxu3 %v5382_v20  ;;  %3294 = vmax.xlane.f32.xlu0 %v3293_v12  ;;  %v13171_v8 = vld [vmem:[#allocation34_spill] sm:$0xff]  ;;  %v5612_v29 = vpack.c.b16 %v5606_v14, %v5605_v39  ;;  %v11419_v53 = vadd.f32 %v13173_v26, %v13172_v13  ;;  %v5603_v4 = vunpack.c.l.b16 %v13175_v16  ;;  %v2155_v12 = vpop.f32.mrf.mxu3 }
 0x59b   : > { %v7710_v19 = vpop.eup %7709  ;;  %5636 = vmatpush.bf16.msra.mxu2 %v5613_v23  ;;  %3972 = vadd.xlane.f32.xlu2 %v3971_v54  ;;  %v5604_v20 = vunpack.c.l.b16 %v13171_v8  ;;  %v5380_v54 = vpack.c.b16 %v5373_v15, %v5372_v27  ;;  %7715 = vpow2.f32 %v3685_v46  ;;  %v5207_v39 = vunpack.c.l.b16 %v4450_v42  ;;  %v13176_v46 = vld [vmem:[#allocation80_spill] sm:$0xff] }
 0x59c   : > { %v4321_v44 = vmul.f32 %v7710_v19, %v13170_v24  ;;  %v4030_v45 = vpop.xlane.xlu2 %4029  ;;  %v11422_v23 = vpop.eup %7711  ;;  %v3296_v3 = vsel %vm2968_vm1, %v11419_v53, -inf  ;;  %v11439_v42 = vadd.f32 %v13176_v46, %v2155_v12  ;;  %v13177_v8 = vld [vmem:[#allocation120_spill] sm:$0xff] }
 0x59d   : > { %v5611_v14 = vpack.c.b16 %v5604_v20, %v5603_v4  ;;  %v11443_v20 = vadd.f32 %v13177_v8, %v11269_v25  ;;  %7717 = vrcp.f32 %v4030_v45 }
 0x59e   : > { %v4449_v50 = vpack.c.bf16 %v4321_v44, %v4321_v44  ;;  %5406 = vmatpush.bf16.msra.mxu3 %v5381_v40  ;;  %v3139_v40 = vpop.xlane.xlu0 %3138  ;;  %v3974_v44 = vsel %vm2968_vm1, %v11422_v23, 0.0  ;;  %v3155_v12 = vsel %vm2968_vm1, %v11439_v42, -inf }
 0x59f   : > { %5637 = vmatpush.bf16.msra.mxu2 %v5612_v29  ;;  %v13178_v29 = vld [vmem:[#allocation74_spill] sm:$0xff] }
 0x5a0   : > { %v11425_v22 = vpop.eup %7713  ;;  %v5206_v19 = vunpack.c.l.b16 %v4449_v50  ;;  %v3409_v13 = vsub.f32 %v13178_v29, %v3139_v40 }
 0x5a1   : > { %v4046_v33 = vsel %vm2968_vm1, %v11425_v22, 0.0  ;;  %3297 = vmax.xlane.f32.xlu1 %v3296_v3  ;;  %v11436_v50 = vpop.eup %7715  ;;  %v11449_v4 = vpop.f32.mrf.mxu2 }
 0x5a2   : > { %v5214_v24 = vpack.c.b16 %v5207_v39, %v5206_v19  ;;  %5407 = vmatpush.bf16.msra.mxu3 %v5380_v54  ;;  %3975 = vadd.xlane.f32.xlu0 %v3974_v44  ;;  %v4043_v16 = vsel %vm2968_vm1, %v11436_v50, 0.0  ;;  %v2157_v54 = vpop.f32.mrf.mxu3  ;;  %v3227_v39 = vsel %vm2968_vm1, %v11443_v20, -inf  ;;  %v3593_v25 = vmul.f32 1.442695, %v3409_v13 }
 0x5a3   : > { %5638 = vmatpush.bf16.msra.mxu2 %v5611_v14  ;;  %4047 = vadd.xlane.f32.xlu2 %v4046_v33  ;;  %v13179_v14 = vld [vmem:[#allocation39_spill] sm:$0xff]  ;;  %v7718_v40 = vpop.eup %7717 }
 0x5a4   : > { %v3211_v15 = vpop.xlane.xlu2 %3210  ;;  %7037 = vmatmul.msk.bf16.vlgmr.msrb.gmra.mxu1 %vm2968_vm1, %v5214_v24  ;;  %v13180_v24 = vld [vmem:[#allocation101_spill] sm:$0xff]  ;;  %v4346_v29 = vmul.f32 %v7718_v40, %v11102_v58 }
 0x5a5   : > { %v3433_v27 = vsub.f32 %v11113_v30, %v3211_v15  ;;  %v11456_v30 = vadd.f32 %v13179_v14, %v2157_v54  ;;  %v11460_v44 = vadd.f32 %v13180_v24, %v11296_v34  ;;  %v13181_v15 = vld [vmem:[#allocation69_spill] sm:$0xff] }
 0x5a6   : > { %v3214_v19 = vpop.xlane.xlu0 %3213 }
 0x5a7   : > { %v3641_v3 = vmul.f32 1.442695, %v3433_v27  ;;  %v3434_v46 = vsub.f32 %v13181_v15, %v3214_v19  ;;  %v3158_v13 = vsel %vm2968_vm1, %v11456_v30, -inf  ;;  %v3230_v27 = vsel %vm2968_vm1, %v11460_v44, -inf }
 0x5a8   : > { %v4474_v19 = vpack.c.bf16 %v4346_v29, %v4346_v29 }
 0x5a9   : > { %4044 = vadd.xlane.f32.xlu1 %v4043_v16  ;;  %v11466_v16 = vpop.f32.mrf.mxu0  ;;  %v3643_v54 = vmul.f32 1.442695, %v3434_v46 }
 0x5aa   : > { %3156 = vmax.xlane.f32.xlu0 %v3155_v12  ;;  %13182 = vst [vmem:[#allocation42_spill] sm:$0xff] %v11466_v16  ;;  %v11470_v12 = vpop.f32.mrf.mxu2 }
 0x5ab   : > { %3228 = vmax.xlane.f32.xlu2 %v3227_v39 }
 0x5ac   : > { %v3820_v45 = vpop.xlane.xlu2 %3819  ;;  %v4027_v33 = vpop.xlane.xlu1 %4026 }
 0x5ad   : > { %7719 = vrcp.f32 %v4027_v33 }
 0x5ae   : > { %7721 = vpow2.f32 %v3593_v25 }
 0x5af   : > { %7723 = vpow2.f32 %v3641_v3 }
 0x5b0   : > { %7725 = vpow2.f32 %v3643_v54 }
 0x5b1   : > { %3159 = vmax.xlane.f32.xlu1 %v3158_v13  ;;  %7727 = vrcp.f32 %v3820_v45  ;;  %v5438_v13 = vunpack.c.l.b16 %v4474_v19 }
 0x5b2   : > { %3231 = vmax.xlane.f32.xlu0 %v3230_v27 }
 0x5b3   : > { %v7720_v34 = vpop.eup %7719 }
 0x5b4   : > { %v3283_v39 = vpop.xlane.xlu2 %3282  ;;  %v4345_v25 = vmul.f32 %v7720_v34, %v11128_v6  ;;  %v3142_v58 = vpop.xlane.xlu1 %3141 }
 0x5b5   : > { %v11473_v14 = vpop.eup %7721  ;;  %v3457_v3 = vsub.f32 %v11140_v61, %v3283_v39  ;;  %v3410_v33 = vsub.f32 %v11144_v5, %v3142_v58  ;;  %v11483_v5 = vpop.f32.mrf.mxu0 }
 0x5b6   : > { %v11477_v40 = vpop.eup %7723  ;;  %v4473_v15 = vpack.c.bf16 %v4345_v25, %v4345_v25  ;;  %v3905_v29 = vsel %vm2968_vm1, %v11473_v14, 0.0  ;;  %13183 = vst [vmem:[#allocation87_spill] sm:$0xff] %v11483_v5  ;;  %v13185_v25 = vld [vmem:[#allocation68_spill] sm:$0xff] }
 0x5b7   : > { %v3595_v46 = vmul.f32 1.442695, %v3410_v33  ;;  %v3689_v16 = vmul.f32 1.442695, %v3457_v3  ;;  %v3977_v6 = vsel %vm2968_vm1, %v11477_v40, 0.0  ;;  %v11485_v54 = vpop.eup %7725  ;;  %v11490_v58 = vadd.f32 %v13185_v25, %v11106_v31  ;;  %v11492_v3 = vpop.f32.mrf.mxu2 }
 0x5b8   : > { %v5437_v27 = vunpack.c.l.b16 %v4473_v15  ;;  %13184 = vst [vmem:[#allocation20_spill] sm:$0xff] %v11485_v54  ;;  %v7728_v19 = vpop.eup %7727  ;;  %v2448_v33 = vpop.f32.mrf.mxu3 }
 0x5b9   : > { %7729 = vpow2.f32 %v3595_v46  ;;  %3906 = vadd.xlane.f32.xlu1 %v3905_v29  ;;  %13186 = vst [vmem:[#allocation59_spill] sm:$0xff] %v11492_v3  ;;  %v4276_v46 = vmul.f32 %v7728_v19, %v11122_v55  ;;  %v3302_v31 = vsel %vm2968_vm1, %v11490_v58, -inf  ;;  %v11510_v55 = vadd.f32 %v13105_v35, %v2448_v33 }
 0x5ba   : > { %v5445_v61 = vpack.c.b16 %v5438_v13, %v5437_v27  ;;  %3978 = vadd.xlane.f32.xlu0 %v3977_v6  ;;  %7731 = vpow2.f32 %v3689_v16  ;;  %v3980_v27 = vsel %vm2968_vm1, %v11485_v54, 0.0  ;;  %v13188_v6 = vld [vmem:[#allocation67_spill] sm:$0xff] }
 0x5bb   : > { %13191 = vst [vmem:[#allocation46_spill] sm:$0xff] %v11510_v55  ;;  %v4404_v5 = vpack.c.bf16 %v4276_v46, %v4276_v46  ;;  %v3233_v33 = vsel %vm2968_vm1, %v11510_v55, -inf }
 0x5bc   : > { %v3964_v34 = vpop.xlane.xlu2 %3963  ;;  %7049 = vmatmul.msk.bf16.vlgmr.msrb.gmra.mxu0 %vm2968_vm1, %v5445_v61  ;;  %v3817_v39 = vpop.xlane.xlu1 %3816  ;;  %v13189_v61 = vld [vmem:[#allocation16_spill] sm:$0xff] }
 0x5bd   : > { %v3889_v45 = vpop.xlane.xlu0 %3888  ;;  %7733 = vrcp.f32 %v3817_v39 }
 0x5be   : > { %7735 = vrcp.f32 %v3889_v45  ;;  %v11507_v45 = vadd.f32 %v13189_v61, %v13188_v6 }
 0x5bf   : > { %v11494_v15 = vpop.eup %7729 }
 0x5c0   : > { %13187 = vst [vmem:[#allocation98_spill] sm:$0xff] %v11494_v15  ;;  %v3908_v13 = vsel %vm2968_vm1, %v11494_v15, 0.0  ;;  %v11503_v16 = vpop.eup %7731  ;;  %v11515_v15 = vpop.f32.mrf.mxu2  ;;  %v3299_v35 = vsel %vm2968_vm1, %v11507_v45, -inf }
 0x5c1   : > { %3909 = vadd.xlane.f32.xlu2 %v3908_v13  ;;  %3981 = vadd.xlane.f32.xlu1 %v3980_v27  ;;  %13190 = vst [vmem:[#allocation86_spill] sm:$0xff] %v11507_v45  ;;  %v2450_v46 = vpop.f32.mrf.mxu3 }
 0x5c2   : > { %v4952_v29 = vpop.f32.mrf.mxu1  ;;  %3303 = vmax.xlane.f32.xlu0 %v3302_v31 }
 0x5c3   : > { %v7734_v19 = vpop.eup %7733 }
 0x5c4   : > { %v3145_v39 = vpop.xlane.xlu2 %3144  ;;  %v3892_v3 = vpop.xlane.xlu1 %3891  ;;  %v4275_v54 = vmul.f32 %v7734_v19, %v11155_v60  ;;  %v5779_v60 = vpack.c.bf16 %v4952_v29, %v4952_v29 }
 0x5c5   : > { %v3286_v24 = vpop.xlane.xlu0 %3285  ;;  %v7736_v13 = vpop.eup %7735  ;;  %7737 = vrcp.f32 %v3892_v3  ;;  %v3411_v31 = vsub.f32 %v11178_v37, %v3145_v39  ;;  %v4747_v3 = vunpack.c.l.b16 %v4404_v5  ;;  %v11534_v5 = vadd.f32 %v10741_v47, %v11360_v63 }
 0x5c6   : > { %v3458_v27 = vsub.f32 %v11182_v10, %v3286_v24  ;;  %v4403_v6 = vpack.c.bf16 %v4275_v54, %v4275_v54  ;;  %7739 = vrcp.f32 %v3964_v34  ;;  %v4299_v25 = vmul.f32 %v7736_v13, %v11163_v38 }
 0x5c7   : > { %v4049_v10 = vsel %vm2968_vm1, %v11503_v16, 0.0  ;;  %v3597_v37 = vmul.f32 1.442695, %v3411_v31  ;;  %v11527_v29 = vunpack.c.l.b16 %v5779_v60 }
 0x5c8   : > { %v3691_v61 = vmul.f32 1.442695, %v3458_v27  ;;  %v4746_v54 = vunpack.c.l.b16 %v4403_v6  ;;  %v13192_v27 = vld [vmem:[#allocation99_spill] sm:$0xff]  ;;  %v4427_v38 = vpack.c.bf16 %v4299_v25, %v4299_v25  ;;  %v11542_v60 = vpop.f32.mrf.mxu2 }
 0x5c9   : > { %3300 = vmax.xlane.f32.xlu2 %v3299_v35  ;;  %4050 = vadd.xlane.f32.xlu1 %v4049_v10  ;;  %v11525_v55 = vadd.f32 %v13192_v27, %v2450_v46  ;;  %13193 = vst [vmem:[#allocation113_spill] sm:$0xff] %v11527_v29  ;;  %v11555_v27 = vadd.f32 %v10781_v41, %v11327_v56 }
 0x5ca   : > { %7741 = vpow2.f32 %v3691_v61  ;;  %v4954_v24 = vpop.f32.mrf.mxu1  ;;  %3234 = vmax.xlane.f32.xlu0 %v3233_v33  ;;  %v4753_v45 = vpack.c.b16 %v4747_v3, %v4746_v54  ;;  %13195 = vst [vmem:[#allocation85_spill] sm:$0xff] %v11542_v60  ;;  %v3308_v54 = vsel %vm2968_vm1, %v11534_v5, -inf }
 0x5cb   : > { %v5780_v39 = vpack.c.bf16 %v4954_v24, %v4954_v24  ;;  %v7738_v19 = vpop.eup %7737  ;;  %7743 = vpow2.f32 %v3597_v37  ;;  %v3236_v10 = vsel %vm2968_vm1, %v11525_v55, -inf  ;;  %v3305_v56 = vsel %vm2968_vm1, %v11555_v27, -inf }
 0x5cc   : > { %v3220_v34 = vpop.xlane.xlu2 %3219  ;;  %v4300_v13 = vmul.f32 %v7738_v19, %v11185_v7  ;;  %v3961_v35 = vpop.xlane.xlu1 %3960  ;;  %7014 = vmatmul.msk.bf16.gmra.mxu3 %vm2968_vm1, %v4753_v45  ;;  %v4977_v45 = vunpack.c.l.b16 %v4427_v38 }
 0x5cd   : > { %v11530_v61 = vunpack.c.l.b16 %v5780_v39  ;;  %v4033_v31 = vpop.xlane.xlu0 %4032  ;;  %v7740_v6 = vpop.eup %7739  ;;  %7745 = vrcp.f32 %v3961_v35  ;;  %v3436_v46 = vsub.f32 %v11198_v59, %v3220_v34 }
 0x5ce   : > { %v4428_v33 = vpack.c.bf16 %v4300_v13, %v4300_v13  ;;  %7747 = vrcp.f32 %v4033_v31  ;;  %v4324_v24 = vmul.f32 %v7740_v6, %v11158_v9 }
 0x5cf   : > { %13194 = vst [vmem:[#allocation61_spill] sm:$0xff] %v11530_v61  ;;  %v3647_v59 = vmul.f32 1.442695, %v3436_v46 }
 0x5d0   : > { %v11540_v7 = vpop.eup %7741  ;;  %v4978_v37 = vunpack.c.l.b16 %v4428_v33  ;;  %v4452_v13 = vpack.c.bf16 %v4324_v24, %v4324_v24 }
 0x5d1   : > { %v4052_v63 = vsel %vm2968_vm1, %v11540_v7, 0.0  ;;  %3237 = vmax.xlane.f32.xlu1 %v3236_v10  ;;  %v11551_v39 = vpop.eup %7743  ;;  %v11565_v10 = vpop.f32.mrf.mxu0 }
 0x5d2   : > { %4053 = vadd.xlane.f32.xlu2 %v4052_v63  ;;  %3309 = vmax.xlane.f32.xlu0 %v3308_v54  ;;  %v4984_v3 = vpack.c.b16 %v4978_v37, %v4977_v45  ;;  %v3911_v63 = vsel %vm2968_vm1, %v11551_v39, 0.0  ;;  %13196 = vst [vmem:[#allocation81_spill] sm:$0xff] %v11565_v10  ;;  %v11567_v45 = vpop.f32.mrf.mxu2 }
 0x5d3   : > { %v7746_v19 = vpop.eup %7745  ;;  %13197 = vst [vmem:[#allocation73_spill] sm:$0xff] %v11567_v45 }
 0x5d4   : > { %7026 = vmatmul.msk.bf16.gmra.mxu2 %vm2968_vm1, %v4984_v3  ;;  %v4036_v34 = vpop.xlane.xlu1 %4035  ;;  %v7748_v9 = vpop.eup %7747  ;;  %v4323_v31 = vmul.f32 %v7746_v19, %v11203_v36  ;;  %v5209_v36 = vunpack.c.l.b16 %v4452_v13 }
 0x5d5   : > { %v3148_v38 = vpop.xlane.xlu0 %3147  ;;  %7749 = vrcp.f32 %v4036_v34  ;;  %v4347_v46 = vmul.f32 %v7748_v9, %v11207_v52 }
 0x5d6   : > { %v3412_v35 = vsub.f32 %v11220_v57, %v3148_v38  ;;  %7751 = vpow2.f32 %v3647_v59  ;;  %v4451_v6 = vpack.c.bf16 %v4323_v31, %v4323_v31 }
 0x5d7   : > { %v4475_v52 = vpack.c.bf16 %v4347_v46, %v4347_v46 }
 0x5d8   : > { %v3599_v33 = vmul.f32 1.442695, %v3412_v35  ;;  %v5208_v37 = vunpack.c.l.b16 %v4451_v6  ;;  %v2453_v6 = vpop.f32.mrf.mxu3 }
 0x5d9   : > { %3912 = vadd.xlane.f32.xlu1 %v3911_v63  ;;  %v5439_v46 = vunpack.c.l.b16 %v4475_v52 }
 0x5da   : > { %7753 = vpow2.f32 %v3599_v33  ;;  %3306 = vmax.xlane.f32.xlu2 %v3305_v56  ;;  %v5215_v24 = vpack.c.b16 %v5209_v36, %v5208_v37  ;;  %v11580_v56 = vpop.f32.mrf.mxu2  ;;  %v11582_v37 = vpop.f32.mrf.mxu0  ;;  %v11585_v36 = vadd.f32 %v13120_v32, %v2453_v6  ;;  %v13200_v6 = vld [vmem:[#allocation31_spill] sm:$0xff] }
 0x5db   : > { %v7750_v57 = vpop.eup %7749  ;;  %13198 = vst [vmem:[#allocation72_spill] sm:$0xff] %v11580_v56 }
 0x5dc   : > { %v11569_v54 = vpop.eup %7751  ;;  %v4348_v59 = vmul.f32 %v7750_v57, %v11226_v2  ;;  %v3217_v3 = vpop.xlane.xlu1 %3216  ;;  %7038 = vmatmul.msk.bf16.gmra.mxu1 %vm2968_vm1, %v5215_v24  ;;  %13199 = vst [vmem:[#allocation66_spill] sm:$0xff] %v11582_v37 }
 0x5dd   : > { %v3895_v19 = vpop.xlane.xlu2 %3894  ;;  %v3435_v34 = vsub.f32 %v11243_v48, %v3217_v3  ;;  %v3823_v38 = vpop.xlane.xlu0 %3822  ;;  %v3986_v13 = vsel %vm2968_vm1, %v11569_v54, 0.0 }
 0x5de   : > { %v4476_v9 = vpack.c.bf16 %v4348_v59, %v4348_v59  ;;  %7755 = vrcp.f32 %v3823_v38 }
 0x5df   : > { %v3645_v35 = vmul.f32 1.442695, %v3435_v34  ;;  %7757 = vrcp.f32 %v3895_v19 }
 0x5e0   : > { %v11574_v31 = vpop.eup %7753  ;;  %v5440_v33 = vunpack.c.l.b16 %v4476_v9 }
 0x5e1   : > { %v3914_v2 = vsel %vm2968_vm1, %v11574_v31, 0.0  ;;  %7759 = vpow2.f32 %v3645_v35  ;;  %3987 = vadd.xlane.f32.xlu1 %v3986_v13  ;;  %v3239_v13 = vsel %vm2968_vm1, %v11585_v36, -inf }
 0x5e2   : > { %v4957_v48 = vpop.f32.mrf.mxu1  ;;  %3915 = vadd.xlane.f32.xlu2 %v3914_v2  ;;  %v5446_v63 = vpack.c.b16 %v5440_v33, %v5439_v46 }
 0x5e3   : > { %v5781_v35 = vpack.c.bf16 %v4957_v48, %v4957_v48 }
 0x5e4   : > { %7050 = vmatmul.msk.bf16.gmra.mxu0 %vm2968_vm1, %v5446_v63  ;;  %v3826_v57 = vpop.xlane.xlu1 %3825  ;;  %v7756_v59 = vpop.eup %7755  ;;  %v13201_v63 = vld [vmem:[#allocation122_spill] sm:$0xff] }
 0x5e5   : > { %v3292_v24 = vpop.xlane.xlu2 %3291  ;;  %7761 = vrcp.f32 %v3826_v57  ;;  %v3898_v3 = vpop.xlane.xlu0 %3897  ;;  %v4277_v9 = vmul.f32 %v7756_v59, %v11246_v18  ;;  %v11599_v57 = vadd.f32 %v13201_v63, %v11427_v49  ;;  %v11603_v59 = vunpack.c.l.b16 %v5781_v35 }
 0x5e6   : > { %v3460_v52 = vsub.f32 %v11263_v21, %v3292_v24  ;;  %v7758_v19 = vpop.eup %7757  ;;  %7763 = vrcp.f32 %v3898_v3  ;;  %v11601_v18 = vpop.f32.mrf.mxu2 }
 0x5e7   : > { %v11589_v34 = vpop.eup %7759  ;;  %v4301_v33 = vmul.f32 %v7758_v19, %v13200_v6  ;;  %13202 = vst [vmem:[#allocation70_spill] sm:$0xff] %v11601_v18  ;;  %v4405_v24 = vpack.c.bf16 %v4277_v9, %v4277_v9 }
 0x5e8   : > { %v3695_v38 = vmul.f32 1.442695, %v3460_v52  ;;  %v3983_v32 = vsel %vm2968_vm1, %v11589_v34, 0.0  ;;  %13203 = vst [vmem:[#allocation55_spill] sm:$0xff] %v11603_v59  ;;  %v13204_v52 = vld [vmem:[#allocation19_spill] sm:$0xff] }
 0x5e9   : > { %3984 = vadd.xlane.f32.xlu0 %v3983_v32  ;;  %3240 = vmax.xlane.f32.xlu1 %v3239_v13  ;;  %v4429_v32 = vpack.c.bf16 %v4301_v33, %v4301_v33  ;;  %v13206_v13 = vld [vmem:[#allocation18_spill] sm:$0xff] }
 0x5ea   : > { %7765 = vpow2.f32 %v3695_v38  ;;  %v4959_v2 = vpop.f32.mrf.mxu1 }
 0x5eb   : > { %v5782_v21 = vpack.c.bf16 %v4959_v2, %v4959_v2  ;;  %v7762_v46 = vpop.eup %7761  ;;  %v13207_v2 = vld [vmem:[#allocation109_spill] sm:$0xff] }
 0x5ec   : > { %v7764_v48 = vpop.eup %7763  ;;  %v4278_v3 = vmul.f32 %v7762_v46, %v13204_v52  ;;  %v3289_v19 = vpop.xlane.xlu1 %3288  ;;  %v4979_v52 = vunpack.c.l.b16 %v4429_v32 }
 0x5ed   : > { %v11606_v25 = vunpack.c.l.b16 %v5782_v21  ;;  %v4039_v38 = vpop.xlane.xlu2 %4038  ;;  %v4302_v6 = vmul.f32 %v7764_v48, %v13206_v13  ;;  %v3459_v56 = vsub.f32 %v13207_v2, %v3289_v19  ;;  %v3967_v60 = vpop.xlane.xlu0 %3966  ;;  %v3314_v21 = vsel %vm2968_vm1, %v11599_v57, -inf }
 0x5ee   : > { %v4406_v49 = vpack.c.bf16 %v4278_v3, %v4278_v3  ;;  %7767 = vrcp.f32 %v3967_v60  ;;  %v4748_v48 = vunpack.c.l.b16 %v4405_v24  ;;  %v11618_v60 = vpop.f32.mrf.mxu2  ;;  %v13210_v24 = vld [vmem:[#allocation102_spill] sm:$0xff] }
 0x5ef   : > { %13205 = vst [vmem:[#allocation60_spill] sm:$0xff] %v11606_v25  ;;  %v4430_v35 = vpack.c.bf16 %v4302_v6, %v4302_v6  ;;  %v3693_v45 = vmul.f32 1.442695, %v3459_v56  ;;  %7769 = vrcp.f32 %v4039_v38  ;;  %v13209_v56 = vld [vmem:[#allocation106_spill] sm:$0xff] }
 0x5f0   : > { %v11612_v9 = vpop.eup %7765  ;;  %v4749_v46 = vunpack.c.l.b16 %v4406_v49  ;;  %13208 = vst [vmem:[#allocation62_spill] sm:$0xff] %v11618_v60  ;;  %v11622_v2 = vadd.f32 %v13209_v56, %v11394_v1 }
 0x5f1   : > { %v4058_v33 = vsel %vm2968_vm1, %v11612_v9, 0.0  ;;  %7771 = vpow2.f32 %v3693_v45  ;;  %3315 = vmax.xlane.f32.xlu1 %v3314_v21  ;;  %v4980_v3 = vunpack.c.l.b16 %v4430_v35 }
 0x5f2   : > { %4059 = vadd.xlane.f32.xlu0 %v4058_v33  ;;  %v4754_v19 = vpack.c.b16 %v4749_v46, %v4748_v48  ;;  %v13211_v46 = vld [vmem:[#allocation114_spill] sm:$0xff] }
 0x5f3   : > { %v4985_v13 = vpack.c.b16 %v4980_v3, %v4979_v52  ;;  %v2455_v52 = vpop.f32.mrf.mxu3  ;;  %v3311_v3 = vsel %vm2968_vm1, %v11622_v2, -inf }
 0x5f4   : > { %v7768_v6 = vpop.eup %7767  ;;  %v3970_v49 = vpop.xlane.xlu1 %3969  ;;  %7015 = vmatmul.msk.bf16.gmra.mxu3 %vm2968_vm1, %v4754_v19  ;;  %v13212_v19 = vld [vmem:[#allocation91_spill] sm:$0xff] }
 0x5f5   : > { %v3154_v38 = vpop.xlane.xlu2 %3153  ;;  %7773 = vrcp.f32 %v3970_v49  ;;  %7027 = vmatmul.msk.bf16.gmra.mxu2 %vm2968_vm1, %v4985_v13  ;;  %v4042_v45 = vpop.xlane.xlu0 %4041  ;;  %v4325_v33 = vmul.f32 %v7768_v6, %v13211_v46  ;;  %v13215_v46 = vld [vmem:[#allocation89_spill] sm:$0xff] }
 0x5f6   : > { %v3414_v32 = vsub.f32 %v13210_v24, %v3154_v38  ;;  %v7770_v35 = vpop.eup %7769  ;;  %7775 = vrcp.f32 %v4042_v45  ;;  %v13213_v38 = vld [vmem:[#allocation65_spill] sm:$0xff]  ;;  %v11638_v24 = vpop.f32.mrf.mxu0 }
 0x5f7   : > { %v11627_v21 = vpop.eup %7771  ;;  %v4349_v49 = vmul.f32 %v7770_v35, %v13212_v19  ;;  %v11636_v45 = vadd.f32 %v13213_v38, %v2455_v52  ;;  %13214 = vst [vmem:[#allocation58_spill] sm:$0xff] %v11638_v24  ;;  %v4453_v6 = vpack.c.bf16 %v4325_v33, %v4325_v33 }
 0x5f8   : > { %v3603_v48 = vmul.f32 1.442695, %v3414_v32  ;;  %v4055_v1 = vsel %vm2968_vm1, %v11627_v21, 0.0 }
 0x5f9   : > { %4056 = vadd.xlane.f32.xlu2 %v4055_v1  ;;  %v4477_v25 = vpack.c.bf16 %v4349_v49, %v4349_v49  ;;  %v5210_v38 = vunpack.c.l.b16 %v4453_v6 }
 0x5fa   : > { %7777 = vpow2.f32 %v3603_v48  ;;  %3312 = vmax.xlane.f32.xlu0 %v3311_v3  ;;  %v11643_v48 = vpop.f32.mrf.mxu2 }
 0x5fb   : > { %v7774_v13 = vpop.eup %7773  ;;  %13216 = vst [vmem:[#allocation71_spill] sm:$0xff] %v11643_v48 }
 0x5fc   : > { %v7776_v32 = vpop.eup %7775  ;;  %v4326_v18 = vmul.f32 %v7774_v13, %v13215_v46  ;;  %v3151_v60 = vpop.xlane.xlu1 %3150  ;;  %v3242_v13 = vsel %vm2968_vm1, %v11636_v45, -inf }
 0x5fd   : > { %v3829_v59 = vpop.xlane.xlu2 %3828  ;;  %v4350_v29 = vmul.f32 %v7776_v32, %v11317_v51  ;;  %v3223_v61 = vpop.xlane.xlu0 %3222  ;;  %v3413_v35 = vsub.f32 %v11337_v17, %v3151_v60  ;;  %v5441_v17 = vunpack.c.l.b16 %v4477_v25 }
 0x5fe   : > { %v4454_v1 = vpack.c.bf16 %v4326_v18, %v4326_v18  ;;  %v3437_v52 = vsub.f32 %v11346_v0, %v3223_v61  ;;  %7779 = vrcp.f32 %v3829_v59 }
 0x5ff   : > { %v4478_v19 = vpack.c.bf16 %v4350_v29, %v4350_v29  ;;  %v3601_v33 = vmul.f32 1.442695, %v3413_v35  ;;  %v2458_v29 = vpop.f32.mrf.mxu3  ;;  %v11653_v35 = vpop.f32.mrf.mxu0 }
 0x600   : > { %v11646_v3 = vpop.eup %7777  ;;  %v5211_v46 = vunpack.c.l.b16 %v4454_v1  ;;  %v3649_v49 = vmul.f32 1.442695, %v3437_v52  ;;  %13217 = vst [vmem:[#allocation116_spill] sm:$0xff] %v11653_v35 }
 0x601   : > { %v3920_v51 = vsel %vm2968_vm1, %v11646_v3, 0.0  ;;  %7781 = vpow2.f32 %v3601_v33  ;;  %3243 = vmax.xlane.f32.xlu2 %v3242_v13  ;;  %v5442_v0 = vunpack.c.l.b16 %v4478_v19 }
 0x602   : > { %v4962_v60 = vpop.f32.mrf.mxu1  ;;  %3921 = vadd.xlane.f32.xlu0 %v3920_v51  ;;  %7783 = vpow2.f32 %v3649_v49  ;;  %v5216_v61 = vpack.c.b16 %v5211_v46, %v5210_v38  ;;  %v11657_v52 = vpop.f32.mrf.mxu2 }
 0x603   : > { %v5447_v18 = vpack.c.b16 %v5442_v0, %v5441_v17  ;;  %13218 = vst [vmem:[#allocation103_spill] sm:$0xff] %v11657_v52  ;;  %v5783_v38 = vpack.c.bf16 %v4962_v60, %v4962_v60 }
 0x604   : > { %7039 = vmatmul.msk.bf16.gmra.mxu1 %vm2968_vm1, %v5216_v61  ;;  %v3226_v32 = vpop.xlane.xlu1 %3225  ;;  %v7780_v1 = vpop.eup %7779 }
 0x605   : > { %v3904_v6 = vpop.xlane.xlu2 %3903  ;;  %7051 = vmatmul.msk.bf16.gmra.mxu0 %vm2968_vm1, %v5447_v18  ;;  %v3832_v59 = vpop.xlane.xlu0 %3831  ;;  %v3438_v25 = vsub.f32 %v11364_v43, %v3226_v32  ;;  %v4279_v49 = vmul.f32 %v7780_v1, %v11333_v28  ;;  %v11668_v61 = vunpack.c.l.b16 %v5783_v38 }
 0x606   : > { %7785 = vrcp.f32 %v3832_v59 }
 0x607   : > { %v11659_v19 = vpop.eup %7781  ;;  %v3651_v33 = vmul.f32 1.442695, %v3438_v25  ;;  %7787 = vrcp.f32 %v3904_v6  ;;  %13219 = vst [vmem:[#allocation21_spill] sm:$0xff] %v11668_v61  ;;  %v4407_v6 = vpack.c.bf16 %v4279_v49, %v4279_v49 }
 0x608   : > { %v11661_v13 = vpop.eup %7783  ;;  %v3917_v46 = vsel %vm2968_vm1, %v11659_v19, 0.0 }
 0x609   : > { %7789 = vpow2.f32 %v3651_v33  ;;  %v3989_v43 = vsel %vm2968_vm1, %v11661_v13, 0.0  ;;  %3918 = vadd.xlane.f32.xlu2 %v3917_v46  ;;  %v4750_v49 = vunpack.c.l.b16 %v4407_v6 }
 0x60a   : > { %v4964_v51 = vpop.f32.mrf.mxu1  ;;  %3990 = vadd.xlane.f32.xlu1 %v3989_v43  ;;  %v11678_v43 = vpop.f32.mrf.mxu2 }
 0x60b   : > { %v5784_v17 = vpack.c.bf16 %v4964_v51, %v4964_v51  ;;  %v2460_v51 = vpop.f32.mrf.mxu3  ;;  %13221 = vst [vmem:[#allocation32_spill] sm:$0xff] %v11678_v43 }
 0x60c   : > { %v7786_v0 = vpop.eup %7785  ;;  %v3901_v32 = vpop.xlane.xlu1 %3900 }
 0x60d   : > { %v11670_v18 = vunpack.c.l.b16 %v5784_v17  ;;  %v7788_v60 = vpop.eup %7787  ;;  %v4280_v59 = vmul.f32 %v7786_v0, %v11372_v62  ;;  %v3295_v25 = vpop.xlane.xlu0 %3294  ;;  %7791 = vrcp.f32 %v3901_v32  ;;  %v13222_v17 = vld [vmem:[#allocation129_spill] sm:$0xff] }
 0x60e   : > { %v3461_v1 = vsub.f32 %v11392_v11, %v3295_v25  ;;  %v3973_v33 = vpop.xlane.xlu2 %3972  ;;  %v4304_v52 = vmul.f32 %v7788_v60, %v13222_v17  ;;  %v13223_v25 = vld [vmem:[#allocation118_spill] sm:$0xff] }
 0x60f   : > { %13220 = vst [vmem:[#allocation47_spill] sm:$0xff] %v11670_v18  ;;  %v11676_v46 = vpop.eup %7789  ;;  %v4408_v38 = vpack.c.bf16 %v4280_v59, %v4280_v59  ;;  %7793 = vrcp.f32 %v3973_v33  ;;  %v11684_v28 = vadd.f32 %v13223_v25, %v2458_v29  ;;  %v13224_v59 = vld [vmem:[#allocation30_spill] sm:$0xff] }
 0x610   : > { %v3697_v48 = vmul.f32 1.442695, %v3461_v1  ;;  %v3992_v62 = vsel %vm2968_vm1, %v11676_v46, 0.0  ;;  %v4432_v24 = vpack.c.bf16 %v4304_v52, %v4304_v52  ;;  %v13238_v18 = vld [vmem:[#allocation126_spill] sm:$0xff] }
 0x611   : > { %v4751_v0 = vunpack.c.l.b16 %v4408_v38  ;;  %3993 = vadd.xlane.f32.xlu2 %v3992_v62  ;;  %v3245_v52 = vsel %vm2968_vm1, %v11684_v28, -inf }
 0x612   : > { %7795 = vpow2.f32 %v3697_v48  ;;  %v4982_v17 = vunpack.c.l.b16 %v4432_v24 }
 0x613   : > { %v7792_v32 = vpop.eup %7791  ;;  %v4755_v11 = vpack.c.b16 %v4751_v0, %v4750_v49  ;;  %v11693_v49 = vpop.f32.mrf.mxu3  ;;  %v13225_v0 = vld [vmem:[#allocation41_spill] sm:$0xff] }
 0x614   : > { %v4303_v35 = vmul.f32 %v7792_v32, %v13224_v59  ;;  %v3298_v43 = vpop.xlane.xlu1 %3297  ;;  %v13226_v32 = vld [vmem:[#allocation112_spill] sm:$0xff] }
 0x615   : > { %v3976_v61 = vpop.xlane.xlu0 %3975  ;;  %v3462_v60 = vsub.f32 %v11419_v53, %v3298_v43  ;;  %7016 = vmatmul.msk.bf16.gmra.mxu3 %vm2968_vm1, %v4755_v11  ;;  %v7794_v1 = vpop.eup %7793  ;;  %v11700_v43 = vadd.f32 %v13173_v26, %v11470_v12  ;;  %v11703_v11 = vadd.f32 %v13226_v32, %v2460_v51 }
 0x616   : > { %v4431_v33 = vpack.c.bf16 %v4303_v35, %v4303_v35  ;;  %7797 = vrcp.f32 %v3976_v61  ;;  %v4048_v6 = vpop.xlane.xlu2 %4047  ;;  %v4327_v53 = vmul.f32 %v7794_v1, %v13225_v0 }
 0x617   : > { %v3699_v38 = vmul.f32 1.442695, %v3462_v60  ;;  %7799 = vrcp.f32 %v4048_v6  ;;  %v3320_v51 = vsel %vm2968_vm1, %v11700_v43, -inf }
 0x618   : > { %v11689_v48 = vpop.eup %7795  ;;  %v4981_v29 = vunpack.c.l.b16 %v4431_v33  ;;  %v4455_v60 = vpack.c.bf16 %v4327_v53, %v4327_v53 }
 0x619   : > { %v5024_v62 = vpop.f32.mrf.mxu2  ;;  %7801 = vpow2.f32 %v3699_v38  ;;  %v4061_v35 = vsel %vm2968_vm1, %v11689_v48, 0.0  ;;  %3246 = vmax.xlane.f32.xlu2 %v3245_v52 }
 0x61a   : > { %4062 = vadd.xlane.f32.xlu0 %v4061_v35  ;;  %v4986_v61 = vpack.c.b16 %v4982_v17, %v4981_v29  ;;  %v5785_v29 = vpack.c.bf16 %v5024_v62, %v5024_v62 }
 0x61c   : > { %v7798_v24 = vpop.eup %7797  ;;  %v4045_v25 = vpop.xlane.xlu1 %4044  ;;  %7028 = vmatmul.msk.bf16.gmra.mxu2 %vm2968_vm1, %v4986_v61 }
 0x61d   : > { %v7800_v59 = vpop.eup %7799  ;;  %v4328_v1 = vmul.f32 %v7798_v24, %v11422_v23  ;;  %7803 = vrcp.f32 %v4045_v25  ;;  %v3157_v33 = vpop.xlane.xlu0 %3156  ;;  %v5212_v24 = vunpack.c.l.b16 %v4455_v60  ;;  %v13230_v60 = vld [vmem:[#allocation36_spill] sm:$0xff] }
 0x61e   : > { %v3229_v6 = vpop.xlane.xlu2 %3228  ;;  %v3415_v38 = vsub.f32 %v11439_v42, %v3157_v33  ;;  %v4352_v0 = vmul.f32 %v7800_v59, %v11425_v22  ;;  %v3248_v42 = vsel %vm2968_vm1, %v11703_v11, -inf  ;;  %v11720_v59 = vpop.f32.mrf.mxu3 }
 0x61f   : > { %v11708_v17 = vpop.eup %7801  ;;  %v4456_v12 = vpack.c.bf16 %v4328_v1, %v4328_v1  ;;  %v3439_v52 = vsub.f32 %v11443_v20, %v3229_v6  ;;  %v11718_v20 = vpop.f32.mrf.mxu0  ;;  %v11722_v1 = vunpack.c.l.b16 %v5785_v29 }
 0x620   : > { %v3605_v35 = vmul.f32 1.442695, %v3415_v38  ;;  %v4064_v23 = vsel %vm2968_vm1, %v11708_v17, 0.0  ;;  %13227 = vst [vmem:[#allocation82_spill] sm:$0xff] %v11718_v20  ;;  %v11728_v38 = vadd.f32 %v13230_v60, %v11449_v4 }
 0x621   : > { %v5026_v53 = vpop.f32.mrf.mxu2  ;;  %v5255_v61 = vpop.f32.mrf.mxu1  ;;  %v5213_v32 = vunpack.c.l.b16 %v4456_v12  ;;  %v3653_v25 = vmul.f32 1.442695, %v3439_v52  ;;  %4065 = vadd.xlane.f32.xlu1 %v4064_v23  ;;  %3321 = vmax.xlane.f32.xlu2 %v3320_v51  ;;  %13228 = vst [vmem:[#allocation78_spill] sm:$0xff] %v11722_v1  ;;  %v4480_v12 = vpack.c.bf16 %v4352_v0, %v4352_v0 }
 0x622   : > { %v5786_v62 = vpack.c.bf16 %v5026_v53, %v5026_v53  ;;  %7805 = vpow2.f32 %v3605_v35  ;;  %3249 = vmax.xlane.f32.xlu0 %v3248_v42 }
 0x623   : > { %v7804_v22 = vpop.eup %7803  ;;  %7807 = vpow2.f32 %v3653_v25  ;;  %v5217_v6 = vpack.c.b16 %v5213_v32, %v5212_v24  ;;  %v5809_v24 = vpack.c.bf16 %v5255_v61, %v5255_v61  ;;  %v5444_v4 = vunpack.c.l.b16 %v4480_v12 }
 0x624   : > { %v11724_v33 = vunpack.c.l.b16 %v5786_v62  ;;  %v4351_v52 = vmul.f32 %v7804_v22, %v11436_v50  ;;  %v3160_v51 = vpop.xlane.xlu1 %3159  ;;  %v3317_v22 = vsel %vm2968_vm1, %v11728_v38, -inf }
 0x625   : > { %7040 = vmatmul.msk.bf16.gmra.mxu1 %vm2968_vm1, %v5217_v6  ;;  %v3232_v53 = vpop.xlane.xlu0 %3231  ;;  %v3416_v29 = vsub.f32 %v11456_v30, %v3160_v51  ;;  %v11746_v12 = vunpack.c.l.b16 %v5809_v24 }
 0x626   : > { %13229 = vst [vmem:[#allocation83_spill] sm:$0xff] %v11724_v33  ;;  %v4479_v23 = vpack.c.bf16 %v4351_v52, %v4351_v52  ;;  %v3440_v42 = vsub.f32 %v11460_v44, %v3232_v53 }
 0x627   : > { %v3607_v32 = vmul.f32 1.442695, %v3416_v29  ;;  %13231 = vst [vmem:[#allocation52_spill] sm:$0xff] %v11746_v12  ;;  %v11750_v51 = vpop.f32.mrf.mxu0  ;;  %v11753_v29 = vpop.f32.mrf.mxu3 }
 0x628   : > { %v11736_v25 = vpop.eup %7805  ;;  %v5443_v0 = vunpack.c.l.b16 %v4479_v23  ;;  %v3655_v62 = vmul.f32 1.442695, %v3440_v42  ;;  %13233 = vst [vmem:[#allocation48_spill] sm:$0xff] %v11750_v51 }
 0x629   : > { %v5257_v50 = vpop.f32.mrf.mxu1  ;;  %v11740_v35 = vpop.eup %7807  ;;  %7809 = vpow2.f32 %v3607_v32  ;;  %3318 = vmax.xlane.f32.xlu1 %v3317_v22  ;;  %v3923_v30 = vsel %vm2968_vm1, %v11736_v25, 0.0 }
 0x62a   : > { %v5810_v6 = vpack.c.bf16 %v5257_v50, %v5257_v50  ;;  %7811 = vpow2.f32 %v3655_v62  ;;  %v3995_v44 = vsel %vm2968_vm1, %v11740_v35, 0.0  ;;  %3924 = vadd.xlane.f32.xlu0 %v3923_v30  ;;  %v5448_v61 = vpack.c.b16 %v5444_v4, %v5443_v0 }
 0x62b   : > { %3996 = vadd.xlane.f32.xlu2 %v3995_v44 }
 0x62c   : > { %v11748_v52 = vunpack.c.l.b16 %v5810_v6  ;;  %7052 = vmatmul.msk.bf16.gmra.mxu0 %vm2968_vm1, %v5448_v61  ;;  %v3907_v53 = vpop.xlane.xlu1 %3906  ;;  %v11767_v6 = vadd.f32 %v13177_v8, %v11693_v49 }
 0x62d   : > { %v3979_v42 = vpop.xlane.xlu0 %3978  ;;  %7813 = vrcp.f32 %v3907_v53 }
 0x62e   : > { %13232 = vst [vmem:[#allocation94_spill] sm:$0xff] %v11748_v52  ;;  %7815 = vrcp.f32 %v3979_v42  ;;  %v3251_v23 = vsel %vm2968_vm1, %v11767_v6, -inf }
 0x62f   : > { %v11757_v32 = vpop.eup %7809  ;;  %v11770_v53 = vpop.f32.mrf.mxu3 }
 0x630   : > { %v11759_v4 = vpop.eup %7811  ;;  %v3926_v24 = vsel %vm2968_vm1, %v11757_v32, 0.0 }
 0x631   : > { %3927 = vadd.xlane.f32.xlu1 %v3926_v24  ;;  %v3998_v0 = vsel %vm2968_vm1, %v11759_v4, 0.0 }
 0x632   : > { %3999 = vadd.xlane.f32.xlu0 %v3998_v0 }
 0x633   : > { %v7814_v22 = vpop.eup %7813 }
 0x634   : > { %v3910_v62 = vpop.xlane.xlu2 %3909  ;;  %v3982_v50 = vpop.xlane.xlu1 %3981  ;;  %v4305_v42 = vmul.f32 %v7814_v22, %v11473_v14  ;;  %v13236_v22 = vld [vmem:[#allocation20_spill] sm:$0xff] }
 0x635   : > { %7817 = vrcp.f32 %v3910_v62  ;;  %v3304_v30 = vpop.xlane.xlu0 %3303  ;;  %v7816_v44 = vpop.eup %7815  ;;  %v13234_v62 = vld [vmem:[#allocation68_spill] sm:$0xff] }
 0x636   : > { %v3464_v61 = vsub.f32 %v11490_v58, %v3304_v30  ;;  %7819 = vrcp.f32 %v3982_v50  ;;  %v4329_v0 = vmul.f32 %v7816_v44, %v11477_v40  ;;  %v11778_v20 = vadd.f32 %v13234_v62, %v11515_v15  ;;  %v13235_v50 = vld [vmem:[#allocation98_spill] sm:$0xff]  ;;  %v13239_v15 = vld [vmem:[#allocation33_spill] sm:$0xff] }
 0x637   : > { %v4433_v58 = vpack.c.bf16 %v4305_v42, %v4305_v42  ;;  %v13237_v40 = vld [vmem:[#allocation86_spill] sm:$0xff]  ;;  %v5687_v10 = vunpack.c.l.b16 %v13239_v15  ;;  %v13241_v15 = vld [vmem:[#allocation57_spill] sm:$0xff] }
 0x638   : > { %v3703_v24 = vmul.f32 1.442695, %v3464_v61  ;;  %v4457_v14 = vpack.c.bf16 %v4329_v0, %v4329_v0  ;;  %v11789_v0 = vpop.f32.mrf.mxu3 }
 0x639   : > { %v5052_v42 = vunpack.c.l.b16 %v4433_v58 }
 0x63a   : > { %7821 = vpow2.f32 %v3703_v24  ;;  %3252 = vmax.xlane.f32.xlu0 %v3251_v23  ;;  %v5686_v24 = vunpack.c.l.b16 %v13238_v18 }
 0x63b   : > { %v7818_v8 = vpop.eup %7817 }
 0x63c   : > { %v7820_v49 = vpop.eup %7819  ;;  %v4306_v30 = vmul.f32 %v7818_v8, %v13235_v50  ;;  %v3301_v51 = vpop.xlane.xlu2 %3300  ;;  %v3326_v8 = vsel %vm2968_vm1, %v11778_v20, -inf }
 0x63d   : > { %v4051_v1 = vpop.xlane.xlu1 %4050  ;;  %v4330_v61 = vmul.f32 %v7820_v49, %v13236_v22  ;;  %v3463_v44 = vsub.f32 %v13237_v40, %v3301_v51  ;;  %v5283_v49 = vunpack.c.l.b16 %v4457_v14  ;;  %v3235_v51 = vpop.xlane.xlu0 %3234  ;;  %v5684_v14 = vunpack.c.l.b16 %v13241_v15 }
 0x63e   : > { %v4434_v33 = vpack.c.bf16 %v4306_v30, %v4306_v30  ;;  %7823 = vrcp.f32 %v4051_v1  ;;  %v13240_v1 = vld [vmem:[#allocation127_spill] sm:$0xff] }
 0x63f   : > { %v4458_v23 = vpack.c.bf16 %v4330_v61, %v4330_v61  ;;  %v3701_v12 = vmul.f32 1.442695, %v3463_v44  ;;  %v5685_v22 = vunpack.c.l.b16 %v13240_v1  ;;  %v5691_v61 = vpack.c.b16 %v5687_v10, %v5686_v24 }
 0x640   : > { %v11784_v52 = vpop.eup %7821  ;;  %v5053_v37 = vunpack.c.l.b16 %v4434_v33 }
 0x641   : > { %v5284_v50 = vunpack.c.l.b16 %v4458_v23  ;;  %7825 = vpow2.f32 %v3701_v12  ;;  %v4070_v18 = vsel %vm2968_vm1, %v11784_v52, 0.0  ;;  %v13242_v23 = vld [vmem:[#allocation59_spill] sm:$0xff]  ;;  %v13243_v12 = vld [vmem:[#allocation16_spill] sm:$0xff] }
 0x642   : > { %v5060_v30 = vpack.c.b16 %v5053_v37, %v5052_v42  ;;  %4071 = vadd.xlane.f32.xlu2 %v4070_v18  ;;  %3327 = vmax.xlane.f32.xlu0 %v3326_v8  ;;  %v11798_v62 = vadd.f32 %v13243_v12, %v13242_v23  ;;  %v13244_v42 = vld [vmem:[#allocation22_spill] sm:$0xff]  ;;  %v13245_v8 = vld [vmem:[#allocation35_spill] sm:$0xff] }
 0x643   : > { %v5291_v58 = vpack.c.b16 %v5284_v50, %v5283_v49  ;;  %v5683_v10 = vunpack.c.l.b16 %v13244_v42  ;;  %v5682_v49 = vunpack.c.l.b16 %v13245_v8  ;;  %v5690_v50 = vpack.c.b16 %v5685_v22, %v5684_v14  ;;  %v13246_v18 = vld [vmem:[#allocation46_spill] sm:$0xff]  ;;  %v11813_v22 = vpop.f32.mrf.mxu3 }
 0x644   : > { %7029 = vmatmul.msk.bf16.vlgmr.msrb.gmra.mxu3 %vm2968_vm1, %v5060_v30  ;;  %v7824_v44 = vpop.eup %7823  ;;  %v3441_v30 = vsub.f32 %v13246_v18, %v3235_v51  ;;  %v13249_v18 = vld [vmem:[#allocation17_spill] sm:$0xff] }
 0x645   : > { %v4054_v33 = vpop.xlane.xlu2 %4053  ;;  %v3238_v40 = vpop.xlane.xlu1 %3237  ;;  %7041 = vmatmul.msk.bf16.vlgmr.msrb.gmra.mxu2 %vm2968_vm1, %v5291_v58  ;;  %5712 = vmatpush.bf16.msrb.mxu3 %v5691_v61  ;;  %v4353_v15 = vmul.f32 %v7824_v44, %v11503_v16  ;;  %v13247_v58 = vld [vmem:[#allocation125_spill] sm:$0xff]  ;;  %v5689_v23 = vpack.c.b16 %v5683_v10, %v5682_v49 }
 0x646   : > { %7827 = vrcp.f32 %v4054_v33  ;;  %v3442_v37 = vsub.f32 %v11525_v55, %v3238_v40  ;;  %v3323_v55 = vsel %vm2968_vm1, %v11798_v62, -inf  ;;  %v5681_v40 = vunpack.c.l.b16 %v13247_v58  ;;  %v3310_v14 = vpop.xlane.xlu0 %3309  ;;  %v13248_v16 = vld [vmem:[#allocation101_spill] sm:$0xff] }
 0x647   : > { %v11803_v24 = vpop.eup %7825  ;;  %v3657_v51 = vmul.f32 1.442695, %v3441_v30  ;;  %v11817_v44 = vadd.f32 %v13248_v16, %v11720_v59  ;;  %v3466_v49 = vsub.f32 %v11534_v5, %v3310_v14 }
 0x648   : > { %v3659_v1 = vmul.f32 1.442695, %v3442_v37  ;;  %v4067_v33 = vsel %vm2968_vm1, %v11803_v24, 0.0  ;;  %v4481_v37 = vpack.c.bf16 %v4353_v15, %v4353_v15 }
 0x649   : > { %5713 = vmatpush.bf16.msrb.mxu3 %v5690_v50  ;;  %4068 = vadd.xlane.f32.xlu1 %v4067_v33  ;;  %v11821_v33 = vpop.f32.mrf.mxu0  ;;  %v3254_v16 = vsel %vm2968_vm1, %v11817_v44, -inf }
 0x64a   : > { %7829 = vpow2.f32 %v3659_v1  ;;  %3324 = vmax.xlane.f32.xlu2 %v3323_v55  ;;  %v5680_v1 = vunpack.c.l.b16 %v13249_v18  ;;  %13250 = vst [vmem:[#allocation104_spill] sm:$0xff] %v11821_v33  ;;  %v5514_v58 = vunpack.c.l.b16 %v4481_v37  ;;  %v11836_v37 = vadd.f32 %v10781_v41, %v11753_v29 }
 0x64c   : > { %v7828_v61 = vpop.eup %7827  ;;  %v5688_v59 = vpack.c.b16 %v5681_v40, %v5680_v1  ;;  %v3329_v41 = vsel %vm2968_vm1, %v11836_v37, -inf }
 0x64d   : > { %v4354_v42 = vmul.f32 %v7828_v61, %v11540_v7  ;;  %v3307_v8 = vpop.xlane.xlu2 %3306  ;;  %v3913_v50 = vpop.xlane.xlu1 %3912  ;;  %5714 = vmatpush.bf16.msrb.mxu3 %v5689_v23  ;;  %v3707_v23 = vmul.f32 1.442695, %v3466_v49 }
 0x64e   : > { %v3465_v55 = vsub.f32 %v11555_v27, %v3307_v8  ;;  %7831 = vrcp.f32 %v3913_v50 }
 0x64f   : > { %v4482_v10 = vpack.c.bf16 %v4354_v42, %v4354_v42  ;;  %7833 = vpow2.f32 %v3657_v51  ;;  %v11838_v42 = vpop.f32.mrf.mxu3 }
 0x650   : > { %v11825_v30 = vpop.eup %7829  ;;  %v3705_v15 = vmul.f32 1.442695, %v3465_v55 }
 0x651   : > { %v5515_v7 = vunpack.c.l.b16 %v4482_v10  ;;  %v4004_v61 = vsel %vm2968_vm1, %v11825_v30, 0.0  ;;  %5715 = vmatpush.bf16.msrb.mxu3 %v5688_v59  ;;  %3255 = vmax.xlane.f32.xlu1 %v3254_v16  ;;  %v11842_v50 = vpop.f32.mrf.mxu0  ;;  %v11853_v59 = vadd.f32 %v10741_v47, %v11770_v53 }
 0x652   : > { %7835 = vpow2.f32 %v3705_v15  ;;  %4005 = vadd.xlane.f32.xlu2 %v4004_v61 }
 0x653   : > { %v5522_v27 = vpack.c.b16 %v5515_v7, %v5514_v58  ;;  %v3332_v53 = vsel %vm2968_vm1, %v11853_v59, -inf }
 0x654   : > { %v7832_v5 = vpop.eup %7831 }
 0x655   : > { %v3916_v14 = vpop.xlane.xlu2 %3915  ;;  %7053 = vmatmul.msk.bf16.vlgmr.msra.gmra.mxu1 %vm2968_vm1, %v5522_v27  ;;  %v3988_v40 = vpop.xlane.xlu1 %3987  ;;  %v4307_v18 = vmul.f32 %v7832_v5, %v11551_v39 }
 0x656   : > { %v11832_v51 = vpop.eup %7833  ;;  %7837 = vrcp.f32 %v3916_v14 }
 0x657   : > { %7839 = vpow2.f32 %v3707_v23  ;;  %v5029_v1 = vpop.f32.mrf.mxu2  ;;  %v4001_v10 = vsel %vm2968_vm1, %v11832_v51, 0.0  ;;  %v4435_v39 = vpack.c.bf16 %v4307_v18, %v4307_v18 }
 0x658   : > { %v11840_v8 = vpop.eup %7835  ;;  %7841 = vrcp.f32 %v3988_v40  ;;  %v5787_v23 = vpack.c.bf16 %v5029_v1, %v5029_v1 }
 0x659   : > { %v4073_v55 = vsel %vm2968_vm1, %v11840_v8, 0.0  ;;  %4002 = vadd.xlane.f32.xlu1 %v4001_v10  ;;  %v5260_v29 = vpop.f32.mrf.mxu1  ;;  %v11859_v14 = vpop.f32.mrf.mxu0  ;;  %v5054_v40 = vunpack.c.l.b16 %v4435_v39 }
 0x65a   : > { %4074 = vadd.xlane.f32.xlu0 %v4073_v55  ;;  %3330 = vmax.xlane.f32.xlu2 %v3329_v41  ;;  %13251 = vst [vmem:[#allocation108_spill] sm:$0xff] %v11859_v14  ;;  %v5811_v1 = vpack.c.bf16 %v5260_v29, %v5260_v29 }
 0x65c   : > { %v7838_v49 = vpop.eup %7837  ;;  %v3985_v7 = vpop.xlane.xlu0 %3984  ;;  %v11876_v29 = vunpack.c.l.b16 %v5811_v1 }
 0x65d   : > { %v11855_v15 = vpop.eup %7839  ;;  %v4308_v58 = vmul.f32 %v7838_v49, %v11574_v31  ;;  %v3241_v61 = vpop.xlane.xlu1 %3240  ;;  %7843 = vrcp.f32 %v3985_v7 }
 0x65e   : > { %v7842_v16 = vpop.eup %7841  ;;  %v3443_v5 = vsub.f32 %v11585_v36, %v3241_v61  ;;  %v4076_v47 = vsel %vm2968_vm1, %v11855_v15, 0.0  ;;  %v11866_v49 = vpop.f32.mrf.mxu3  ;;  %v11868_v36 = vunpack.c.l.b16 %v5787_v23 }
 0x65f   : > { %v4436_v27 = vpack.c.bf16 %v4308_v58, %v4308_v58  ;;  %v5031_v55 = vpop.f32.mrf.mxu2  ;;  %v4332_v31 = vmul.f32 %v7842_v16, %v11569_v54 }
 0x660   : > { %v3661_v10 = vmul.f32 1.442695, %v3443_v5  ;;  %v5788_v41 = vpack.c.bf16 %v5031_v55, %v5031_v55  ;;  %13252 = vst [vmem:[#allocation110_spill] sm:$0xff] %v11868_v36 }
 0x661   : > { %v5055_v18 = vunpack.c.l.b16 %v4436_v27  ;;  %4077 = vadd.xlane.f32.xlu1 %v4076_v47  ;;  %v5262_v58 = vpop.f32.mrf.mxu1  ;;  %v4460_v33 = vpack.c.bf16 %v4332_v31, %v4332_v31 }
 0x662   : > { %3333 = vmax.xlane.f32.xlu0 %v3332_v53  ;;  %7845 = vpow2.f32 %v3661_v10  ;;  %v11870_v39 = vunpack.c.l.b16 %v5788_v41  ;;  %v5812_v14 = vpack.c.bf16 %v5262_v58, %v5262_v58  ;;  %v11885_v10 = vpop.f32.mrf.mxu0 }
 0x663   : > { %v5061_v7 = vpack.c.b16 %v5055_v18, %v5054_v40  ;;  %v7844_v61 = vpop.eup %7843  ;;  %v5286_v18 = vunpack.c.l.b16 %v4460_v33 }
 0x664   : > { %v4331_v27 = vmul.f32 %v7844_v61, %v11589_v34  ;;  %v11878_v23 = vunpack.c.l.b16 %v5812_v14 }
 0x665   : > { %v4060_v16 = vpop.xlane.xlu0 %4059  ;;  %v3316_v5 = vpop.xlane.xlu1 %3315  ;;  %7030 = vmatmul.msk.bf16.gmra.mxu3 %vm2968_vm1, %v5061_v7 }
 0x666   : > { %v3468_v55 = vsub.f32 %v11599_v57, %v3316_v5  ;;  %v4459_v47 = vpack.c.bf16 %v4331_v27, %v4331_v27  ;;  %7847 = vrcp.f32 %v4060_v16  ;;  %v11889_v1 = vpop.f32.mrf.mxu3 }
 0x668   : > { %v3711_v53 = vmul.f32 1.442695, %v3468_v55  ;;  %v11883_v34 = vpop.eup %7845  ;;  %v5285_v31 = vunpack.c.l.b16 %v4459_v47 }
 0x669   : > { %v4007_v41 = vsel %vm2968_vm1, %v11883_v34, 0.0 }
 0x66a   : > { %7849 = vpow2.f32 %v3711_v53  ;;  %4008 = vadd.xlane.f32.xlu1 %v4007_v41  ;;  %v5292_v14 = vpack.c.b16 %v5286_v18, %v5285_v31  ;;  %v11898_v47 = vpop.f32.mrf.mxu0 }
 0x66c   : > { %v4057_v57 = vpop.xlane.xlu2 %4056  ;;  %7042 = vmatmul.msk.bf16.gmra.mxu2 %vm2968_vm1, %v5292_v14  ;;  %v7848_v7 = vpop.eup %7847 }
 0x66d   : > { %v3313_v58 = vpop.xlane.xlu0 %3312  ;;  %7851 = vrcp.f32 %v4057_v57  ;;  %v4356_v16 = vmul.f32 %v7848_v7, %v11612_v9 }
 0x66e   : > { %v3467_v61 = vsub.f32 %v11622_v2, %v3313_v58  ;;  %v11902_v14 = vpop.f32.mrf.mxu3 }
 0x66f   : > { %v4484_v53 = vpack.c.bf16 %v4356_v16, %v4356_v16  ;;  %v11910_v16 = vadd.f32 %v13201_v63, %v11813_v22 }
 0x670   : > { %v11893_v33 = vpop.eup %7849  ;;  %v3709_v27 = vmul.f32 1.442695, %v3467_v61 }
 0x671   : > { %v4082_v5 = vsel %vm2968_vm1, %v11893_v33, 0.0  ;;  %v5517_v7 = vunpack.c.l.b16 %v4484_v53  ;;  %v3338_v22 = vsel %vm2968_vm1, %v11910_v16, -inf }
 0x672   : > { %7853 = vpow2.f32 %v3709_v27  ;;  %4083 = vadd.xlane.f32.xlu1 %v4082_v5 }
 0x673   : > { %v7852_v55 = vpop.eup %7851 }
 0x674   : > { %v4355_v18 = vmul.f32 %v7852_v55, %v11627_v21  ;;  %v3244_v41 = vpop.xlane.xlu2 %3243 }
 0x675   : > { %v3922_v31 = vpop.xlane.xlu0 %3921  ;;  %v3444_v2 = vsub.f32 %v11636_v45, %v3244_v41 }
 0x676   : > { %v4483_v57 = vpack.c.bf16 %v4355_v18, %v4355_v18  ;;  %7855 = vrcp.f32 %v3922_v31  ;;  %v11913_v31 = vpop.f32.mrf.mxu0  ;;  %v11915_v53 = vpop.f32.mrf.mxu3 }
 0x677   : > { %v3663_v9 = vmul.f32 1.442695, %v3444_v2  ;;  %13253 = vst [vmem:[#allocation107_spill] sm:$0xff] %v11915_v53 }
 0x678   : > { %v11904_v58 = vpop.eup %7853  ;;  %v5516_v61 = vunpack.c.l.b16 %v4483_v57  ;;  %v5034_v27 = vpop.f32.mrf.mxu2 }
 0x679   : > { %v4079_v5 = vsel %vm2968_vm1, %v11904_v58, 0.0  ;;  %7857 = vpow2.f32 %v3663_v9  ;;  %v5789_v2 = vpack.c.bf16 %v5034_v27, %v5034_v27 }
 0x67a   : > { %4080 = vadd.xlane.f32.xlu0 %v4079_v5  ;;  %v5523_v21 = vpack.c.b16 %v5517_v7, %v5516_v61 }
 0x67b   : > { %v11928_v27 = vunpack.c.l.b16 %v5789_v2 }
 0x67c   : > { %7054 = vmatmul.msk.bf16.gmra.mxu1 %vm2968_vm1, %v5523_v21  ;;  %v3919_v45 = vpop.xlane.xlu2 %3918  ;;  %v7856_v55 = vpop.eup %7855  ;;  %v11926_v21 = vadd.f32 %v13209_v56, %v11789_v0 }
 0x67d   : > { %v3991_v18 = vpop.xlane.xlu1 %3990  ;;  %7859 = vrcp.f32 %v3919_v45  ;;  %v4310_v57 = vmul.f32 %v7856_v55, %v11646_v3  ;;  %13254 = vst [vmem:[#allocation51_spill] sm:$0xff] %v11928_v27 }
 0x67e   : > { %7861 = vrcp.f32 %v3991_v18  ;;  %v11937_v40 = vpop.f32.mrf.mxu0  ;;  %v11939_v56 = vpop.f32.mrf.mxu3 }
 0x67f   : > { %v11917_v41 = vpop.eup %7857  ;;  %v4438_v3 = vpack.c.bf16 %v4310_v57, %v4310_v57  ;;  %13256 = vst [vmem:[#allocation45_spill] sm:$0xff] %v11939_v56 }
 0x680   : > { %v5036_v9 = vpop.f32.mrf.mxu2  ;;  %v4010_v63 = vsel %vm2968_vm1, %v11917_v41, 0.0 }
 0x681   : > { %v5790_v7 = vpack.c.bf16 %v5036_v9, %v5036_v9  ;;  %v5265_v61 = vpop.f32.mrf.mxu1  ;;  %4011 = vadd.xlane.f32.xlu2 %v4010_v63  ;;  %v5057_v0 = vunpack.c.l.b16 %v4438_v3 }
 0x682   : > { %3339 = vmax.xlane.f32.xlu0 %v3338_v22  ;;  %v3335_v22 = vsel %vm2968_vm1, %v11926_v21, -inf }
 0x683   : > { %v7860_v5 = vpop.eup %7859  ;;  %v11930_v45 = vunpack.c.l.b16 %v5790_v7  ;;  %v5813_v7 = vpack.c.bf16 %v5265_v61, %v5265_v61 }
 0x684   : > { %v4309_v55 = vmul.f32 %v7860_v5, %v11659_v19  ;;  %v3994_v18 = vpop.xlane.xlu2 %3993  ;;  %v7862_v54 = vpop.eup %7861 }
 0x685   : > { %13255 = vst [vmem:[#allocation96_spill] sm:$0xff] %v11930_v45  ;;  %7863 = vrcp.f32 %v3994_v18  ;;  %v4333_v2 = vmul.f32 %v7862_v54, %v11661_v13  ;;  %v11942_v18 = vunpack.c.l.b16 %v5813_v7 }
 0x686   : > { %v4437_v63 = vpack.c.bf16 %v4309_v55, %v4309_v55 }
 0x687   : > { %v4461_v9 = vpack.c.bf16 %v4333_v2, %v4333_v2 }
 0x688   : > { %v5056_v57 = vunpack.c.l.b16 %v4437_v63 }
 0x689   : > { %v5267_v19 = vpop.f32.mrf.mxu1  ;;  %3336 = vmax.xlane.f32.xlu2 %v3335_v22  ;;  %v11951_v22 = vpop.f32.mrf.mxu3 }
 0x68a   : > { %v5814_v5 = vpack.c.bf16 %v5267_v19, %v5267_v19  ;;  %v5062_v53 = vpack.c.b16 %v5057_v0, %v5056_v57  ;;  %13257 = vst [vmem:[#allocation105_spill] sm:$0xff] %v11951_v22  ;;  %v5287_v0 = vunpack.c.l.b16 %v4461_v9 }
 0x68b   : > { %v7864_v36 = vpop.eup %7863 }
 0x68c   : > { %v4334_v55 = vmul.f32 %v7864_v36, %v11676_v46  ;;  %v11945_v27 = vunpack.c.l.b16 %v5814_v5  ;;  %v3247_v45 = vpop.xlane.xlu2 %3246  ;;  %7031 = vmatmul.msk.bf16.gmra.mxu3 %vm2968_vm1, %v5062_v53  ;;  %v11953_v46 = vpop.f32.mrf.mxu0 }
 0x68d   : > { %v4063_v3 = vpop.xlane.xlu0 %4062  ;;  %v3445_v13 = vsub.f32 %v11684_v28, %v3247_v45 }
 0x68e   : > { %v4462_v54 = vpack.c.bf16 %v4334_v55, %v4334_v55  ;;  %7865 = vrcp.f32 %v4063_v3 }
 0x68f   : > { %v3665_v63 = vmul.f32 1.442695, %v3445_v13 }
 0x690   : > { %v5288_v2 = vunpack.c.l.b16 %v4462_v54 }
 0x691   : > { %7867 = vpow2.f32 %v3665_v63  ;;  %v11965_v63 = vpop.f32.mrf.mxu3 }
 0x692   : > { %v5293_v36 = vpack.c.b16 %v5288_v2, %v5287_v0  ;;  %13258 = vst [vmem:[#allocation37_spill] sm:$0xff] %v11965_v63 }
 0x694   : > { %v4066_v57 = vpop.xlane.xlu1 %4065  ;;  %7043 = vmatmul.msk.bf16.gmra.mxu2 %vm2968_vm1, %v5293_v36  ;;  %v3322_v53 = vpop.xlane.xlu2 %3321 }
 0x695   : > { %v7866_v7 = vpop.eup %7865  ;;  %7869 = vrcp.f32 %v4066_v57  ;;  %v3470_v28 = vsub.f32 %v11700_v43, %v3322_v53  ;;  %v3250_v45 = vpop.xlane.xlu0 %3249 }
 0x696   : > { %v3446_v19 = vsub.f32 %v11703_v11, %v3250_v45  ;;  %v4357_v9 = vmul.f32 %v7866_v7, %v11689_v48  ;;  %v11963_v54 = vpop.f32.mrf.mxu0 }
 0x697   : > { %v11958_v5 = vpop.eup %7867  ;;  %v3715_v55 = vmul.f32 1.442695, %v3470_v28 }
 0x698   : > { %v3667_v3 = vmul.f32 1.442695, %v3446_v19  ;;  %v4013_v13 = vsel %vm2968_vm1, %v11958_v5, 0.0  ;;  %v4485_v0 = vpack.c.bf16 %v4357_v9, %v4357_v9 }
 0x699   : > { %7871 = vpow2.f32 %v3715_v55  ;;  %4014 = vadd.xlane.f32.xlu1 %v4013_v13 }
 0x69a   : > { %7873 = vpow2.f32 %v3667_v3  ;;  %v5518_v55 = vunpack.c.l.b16 %v4485_v0 }
 0x69b   : > { %v7870_v43 = vpop.eup %7869 }
 0x69c   : > { %v4358_v11 = vmul.f32 %v7870_v43, %v11708_v17  ;;  %v3319_v2 = vpop.xlane.xlu1 %3318 }
 0x69d   : > { %v3469_v36 = vsub.f32 %v11728_v38, %v3319_v2  ;;  %v3925_v57 = vpop.xlane.xlu0 %3924  ;;  %v11977_v38 = vpop.f32.mrf.mxu3 }
 0x69e   : > { %v4486_v48 = vpack.c.bf16 %v4358_v11, %v4358_v11  ;;  %v3997_v53 = vpop.xlane.xlu2 %3996  ;;  %7875 = vrcp.f32 %v3925_v57  ;;  %13259 = vst [vmem:[#allocation121_spill] sm:$0xff] %v11977_v38  ;;  %v11979_v11 = vpop.f32.mrf.mxu0 }
 0x69f   : > { %v11969_v7 = vpop.eup %7871  ;;  %v3713_v28 = vmul.f32 1.442695, %v3469_v36  ;;  %v5039_v45 = vpop.f32.mrf.mxu2  ;;  %7877 = vrcp.f32 %v3997_v53  ;;  %v11984_v36 = vadd.f32 %v13230_v60, %v11838_v42 }
 0x6a0   : > { %v11971_v19 = vpop.eup %7873  ;;  %v5519_v13 = vunpack.c.l.b16 %v4486_v48  ;;  %v4088_v9 = vsel %vm2968_vm1, %v11969_v7, 0.0  ;;  %v5791_v53 = vpack.c.bf16 %v5039_v45, %v5039_v45 }
 0x6a1   : > { %7879 = vpow2.f32 %v3713_v28  ;;  %4089 = vadd.xlane.f32.xlu1 %v4088_v9  ;;  %v4016_v17 = vsel %vm2968_vm1, %v11971_v19, 0.0  ;;  %v3341_v60 = vsel %vm2968_vm1, %v11984_v36, -inf }
 0x6a2   : > { %v5270_v3 = vpop.f32.mrf.mxu1  ;;  %4017 = vadd.xlane.f32.xlu2 %v4016_v17  ;;  %v5524_v43 = vpack.c.b16 %v5519_v13, %v5518_v55  ;;  %v11994_v42 = vunpack.c.l.b16 %v5791_v53 }
 0x6a3   : > { %v5815_v61 = vpack.c.bf16 %v5270_v3, %v5270_v3 }
 0x6a4   : > { %7055 = vmatmul.msk.bf16.gmra.mxu1 %vm2968_vm1, %v5524_v43  ;;  %v3928_v0 = vpop.xlane.xlu1 %3927  ;;  %v7876_v2 = vpop.eup %7875 }
 0x6a5   : > { %7881 = vrcp.f32 %v3928_v0  ;;  %v4000_v57 = vpop.xlane.xlu0 %3999  ;;  %v7878_v48 = vpop.eup %7877  ;;  %v4311_v55 = vmul.f32 %v7876_v2, %v11736_v25  ;;  %v12000_v2 = vadd.f32 %v13173_v26, %v11866_v49 }
 0x6a6   : > { %7883 = vrcp.f32 %v4000_v57  ;;  %v4335_v43 = vmul.f32 %v7878_v48, %v11740_v35  ;;  %v12004_v35 = vpop.f32.mrf.mxu3 }
 0x6a7   : > { %v11986_v28 = vpop.eup %7879  ;;  %v5041_v9 = vpop.f32.mrf.mxu2  ;;  %13260 = vst [vmem:[#allocation25_spill] sm:$0xff] %v12004_v35  ;;  %v4439_v3 = vpack.c.bf16 %v4311_v55, %v4311_v55 }
 0x6a8   : > { %v5792_v13 = vpack.c.bf16 %v5041_v9, %v5041_v9  ;;  %v4085_v17 = vsel %vm2968_vm1, %v11986_v28, 0.0  ;;  %v12002_v9 = vpop.f32.mrf.mxu0 }
 0x6a9   : > { %4086 = vadd.xlane.f32.xlu0 %v4085_v17  ;;  %v12009_v17 = vunpack.c.l.b16 %v5815_v61  ;;  %v5058_v35 = vunpack.c.l.b16 %v4439_v3 }
 0x6aa   : > { %v11996_v45 = vunpack.c.l.b16 %v5792_v13  ;;  %v5272_v0 = vpop.f32.mrf.mxu1  ;;  %3342 = vmax.xlane.f32.xlu2 %v3341_v60  ;;  %v4463_v13 = vpack.c.bf16 %v4335_v43, %v4335_v43  ;;  %v3344_v43 = vsel %vm2968_vm1, %v12000_v2, -inf }
 0x6ab   : > { %v7882_v57 = vpop.eup %7881  ;;  %v5816_v38 = vpack.c.bf16 %v5272_v0, %v5272_v0 }
 0x6ac   : > { %v7884_v25 = vpop.eup %7883  ;;  %v4312_v48 = vmul.f32 %v7882_v57, %v11757_v32  ;;  %v5289_v61 = vunpack.c.l.b16 %v4463_v13 }
 0x6ad   : > { %v4336_v60 = vmul.f32 %v7884_v25, %v11759_v4  ;;  %v12012_v0 = vunpack.c.l.b16 %v5816_v38  ;;  %v3253_v22 = vpop.xlane.xlu0 %3252 }
 0x6ae   : > { %v4440_v26 = vpack.c.bf16 %v4312_v48, %v4312_v48  ;;  %v3447_v49 = vsub.f32 %v11767_v6, %v3253_v22  ;;  %v12019_v25 = vpop.f32.mrf.mxu3 }
 0x6af   : > { %v4464_v63 = vpack.c.bf16 %v4336_v60, %v4336_v60  ;;  %13261 = vst [vmem:[#allocation23_spill] sm:$0xff] %v12019_v25 }
 0x6b0   : > { %v5059_v32 = vunpack.c.l.b16 %v4440_v26  ;;  %v3669_v57 = vmul.f32 1.442695, %v3447_v49  ;;  %v12023_v3 = vpop.f32.mrf.mxu0 }
 0x6b1   : > { %v5290_v53 = vunpack.c.l.b16 %v4464_v63  ;;  %3345 = vmax.xlane.f32.xlu0 %v3344_v43 }
 0x6b2   : > { %7885 = vpow2.f32 %v3669_v57  ;;  %v5063_v4 = vpack.c.b16 %v5059_v32, %v5058_v35 }
 0x6b3   : > { %v5294_v38 = vpack.c.b16 %v5290_v53, %v5289_v61 }
 0x6b4   : > { %7032 = vmatmul.msk.bf16.gmra.mxu3 %vm2968_vm1, %v5063_v4 }
 0x6b5   : > { %v4072_v6 = vpop.xlane.xlu2 %4071  ;;  %7044 = vmatmul.msk.bf16.gmra.mxu2 %vm2968_vm1, %v5294_v38  ;;  %v3328_v22 = vpop.xlane.xlu0 %3327 }
 0x6b6   : > { %v3472_v48 = vsub.f32 %v11778_v20, %v3328_v22  ;;  %7887 = vrcp.f32 %v4072_v6  ;;  %v12033_v57 = vpop.f32.mrf.mxu3 }
 0x6b7   : > { %13262 = vst [vmem:[#allocation75_spill] sm:$0xff] %v12033_v57 }
 0x6b8   : > { %v12026_v60 = vpop.eup %7885  ;;  %v3719_v63 = vmul.f32 1.442695, %v3472_v48  ;;  %v12030_v49 = vpop.f32.mrf.mxu0 }
 0x6b9   : > { %v4019_v35 = vsel %vm2968_vm1, %v12026_v60, 0.0 }
 0x6ba   : > { %7889 = vpow2.f32 %v3719_v63  ;;  %4020 = vadd.xlane.f32.xlu1 %v4019_v35 }
 0x6bc   : > { %v4069_v53 = vpop.xlane.xlu1 %4068  ;;  %v7888_v13 = vpop.eup %7887 }
 0x6bd   : > { %7891 = vrcp.f32 %v4069_v53  ;;  %v3325_v26 = vpop.xlane.xlu2 %3324  ;;  %v4360_v43 = vmul.f32 %v7888_v13, %v11784_v52 }
 0x6be   : > { %v3471_v32 = vsub.f32 %v11798_v62, %v3325_v26 }
 0x6bf   : > { %v4488_v6 = vpack.c.bf16 %v4360_v43, %v4360_v43 }
 0x6c0   : > { %v12035_v20 = vpop.eup %7889  ;;  %v3717_v61 = vmul.f32 1.442695, %v3471_v32  ;;  %v12044_v52 = vpop.f32.mrf.mxu0 }
 0x6c1   : > { %v4094_v4 = vsel %vm2968_vm1, %v12035_v20, 0.0  ;;  %v5521_v13 = vunpack.c.l.b16 %v4488_v6 }
 0x6c2   : > { %7893 = vpow2.f32 %v3717_v61  ;;  %4095 = vadd.xlane.f32.xlu1 %v4094_v4 }
 0x6c3   : > { %v7892_v38 = vpop.eup %7891 }
 0x6c4   : > { %v4359_v22 = vmul.f32 %v7892_v38, %v11803_v24  ;;  %v3256_v48 = vpop.xlane.xlu1 %3255 }
 0x6c5   : > { %v4006_v63 = vpop.xlane.xlu2 %4005  ;;  %v3448_v62 = vsub.f32 %v11817_v44, %v3256_v48 }
 0x6c6   : > { %v4487_v35 = vpack.c.bf16 %v4359_v22, %v4359_v22  ;;  %7895 = vrcp.f32 %v4006_v63  ;;  %v13263_v22 = vld [vmem:[#allocation68_spill] sm:$0xff] }
 0x6c7   : > { %v3671_v53 = vmul.f32 1.442695, %v3448_v62  ;;  %v5101_v26 = vpop.f32.mrf.mxu3  ;;  %v12051_v48 = vadd.f32 %v13263_v22, %v11902_v14 }
 0x6c8   : > { %v12042_v55 = vpop.eup %7893  ;;  %v5520_v32 = vunpack.c.l.b16 %v4487_v35  ;;  %v5332_v61 = vpop.f32.mrf.mxu2  ;;  %v5793_v62 = vpack.c.bf16 %v5101_v26, %v5101_v26 }
 0x6c9   : > { %7897 = vpow2.f32 %v3671_v53  ;;  %v4091_v43 = vsel %vm2968_vm1, %v12042_v55, 0.0  ;;  %v5817_v53 = vpack.c.bf16 %v5332_v61, %v5332_v61 }
 0x6ca   : > { %4092 = vadd.xlane.f32.xlu0 %v4091_v43  ;;  %v5525_v24 = vpack.c.b16 %v5521_v13, %v5520_v32  ;;  %v12056_v13 = vpop.f32.mrf.mxu0  ;;  %v12063_v26 = vunpack.c.l.b16 %v5793_v62 }
 0x6cc   : > { %7056 = vmatmul.msk.bf16.gmra.mxu1 %vm2968_vm1, %v5525_v24  ;;  %v4003_v4 = vpop.xlane.xlu1 %4002  ;;  %v7896_v38 = vpop.eup %7895  ;;  %13264 = vst [vmem:[#allocation119_spill] sm:$0xff] %v12063_v26 }
 0x6cd   : > { %v4075_v44 = vpop.xlane.xlu0 %4074  ;;  %v3331_v63 = vpop.xlane.xlu2 %3330  ;;  %7899 = vrcp.f32 %v4003_v4  ;;  %v4338_v32 = vmul.f32 %v7896_v38, %v11825_v30  ;;  %v12073_v38 = vadd.f32 %v13243_v12, %v11889_v1 }
 0x6ce   : > { %v3473_v6 = vsub.f32 %v11836_v37, %v3331_v63  ;;  %7901 = vrcp.f32 %v4075_v44  ;;  %v3350_v37 = vsel %vm2968_vm1, %v12051_v48, -inf  ;;  %v12067_v44 = vunpack.c.l.b16 %v5817_v53 }
 0x6cf   : > { %v12054_v35 = vpop.eup %7897  ;;  %v5103_v43 = vpop.f32.mrf.mxu3  ;;  %v3347_v1 = vsel %vm2968_vm1, %v12073_v38, -inf }
 0x6d0   : > { %v3721_v24 = vmul.f32 1.442695, %v3473_v6  ;;  %v5794_v25 = vpack.c.bf16 %v5103_v43, %v5103_v43  ;;  %v5334_v57 = vpop.f32.mrf.mxu2  ;;  %v4022_v14 = vsel %vm2968_vm1, %v12054_v35, 0.0 }
 0x6d1   : > { %v5818_v22 = vpack.c.bf16 %v5334_v57, %v5334_v57  ;;  %4023 = vadd.xlane.f32.xlu2 %v4022_v14  ;;  %v4466_v57 = vpack.c.bf16 %v4338_v32, %v4338_v32 }
 0x6d2   : > { %7903 = vpow2.f32 %v3721_v24  ;;  %v12065_v61 = vunpack.c.l.b16 %v5794_v25  ;;  %3351 = vmax.xlane.f32.xlu0 %v3350_v37 }
 0x6d3   : > { %v12069_v30 = vunpack.c.l.b16 %v5818_v22  ;;  %v7900_v4 = vpop.eup %7899  ;;  %v5361_v32 = vunpack.c.l.b16 %v4466_v57  ;;  %v13266_v57 = vld [vmem:[#allocation104_spill] sm:$0xff] }
 0x6d4   : > { %13265 = vst [vmem:[#allocation117_spill] sm:$0xff] %v12065_v61  ;;  %v4078_v6 = vpop.xlane.xlu1 %4077  ;;  %v7902_v43 = vpop.eup %7901  ;;  %v4337_v25 = vmul.f32 %v7900_v4, %v11832_v51 }
 0x6d5   : > { %v3334_v62 = vpop.xlane.xlu0 %3333  ;;  %7905 = vrcp.f32 %v4078_v6  ;;  %v4361_v12 = vmul.f32 %v7902_v43, %v11840_v8  ;;  %v12088_v4 = vpop.f32.mrf.mxu0 }
 0x6d6   : > { %v3474_v24 = vsub.f32 %v11853_v59, %v3334_v62  ;;  %v4465_v14 = vpack.c.bf16 %v4337_v25, %v4337_v25  ;;  %v5770_v62 = vpack.c.bf16 %v11842_v50, %v11842_v50 }
 0x6d7   : > { %v4489_v25 = vpack.c.bf16 %v4361_v12, %v4361_v12 }
 0x6d8   : > { %v3723_v22 = vmul.f32 1.442695, %v3474_v24  ;;  %v12081_v37 = vpop.eup %7903  ;;  %v5360_v63 = vunpack.c.l.b16 %v4465_v14  ;;  %v5769_v24 = vpack.c.bf16 %v13266_v57, %v13266_v57 }
 0x6d9   : > { %v4097_v51 = vsel %vm2968_vm1, %v12081_v37, 0.0  ;;  %3348 = vmax.xlane.f32.xlu2 %v3347_v1  ;;  %v5978_v1 = vunpack.c.l.b16 %v5770_v62  ;;  %v5591_v53 = vunpack.c.l.b16 %v4489_v25  ;;  %v5802_v62 = vpack.c.bf16 %v11979_v11, %v11979_v11 }
 0x6da   : > { %7907 = vpow2.f32 %v3723_v22  ;;  %4098 = vadd.xlane.f32.xlu1 %v4097_v51  ;;  %v5368_v6 = vpack.c.b16 %v5361_v32, %v5360_v63  ;;  %v5977_v50 = vunpack.c.l.b16 %v5769_v24  ;;  %v5801_v25 = vpack.c.bf16 %v11963_v54, %v11963_v54 }
 0x6db   : > { %v7906_v59 = vpop.eup %7905  ;;  %v6090_v24 = vunpack.c.l.b16 %v5802_v62 }
 0x6dc   : > { %v4362_v8 = vmul.f32 %v7906_v59, %v11855_v15  ;;  %7045 = vmatmul.msk.bf16.vlgmr.msra.gmra.mxu3 %vm2968_vm1, %v5368_v6  ;;  %v6009_v15 = vpack.c.b16 %v5978_v1, %v5977_v50  ;;  %v6089_v1 = vunpack.c.l.b16 %v5801_v25 }
 0x6dd   : > { %v4009_v43 = vpop.xlane.xlu1 %4008  ;;  %v5486_v12 = vpop.f32.mrf.mxu0 }
 0x6de   : > { %v4490_v14 = vpack.c.bf16 %v4362_v8, %v4362_v8  ;;  %v5833_v56 = vpack.c.bf16 %v5486_v12, %v5486_v12 }
 0x6e0   : > { %v12096_v22 = vpop.eup %7907  ;;  %v5592_v51 = vunpack.c.l.b16 %v4490_v14 }
 0x6e1   : > { %v4100_v63 = vsel %vm2968_vm1, %v12096_v22, 0.0 }
 0x6e2   : > { %4101 = vadd.xlane.f32.xlu2 %v4100_v63  ;;  %v5599_v32 = vpack.c.b16 %v5592_v51, %v5591_v53 }
 0x6e4   : > { %7057 = vmatmul.msk.bf16.vlgmr.msra.gmra.mxu2 %vm2968_vm1, %v5599_v32 }
 0x6e5   : > { %v4084_v59 = vpop.xlane.xlu1 %4083  ;;  %v5488_v8 = vpop.f32.mrf.mxu0 }
 0x6e6   : > { %6025 = vrot.lane.b32.xlu0 %v6009_v15, %s8195_s27  ;;  %7909 = vrcp.f32 %v4084_v59  ;;  %v5834_v51 = vpack.c.bf16 %v5488_v8, %v5488_v8  ;;  %v6121_v59 = vpack.c.b16 %v6090_v24, %v6089_v1 }
 0x6e8   : > { %v5106_v6 = vpop.f32.mrf.mxu3  ;;  %v6202_v61 = vunpack.c.l.b16 %v5834_v51 }
 0x6e9   : > { %v5795_v53 = vpack.c.bf16 %v5106_v6, %v5106_v6 }
 0x6eb   : > { %v12107_v11 = vunpack.c.l.b16 %v5795_v53 }
 0x6ec   : > { %v7910_v14 = vpop.eup %7909 }
 0x6ed   : > { %v4081_v57 = vpop.xlane.xlu0 %4080  ;;  %v4364_v32 = vmul.f32 %v7910_v14, %v11893_v33  ;;  %v6201_v33 = vunpack.c.l.b16 %v5833_v56  ;;  %v5772_v14 = vpack.c.bf16 %v11885_v10, %v11885_v10 }
 0x6ee   : > { %7911 = vrcp.f32 %v4081_v57 }
 0x6ef   : > { %7913 = vrcp.f32 %v4009_v43  ;;  %v5337_v50 = vpop.f32.mrf.mxu2  ;;  %v4492_v62 = vpack.c.bf16 %v4364_v32, %v4364_v32  ;;  %v6233_v24 = vpack.c.b16 %v6202_v61, %v6201_v33  ;;  %v5980_v10 = vunpack.c.l.b16 %v5772_v14 }
 0x6f0   : > { %v5108_v63 = vpop.f32.mrf.mxu3  ;;  %v5819_v12 = vpack.c.bf16 %v5337_v50, %v5337_v50  ;;  %v5803_v14 = vpack.c.bf16 %v12002_v9, %v12002_v9 }
 0x6f1   : > { %v5796_v15 = vpack.c.bf16 %v5108_v63, %v5108_v63  ;;  %v5594_v51 = vunpack.c.l.b16 %v4492_v62 }
 0x6f2   : > { %v12121_v56 = vunpack.c.l.b16 %v5819_v12 }
 0x6f3   : > { %v12109_v26 = vunpack.c.l.b16 %v5796_v15  ;;  %6137 = vrot.lane.b32.xlu1 %v6121_v59, %s8196_s8  ;;  %v5491_v59 = vpop.f32.mrf.mxu0 }
 0x6f4   : > { %v7912_v54 = vpop.eup %7911  ;;  %v4012_v25 = vpop.xlane.xlu2 %4011 }
 0x6f5   : > { %v4363_v6 = vmul.f32 %v7912_v54, %v11904_v58  ;;  %v6022_v43 = vpack.c.b16 %v12109_v26, %v12107_v11  ;;  %v7914_v8 = vpop.eup %7913  ;;  %7915 = vrcp.f32 %v4012_v25  ;;  %v13267_v58 = vld [vmem:[#allocation108_spill] sm:$0xff] }
 0x6f6   : > { %v4339_v1 = vmul.f32 %v7914_v8, %v11883_v34  ;;  %v5771_v15 = vpack.c.bf16 %v13267_v58, %v13267_v58  ;;  %v6091_v58 = vunpack.c.l.b16 %v5803_v14 }
 0x6f7   : > { %v4491_v57 = vpack.c.bf16 %v4363_v6, %v4363_v6  ;;  %v5339_v53 = vpop.f32.mrf.mxu2 }
 0x6f8   : > { %v5820_v32 = vpack.c.bf16 %v5339_v53, %v5339_v53  ;;  %v4467_v61 = vpack.c.bf16 %v4339_v1, %v4339_v1  ;;  %v5979_v8 = vunpack.c.l.b16 %v5771_v15 }
 0x6f9   : > { %v5593_v63 = vunpack.c.l.b16 %v4491_v57 }
 0x6fa   : > { %6249 = vrot.lane.b32.xlu2 %v6233_v24, %s8197_s14  ;;  %v12123_v54 = vunpack.c.l.b16 %v5820_v32  ;;  %v6010_v12 = vpack.c.b16 %v5980_v10, %v5979_v8  ;;  %v5804_v24 = vpack.c.bf16 %v12023_v3, %v12023_v3  ;;  %v5362_v53 = vunpack.c.l.b16 %v4467_v61 }
 0x6fb   : > { %v5600_v50 = vpack.c.b16 %v5594_v51, %v5593_v63  ;;  %v7916_v6 = vpop.eup %7915  ;;  %v5493_v32 = vpop.f32.mrf.mxu0 }
 0x6fc   : > { %v4340_v25 = vmul.f32 %v7916_v6, %v11917_v41  ;;  %v6130_v34 = vpack.c.b16 %v12123_v54, %v12121_v56  ;;  %v3337_v62 = vpop.xlane.xlu2 %3336  ;;  %v6092_v63 = vunpack.c.l.b16 %v5804_v24  ;;  %v5836_v15 = vpack.c.bf16 %v5493_v32, %v5493_v32 }
 0x6fd   : > { %7058 = vmatmul.msk.bf16.gmra.mxu2 %vm2968_vm1, %v5600_v50  ;;  %v3475_v57 = vsub.f32 %v11926_v21, %v3337_v62  ;;  %v3340_v50 = vpop.xlane.xlu0 %3339  ;;  %v5835_v6 = vpack.c.bf16 %v5491_v59, %v5491_v59 }
 0x6fe   : > { %v4468_v33 = vpack.c.bf16 %v4340_v25, %v4340_v25  ;;  %v6122_v21 = vpack.c.b16 %v6092_v63, %v6091_v58  ;;  %v6204_v3 = vunpack.c.l.b16 %v5836_v15  ;;  %v3476_v10 = vsub.f32 %v11910_v16, %v3340_v50 }
 0x6ff   : > { %v3725_v41 = vmul.f32 1.442695, %v3475_v57  ;;  %v6203_v25 = vunpack.c.l.b16 %v5835_v6 }
 0x700   : > { %v5363_v51 = vunpack.c.l.b16 %v4468_v33  ;;  %v3727_v8 = vmul.f32 1.442695, %v3476_v10 }
 0x701   : > { %7917 = vpow2.f32 %v3725_v41  ;;  %v6234_v62 = vpack.c.b16 %v6204_v3, %v6203_v25 }
 0x702   : > { %6027 = vrot.lane.b32.xlu2 %v6010_v12, %s8195_s27  ;;  %v5369_v1 = vpack.c.b16 %v5363_v51, %v5362_v53 }
 0x704   : > { %7046 = vmatmul.msk.bf16.gmra.mxu3 %vm2968_vm1, %v5369_v1 }
 0x707   : > { %v12138_v9 = vpop.eup %7917 }
 0x708   : > { %v4103_v33 = vsel %vm2968_vm1, %v12138_v9, 0.0 }
 0x70a   : > { %6139 = vrot.lane.b32.xlu2 %v6122_v21, %s8196_s8 }
 0x70c   : > { %v4015_v61 = vpop.xlane.xlu1 %4014 }
 0x70d   : > { %7919 = vrcp.f32 %v4015_v61 }
 0x70e   : > { %7921 = vpow2.f32 %v3727_v8 }
 0x710   : > { %4104 = vadd.xlane.f32.xlu0 %v4103_v33 }
 0x712   : > { %6251 = vrot.lane.b32.xlu2 %v6234_v62, %s8197_s14 }
 0x713   : > { %v7920_v12 = vpop.eup %7919 }
 0x714   : > { %v4090_v59 = vpop.xlane.xlu1 %4089  ;;  %v12143_v24 = vpop.eup %7921  ;;  %v4341_v53 = vmul.f32 %v7920_v12, %v11958_v5 }
 0x715   : > { %v4018_v57 = vpop.xlane.xlu2 %4017  ;;  %v4106_v14 = vsel %vm2968_vm1, %v12143_v24, 0.0 }
 0x716   : > { %7923 = vrcp.f32 %v4018_v57  ;;  %v4469_v63 = vpack.c.bf16 %v4341_v53, %v4341_v53 }
 0x717   : > { %7925 = vrcp.f32 %v4090_v59  ;;  %v5342_v16 = vpop.f32.mrf.mxu2 }
 0x718   : > { %v5821_v58 = vpack.c.bf16 %v5342_v16, %v5342_v16  ;;  %v5364_v3 = vunpack.c.l.b16 %v4469_v63 }
 0x71a   : > { %v12150_v5 = vunpack.c.l.b16 %v5821_v58 }
 0x71c   : > { %v7924_v51 = vpop.eup %7923  ;;  %v4087_v41 = vpop.xlane.xlu0 %4086 }
 0x71d   : > { %v7926_v1 = vpop.eup %7925  ;;  %v4342_v32 = vmul.f32 %v7924_v51, %v11971_v19  ;;  %4107 = vadd.xlane.f32.xlu1 %v4106_v14  ;;  %7927 = vrcp.f32 %v4087_v41  ;;  %v3343_v57 = vpop.xlane.xlu2 %3342  ;;  %v7152_v41 = vld [vmem:[#allocation10 + $0x38] sm:$0xff] }
 0x71e   : > { %v4366_v50 = vmul.f32 %v7926_v1, %v11969_v7  ;;  %v3477_v14 = vsub.f32 %v11984_v36, %v3343_v57  ;;  %6478 = vmatpush.bf16.msra.mxu0 %v7152_v41  ;;  %v7147_v57 = vld [vmem:[#allocation10 + $0x10] sm:$0xff]  ;;  %v7146_v41 = vld [vmem:[#allocation10 + $0x8] sm:$0xff] }
 0x71f   : > { %v4470_v21 = vpack.c.bf16 %v4342_v32, %v4342_v32  ;;  %v5344_v15 = vpop.f32.mrf.mxu2  ;;  %v7151_v32 = vld [vmem:[#allocation10 + $0x30] sm:$0xff] }
 0x720   : > { %v5822_v6 = vpack.c.bf16 %v5344_v15, %v5344_v15  ;;  %v4494_v8 = vpack.c.bf16 %v4366_v50, %v4366_v50  ;;  %v3729_v63 = vmul.f32 1.442695, %v3477_v14  ;;  %v7150_v50 = vld [vmem:[#allocation10 + $0x28] sm:$0xff] }
 0x721   : > { %v5365_v10 = vunpack.c.l.b16 %v4470_v21 }
 0x722   : > { %v12152_v61 = vunpack.c.l.b16 %v5822_v6  ;;  %v5596_v53 = vunpack.c.l.b16 %v4494_v8  ;;  %6479 = vmatpush.bf16.msra.mxu0 %v7151_v32  ;;  %v7145_v32 = vld [vmem:[#allocation10] sm:$0xff] }
 0x723   : > { %v7928_v25 = vpop.eup %7927  ;;  %v5370_v62 = vpack.c.b16 %v5365_v10, %v5364_v3  ;;  %v5496_v3 = vpop.f32.mrf.mxu0 }
 0x724   : > { %v4365_v33 = vmul.f32 %v7928_v25, %v11986_v28  ;;  %v6131_v19 = vpack.c.b16 %v12152_v61, %v12150_v5  ;;  %v3346_v59 = vpop.xlane.xlu0 %3345  ;;  %v5774_v28 = vpack.c.bf16 %v11913_v31, %v11913_v31  ;;  %v12169_v10 = vpop.f32.mrf.mxu1  ;;  %v7149_v25 = vld [vmem:[#allocation10 + $0x20] sm:$0xff] }
 0x725   : > { %7047 = vmatmul.msk.bf16.gmra.mxu3 %vm2968_vm1, %v5370_v62  ;;  %v3478_v7 = vsub.f32 %v12000_v2, %v3346_v59  ;;  %v5773_v2 = vpack.c.bf16 %v11898_v47, %v11898_v47  ;;  %v7148_v47 = vld [vmem:[#allocation10 + $0x18] sm:$0xff]  ;;  %v5806_v59 = vpack.c.bf16 %v12044_v52, %v12044_v52 }
 0x726   : > { %v4493_v12 = vpack.c.bf16 %v4365_v33, %v4365_v33  ;;  %v5982_v15 = vunpack.c.l.b16 %v5774_v28  ;;  %6480 = vmatpush.bf16.msra.mxu0 %v7150_v50 }
 0x727   : > { %v3731_v16 = vmul.f32 1.442695, %v3478_v7  ;;  %v5981_v6 = vunpack.c.l.b16 %v5773_v2  ;;  %v5805_v7 = vpack.c.bf16 %v12030_v49, %v12030_v49  ;;  %v6094_v14 = vunpack.c.l.b16 %v5806_v59 }
 0x728   : > { %v5595_v51 = vunpack.c.l.b16 %v4493_v12 }
 0x729   : > { %7929 = vpow2.f32 %v3731_v16  ;;  %v6011_v31 = vpack.c.b16 %v5982_v15, %v5981_v6 }
 0x72a   : > { %v5601_v1 = vpack.c.b16 %v5596_v53, %v5595_v51  ;;  %7931 = vpow2.f32 %v3729_v63  ;;  %6481 = vmatpush.bf16.msra.mxu0 %v7149_v25 }
 0x72b   : > { %v5498_v53 = vpop.f32.mrf.mxu0 }
 0x72c   : > { %7059 = vmatmul.msk.bf16.gmra.mxu2 %vm2968_vm1, %v5601_v1  ;;  %v12180_v51 = vpop.f32.mrf.mxu1  ;;  %v6093_v1 = vunpack.c.l.b16 %v5805_v7  ;;  %v5838_v52 = vpack.c.bf16 %v5498_v53, %v5498_v53 }
 0x72d   : > { %v4021_v58 = vpop.xlane.xlu1 %4020 }
 0x72e   : > { %6482 = vmatpush.bf16.msra.mxu0 %v7148_v47  ;;  %v6123_v63 = vpack.c.b16 %v6094_v14, %v6093_v1  ;;  %v5775_v1 = vpack.c.bf16 %v11937_v40, %v11937_v40 }
 0x72f   : > { %v12165_v21 = vpop.eup %7929 }
 0x730   : > { %v4112_v36 = vsel %vm2968_vm1, %v12165_v21, 0.0  ;;  %v12171_v8 = vpop.eup %7931 }
 0x731   : > { %4113 = vadd.xlane.f32.xlu0 %v4112_v36  ;;  %v4109_v33 = vsel %vm2968_vm1, %v12171_v8, 0.0  ;;  %v5837_v36 = vpack.c.bf16 %v5496_v3, %v5496_v3 }
 0x732   : > { %6483 = vmatpush.bf16.msra.mxu0 %v7147_v57 }
 0x733   : > { %v6205_v57 = vunpack.c.l.b16 %v5837_v36 }
 0x734   : > { %v12185_v25 = vpop.f32.mrf.mxu1 }
 0x735   : > { %v4096_v62 = vpop.xlane.xlu1 %4095 }
 0x736   : > { %6029 = vrot.lane.b32.xlu1 %v6011_v31, %s8195_s27  ;;  %7933 = vrcp.f32 %v4096_v62  ;;  %6484 = vmatpush.bf16.msra.mxu0 %v7146_v41  ;;  %v6206_v62 = vunpack.c.l.b16 %v5838_v52 }
 0x73a   : > { %6485 = vmatpush.bf16.msra.mxu0 %v7145_v32 }
 0x73b   : > { %4110 = vadd.xlane.f32.xlu2 %v4109_v33 }
 0x73c   : > { %v7934_v16 = vpop.eup %7933 }
 0x73d   : > { %v4093_v12 = vpop.xlane.xlu0 %4092  ;;  %v4368_v28 = vmul.f32 %v7934_v16, %v12035_v20  ;;  %v6235_v16 = vpack.c.b16 %v6206_v62, %v6205_v57 }
 0x73e   : > { %7935 = vrcp.f32 %v4093_v12  ;;  %v5776_v12 = vpack.c.bf16 %v11953_v46, %v11953_v46 }
 0x73f   : > { %7937 = vrcp.f32 %v4021_v58  ;;  %v4496_v50 = vpack.c.bf16 %v4368_v28, %v4368_v28  ;;  %v5501_v58 = vpop.f32.mrf.mxu0 }
 0x740   : > { %v5984_v52 = vunpack.c.l.b16 %v5776_v12  ;;  %v5839_v62 = vpack.c.bf16 %v5501_v58, %v5501_v58 }
 0x741   : > { %v5598_v3 = vunpack.c.l.b16 %v4496_v50 }
 0x742   : > { %v6207_v57 = vunpack.c.l.b16 %v5839_v62  ;;  %v13271_v62 = vld [vmem:[#allocation49_spill] sm:$0xff] }
 0x744   : > { %v7936_v2 = vpop.eup %7935  ;;  %v4024_v15 = vpop.xlane.xlu2 %4023 }
 0x745   : > { %v7938_v49 = vpop.eup %7937  ;;  %v4367_v6 = vmul.f32 %v7936_v2, %v12042_v55  ;;  %7939 = vrcp.f32 %v4024_v15  ;;  %v3352_v31 = vpop.xlane.xlu0 %3351  ;;  %6141 = vrot.lane.b32.xlu0 %v6123_v63, %s8196_s8 }
 0x746   : > { %v3480_v20 = vsub.f32 %v12051_v48, %v3352_v31  ;;  %v4343_v33 = vmul.f32 %v7938_v49, %v12026_v60  ;;  %v12199_v2 = vpop.f32.mrf.mxu1  ;;  %v5983_v49 = vunpack.c.l.b16 %v5775_v1 }
 0x747   : > { %v4495_v47 = vpack.c.bf16 %v4367_v6, %v4367_v6  ;;  %v5503_v32 = vpop.f32.mrf.mxu0 }
 0x748   : > { %v3735_v59 = vmul.f32 1.442695, %v3480_v20  ;;  %v4471_v14 = vpack.c.bf16 %v4343_v33, %v4343_v33  ;;  %v6012_v6 = vpack.c.b16 %v5984_v52, %v5983_v49  ;;  %v5840_v31 = vpack.c.bf16 %v5503_v32, %v5503_v32 }
 0x749   : > { %v5597_v7 = vunpack.c.l.b16 %v4495_v47 }
 0x74a   : > { %7941 = vpow2.f32 %v3735_v59  ;;  %v6208_v47 = vunpack.c.l.b16 %v5840_v31 }
 0x74b   : > { %v7940_v55 = vpop.eup %7939  ;;  %v5602_v53 = vpack.c.b16 %v5598_v3, %v5597_v7  ;;  %v13268_v7 = vld [vmem:[#allocation87_spill] sm:$0xff] }
 0x74c   : > { %v4344_v41 = vmul.f32 %v7940_v55, %v12054_v35  ;;  %v3349_v48 = vpop.xlane.xlu2 %3348  ;;  %v5366_v35 = vunpack.c.l.b16 %v4471_v14  ;;  %v5738_v55 = vpack.c.bf16 %v13268_v7, %v13268_v7  ;;  %v6236_v12 = vpack.c.b16 %v6208_v47, %v6207_v57 }
 0x74d   : > { %v4099_v28 = vpop.xlane.xlu1 %4098  ;;  %7060 = vmatmul.msk.bf16.gmra.mxu2 %vm2968_vm1, %v5602_v53  ;;  %6253 = vrot.lane.b32.xlu0 %v6235_v16, %s8197_s14  ;;  %v3479_v63 = vsub.f32 %v12073_v38, %v3349_v48  ;;  %v12210_v16 = vpop.f32.mrf.mxu2  ;;  %v13269_v48 = vld [vmem:[#allocation42_spill] sm:$0xff] }
 0x74e   : > { %v4472_v60 = vpack.c.bf16 %v4344_v41, %v4344_v41  ;;  %7943 = vrcp.f32 %v4099_v28  ;;  %v12205_v33 = vpop.f32.mrf.mxu1  ;;  %v5737_v1 = vpack.c.bf16 %v13269_v48, %v13269_v48  ;;  %v5898_v28 = vunpack.c.l.b16 %v5738_v55 }
 0x74f   : > { %v3733_v36 = vmul.f32 1.442695, %v3479_v63  ;;  %v5808_v63 = vpack.c.bf16 %v12088_v4, %v12088_v4  ;;  %v5842_v55 = vpack.c.bf16 %v12180_v51, %v12180_v51  ;;  %v13276_v51 = vld [vmem:[#allocation52_spill] sm:$0xff] }
 0x750   : > { %v12197_v46 = vpop.eup %7941  ;;  %v5367_v15 = vunpack.c.l.b16 %v4472_v60 }
 0x751   : > { %v4118_v40 = vsel %vm2968_vm1, %v12197_v46, 0.0 }
 0x752   : > { %4119 = vadd.xlane.f32.xlu2 %v4118_v40  ;;  %v5371_v50 = vpack.c.b16 %v5367_v15, %v5366_v35  ;;  %v5897_v35 = vunpack.c.l.b16 %v5737_v1  ;;  %v13274_v1 = vld [vmem:[#allocation81_spill] sm:$0xff] }
 0x754   : > { %7048 = vmatmul.msk.bf16.gmra.mxu3 %vm2968_vm1, %v5371_v50  ;;  %v7944_v38 = vpop.eup %7943  ;;  %v6096_v50 = vunpack.c.l.b16 %v5808_v63 }
 0x755   : > { %v4102_v20 = vpop.xlane.xlu2 %4101  ;;  %6031 = vrot.lane.b32.xlu0 %v6012_v6, %s8195_s27  ;;  %v4369_v59 = vmul.f32 %v7944_v38, %v12081_v37  ;;  %v12225_v31 = vpop.f32.mrf.mxu2  ;;  %v13270_v38 = vld [vmem:[#allocation92_spill] sm:$0xff] }
 0x756   : > { %7945 = vrcp.f32 %v4102_v20  ;;  %v5575_v15 = vpop.f32.mrf.mxu1  ;;  %v13272_v47 = vpack.c.b16 %v13270_v38, %v13271_v62 }
 0x757   : > { %7947 = vpow2.f32 %v3733_v36  ;;  %v4497_v58 = vpack.c.bf16 %v4369_v59, %v4369_v59  ;;  %v5929_v36 = vpack.c.b16 %v5898_v28, %v5897_v35  ;;  %v12232_v59 = vpop.f32.mrf.mxu3  ;;  %v6210_v28 = vunpack.c.l.b16 %v5842_v55 }
 0x758   : > { %v6026_v40 = vpop.permute.xlu0 %6025 }
 0x759   : > { %v5668_v52 = vunpack.c.l.b16 %v4497_v58  ;;  %v6283_v4 = vsel %vm1567_vm0, %v5929_v36, %v6026_v40 }
 0x75c   : > { %v7946_v3 = vpop.eup %7945 }
 0x75d   : > { %v12212_v53 = vpop.eup %7947  ;;  %v4370_v14 = vmul.f32 %v7946_v3, %v12096_v22  ;;  %v6250_v41 = vpop.permute.xlu2 %6249  ;;  %6255 = vrot.lane.b32.xlu0 %v6236_v12, %s8197_s14  ;;  %v5807_v22 = vpack.c.bf16 %v12056_v13, %v12056_v13  ;;  %v13273_v12 = vld [vmem:[#allocation66_spill] sm:$0xff] }
 0x75e   : > { %v4115_v60 = vsel %vm2968_vm1, %v12212_v53, 0.0  ;;  %v5740_v58 = vpack.c.bf16 %v13273_v12, %v13273_v12  ;;  %v5578_v48 = vpop.f32.mrf.mxu1 }
 0x75f   : > { %v4498_v37 = vpack.c.bf16 %v4370_v14, %v4370_v14  ;;  %v6095_v13 = vunpack.c.l.b16 %v5807_v22  ;;  %v5841_v14 = vpack.c.bf16 %v12169_v10, %v12169_v10  ;;  %v5844_v10 = vpack.c.bf16 %v12199_v2, %v12199_v2  ;;  %v12251_v40 = vpop.f32.mrf.mxu3 }
 0x760   : > { %4116 = vadd.xlane.f32.xlu1 %v4115_v60 }
 0x761   : > { %v5669_v32 = vunpack.c.l.b16 %v4498_v37  ;;  %v6124_v7 = vpack.c.b16 %v6096_v50, %v6095_v13  ;;  %v5739_v37 = vpack.c.bf16 %v13274_v1, %v13274_v1  ;;  %v6209_v35 = vunpack.c.l.b16 %v5841_v14  ;;  %v13278_v13 = vld [vmem:[#allocation61_spill] sm:$0xff] }
 0x762   : > { %v5843_v50 = vpack.c.bf16 %v12185_v25, %v12185_v25  ;;  %v13281_v14 = vpack.c.b16 %v11878_v23, %v11876_v29  ;;  %v5846_v1 = vpack.c.bf16 %v5575_v15, %v5575_v15 }
 0x763   : > { %v5676_v49 = vpack.c.b16 %v5669_v32, %v5668_v52  ;;  %v13275_v52 = vld [vmem:[#allocation94_spill] sm:$0xff]  ;;  %v5899_v22 = vunpack.c.l.b16 %v5739_v37 }
 0x764   : > { %v13277_v32 = vpack.c.b16 %v13275_v52, %v13276_v51  ;;  %v13283_v52 = vld [vmem:[#allocation55_spill] sm:$0xff] }
 0x765   : > { %v6028_v6 = vpop.permute.xlu2 %6027  ;;  %7061 = vmatmul.msk.bf16.vlgmr.msrb.gmra.mxu3 %vm2968_vm1, %v5676_v49  ;;  %v6138_v20 = vpop.permute.xlu1 %6137  ;;  %6033 = vrot.lane.b32.xlu0 %v13272_v47, %s8195_s27  ;;  %v6237_v49 = vpack.c.b16 %v6210_v28, %v6209_v35  ;;  %v5845_v28 = vpack.c.bf16 %v12205_v33, %v12205_v33  ;;  %v13285_v33 = vpack.c.b16 %v11945_v27, %v11942_v18 }
 0x766   : > { %v6330_v57 = vsel %vm2968_vm1, %v6283_v4, %v6138_v20  ;;  %v6212_v20 = vunpack.c.l.b16 %v5844_v10  ;;  %v5580_v38 = vpop.f32.mrf.mxu1 }
 0x767   : > { %v6363_v3 = vsel %vm6361_vm2, %v6330_v57, %v6250_v41  ;;  %v5900_v41 = vunpack.c.l.b16 %v5740_v58  ;;  %v5640_v63 = vpop.f32.mrf.mxu2  ;;  %v13279_v57 = vld [vmem:[#allocation113_spill] sm:$0xff]  ;;  %v5848_v55 = vpack.c.bf16 %v5580_v38, %v5580_v38  ;;  %v12263_v58 = vpop.f32.mrf.mxu3 }
 0x768   : > { %6486 = vmatmul.bf16.vlgmr.msra.gmra.mxu0 %v6363_v3  ;;  %v13280_v3 = vpack.c.b16 %v13278_v13, %v13279_v57  ;;  %v5849_v29 = vpack.c.bf16 %v5640_v63, %v5640_v63  ;;  %v13287_v13 = vld [vmem:[#allocation21_spill] sm:$0xff] }
 0x769   : > { %v5930_v36 = vpack.c.b16 %v5900_v41, %v5899_v22  ;;  %v6216_v37 = vunpack.c.l.b16 %v5848_v55  ;;  %v13282_v41 = vld [vmem:[#allocation60_spill] sm:$0xff] }
 0x76a   : > { %6143 = vrot.lane.b32.xlu2 %v6124_v7, %s8196_s8  ;;  %v6211_v7 = vunpack.c.l.b16 %v5843_v50  ;;  %v13284_v51 = vpack.c.b16 %v13282_v41, %v13283_v52  ;;  %v13294_v41 = vld [vmem:[#allocation110_spill] sm:$0xff] }
 0x76b   : > { %v6286_v4 = vsel %vm1567_vm0, %v5930_v36, %v6028_v6  ;;  %v5847_v6 = vpack.c.bf16 %v5578_v48, %v5578_v48  ;;  %v6217_v36 = vunpack.c.l.b16 %v5849_v29  ;;  %v13295_v52 = vpack.c.b16 %v11870_v39, %v13294_v41 }
 0x76c   : > { %v6238_v25 = vpack.c.b16 %v6212_v20, %v6211_v7  ;;  %v5824_v39 = vpack.c.bf16 %v12225_v31, %v12225_v31 }
 0x76d   : > { %v6140_v60 = vpop.permute.xlu2 %6139  ;;  %6145 = vrot.lane.b32.xlu0 %v13277_v32, %s8196_s8  ;;  %v6214_v32 = vunpack.c.l.b16 %v5846_v1 }
 0x76e   : > { %v6332_v62 = vsel %vm2968_vm1, %v6286_v4, %v6140_v60  ;;  %v6215_v60 = vunpack.c.l.b16 %v5847_v6  ;;  %v6112_v54 = vunpack.c.l.b16 %v5824_v39 }
 0x76f   : > { %v5642_v12 = vpop.f32.mrf.mxu2  ;;  %v12277_v23 = vpop.f32.mrf.mxu3 }
 0x770   : > { %v6240_v48 = vpack.c.b16 %v6216_v37, %v6215_v60  ;;  %v5850_v35 = vpack.c.bf16 %v5642_v12, %v5642_v12  ;;  %v13290_v12 = vld [vmem:[#allocation83_spill] sm:$0xff]  ;;  %v13293_v37 = vpack.c.b16 %v12069_v30, %v12067_v44  ;;  %v13296_v30 = vld [vmem:[#allocation96_spill] sm:$0xff]  ;;  %v5800_v39 = vpack.c.bf16 %v12277_v23, %v12277_v23 }
 0x772   : > { %6257 = vrot.lane.b32.xlu2 %v6237_v49, %s8197_s14  ;;  %v6213_v49 = vunpack.c.l.b16 %v5845_v28  ;;  %v6218_v10 = vunpack.c.l.b16 %v5850_v35  ;;  %v5823_v35 = vpack.c.bf16 %v12210_v16, %v12210_v16 }
 0x774   : > { %v6239_v15 = vpack.c.b16 %v6214_v32, %v6213_v49  ;;  %v6241_v50 = vpack.c.b16 %v6218_v10, %v6217_v36  ;;  %v13299_v49 = vpack.c.b16 %v11996_v45, %v11994_v42 }
 0x775   : > { %v6252_v47 = vpop.permute.xlu2 %6251  ;;  %6035 = vrot.lane.b32.xlu0 %v13280_v3, %s8195_s27  ;;  %v13289_v3 = vpack.c.b16 %v12012_v0, %v12009_v17 }
 0x776   : > { %v6366_v2 = vsel %vm6361_vm2, %v6332_v62, %v6252_v47  ;;  %v13286_v47 = vld [vmem:[#allocation47_spill] sm:$0xff] }
 0x777   : > { %v5409_v63 = vpop.f32.mrf.mxu3  ;;  %v13288_v57 = vpack.c.b16 %v13286_v47, %v13287_v13 }
 0x778   : > { %6491 = vmatmul.bf16.gmra.mxu0 %v6366_v2 }
 0x779   : > { %6147 = vrot.lane.b32.xlu1 %v13281_v14, %s8196_s8 }
 0x77a   : > { %6259 = vrot.lane.b32.xlu2 %v6238_v25, %s8197_s14  ;;  %v13291_v25 = vld [vmem:[#allocation78_spill] sm:$0xff] }
 0x77b   : > { %v13292_v6 = vpack.c.b16 %v13290_v12, %v13291_v25  ;;  %v5798_v25 = vpack.c.bf16 %v12251_v40, %v12251_v40 }
 0x77d   : > { %6037 = vrot.lane.b32.xlu0 %v13284_v51, %s8195_s27 }
 0x77f   : > { %v5411_v14 = vpop.f32.mrf.mxu3 }
 0x780   : > { %v5645_v22 = vpop.f32.mrf.mxu2  ;;  %v5826_v31 = vpack.c.bf16 %v5411_v14, %v5411_v14 }
 0x781   : > { %6263 = vrot.lane.b32.xlu1 %v6240_v48, %s8197_s14  ;;  %v5851_v62 = vpack.c.bf16 %v5645_v22, %v5645_v22 }
 0x782   : > { %6149 = vrot.lane.b32.xlu2 %v13285_v33, %s8196_s8  ;;  %v5825_v33 = vpack.c.bf16 %v5409_v63, %v5409_v63  ;;  %v6114_v5 = vunpack.c.l.b16 %v5826_v31 }
 0x783   : > { %v4105_v20 = vpop.xlane.xlu0 %4104  ;;  %v6219_v18 = vunpack.c.l.b16 %v5851_v62  ;;  %v13303_v62 = vld [vmem:[#allocation116_spill] sm:$0xff] }
 0x784   : > { %7949 = vrcp.f32 %v4105_v20  ;;  %v5742_v63 = vpack.c.bf16 %v13303_v62, %v13303_v62  ;;  %v13307_v62 = vld [vmem:[#allocation128_spill] sm:$0xff] }
 0x785   : > { %6261 = vrot.lane.b32.xlu0 %v6239_v15, %s8197_s14 }
 0x786   : > { %v5902_v12 = vunpack.c.l.b16 %v5742_v63  ;;  %v5746_v63 = vpack.c.bf16 %v13307_v62, %v13307_v62 }
 0x787   : > { %v5414_v32 = vpop.f32.mrf.mxu3 }
 0x788   : > { %v5647_v4 = vpop.f32.mrf.mxu2  ;;  %v5827_v47 = vpack.c.bf16 %v5414_v32, %v5414_v32 }
 0x789   : > { %v5852_v38 = vpack.c.bf16 %v5647_v4, %v5647_v4  ;;  %6265 = vrot.lane.b32.xlu1 %v6241_v50, %s8197_s14  ;;  %v13300_v50 = vld [vmem:[#allocation117_spill] sm:$0xff]  ;;  %v13301_v4 = vld [vmem:[#allocation119_spill] sm:$0xff] }
 0x78a   : > { %6039 = vrot.lane.b32.xlu2 %v13288_v57, %s8195_s27  ;;  %v7950_v55 = vpop.eup %7949  ;;  %v13302_v20 = vpack.c.b16 %v13300_v50, %v13301_v4 }
 0x78b   : > { %v6220_v27 = vunpack.c.l.b16 %v5852_v38  ;;  %v4371_v1 = vmul.f32 %v7950_v55, %v12138_v9  ;;  %v13297_v9 = vld [vmem:[#allocation51_spill] sm:$0xff] }
 0x78d   : > { %6151 = vrot.lane.b32.xlu0 %v13289_v3, %s8196_s8  ;;  %v6242_v2 = vpack.c.b16 %v6220_v27, %v6219_v18  ;;  %v4499_v0 = vpack.c.bf16 %v4371_v1, %v4371_v1  ;;  %v13304_v27 = vld [vmem:[#allocation58_spill] sm:$0xff]  ;;  %v6115_v1 = vunpack.c.l.b16 %v5827_v47 }
 0x78e   : > { %v13308_v47 = vld [vmem:[#allocation54_spill] sm:$0xff] }
 0x78f   : > { %v5670_v51 = vunpack.c.l.b16 %v4499_v0  ;;  %v5416_v56 = vpop.f32.mrf.mxu3  ;;  %v5797_v0 = vpack.c.bf16 %v12232_v59, %v12232_v59 }
 0x790   : > { %v4108_v7 = vpop.xlane.xlu1 %4107  ;;  %v5828_v45 = vpack.c.bf16 %v5416_v56, %v5416_v56  ;;  %v5799_v56 = vpack.c.bf16 %v12263_v58, %v12263_v58 }
 0x791   : > { %7951 = vrcp.f32 %v4108_v7  ;;  %6267 = vrot.lane.b32.xlu1 %v6242_v2, %s8197_s14  ;;  %v6005_v59 = vunpack.c.l.b16 %v5797_v0 }
 0x792   : > { %6041 = vrot.lane.b32.xlu2 %v13292_v6, %s8195_s27  ;;  %v6116_v3 = vunpack.c.l.b16 %v5828_v45 }
 0x794   : > { %v6134_v41 = vpack.c.b16 %v6116_v3, %v6115_v1 }
 0x795   : > { %6153 = vrot.lane.b32.xlu0 %v13293_v37, %s8196_s8 }
 0x797   : > { %v7952_v17 = vpop.eup %7951 }
 0x798   : > { %v4372_v28 = vmul.f32 %v7952_v17, %v12143_v24  ;;  %v13298_v24 = vpack.c.b16 %v13296_v30, %v13297_v9 }
 0x79a   : > { %v4500_v60 = vpack.c.bf16 %v4372_v28, %v4372_v28  ;;  %6043 = vrot.lane.b32.xlu2 %v13295_v52, %s8195_s27 }
 0x79c   : > { %v5671_v48 = vunpack.c.l.b16 %v4500_v60 }
 0x79d   : > { %6155 = vrot.lane.b32.xlu0 %v6130_v34, %s8196_s8  ;;  %v6111_v34 = vunpack.c.l.b16 %v5823_v35 }
 0x79e   : > { %v5677_v44 = vpack.c.b16 %v5671_v48, %v5670_v51  ;;  %v6006_v48 = vunpack.c.l.b16 %v5798_v25 }
 0x79f   : > { %v6132_v29 = vpack.c.b16 %v6112_v54, %v6111_v34  ;;  %v13305_v34 = vld [vmem:[#allocation48_spill] sm:$0xff] }
 0x7a0   : > { %7062 = vmatmul.msk.bf16.gmra.mxu3 %vm2968_vm1, %v5677_v44 }
 0x7a2   : > { %6045 = vrot.lane.b32.xlu2 %v13298_v24, %s8195_s27 }
 0x7a4   : > { %v4114_v22 = vpop.xlane.xlu0 %4113 }
 0x7a5   : > { %6157 = vrot.lane.b32.xlu0 %v6131_v19, %s8196_s8  ;;  %7953 = vrcp.f32 %v4114_v22  ;;  %v6113_v19 = vunpack.c.l.b16 %v5825_v33  ;;  %v13306_v33 = vld [vmem:[#allocation82_spill] sm:$0xff] }
 0x7a6   : > { %v5743_v23 = vpack.c.bf16 %v13306_v33, %v13306_v33 }
 0x7a7   : > { %v6133_v42 = vpack.c.b16 %v6114_v5, %v6113_v19 }
 0x7a8   : > { %v5419_v10 = vpop.f32.mrf.mxu3  ;;  %v6030_v52 = vpop.permute.xlu1 %6029 }
 0x7a9   : > { %v5829_v30 = vpack.c.bf16 %v5419_v10, %v5419_v10 }
 0x7aa   : > { %6047 = vrot.lane.b32.xlu2 %v13299_v49, %s8195_s27  ;;  %v5744_v49 = vpack.c.bf16 %v13305_v34, %v13305_v34 }
 0x7ab   : > { %v7954_v16 = vpop.eup %7953  ;;  %v6117_v22 = vunpack.c.l.b16 %v5829_v30 }
 0x7ac   : > { %v4374_v36 = vmul.f32 %v7954_v16, %v12165_v21  ;;  %v5741_v21 = vpack.c.bf16 %v13304_v27, %v13304_v27  ;;  %v5904_v10 = vunpack.c.l.b16 %v5744_v49 }
 0x7ad   : > { %6159 = vrot.lane.b32.xlu0 %v6132_v29, %s8196_s8  ;;  %v6008_v29 = vunpack.c.l.b16 %v5800_v39 }
 0x7ae   : > { %v4111_v15 = vpop.xlane.xlu2 %4110  ;;  %v4502_v13 = vpack.c.bf16 %v4374_v36, %v4374_v36 }
 0x7af   : > { %7955 = vrcp.f32 %v4111_v15  ;;  %v5650_v61 = vpop.f32.mrf.mxu2  ;;  %v6007_v15 = vunpack.c.l.b16 %v5799_v56  ;;  %v12388_v56 = vld [vmem:[%s12560_s5] ss:$0 sm:$0xff] }
 0x7b0   : > { %v5853_v18 = vpack.c.bf16 %v5650_v61, %v5650_v61  ;;  %v5421_v6 = vpop.f32.mrf.mxu3  ;;  %v5673_v37 = vunpack.c.l.b16 %v4502_v13  ;;  %v5903_v61 = vunpack.c.l.b16 %v5743_v23  ;;  %v5745_v13 = vpack.c.bf16 %v13308_v47, %v13308_v47 }
 0x7b1   : > { %v5830_v51 = vpack.c.bf16 %v5421_v6, %v5421_v6  ;;  %v6024_v5 = vpack.c.b16 %v6008_v29, %v6007_v15 }
 0x7b2   : > { %6049 = vrot.lane.b32.xlu2 %v13302_v20, %s8195_s27  ;;  %v6221_v28 = vunpack.c.l.b16 %v5853_v18  ;;  %v5932_v58 = vpack.c.b16 %v5904_v10, %v5903_v61 }
 0x7b3   : > { %v6118_v24 = vunpack.c.l.b16 %v5830_v51 }
 0x7b5   : > { %v7956_v38 = vpop.eup %7955  ;;  %6161 = vrot.lane.b32.xlu0 %v6133_v42, %s8196_s8  ;;  %v6135_v54 = vpack.c.b16 %v6118_v24, %v6117_v22 }
 0x7b6   : > { %v4373_v57 = vmul.f32 %v7956_v38, %v12171_v8  ;;  %v5901_v8 = vunpack.c.l.b16 %v5741_v21 }
 0x7b7   : > { %v5652_v7 = vpop.f32.mrf.mxu2  ;;  %v6142_v55 = vpop.permute.xlu0 %6141 }
 0x7b8   : > { %v4501_v2 = vpack.c.bf16 %v4373_v57, %v4373_v57  ;;  %v5854_v14 = vpack.c.bf16 %v5652_v7, %v5652_v7  ;;  %v5931_v32 = vpack.c.b16 %v5902_v12, %v5901_v8  ;;  %v5905_v12 = vunpack.c.l.b16 %v5745_v13 }
 0x7ba   : > { %v5672_v17 = vunpack.c.l.b16 %v4501_v2  ;;  %v6222_v60 = vunpack.c.l.b16 %v5854_v14  ;;  %6051 = vrot.lane.b32.xlu2 %v6022_v43, %s8195_s27  ;;  %v6289_v9 = vsel %vm1567_vm0, %v5931_v32, %v6030_v52  ;;  %v6023_v43 = vpack.c.b16 %v6006_v48, %v6005_v59  ;;  %v13309_v59 = vld [vmem:[#allocation43_spill] sm:$0xff] }
 0x7bb   : > { %v6334_v26 = vsel %vm2968_vm1, %v6289_v9, %v6142_v55  ;;  %v5906_v2 = vunpack.c.l.b16 %v5746_v63  ;;  %v5748_v9 = vpack.c.bf16 %v13309_v59, %v13309_v59 }
 0x7bc   : > { %v5678_v40 = vpack.c.b16 %v5673_v37, %v5672_v17  ;;  %v6243_v44 = vpack.c.b16 %v6222_v60, %v6221_v28 }
 0x7bd   : > { %6163 = vrot.lane.b32.xlu0 %v6134_v41, %s8196_s8  ;;  %v5933_v37 = vpack.c.b16 %v5906_v2, %v5905_v12  ;;  %v5908_v39 = vunpack.c.l.b16 %v5748_v9 }
 0x7be   : > { %7063 = vmatmul.msk.bf16.gmra.mxu3 %vm2968_vm1, %v5678_v40  ;;  %6269 = vrot.lane.b32.xlu1 %v6243_v44, %s8197_s14 }
 0x7bf   : > { %v6254_v11 = vpop.permute.xlu0 %6253 }
 0x7c0   : > { %v6369_v35 = vsel %vm6361_vm2, %v6334_v26, %v6254_v11  ;;  %v13310_v26 = vld [vmem:[#allocation44_spill] sm:$0xff] }
 0x7c1   : > { %6496 = vmatmul.bf16.gmra.mxu0 %v6369_v35  ;;  %v5747_v11 = vpack.c.bf16 %v13310_v26, %v13310_v26 }
 0x7c2   : > { %6053 = vrot.lane.b32.xlu2 %v6023_v43, %s8195_s27 }
 0x7c3   : > { %v5907_v22 = vunpack.c.l.b16 %v5747_v11 }
 0x7c5   : > { %v4120_v31 = vpop.xlane.xlu2 %4119  ;;  %6165 = vrot.lane.b32.xlu0 %v6135_v54, %s8196_s8  ;;  %v5934_v34 = vpack.c.b16 %v5908_v39, %v5907_v22 }
 0x7c6   : > { %7957 = vrcp.f32 %v4120_v31 }
 0x7c7   : > { %v6032_v16 = vpop.permute.xlu0 %6031 }
 0x7c8   : > { %v6292_v36 = vsel %vm1567_vm0, %v5932_v58, %v6032_v16 }
 0x7ca   : > { %6055 = vrot.lane.b32.xlu2 %v6024_v5, %s8195_s27 }
 0x7cc   : > { %v7958_v38 = vpop.eup %7957 }
 0x7cd   : > { %v6144_v19 = vpop.permute.xlu2 %6143  ;;  %v4376_v57 = vmul.f32 %v7958_v38, %v12197_v46  ;;  %v13312_v38 = vld [vmem:[#allocation40_spill] sm:$0xff] }
 0x7ce   : > { %v6336_v50 = vsel %vm2968_vm1, %v6292_v36, %v6144_v19  ;;  %v5749_v62 = vpack.c.bf16 %v13312_v38, %v13312_v38  ;;  %v13320_v38 = vld [vmem:[#allocation62_spill] sm:$0xff] }
 0x7cf   : > { %v6256_v4 = vpop.permute.xlu0 %6255  ;;  %v4504_v25 = vpack.c.bf16 %v4376_v57, %v4376_v57 }
 0x7d0   : > { %v5655_v20 = vpop.f32.mrf.mxu2  ;;  %v6372_v42 = vsel %vm6361_vm2, %v6336_v50, %v6256_v4  ;;  %v13311_v4 = vld [vmem:[#allocation27_spill] sm:$0xff]  ;;  %v5909_v13 = vunpack.c.l.b16 %v5749_v62  ;;  %v5757_v62 = vpack.c.bf16 %v13320_v38, %v13320_v38 }
 0x7d1   : > { %6501 = vmatmul.bf16.gmra.mxu0 %v6372_v42  ;;  %v5855_v27 = vpack.c.bf16 %v5655_v20, %v5655_v20  ;;  %v5675_v28 = vunpack.c.l.b16 %v4504_v25  ;;  %v5750_v20 = vpack.c.bf16 %v13311_v4, %v13311_v4 }
 0x7d3   : > { %v4117_v45 = vpop.xlane.xlu1 %4116  ;;  %v6223_v6 = vunpack.c.l.b16 %v5855_v27  ;;  %v5910_v47 = vunpack.c.l.b16 %v5750_v20 }
 0x7d4   : > { %7959 = vrcp.f32 %v4117_v45 }
 0x7d5   : > { %v6258_v51 = vpop.permute.xlu2 %6257  ;;  %v5935_v57 = vpack.c.b16 %v5910_v47, %v5909_v13  ;;  %v5917_v47 = vunpack.c.l.b16 %v5757_v62 }
 0x7d7   : > { %v5424_v21 = vpop.f32.mrf.mxu3  ;;  %v6034_v18 = vpop.permute.xlu0 %6033 }
 0x7d8   : > { %v5657_v3 = vpop.f32.mrf.mxu2  ;;  %v5831_v0 = vpack.c.bf16 %v5424_v21, %v5424_v21  ;;  %v6295_v46 = vsel %vm1567_vm0, %v5933_v37, %v6034_v18 }
 0x7d9   : > { %v5856_v7 = vpack.c.bf16 %v5657_v3, %v5657_v3 }
 0x7da   : > { %v7960_v55 = vpop.eup %7959  ;;  %v6119_v44 = vunpack.c.l.b16 %v5831_v0 }
 0x7db   : > { %v4375_v14 = vmul.f32 %v7960_v55, %v12212_v53  ;;  %v6224_v1 = vunpack.c.l.b16 %v5856_v7 }
 0x7dd   : > { %v4503_v17 = vpack.c.bf16 %v4375_v14, %v4375_v14  ;;  %v6244_v8 = vpack.c.b16 %v6224_v1, %v6223_v6  ;;  %v6260_v5 = vpop.permute.xlu2 %6259  ;;  %v13313_v6 = vld [vmem:[#allocation124_spill] sm:$0xff] }
 0x7de   : > { %v5752_v14 = vpack.c.bf16 %v13313_v6, %v13313_v6  ;;  %v13314_v1 = vld [vmem:[#allocation28_spill] sm:$0xff] }
 0x7df   : > { %v5674_v60 = vunpack.c.l.b16 %v4503_v17  ;;  %6271 = vrot.lane.b32.xlu1 %v6244_v8, %s8197_s14  ;;  %v5426_v41 = vpop.f32.mrf.mxu3  ;;  %v6146_v52 = vpop.permute.xlu0 %6145  ;;  %v5751_v37 = vpack.c.bf16 %v13314_v1, %v13314_v1 }
 0x7e0   : > { %v5832_v40 = vpack.c.bf16 %v5426_v41, %v5426_v41  ;;  %v6338_v32 = vsel %vm2968_vm1, %v6295_v46, %v6146_v52  ;;  %v5912_v17 = vunpack.c.l.b16 %v5752_v14 }
 0x7e1   : > { %v5679_v48 = vpack.c.b16 %v5675_v28, %v5674_v60  ;;  %v6375_v53 = vsel %vm6361_vm2, %v6338_v32, %v6258_v51  ;;  %v5911_v8 = vunpack.c.l.b16 %v5751_v37 }
 0x7e2   : > { %v6120_v30 = vunpack.c.l.b16 %v5832_v40  ;;  %6506 = vmatmul.bf16.gmra.mxu0 %v6375_v53  ;;  %v13315_v40 = vld [vmem:[#allocation73_spill] sm:$0xff] }
 0x7e3   : > { %7064 = vmatmul.msk.bf16.gmra.mxu3 %vm2968_vm1, %v5679_v48  ;;  %v5936_v28 = vpack.c.b16 %v5912_v17, %v5911_v8  ;;  %v5754_v32 = vpack.c.bf16 %v13315_v40, %v13315_v40  ;;  %v13316_v48 = vld [vmem:[#allocation85_spill] sm:$0xff]  ;;  %v13322_v17 = vld [vmem:[#allocation103_spill] sm:$0xff] }
 0x7e4   : > { %v6136_v24 = vpack.c.b16 %v6120_v30, %v6119_v44  ;;  %v5753_v53 = vpack.c.bf16 %v13316_v48, %v13316_v48  ;;  %v5759_v8 = vpack.c.bf16 %v13322_v17, %v13322_v17 }
 0x7e5   : > { %v6487_v43 = vpop.f32.mrf.mxu0  ;;  %v6150_v7 = vpop.permute.xlu2 %6149  ;;  %v5914_v44 = vunpack.c.l.b16 %v5754_v32 }
 0x7e6   : > { %6167 = vrot.lane.b32.xlu0 %v6136_v24, %s8196_s8  ;;  %v6488_v33 = vadd.f32 %v12388_v56, %v6487_v43  ;;  %v5913_v30 = vunpack.c.l.b16 %v5753_v53 }
 0x7e7   : > { %v6036_v54 = vpop.permute.xlu0 %6035 }
 0x7e8   : > { %v5717_v35 = vpop.f32.mrf.mxu3  ;;  %v6298_v29 = vsel %vm1567_vm0, %v5934_v34, %v6036_v54  ;;  %v5937_v9 = vpack.c.b16 %v5914_v44, %v5913_v30  ;;  %v13318_v34 = vld [vmem:[#allocation72_spill] sm:$0xff] }
 0x7e9   : > { %v5857_v23 = vpack.c.bf16 %v5717_v35, %v5717_v35  ;;  %v13317_v35 = vld [vmem:[#allocation70_spill] sm:$0xff] }
 0x7ea   : > { %v5756_v22 = vpack.c.bf16 %v13317_v35, %v13317_v35  ;;  %v13323_v35 = vld [vmem:[#allocation45_spill] sm:$0xff] }
 0x7eb   : > { %v6148_v49 = vpop.permute.xlu1 %6147  ;;  %v6225_v36 = vunpack.c.l.b16 %v5857_v23 }
 0x7ec   : > { %v6340_v15 = vsel %vm2968_vm1, %v6298_v29, %v6148_v49  ;;  %v5755_v49 = vpack.c.bf16 %v13318_v34, %v13318_v34  ;;  %v5916_v29 = vunpack.c.l.b16 %v5756_v22  ;;  %v5762_v22 = vpack.c.bf16 %v13323_v35, %v13323_v35 }
 0x7ed   : > { %v6489_v31 = vpop.f32.mrf.mxu0  ;;  %v6378_v19 = vsel %vm6361_vm2, %v6340_v15, %v6260_v5  ;;  %v6040_v0 = vpop.permute.xlu2 %6039 }
 0x7ee   : > { %v6490_v16 = vadd.f32 %v12388_v56, %v6489_v31  ;;  %v6304_v46 = vsel %vm1567_vm0, %v5936_v28, %v6040_v0  ;;  %v5915_v31 = vunpack.c.l.b16 %v5755_v49 }
 0x7ef   : > { %v6038_v45 = vpop.permute.xlu0 %6037 }
 0x7f0   : > { %v5719_v10 = vpop.f32.mrf.mxu3  ;;  %v7222_v61 = vpack.c.bf16 %v6490_v16, %v6488_v33  ;;  %v6301_v27 = vsel %vm1567_vm0, %v5935_v57, %v6038_v45  ;;  %v5938_v15 = vpack.c.b16 %v5916_v29, %v5915_v31  ;;  %v5922_v29 = vunpack.c.l.b16 %v5762_v22 }
 0x7f1   : > { %v5858_v58 = vpack.c.bf16 %v5719_v10, %v5719_v10  ;;  %v6342_v12 = vsel %vm2968_vm1, %v6301_v27, %v6150_v7 }
 0x7f2   : > { %7223 = vst [vmem:[%s12397_s17] sm:$0xff] %v7222_v61   ;;  %6511 = vmatmul.bf16.gmra.mxu0 %v6378_v19 }
 0x7f3   : > { %v6226_v50 = vunpack.c.l.b16 %v5858_v58  ;;  %v6264_v52 = vpop.permute.xlu1 %6263 }
 0x7f5   : > { %v6245_v42 = vpack.c.b16 %v6226_v50, %v6225_v36  ;;  %v6492_v63 = vpop.f32.mrf.mxu0  ;;  %v6042_v59 = vpop.permute.xlu2 %6041 }
 0x7f6   : > { %v6493_v18 = vadd.f32 %v12388_v56, %v6492_v63  ;;  %v6307_v26 = vsel %vm1567_vm0, %v5937_v9, %v6042_v59 }
 0x7f7   : > { %6273 = vrot.lane.b32.xlu1 %v6245_v42, %s8197_s14  ;;  %v6262_v3 = vpop.permute.xlu0 %6261  ;;  %v13319_v42 = vld [vmem:[#allocation71_spill] sm:$0xff] }
 0x7f8   : > { %v6381_v25 = vsel %vm6361_vm2, %v6342_v12, %v6262_v3  ;;  %v5758_v45 = vpack.c.bf16 %v13319_v42, %v13319_v42  ;;  %v13321_v12 = vld [vmem:[#allocation32_spill] sm:$0xff] }
 0x7fa   : > { %v5918_v63 = vunpack.c.l.b16 %v5758_v45 }
 0x7fb   : > { %v6266_v43 = vpop.permute.xlu1 %6265 }
 0x7fc   : > { %v5939_v57 = vpack.c.b16 %v5918_v63, %v5917_v47 }
 0x7fd   : > { %v6494_v21 = vpop.f32.mrf.mxu0  ;;  %v6044_v33 = vpop.permute.xlu2 %6043 }
 0x7fe   : > { %v6495_v2 = vadd.f32 %v12388_v56, %v6494_v21  ;;  %v6310_v61 = vsel %vm1567_vm0, %v5938_v15, %v6044_v33 }
 0x7ff   : > { %v6152_v60 = vpop.permute.xlu0 %6151 }
 0x800   : > { %v7227_v55 = vpack.c.bf16 %v6495_v2, %v6493_v18  ;;  %v6344_v41 = vsel %vm2968_vm1, %v6304_v46, %v6152_v60 }
 0x801   : > { %v6384_v51 = vsel %vm6361_vm2, %v6344_v41, %v6264_v52 }
 0x802   : > { %7314 = vst [vmem:[%s12397_s17 + $0x8] sm:$0xff] %v7227_v55   ;;  %6516 = vmatmul.bf16.gmra.mxu0 %v6381_v25  ;;  %v5760_v25 = vpack.c.bf16 %v13321_v12, %v13321_v12 }
 0x803   : > { %v6268_v50 = vpop.permute.xlu1 %6267 }
 0x804   : > { %v5920_v46 = vunpack.c.l.b16 %v5760_v25 }
 0x805   : > { %v6046_v13 = vpop.permute.xlu2 %6045 }
 0x806   : > { %v6313_v3 = vsel %vm1567_vm0, %v5939_v57, %v6046_v13 }
 0x807   : > { %v6154_v24 = vpop.permute.xlu0 %6153 }
 0x808   : > { %v6346_v11 = vsel %vm2968_vm1, %v6307_v26, %v6154_v24 }
 0x809   : > { %v6387_v39 = vsel %vm6361_vm2, %v6346_v11, %v6266_v43 }
 0x80d   : > { %v6048_v40 = vpop.permute.xlu2 %6047 }
 0x80f   : > { %v6156_v16 = vpop.permute.xlu0 %6155 }
 0x810   : > { %v6348_v58 = vsel %vm2968_vm1, %v6310_v61, %v6156_v16 }
 0x811   : > { %v6390_v20 = vsel %vm6361_vm2, %v6348_v58, %v6268_v50 }
 0x812   : > { %6521 = vmatmul.bf16.gmra.mxu0 %v6384_v51  ;;  %v5919_v51 = vunpack.c.l.b16 %v5759_v8  ;;  %v13326_v8 = vld [vmem:[#allocation105_spill] sm:$0xff] }
 0x814   : > { %v5940_v48 = vpack.c.b16 %v5920_v46, %v5919_v51 }
 0x815   : > { %v6050_v33 = vpop.permute.xlu2 %6049 }
 0x816   : > { %v6316_v30 = vsel %vm1567_vm0, %v5940_v48, %v6048_v40 }
 0x817   : > { %v6158_v27 = vpop.permute.xlu0 %6157 }
 0x818   : > { %v6350_v2 = vsel %vm2968_vm1, %v6313_v3, %v6158_v27 }
 0x81f   : > { %v6160_v53 = vpop.permute.xlu0 %6159 }
 0x820   : > { %v6352_v59 = vsel %vm2968_vm1, %v6316_v30, %v6160_v53 }
 0x822   : > { %6526 = vmatmul.bf16.gmra.mxu0 %v6387_v39 }
 0x823   : > { %v5722_v54 = vpop.f32.mrf.mxu3 }
 0x824   : > { %v5859_v23 = vpack.c.bf16 %v5722_v54, %v5722_v54  ;;  %v13324_v54 = vld [vmem:[#allocation107_spill] sm:$0xff] }
 0x825   : > { %v5761_v34 = vpack.c.bf16 %v13324_v54, %v13324_v54 }
 0x826   : > { %v6227_v19 = vunpack.c.l.b16 %v5859_v23 }
 0x827   : > { %v5921_v31 = vunpack.c.l.b16 %v5761_v34  ;;  %v6162_v15 = vpop.permute.xlu0 %6161 }
 0x829   : > { %v5941_v23 = vpack.c.b16 %v5922_v29, %v5921_v31 }
 0x82b   : > { %v5724_v10 = vpop.f32.mrf.mxu3 }
 0x82c   : > { %v5860_v5 = vpack.c.bf16 %v5724_v10, %v5724_v10  ;;  %v6319_v10 = vsel %vm1567_vm0, %v5941_v23, %v6050_v33 }
 0x82d   : > { %v6354_v61 = vsel %vm2968_vm1, %v6319_v10, %v6162_v15 }
 0x82e   : > { %v6228_v36 = vunpack.c.l.b16 %v5860_v5 }
 0x82f   : > { %v6164_v51 = vpop.permute.xlu0 %6163 }
 0x830   : > { %v6246_v4 = vpack.c.b16 %v6228_v36, %v6227_v19  ;;  %v6270_v21 = vpop.permute.xlu1 %6269 }
 0x831   : > { %v6393_v55 = vsel %vm6361_vm2, %v6350_v2, %v6270_v21 }
 0x832   : > { %6275 = vrot.lane.b32.xlu1 %v6246_v4, %s8197_s14  ;;  %6531 = vmatmul.bf16.gmra.mxu0 %v6390_v20 }
 0x837   : > { %v6166_v23 = vpop.permute.xlu0 %6165 }
 0x83e   : > { %v6497_v18 = vpop.f32.mrf.mxu0 }
 0x83f   : > { %v6498_v14 = vadd.f32 %v12388_v56, %v6497_v18 }
 0x841   : > { %v5727_v7 = vpop.f32.mrf.mxu3 }
 0x842   : > { %6536 = vmatmul.bf16.gmra.mxu0 %v6393_v55  ;;  %v5861_v1 = vpack.c.bf16 %v5727_v7, %v5727_v7 }
 0x844   : > { %v6229_v41 = vunpack.c.l.b16 %v5861_v1  ;;  %v13325_v1 = vld [vmem:[#allocation37_spill] sm:$0xff] }
 0x846   : > { %v6499_v6 = vpop.f32.mrf.mxu0 }
 0x847   : > { %v6500_v37 = vadd.f32 %v12388_v56, %v6499_v6 }
 0x849   : > { %v5729_v0 = vpop.f32.mrf.mxu3  ;;  %v7232_v28 = vpack.c.bf16 %v6500_v37, %v6498_v14  ;;  %v5764_v37 = vpack.c.bf16 %v13325_v1, %v13325_v1 }
 0x84a   : > { %v5862_v60 = vpack.c.bf16 %v5729_v0, %v5729_v0  ;;  %v5763_v0 = vpack.c.bf16 %v13326_v8, %v13326_v8 }
 0x84b   : > { %7315 = vst [vmem:[%s12397_s17 + $0x10] sm:$0xff] %v7232_v28   ;;  %v5924_v28 = vunpack.c.l.b16 %v5764_v37 }
 0x84c   : > { %v6230_v52 = vunpack.c.l.b16 %v5862_v60  ;;  %v5923_v60 = vunpack.c.l.b16 %v5763_v0 }
 0x84e   : > { %v6247_v32 = vpack.c.b16 %v6230_v52, %v6229_v41  ;;  %v6502_v44 = vpop.f32.mrf.mxu0  ;;  %v6052_v41 = vpop.permute.xlu2 %6051  ;;  %v5942_v52 = vpack.c.b16 %v5924_v28, %v5923_v60 }
 0x84f   : > { %v6503_v11 = vadd.f32 %v12388_v56, %v6502_v44 }
 0x850   : > { %6277 = vrot.lane.b32.xlu1 %v6247_v32, %s8197_s14  ;;  %v6322_v40 = vsel %vm1567_vm0, %v5942_v52, %v6052_v41 }
 0x851   : > { %v6272_v9 = vpop.permute.xlu1 %6271  ;;  %v6356_v32 = vsel %vm2968_vm1, %v6322_v40, %v6164_v51 }
 0x852   : > { %v6396_v24 = vsel %vm6361_vm2, %v6352_v59, %v6272_v9 }
 0x853   : > { %6541 = vmatmul.bf16.gmra.mxu0 %v6396_v24 }
 0x856   : > { %v6504_v26 = vpop.f32.mrf.mxu0  ;;  %v6054_v31 = vpop.permute.xlu2 %6053 }
 0x857   : > { %v6505_v43 = vadd.f32 %v12388_v56, %v6504_v26  ;;  %v13327_v26 = vld [vmem:[#allocation25_spill] sm:$0xff] }
 0x859   : > { %v7237_v39 = vpack.c.bf16 %v6505_v43, %v6503_v11  ;;  %v5766_v11 = vpack.c.bf16 %v13327_v26, %v13327_v26 }
 0x85b   : > { %7316 = vst [vmem:[%s12397_s17 + $0x18] sm:$0xff] %v7237_v39   ;;  %v13328_v39 = vld [vmem:[#allocation121_spill] sm:$0xff]  ;;  %v5926_v34 = vunpack.c.l.b16 %v5766_v11 }
 0x85c   : > { %v5765_v35 = vpack.c.bf16 %v13328_v39, %v13328_v39 }
 0x85e   : > { %v5925_v29 = vunpack.c.l.b16 %v5765_v35 }
 0x85f   : > { %v6507_v49 = vpop.f32.mrf.mxu0 }
 0x860   : > { %v6508_v58 = vadd.f32 %v12388_v56, %v6507_v49  ;;  %v5943_v33 = vpack.c.b16 %v5926_v34, %v5925_v29 }
 0x866   : > { %v5732_v16 = vpop.f32.mrf.mxu3 }
 0x867   : > { %v6509_v5 = vpop.f32.mrf.mxu0  ;;  %v5863_v20 = vpack.c.bf16 %v5732_v16, %v5732_v16  ;;  %v6325_v16 = vsel %vm1567_vm0, %v5943_v33, %v6054_v31 }
 0x868   : > { %v6510_v19 = vadd.f32 %v12388_v56, %v6509_v5  ;;  %v6358_v10 = vsel %vm2968_vm1, %v6325_v16, %v6166_v23 }
 0x869   : > { %v6274_v36 = vpop.permute.xlu1 %6273  ;;  %v6231_v62 = vunpack.c.l.b16 %v5863_v20 }
 0x86a   : > { %v6399_v50 = vsel %vm6361_vm2, %v6354_v61, %v6274_v36  ;;  %v7242_v4 = vpack.c.bf16 %v6510_v19, %v6508_v58 }
 0x86b   : > { %6546 = vmatmul.bf16.gmra.mxu0 %v6399_v50 }
 0x86c   : > { %7317 = vst [vmem:[%s12397_s17 + $0x20] sm:$0xff] %v7242_v4  }
 0x86e   : > { %v5734_v42 = vpop.f32.mrf.mxu3 }
 0x86f   : > { %v5864_v45 = vpack.c.bf16 %v5734_v42, %v5734_v42  ;;  %v6512_v38 = vpop.f32.mrf.mxu0 }
 0x870   : > { %v6513_v57 = vadd.f32 %v12388_v56, %v6512_v38 }
 0x871   : > { %v6232_v63 = vunpack.c.l.b16 %v5864_v45 }
 0x873   : > { %v6248_v47 = vpack.c.b16 %v6232_v63, %v6231_v62  ;;  %v13329_v62 = vld [vmem:[#allocation75_spill] sm:$0xff] }
 0x874   : > { %v5768_v63 = vpack.c.bf16 %v13329_v62, %v13329_v62 }
 0x875   : > { %6279 = vrot.lane.b32.xlu1 %v6248_v47, %s8197_s14  ;;  %v13330_v47 = vld [vmem:[#allocation23_spill] sm:$0xff] }
 0x877   : > { %v6514_v13 = vpop.f32.mrf.mxu0 }
 0x878   : > { %v6515_v27 = vadd.f32 %v12388_v56, %v6514_v13  ;;  %v5767_v13 = vpack.c.bf16 %v13330_v47, %v13330_v47 }
 0x87a   : > { %v7247_v21 = vpack.c.bf16 %v6515_v27, %v6513_v57  ;;  %v5928_v57 = vunpack.c.l.b16 %v5768_v63  ;;  %v5927_v27 = vunpack.c.l.b16 %v5767_v13 }
 0x87c   : > { %7318 = vst [vmem:[%s12397_s17 + $0x28] sm:$0xff] %v7247_v21   ;;  %v6056_v21 = vpop.permute.xlu2 %6055 }
 0x87f   : > { %v6517_v18 = vpop.f32.mrf.mxu0 }
 0x880   : > { %v6518_v2 = vadd.f32 %v12388_v56, %v6517_v18  ;;  %v5944_v18 = vpack.c.b16 %v5928_v57, %v5927_v27 }
 0x887   : > { %v6519_v3 = vpop.f32.mrf.mxu0 }
 0x888   : > { %v6520_v7 = vadd.f32 %v12388_v56, %v6519_v3  ;;  %v6168_v3 = vpop.permute.xlu0 %6167 }
 0x88a   : > { %v7252_v55 = vpack.c.bf16 %v6520_v7, %v6518_v2  ;;  %v6328_v2 = vsel %vm1567_vm0, %v5944_v18, %v6056_v21 }
 0x88b   : > { %v6360_v7 = vsel %vm2968_vm1, %v6328_v2, %v6168_v3 }
 0x88c   : > { %7319 = vst [vmem:[%s12397_s17 + $0x30] sm:$0xff] %v7252_v55  }
 0x88f   : > { %v6522_v12 = vpop.f32.mrf.mxu0 }
 0x890   : > { %v6523_v6 = vadd.f32 %v12388_v56, %v6522_v12 }
 0x897   : > { %v6524_v25 = vpop.f32.mrf.mxu0 }
 0x898   : > { %v6525_v14 = vadd.f32 %v12388_v56, %v6524_v25 }
 0x89a   : > { %v7257_v17 = vpack.c.bf16 %v6525_v14, %v6523_v6 }
 0x89c   : > { %7320 = vst [vmem:[%s12397_s17 + $0x38] sm:$0xff] %v7257_v17  }
 0x89f   : > { %v6527_v46 = vpop.f32.mrf.mxu0 }
 0x8a0   : > { %v6528_v30 = vadd.f32 %v12388_v56, %v6527_v46 }
 0x8a4   : > { %v6276_v48 = vpop.permute.xlu1 %6275 }
 0x8a5   : > { %v6402_v53 = vsel %vm6361_vm2, %v6356_v32, %v6276_v48 }
 0x8a6   : > { %6551 = vmatmul.bf16.gmra.mxu0 %v6402_v53 }
 0x8a7   : > { %v6529_v44 = vpop.f32.mrf.mxu0 }
 0x8a8   : > { %v6530_v59 = vadd.f32 %v12388_v56, %v6529_v44 }
 0x8aa   : > { %v7262_v9 = vpack.c.bf16 %v6530_v59, %v6528_v30 }
 0x8ac   : > { %7321 = vst [vmem:[%s12397_s17 + $0x40] sm:$0xff] %v7262_v9  }
 0x8af   : > { %v6532_v24 = vpop.f32.mrf.mxu0 }
 0x8b0   : > { %v6533_v22 = vadd.f32 %v12388_v56, %v6532_v24 }
 0x8b7   : > { %v6534_v43 = vpop.f32.mrf.mxu0 }
 0x8b8   : > { %v6535_v54 = vadd.f32 %v12388_v56, %v6534_v43 }
 0x8ba   : > { %v7267_v49 = vpack.c.bf16 %v6535_v54, %v6533_v22 }
 0x8bc   : > { %7322 = vst [vmem:[%s12397_s17 + $0x48] sm:$0xff] %v7267_v49  }
 0x8bf   : > { %v6537_v15 = vpop.f32.mrf.mxu0 }
 0x8c0   : > { %v6538_v19 = vadd.f32 %v12388_v56, %v6537_v15 }
 0x8c2   : > { %v6278_v5 = vpop.permute.xlu1 %6277 }
 0x8c3   : > { %v6405_v61 = vsel %vm6361_vm2, %v6358_v10, %v6278_v5 }
 0x8c4   : > { %6556 = vmatmul.bf16.gmra.mxu0 %v6405_v61 }
 0x8c7   : > { %v6539_v58 = vpop.f32.mrf.mxu0 }
 0x8c8   : > { %v6540_v36 = vadd.f32 %v12388_v56, %v6539_v58 }
 0x8ca   : > { %v7272_v50 = vpack.c.bf16 %v6540_v36, %v6538_v19 }
 0x8cc   : > { %7323 = vst [vmem:[%s12397_s17 + $0x50] sm:$0xff] %v7272_v50  }
 0x8d0   : > { %v6542_v4 = vpop.f32.mrf.mxu0 }
 0x8d1   : > { %v6543_v42 = vadd.f32 %v12388_v56, %v6542_v4 }
 0x8d8   : > { %v6544_v20 = vpop.f32.mrf.mxu0 }
 0x8d9   : > { %v6545_v45 = vadd.f32 %v12388_v56, %v6544_v20 }
 0x8db   : > { %v7277_v38 = vpack.c.bf16 %v6545_v45, %v6543_v42 }
 0x8dd   : > { %7324 = vst [vmem:[%s12397_s17 + $0x58] sm:$0xff] %v7277_v38  }
 0x8e7   : > { %v6280_v55 = vpop.permute.xlu1 %6279 }
 0x8e8   : > { %v6547_v12 = vpop.f32.mrf.mxu0  ;;  %v6408_v25 = vsel %vm6361_vm2, %v6360_v7, %v6280_v55 }
 0x8e9   : > { %6561 = vmatmul.bf16.gmra.mxu0 %v6408_v25  ;;  %v6548_v14 = vadd.f32 %v12388_v56, %v6547_v12 }
 0x8f0   : > { %v6549_v6 = vpop.f32.mrf.mxu0 }
 0x8f1   : > { %v6550_v1 = vadd.f32 %v12388_v56, %v6549_v6 }
 0x8f3   : > { %v7282_v37 = vpack.c.bf16 %v6550_v1, %v6548_v14 }
 0x8f5   : > { %7325 = vst [vmem:[%s12397_s17 + $0x60] sm:$0xff] %v7282_v37  }
 0x923   : > { %v6552_v17 = vpop.f32.mrf.mxu0 }
 0x924   : > { %v6553_v0 = vadd.f32 %v12388_v56, %v6552_v17 }
 0x92b   : > { %v6554_v8 = vpop.f32.mrf.mxu0 }
 0x92c   : > { %v6555_v28 = vadd.f32 %v12388_v56, %v6554_v8 }
 0x92e   : > { %v7287_v60 = vpack.c.bf16 %v6555_v28, %v6553_v0 }
 0x930   : > { %7326 = vst [vmem:[%s12397_s17 + $0x68] sm:$0xff] %v7287_v60  }
 0x941   : > { %v6557_v46 = vpop.f32.mrf.mxu0 }
 0x942   : > { %v6558_v52 = vadd.f32 %v12388_v56, %v6557_v46 }
 0x949   : > { %v6559_v41 = vpop.f32.mrf.mxu0 }
 0x94a   : > { %v6560_v51 = vadd.f32 %v12388_v56, %v6559_v41 }
 0x94c   : > { %v7292_v40 = vpack.c.bf16 %v6560_v51, %v6558_v52 }
 0x94e   : > { %7327 = vst [vmem:[%s12397_s17 + $0x70] sm:$0xff] %v7292_v40  }
 0x966   : > { %v6562_v32 = vpop.f32.mrf.mxu0 }
 0x967   : > { %v6563_v53 = vadd.f32 %v12388_v56, %v6562_v32 }
 0x96e   : > { %v6564_v48 = vpop.f32.mrf.mxu0 }
 0x96f   : > { %v6565_v44 = vadd.f32 %v12388_v56, %v6564_v48 }
 0x971   : > { %v7297_v30 = vpack.c.bf16 %v6565_v44, %v6563_v53 }
 0x973   : > { %7328 = vst [vmem:[%s12397_s17 + $0x78] sm:$0xff] %v7297_v30  }
 0x974   : > { %8138 = shalt.err (!%p8135_p10)
}
 0x975   : > { %s8198_s7 = smov 4  }
 0x976   : > { %7371 = dma.vmem_to_hbm [thread:$0]  (%p8324_p3), %s6646_s13, 2048, %s6648_s19, %s6632_s20, %s8196_s8, %s8196_s8, %s8198_s7  }
 0x977 PF: > { %s6662_s17 = sand.u32 1, %s8173_s21   ;;  %p13331_p12 = scmp.ge.s32.totalorder %s8185_s24, 2 }
 0x978   : > { %s6663_s10 = scalar_lea.sflag [#allocation4], %s6662_s17 }
 0x979   : > { %p7391_p13 = pnand %p13331_p12, %p8269_p6 }
 0x97b   : > { %p7392_p0 = pneg %p7391_p13 }
 0x97d   : > { %8168 = dma.done.wait (%p7392_p0), %s6663_s10, 2048  }
 0x97e   : > { %8170 = vsyncadd (%p7392_p0), %s6663_s10, 4294965248  ;;  %p21_p5 = scmp.ge.s32.totalorder %s8314_s16, 4   ;;  %s13332_s21 = smov %s8177_s22 }
 0x97f   : > { %s13333_s22 = smov %s8181_s23  ;;  %s13334_s23 = smov %s8330_s29 }
 0x980   : > { %s13335_s24 = smov %s8314_s16  ;;  %23 = sbr.rel (!%p21_p5) target bundleno = 7 (0x7), region = 105 }
 0x985   :  { %6669 = vsyncpa [#allocation3], 1 }
 0x986   :  { %6671 = vsyncpa [#allocation3 + $0x1], 1 }
 0x987   :  { %6672 = vsyncpa [#allocation6], 1 }
 0x988   :  { %6673 = vsyncpa [#allocation9], 1 }
 0x989   :  { %6674 = vsyncpa [#allocation4], 1 }
 0x98a   :  { %6676 = vsyncpa [#allocation4 + $0x1], 1 }

</bundles_post_ra>
